<compile_context>
chip_gen: v7x
topology: tpu7x:2x2x1
jax: 0.10.0
libtpu: 0.0.40
codegen_flags: <defaults>
</compile_context>

<pallas_src>
import jax
import jax.numpy as jnp
from jax import lax
from jax.experimental import pallas as pl
from jax.experimental.pallas import tpu as pltpu

INPUT_DIM = 32      # module default 128, scaled down for the demo
HIDDEN_DIM = 32     # module default 256, scaled down for the demo
NUM_LAYERS = 3
HEAD_PACK = 128     # lane-dense packed width for the (imm | dly | stab) heads


def _vmem():
    return pl.BlockSpec(memory_space=pltpu.MemorySpace.VMEM)


def fused_kernel(x_ref, sel_ref, selT_ref, rev_ref, pw_ref, pb_ref,
                 wih0_ref, wih12_ref, whh_ref, bih_ref, bhh_ref,
                 wa1_ref, ba1_ref, wa2_ref, ba2_ref,
                 hw1_ref, hb1_ref, hw2_ref, hb2_ref,
                 attn_ref, ctx_ref, heads_ref, hid_ref,
                 seq_ref, cat_ref):
    # x: (T, B, Din) time-major.
    # seq_ref scratch: (T*B, 2H), rows = t*B + b, lanes [0:H]=fwd, [H:2H]=bwd.
    # cat_ref scratch: (T*B, 4H) staging for [layer_input | reversed_input].
    T, B, Din0 = x_ref.shape
    H = pw_ref.shape[1]
    H2 = 2 * H
    L = hid_ref.shape[0] // 2

    # ---------------- input projection: one matmul over the whole sequence ----
    x_flat = x_ref[...].reshape(T * B, Din0)
    inp = jnp.dot(x_flat, pw_ref[...],
                  preferred_element_type=jnp.float32) + pb_ref[...]      # (T*B, H)
    rev = rev_ref[...]                                                   # (T*B, T*B)

    # ---------------- bidirectional multi-layer GRU ----------------
    # Both directions are carried in one (B, 2H) state; fwd lives in lanes
    # [0:H], bwd in lanes [H:2H].  Block-diagonal weights keep them decoupled.
    # TODO(synk): nn.GRU inter-layer dropout is train-mode only; eval path omits it.
    din = H
    for l in range(L):
        # Time-reversed copy of this layer's input (what the bwd direction
        # consumes), via a tiny permutation matmul; staged next to the
        # forward copy so one block-diagonal matmul per gate projects both
        # directions at once for the whole sequence.
        inp_rev = jnp.dot(rev, inp, preferred_element_type=jnp.float32)   # (T*B, din)
        cat_ref[:, 0:din] = inp
        cat_ref[:, din:2 * din] = inp_rev
        inp_both = cat_ref[:, 0:2 * din]                                  # (T*B, 2*din)

        gi, whh, bhh = [], [], []
        for g in range(3):                                               # r, z, n
            idx = l * 3 + g
            w_in = wih0_ref[g] if l == 0 else wih12_ref[(l - 1) * 3 + g]
            gi.append(jnp.dot(inp_both, w_in,
                              preferred_element_type=jnp.float32)
                      + bih_ref[idx])                                    # (T*B, 2H)
            whh.append(whh_ref[idx])                                     # (2H, 2H) blk-diag
            bhh.append(bhh_ref[idx])                                     # (1, 2H)

        h = jnp.zeros((B, H2), jnp.float32)                              # [fwd | bwd]
        # Fully unrolled time loop (T static); 3 recurrent matmuls per step.
        for t in range(T):
            f0, f1 = t * B, (t + 1) * B                                  # fwd time t
            tb = T - 1 - t
            b0, b1 = tb * B, (tb + 1) * B                                # bwd time tb
            gh_r = jnp.dot(h, whh[0], preferred_element_type=jnp.float32) + bhh[0]
            gh_z = jnp.dot(h, whh[1], preferred_element_type=jnp.float32) + bhh[1]
            gh_n = jnp.dot(h, whh[2], preferred_element_type=jnp.float32) + bhh[2]
            r = jax.nn.sigmoid(gi[0][f0:f1] + gh_r)
            z = jax.nn.sigmoid(gi[1][f0:f1] + gh_z)
            # PyTorch gate math: n = tanh(gi_n + r * (h @ W_hn + b_hn))
            n = jnp.tanh(gi[2][f0:f1] + r * gh_n)
            h = (1.0 - z) * n + z * h
            seq_ref[f0:f1, 0:H] = h[:, 0:H]          # forward output at time t
            seq_ref[b0:b1, H:H2] = h[:, H:H2]        # backward output at time tb
        hid_ref[2 * l] = h[:, 0:H]                   # final fwd hidden (layer l)
        hid_ref[2 * l + 1] = h[:, H:H2]              # final bwd hidden (layer l)
        inp = seq_ref[...]                           # (T*B, 2H) next-layer input
        din = H2

    # ---------------- attention: Linear -> tanh -> row-dot -> softmax ----------
    seq = inp                                                            # (T*B, 2H)
    a = jnp.tanh(jnp.dot(seq, wa1_ref[...],
                         preferred_element_type=jnp.float32) + ba1_ref[...])
    # score matvec as a VPU/XLU lane reduction (avoids an N=1 MXU matmul)
    s = jnp.sum(a * wa2_ref[...], axis=-1, keepdims=True) + ba2_ref[...]  # (T*B, 1)

    # Exact per-batch softmax over time using the one-hot batch mask selT
    # (selT[i, b] = 1 iff row i belongs to batch b); no in-kernel reshapes.
    selT = selT_ref[...]                                                 # (T*B, B)
    masked = jnp.where(selT > 0.5, s, -jnp.inf)                          # (T*B, B)
    m_b = jnp.max(masked, axis=0, keepdims=True)                         # (1, B)
    m_row = jnp.sum(selT * m_b, axis=-1, keepdims=True)                  # (T*B, 1)
    e = jnp.exp(s - m_row)                                               # (T*B, 1)
    den_b = jnp.sum(selT * e, axis=0, keepdims=True)                     # (1, B)
    den_row = jnp.sum(selT * den_b, axis=-1, keepdims=True)              # (T*B, 1)
    w = e / den_row                                                      # (T*B, 1)
    attn_ref[...] = w

    # context = sum_t w[t, b] * seq[t, b, :]  via a (B, T*B) selection matmul
    ctx = jnp.dot(sel_ref[...], w * seq, preferred_element_type=jnp.float32)
    ctx_ref[...] = ctx                                                   # (B, 2H)

    # ---------------- fused response heads, packed lane-dense ------------------
    # hw1 = [imm_w1 | dly_w1 | stab_w1], hw2 = block-diagonal into 128 lanes.
    h1 = jnp.maximum(jnp.dot(ctx, hw1_ref[...],
                             preferred_element_type=jnp.float32) + hb1_ref[...],
                     0.0)                                                # (B, 3H)
    out = jnp.dot(h1, hw2_ref[...],
                  preferred_element_type=jnp.float32) + hb2_ref[...]     # (B, 128)
    lane = lax.broadcasted_iota(jnp.int32, out.shape, 1)
    out = jnp.where(lane == 6, jax.nn.sigmoid(out), out)  # sigmoid only on stab lane
    heads_ref[...] = out


# ----------------------------- parameters -----------------------------

def init_params(key):
    """PyTorch-convention parameters (weights pre-transposed to (in, out),
    GRU gates concatenated in r|z|n order along the output axis)."""
    H = HIDDEN_DIM

    def nrm(k, shape):
        return 0.1 * jax.random.normal(k, shape, dtype=jnp.float32)

    keys = iter(jax.random.split(key, 64))
    p = {}
    p['proj_w'] = nrm(next(keys), (INPUT_DIM, H))
    p['proj_b'] = nrm(next(keys), (1, H))
    p['gru'] = []
    for l in range(NUM_LAYERS):
        din = H if l == 0 else 2 * H
        layer = {}
        for d in ('fwd', 'bwd'):
            layer[d] = {
                'wih': nrm(next(keys), (din, 3 * H)),
                'whh': nrm(next(keys), (H, 3 * H)),
                'bih': nrm(next(keys), (1, 3 * H)),
                'bhh': nrm(next(keys), (1, 3 * H)),
            }
        p['gru'].append(layer)
    p['attn_w1'] = nrm(next(keys), (2 * H, H)); p['attn_b1'] = nrm(next(keys), (1, H))
    p['attn_w2'] = nrm(next(keys), (H, 1));     p['attn_b2'] = nrm(next(keys), (1, 1))
    for name, out in (('imm', 3), ('dly', 3), ('stab', 1)):
        p[f'{name}_w1'] = nrm(next(keys), (2 * H, H))
        p[f'{name}_b1'] = nrm(next(keys), (1, H))
        p[f'{name}_w2'] = nrm(next(keys), (H, out))
        p[f'{name}_b2'] = nrm(next(keys), (1, out))
    return p


def pack_params(p):
    """Repack PyTorch-layout params into the fused-kernel layout:
    per-gate, fwd/bwd block-diagonal weight stacks (index = layer*3 + gate),
    concatenated head first layers and a block-diagonal, zero-padded,
    lane-dense second-layer head matrix."""
    H = HIDDEN_DIM

    def split3(m):   # (R, 3H) -> [r, z, n] each (R, H)
        return [m[:, 0:H], m[:, H:2 * H], m[:, 2 * H:3 * H]]

    def blockdiag(wf, wb):   # (din, H) x2 -> (2*din, 2H) block-diagonal
        din = wf.shape[0]
        m = jnp.zeros((2 * din, 2 * H), jnp.float32)
        m = m.at[0:din, 0:H].set(wf)
        m = m.at[din:2 * din, H:2 * H].set(wb)
        return m

    wih0, wih12, whh, bih, bhh = [], [], [], [], []
    for l in range(NUM_LAYERS):
        f = p['gru'][l]['fwd']; b = p['gru'][l]['bwd']
        wf_i, wb_i = split3(f['wih']), split3(b['wih'])
        wf_h, wb_h = split3(f['whh']), split3(b['whh'])
        bf_i, bb_i = split3(f['bih']), split3(b['bih'])
        bf_h, bb_h = split3(f['bhh']), split3(b['bhh'])
        for g in range(3):
            (wih0 if l == 0 else wih12).append(blockdiag(wf_i[g], wb_i[g]))
            whh.append(blockdiag(wf_h[g], wb_h[g]))
            bih.append(jnp.concatenate([bf_i[g], bb_i[g]], axis=1))
            bhh.append(jnp.concatenate([bf_h[g], bb_h[g]], axis=1))

    hw1 = jnp.concatenate([p['imm_w1'], p['dly_w1'], p['stab_w1']], axis=1)  # (2H, 3H)
    hb1 = jnp.concatenate([p['imm_b1'], p['dly_b1'], p['stab_b1']], axis=1)  # (1, 3H)
    hw2 = jnp.zeros((3 * H, HEAD_PACK), jnp.float32)
    hw2 = hw2.at[0:H, 0:3].set(p['imm_w2'])
    hw2 = hw2.at[H:2 * H, 3:6].set(p['dly_w2'])
    hw2 = hw2.at[2 * H:3 * H, 6:7].set(p['stab_w2'])
    hb2 = jnp.zeros((1, HEAD_PACK), jnp.float32)
    hb2 = hb2.at[:, 0:3].set(p['imm_b2'])
    hb2 = hb2.at[:, 3:6].set(p['dly_b2'])
    hb2 = hb2.at[:, 6:7].set(p['stab_b2'])

    return {
        'proj_w': p['proj_w'], 'proj_b': p['proj_b'],
        'wih0': jnp.stack(wih0),     # (3, 2H, 2H)        layer 0 input weights
        'wih12': jnp.stack(wih12),   # (6, 4H, 2H)        layers 1..2 input weights
        'whh': jnp.stack(whh),       # (3L, 2H, 2H)       recurrent weights
        'bih': jnp.stack(bih),       # (3L, 1, 2H)
        'bhh': jnp.stack(bhh),       # (3L, 1, 2H)
        'attn_w1': p['attn_w1'], 'attn_b1': p['attn_b1'],
        'attn_w2_row': jnp.reshape(p['attn_w2'], (1, H)), 'attn_b2': p['attn_b2'],
        'head_w1': hw1, 'head_b1': hb1, 'head_w2': hw2, 'head_b2': hb2,
    }


# ----------------------------- forward wrapper -----------------------------

@jax.jit
def stimulation_net_forward(packed, x):
    # TODO(synk): optional initial hidden state is not plumbed; defaults to
    # zeros, matching forward(x, hidden=None).
    B, T, _ = x.shape
    H = HIDDEN_DIM
    L = NUM_LAYERS

    x_t = jnp.transpose(x, (1, 0, 2))                      # time-major (T, B, Din)
    row = jnp.arange(T * B, dtype=jnp.int32)
    b_of_row = row % B
    t_of_row = row // B
    sel = (b_of_row[None, :] ==
           jnp.arange(B, dtype=jnp.int32)[:, None]).astype(jnp.float32)  # (B, T*B)
    selT = jnp.transpose(sel)                                            # (T*B, B)
    # time-reversal permutation: (rev @ seq)[t*B + b] = seq[(T-1-t)*B + b]
    src = (T - 1 - t_of_row) * B + b_of_row
    rev = (row[None, :] == src[:, None]).astype(jnp.float32)             # (T*B, T*B)

    attn_flat, ctx, heads, hidden = pl.pallas_call(
        fused_kernel,
        out_shape=(jax.ShapeDtypeStruct((T * B, 1), jnp.float32),
                   jax.ShapeDtypeStruct((B, 2 * H), jnp.float32),
                   jax.ShapeDtypeStruct((B, HEAD_PACK), jnp.float32),
                   jax.ShapeDtypeStruct((2 * L, B, H), jnp.float32)),
        in_specs=[_vmem()] * 19,
        out_specs=(_vmem(), _vmem(), _vmem(), _vmem()),
        scratch_shapes=[pltpu.VMEM((T * B, 2 * H), jnp.float32),
                        pltpu.VMEM((T * B, 4 * H), jnp.float32)],
    )(x_t, sel, selT, rev,
      packed['proj_w'], packed['proj_b'],
      packed['wih0'], packed['wih12'], packed['whh'], packed['bih'], packed['bhh'],
      packed['attn_w1'], packed['attn_b1'], packed['attn_w2_row'], packed['attn_b2'],
      packed['head_w1'], packed['head_b1'], packed['head_w2'], packed['head_b2'])

    attention_weights = jnp.transpose(attn_flat.reshape(T, B), (1, 0))[:, :, None]
    return {
        'immediate_response': heads[:, 0:3],
        'delayed_response': heads[:, 3:6],
        'stability_score': heads[:, 6:7],
        'attention_weights': attention_weights,
        'hidden_state': hidden,
        'context_vector': ctx,
    }


# ----------------------------- pure-JAX reference -----------------------------

def reference_forward(p, x):
    """Straightforward pure-JAX forward (torch semantics) for validation."""
    B, T, _ = x.shape
    H = HIDDEN_DIM
    h = x @ p['proj_w'] + p['proj_b']                       # (B, T, H)

    def run_dir(seq, prm, reverse):
        wih, whh, bih, bhh = prm['wih'], prm['whh'], prm['bih'], prm['bhh']
        order = range(T - 1, -1, -1) if reverse else range(T)
        state = jnp.zeros((B, H), jnp.float32)
        outs = [None] * T
        for t in order:
            gi = seq[:, t, :] @ wih + bih
            gh = state @ whh + bhh
            r = jax.nn.sigmoid(gi[:, 0:H] + gh[:, 0:H])
            z = jax.nn.sigmoid(gi[:, H:2 * H] + gh[:, H:2 * H])
            n = jnp.tanh(gi[:, 2 * H:3 * H] + r * gh[:, 2 * H:3 * H])
            state = (1.0 - z) * n + z * state
            outs[t] = state
        return jnp.stack(outs, axis=1), state

    inp = h
    finals = []
    for l in range(NUM_LAYERS):
        of, hf = run_dir(inp, p['gru'][l]['fwd'], False)
        ob, hb = run_dir(inp, p['gru'][l]['bwd'], True)
        inp = jnp.concatenate([of, ob], axis=-1)
        finals += [hf, hb]
    seq = inp                                                # (B, T, 2H)
    a = jnp.tanh(seq @ p['attn_w1'] + p['attn_b1'])
    s = a @ p['attn_w2'] + p['attn_b2']                      # (B, T, 1)
    w = jax.nn.softmax(s, axis=1)
    ctx = jnp.sum(w * seq, axis=1)                           # (B, 2H)

    def head(prefix, act=None):
        y = jnp.maximum(ctx @ p[f'{prefix}_w1'] + p[f'{prefix}_b1'], 0.0)
        y = y @ p[f'{prefix}_w2'] + p[f'{prefix}_b2']
        return act(y) if act is not None else y

    return {
        'immediate_response': head('imm'),
        'delayed_response': head('dly'),
        'stability_score': head('stab', jax.nn.sigmoid),
        'attention_weights': w,
        'hidden_state': jnp.stack(finals, axis=0),
        'context_vector': ctx,
    }


if __name__ == "__main__":
    key = jax.random.PRNGKey(0)
    pkey, xkey = jax.random.split(key)
    params = init_params(pkey)
    packed = pack_params(params)

    B, T = 2, 8
    x = jax.random.normal(xkey, (B, T, INPUT_DIM), dtype=jnp.float32)

    out = stimulation_net_forward(packed, x)
    out = jax.block_until_ready(out)

    assert out['immediate_response'].shape == (B, 3)
    assert out['delayed_response'].shape == (B, 3)
    assert out['stability_score'].shape == (B, 1)
    assert out['attention_weights'].shape == (B, T, 1)
    assert out['hidden_state'].shape == (2 * NUM_LAYERS, B, HIDDEN_DIM)
    assert out['context_vector'].shape == (B, 2 * HIDDEN_DIM)

    # numerical check against a pure-JAX reference of the torch module
    ref = reference_forward(params, x)
    for k in ('immediate_response', 'delayed_response', 'stability_score',
              'attention_weights', 'hidden_state', 'context_vector'):
        assert bool(jnp.allclose(out[k], ref[k], rtol=1e-4, atol=1e-4)), k

    # attention weights sum to 1 over time
    ssum = jnp.sum(out['attention_weights'][..., 0], axis=1)
    assert bool(jnp.all(jnp.abs(ssum - 1.0) < 1e-4))
    # stability score is a valid sigmoid output
    assert bool(jnp.all((out['stability_score'] > 0.0) & (out['stability_score'] < 1.0)))
    assert bool(jnp.all(jnp.isfinite(out['context_vector'])))

    print("KERNEL_OK")
</pallas_src>

<mosaic_0001>
module attributes {stable_mosaic.version = 11 : i64} {
  func.func @fused_kernel(%arg0: memref<8x2x32xf32, #tpu.memory_space<vmem>>, %arg1: memref<2x16xf32, #tpu.memory_space<vmem>>, %arg2: memref<16x2xf32, #tpu.memory_space<vmem>>, %arg3: memref<16x16xf32, #tpu.memory_space<vmem>>, %arg4: memref<32x32xf32, #tpu.memory_space<vmem>>, %arg5: memref<1x32xf32, #tpu.memory_space<vmem>>, %arg6: memref<3x64x64xf32, #tpu.memory_space<vmem>>, %arg7: memref<6x128x64xf32, #tpu.memory_space<vmem>>, %arg8: memref<9x64x64xf32, #tpu.memory_space<vmem>>, %arg9: memref<9x1x64xf32, #tpu.memory_space<vmem>>, %arg10: memref<9x1x64xf32, #tpu.memory_space<vmem>>, %arg11: memref<64x32xf32, #tpu.memory_space<vmem>>, %arg12: memref<1x32xf32, #tpu.memory_space<vmem>>, %arg13: memref<1x32xf32, #tpu.memory_space<vmem>>, %arg14: memref<1x1xf32, #tpu.memory_space<vmem>>, %arg15: memref<64x96xf32, #tpu.memory_space<vmem>>, %arg16: memref<1x96xf32, #tpu.memory_space<vmem>>, %arg17: memref<96x128xf32, #tpu.memory_space<vmem>>, %arg18: memref<1x128xf32, #tpu.memory_space<vmem>>, %arg19: memref<16x1xf32, #tpu.memory_space<vmem>>, %arg20: memref<2x64xf32, #tpu.memory_space<vmem>>, %arg21: memref<2x128xf32, #tpu.memory_space<vmem>>, %arg22: memref<6x2x32xf32, #tpu.memory_space<vmem>>, %arg23: memref<16x64xf32, #tpu.memory_space<vmem>>, %arg24: memref<16x128xf32, #tpu.memory_space<vmem>>) attributes {dimension_semantics = [], scalar_prefetch = 0 : i64, scratch_operands = 2 : i64, tpu.core_type = #tpu.core_type<tc>} {
    %c0 = arith.constant 0 : index
    %c0_0 = arith.constant 0 : index
    %c0_1 = arith.constant 0 : index
    %0 = vector.load %arg0[%c0, %c0_0, %c0_1] : memref<8x2x32xf32, #tpu.memory_space<vmem>>, vector<8x2x32xf32>
    %1 = vector.shape_cast %0 : vector<8x2x32xf32> to vector<16x32xf32>
    %c0_2 = arith.constant 0 : index
    %c0_3 = arith.constant 0 : index
    %2 = vector.load %arg4[%c0_2, %c0_3] : memref<32x32xf32, #tpu.memory_space<vmem>>, vector<32x32xf32>
    %cst = arith.constant dense<0.000000e+00> : vector<16x32xf32>
    %3 = tpu.matmul %1, %2, %cst {dimension_numbers = #tpu.dot_dimension_numbers<[1], [0], [0], [1], [0, 0, 1, 1], [], []>} : vector<16x32xf32>, vector<32x32xf32>, vector<16x32xf32> -> vector<16x32xf32>
    %c0_4 = arith.constant 0 : index
    %c0_5 = arith.constant 0 : index
    %4 = vector.load %arg5[%c0_4, %c0_5] : memref<1x32xf32, #tpu.memory_space<vmem>>, vector<1x32xf32>
    %5 = vector.broadcast %4 : vector<1x32xf32> to vector<16x32xf32>
    %6 = arith.addf %3, %5 : vector<16x32xf32>
    %c0_6 = arith.constant 0 : index
    %c0_7 = arith.constant 0 : index
    %7 = vector.load %arg3[%c0_6, %c0_7] : memref<16x16xf32, #tpu.memory_space<vmem>>, vector<16x16xf32>
    %cst_8 = arith.constant dense<0.000000e+00> : vector<16x32xf32>
    %8 = tpu.matmul %7, %6, %cst_8 {dimension_numbers = #tpu.dot_dimension_numbers<[1], [0], [0], [1], [0, 0, 1, 1], [], []>} : vector<16x16xf32>, vector<16x32xf32>, vector<16x32xf32> -> vector<16x32xf32>
    %c0_9 = arith.constant 0 : index
    %c0_10 = arith.constant 0 : index
    %9 = vector.load %arg24[%c0_9, %c0_10] : memref<16x128xf32, #tpu.memory_space<vmem>>, vector<16x32xf32>
    tpu.vector_store %arg24[%c0_9, %c0_10], %6 {strides = array<i32>} : memref<16x128xf32, #tpu.memory_space<vmem>>, vector<16x32xf32>,
    %c0_11 = arith.constant 0 : index
    %c32 = arith.constant 32 : index
    %10 = vector.load %arg24[%c0_11, %c32] : memref<16x128xf32, #tpu.memory_space<vmem>>, vector<16x32xf32>
    tpu.vector_store %arg24[%c0_11, %c32], %8 {strides = array<i32>} : memref<16x128xf32, #tpu.memory_space<vmem>>, vector<16x32xf32>,
    %c0_12 = arith.constant 0 : index
    %c0_13 = arith.constant 0 : index
    %11 = vector.load %arg24[%c0_12, %c0_13] : memref<16x128xf32, #tpu.memory_space<vmem>>, vector<16x64xf32>
    %c0_14 = arith.constant 0 : index
    %c0_15 = arith.constant 0 : index
    %c0_16 = arith.constant 0 : index
    %12 = vector.load %arg6[%c0_14, %c0_15, %c0_16] : memref<3x64x64xf32, #tpu.memory_space<vmem>>, vector<1x64x64xf32>
    %13 = vector.shape_cast %12 : vector<1x64x64xf32> to vector<64x64xf32>
    %cst_17 = arith.constant dense<0.000000e+00> : vector<16x64xf32>
    %14 = tpu.matmul %11, %13, %cst_17 {dimension_numbers = #tpu.dot_dimension_numbers<[1], [0], [0], [1], [0, 0, 1, 1], [], []>} : vector<16x64xf32>, vector<64x64xf32>, vector<16x64xf32> -> vector<16x64xf32>
    %c0_18 = arith.constant 0 : index
    %c0_19 = arith.constant 0 : index
    %c0_20 = arith.constant 0 : index
    %15 = vector.load %arg9[%c0_18, %c0_19, %c0_20] : memref<9x1x64xf32, #tpu.memory_space<vmem>>, vector<1x1x64xf32>
    %16 = vector.shape_cast %15 : vector<1x1x64xf32> to vector<1x64xf32>
    %17 = vector.broadcast %16 : vector<1x64xf32> to vector<16x64xf32>
    %18 = arith.addf %14, %17 : vector<16x64xf32>
    %c0_21 = arith.constant 0 : index
    %c0_22 = arith.constant 0 : index
    %c0_23 = arith.constant 0 : index
    %19 = vector.load %arg8[%c0_21, %c0_22, %c0_23] : memref<9x64x64xf32, #tpu.memory_space<vmem>>, vector<1x64x64xf32>
    %20 = vector.shape_cast %19 : vector<1x64x64xf32> to vector<64x64xf32>
    %c0_24 = arith.constant 0 : index
    %c0_25 = arith.constant 0 : index
    %c0_26 = arith.constant 0 : index
    %21 = vector.load %arg10[%c0_24, %c0_25, %c0_26] : memref<9x1x64xf32, #tpu.memory_space<vmem>>, vector<1x1x64xf32>
    %22 = vector.shape_cast %21 : vector<1x1x64xf32> to vector<1x64xf32>
    %c1 = arith.constant 1 : index
    %c0_27 = arith.constant 0 : index
    %c0_28 = arith.constant 0 : index
    %23 = vector.load %arg6[%c1, %c0_27, %c0_28] : memref<3x64x64xf32, #tpu.memory_space<vmem>>, vector<1x64x64xf32>
    %24 = vector.shape_cast %23 : vector<1x64x64xf32> to vector<64x64xf32>
    %cst_29 = arith.constant dense<0.000000e+00> : vector<16x64xf32>
    %25 = tpu.matmul %11, %24, %cst_29 {dimension_numbers = #tpu.dot_dimension_numbers<[1], [0], [0], [1], [0, 0, 1, 1], [], []>} : vector<16x64xf32>, vector<64x64xf32>, vector<16x64xf32> -> vector<16x64xf32>
    %c1_30 = arith.constant 1 : index
    %c0_31 = arith.constant 0 : index
    %c0_32 = arith.constant 0 : index
    %26 = vector.load %arg9[%c1_30, %c0_31, %c0_32] : memref<9x1x64xf32, #tpu.memory_space<vmem>>, vector<1x1x64xf32>
    %27 = vector.shape_cast %26 : vector<1x1x64xf32> to vector<1x64xf32>
    %28 = vector.broadcast %27 : vector<1x64xf32> to vector<16x64xf32>
    %29 = arith.addf %25, %28 : vector<16x64xf32>
    %c1_33 = arith.constant 1 : index
    %c0_34 = arith.constant 0 : index
    %c0_35 = arith.constant 0 : index
    %30 = vector.load %arg8[%c1_33, %c0_34, %c0_35] : memref<9x64x64xf32, #tpu.memory_space<vmem>>, vector<1x64x64xf32>
    %31 = vector.shape_cast %30 : vector<1x64x64xf32> to vector<64x64xf32>
    %c1_36 = arith.constant 1 : index
    %c0_37 = arith.constant 0 : index
    %c0_38 = arith.constant 0 : index
    %32 = vector.load %arg10[%c1_36, %c0_37, %c0_38] : memref<9x1x64xf32, #tpu.memory_space<vmem>>, vector<1x1x64xf32>
    %33 = vector.shape_cast %32 : vector<1x1x64xf32> to vector<1x64xf32>
    %c2 = arith.constant 2 : index
    %c0_39 = arith.constant 0 : index
    %c0_40 = arith.constant 0 : index
    %34 = vector.load %arg6[%c2, %c0_39, %c0_40] : memref<3x64x64xf32, #tpu.memory_space<vmem>>, vector<1x64x64xf32>
    %35 = vector.shape_cast %34 : vector<1x64x64xf32> to vector<64x64xf32>
    %cst_41 = arith.constant dense<0.000000e+00> : vector<16x64xf32>
    %36 = tpu.matmul %11, %35, %cst_41 {dimension_numbers = #tpu.dot_dimension_numbers<[1], [0], [0], [1], [0, 0, 1, 1], [], []>} : vector<16x64xf32>, vector<64x64xf32>, vector<16x64xf32> -> vector<16x64xf32>
    %c2_42 = arith.constant 2 : index
    %c0_43 = arith.constant 0 : index
    %c0_44 = arith.constant 0 : index
    %37 = vector.load %arg9[%c2_42, %c0_43, %c0_44] : memref<9x1x64xf32, #tpu.memory_space<vmem>>, vector<1x1x64xf32>
    %38 = vector.shape_cast %37 : vector<1x1x64xf32> to vector<1x64xf32>
    %39 = vector.broadcast %38 : vector<1x64xf32> to vector<16x64xf32>
    %40 = arith.addf %36, %39 : vector<16x64xf32>
    %c2_45 = arith.constant 2 : index
    %c0_46 = arith.constant 0 : index
    %c0_47 = arith.constant 0 : index
    %41 = vector.load %arg8[%c2_45, %c0_46, %c0_47] : memref<9x64x64xf32, #tpu.memory_space<vmem>>, vector<1x64x64xf32>
    %42 = vector.shape_cast %41 : vector<1x64x64xf32> to vector<64x64xf32>
    %c2_48 = arith.constant 2 : index
    %c0_49 = arith.constant 0 : index
    %c0_50 = arith.constant 0 : index
    %43 = vector.load %arg10[%c2_48, %c0_49, %c0_50] : memref<9x1x64xf32, #tpu.memory_space<vmem>>, vector<1x1x64xf32>
    %44 = vector.shape_cast %43 : vector<1x1x64xf32> to vector<1x64xf32>
    %cst_51 = arith.constant 0.000000e+00 : f32
    %45 = vector.broadcast %cst_51 : f32 to vector<2x64xf32>
    %cst_52 = arith.constant dense<0.000000e+00> : vector<2x64xf32>
    %46 = tpu.matmul %45, %20, %cst_52 {dimension_numbers = #tpu.dot_dimension_numbers<[1], [0], [0], [1], [0, 0, 1, 1], [], []>} : vector<2x64xf32>, vector<64x64xf32>, vector<2x64xf32> -> vector<2x64xf32>
    %47 = vector.broadcast %22 : vector<1x64xf32> to vector<2x64xf32>
    %48 = arith.addf %46, %47 : vector<2x64xf32>
    %cst_53 = arith.constant dense<0.000000e+00> : vector<2x64xf32>
    %49 = tpu.matmul %45, %31, %cst_53 {dimension_numbers = #tpu.dot_dimension_numbers<[1], [0], [0], [1], [0, 0, 1, 1], [], []>} : vector<2x64xf32>, vector<64x64xf32>, vector<2x64xf32> -> vector<2x64xf32>
    %50 = vector.broadcast %33 : vector<1x64xf32> to vector<2x64xf32>
    %51 = arith.addf %49, %50 : vector<2x64xf32>
    %cst_54 = arith.constant dense<0.000000e+00> : vector<2x64xf32>
    %52 = tpu.matmul %45, %42, %cst_54 {dimension_numbers = #tpu.dot_dimension_numbers<[1], [0], [0], [1], [0, 0, 1, 1], [], []>} : vector<2x64xf32>, vector<64x64xf32>, vector<2x64xf32> -> vector<2x64xf32>
    %53 = vector.broadcast %44 : vector<1x64xf32> to vector<2x64xf32>
    %54 = arith.addf %52, %53 : vector<2x64xf32>
    %55 = vector.extract_strided_slice %18 {offsets = [0, 0], sizes = [2, 64], strides = [1, 1]} : vector<16x64xf32> to vector<2x64xf32>
    %56 = arith.addf %55, %48 : vector<2x64xf32>
    %57 = arith.negf %56 : vector<2x64xf32>
    %58 = math.exp %57 : vector<2x64xf32>
    %cst_55 = arith.constant 1.000000e+00 : f32
    %59 = vector.broadcast %cst_55 : f32 to vector<2x64xf32>
    %60 = arith.addf %59, %58 : vector<2x64xf32>
    %61 = arith.divf %59, %60 : vector<2x64xf32>
    %62 = vector.extract_strided_slice %29 {offsets = [0, 0], sizes = [2, 64], strides = [1, 1]} : vector<16x64xf32> to vector<2x64xf32>
    %63 = arith.addf %62, %51 : vector<2x64xf32>
    %64 = arith.negf %63 : vector<2x64xf32>
    %65 = math.exp %64 : vector<2x64xf32>
    %cst_56 = arith.constant 1.000000e+00 : f32
    %66 = vector.broadcast %cst_56 : f32 to vector<2x64xf32>
    %67 = arith.addf %66, %65 : vector<2x64xf32>
    %68 = arith.divf %66, %67 : vector<2x64xf32>
    %69 = vector.extract_strided_slice %40 {offsets = [0, 0], sizes = [2, 64], strides = [1, 1]} : vector<16x64xf32> to vector<2x64xf32>
    %70 = arith.mulf %61, %54 : vector<2x64xf32>
    %71 = arith.addf %69, %70 : vector<2x64xf32>
    %72 = math.tanh %71 : vector<2x64xf32>
    %cst_57 = arith.constant 1.000000e+00 : f32
    %73 = vector.broadcast %cst_57 : f32 to vector<2x64xf32>
    %74 = arith.subf %73, %68 : vector<2x64xf32>
    %75 = arith.mulf %74, %72 : vector<2x64xf32>
    %76 = arith.mulf %68, %45 : vector<2x64xf32>
    %77 = arith.addf %75, %76 : vector<2x64xf32>
    %78 = vector.extract_strided_slice %77 {offsets = [0, 0], sizes = [2, 32], strides = [1, 1]} : vector<2x64xf32> to vector<2x32xf32>
    %c0_58 = arith.constant 0 : index
    %c0_59 = arith.constant 0 : index
    %79 = vector.load %arg23[%c0_58, %c0_59] : memref<16x64xf32, #tpu.memory_space<vmem>>, vector<2x32xf32>
    tpu.vector_store %arg23[%c0_58, %c0_59], %78 {strides = array<i32>} : memref<16x64xf32, #tpu.memory_space<vmem>>, vector<2x32xf32>,
    %80 = vector.extract_strided_slice %77 {offsets = [0, 32], sizes = [2, 32], strides = [1, 1]} : vector<2x64xf32> to vector<2x32xf32>
    %c14 = arith.constant 14 : index
    %c32_60 = arith.constant 32 : index
    %81 = vector.load %arg23[%c14, %c32_60] : memref<16x64xf32, #tpu.memory_space<vmem>>, vector<2x32xf32>
    tpu.vector_store %arg23[%c14, %c32_60], %80 {strides = array<i32>} : memref<16x64xf32, #tpu.memory_space<vmem>>, vector<2x32xf32>,
    %cst_61 = arith.constant dense<0.000000e+00> : vector<2x64xf32>
    %82 = tpu.matmul %77, %20, %cst_61 {dimension_numbers = #tpu.dot_dimension_numbers<[1], [0], [0], [1], [0, 0, 1, 1], [], []>} : vector<2x64xf32>, vector<64x64xf32>, vector<2x64xf32> -> vector<2x64xf32>
    %83 = vector.broadcast %22 : vector<1x64xf32> to vector<2x64xf32>
    %84 = arith.addf %82, %83 : vector<2x64xf32>
    %cst_62 = arith.constant dense<0.000000e+00> : vector<2x64xf32>
    %85 = tpu.matmul %77, %31, %cst_62 {dimension_numbers = #tpu.dot_dimension_numbers<[1], [0], [0], [1], [0, 0, 1, 1], [], []>} : vector<2x64xf32>, vector<64x64xf32>, vector<2x64xf32> -> vector<2x64xf32>
    %86 = vector.broadcast %33 : vector<1x64xf32> to vector<2x64xf32>
    %87 = arith.addf %85, %86 : vector<2x64xf32>
    %cst_63 = arith.constant dense<0.000000e+00> : vector<2x64xf32>
    %88 = tpu.matmul %77, %42, %cst_63 {dimension_numbers = #tpu.dot_dimension_numbers<[1], [0], [0], [1], [0, 0, 1, 1], [], []>} : vector<2x64xf32>, vector<64x64xf32>, vector<2x64xf32> -> vector<2x64xf32>
    %89 = vector.broadcast %44 : vector<1x64xf32> to vector<2x64xf32>
    %90 = arith.addf %88, %89 : vector<2x64xf32>
    %91 = vector.extract_strided_slice %18 {offsets = [2, 0], sizes = [2, 64], strides = [1, 1]} : vector<16x64xf32> to vector<2x64xf32>
    %92 = arith.addf %91, %84 : vector<2x64xf32>
    %93 = arith.negf %92 : vector<2x64xf32>
    %94 = math.exp %93 : vector<2x64xf32>
    %cst_64 = arith.constant 1.000000e+00 : f32
    %95 = vector.broadcast %cst_64 : f32 to vector<2x64xf32>
    %96 = arith.addf %95, %94 : vector<2x64xf32>
    %97 = arith.divf %95, %96 : vector<2x64xf32>
    %98 = vector.extract_strided_slice %29 {offsets = [2, 0], sizes = [2, 64], strides = [1, 1]} : vector<16x64xf32> to vector<2x64xf32>
    %99 = arith.addf %98, %87 : vector<2x64xf32>
    %100 = arith.negf %99 : vector<2x64xf32>
    %101 = math.exp %100 : vector<2x64xf32>
    %cst_65 = arith.constant 1.000000e+00 : f32
    %102 = vector.broadcast %cst_65 : f32 to vector<2x64xf32>
    %103 = arith.addf %102, %101 : vector<2x64xf32>
    %104 = arith.divf %102, %103 : vector<2x64xf32>
    %105 = vector.extract_strided_slice %40 {offsets = [2, 0], sizes = [2, 64], strides = [1, 1]} : vector<16x64xf32> to vector<2x64xf32>
    %106 = arith.mulf %97, %90 : vector<2x64xf32>
    %107 = arith.addf %105, %106 : vector<2x64xf32>
    %108 = math.tanh %107 : vector<2x64xf32>
    %cst_66 = arith.constant 1.000000e+00 : f32
    %109 = vector.broadcast %cst_66 : f32 to vector<2x64xf32>
    %110 = arith.subf %109, %104 : vector<2x64xf32>
    %111 = arith.mulf %110, %108 : vector<2x64xf32>
    %112 = arith.mulf %104, %77 : vector<2x64xf32>
    %113 = arith.addf %111, %112 : vector<2x64xf32>
    %114 = vector.extract_strided_slice %113 {offsets = [0, 0], sizes = [2, 32], strides = [1, 1]} : vector<2x64xf32> to vector<2x32xf32>
    %c2_67 = arith.constant 2 : index
    %c0_68 = arith.constant 0 : index
    %115 = vector.load %arg23[%c2_67, %c0_68] : memref<16x64xf32, #tpu.memory_space<vmem>>, vector<2x32xf32>
    tpu.vector_store %arg23[%c2_67, %c0_68], %114 {strides = array<i32>} : memref<16x64xf32, #tpu.memory_space<vmem>>, vector<2x32xf32>,
    %116 = vector.extract_strided_slice %113 {offsets = [0, 32], sizes = [2, 32], strides = [1, 1]} : vector<2x64xf32> to vector<2x32xf32>
    %c12 = arith.constant 12 : index
    %c32_69 = arith.constant 32 : index
    %117 = vector.load %arg23[%c12, %c32_69] : memref<16x64xf32, #tpu.memory_space<vmem>>, vector<2x32xf32>
    tpu.vector_store %arg23[%c12, %c32_69], %116 {strides = array<i32>} : memref<16x64xf32, #tpu.memory_space<vmem>>, vector<2x32xf32>,
    %cst_70 = arith.constant dense<0.000000e+00> : vector<2x64xf32>
    %118 = tpu.matmul %113, %20, %cst_70 {dimension_numbers = #tpu.dot_dimension_numbers<[1], [0], [0], [1], [0, 0, 1, 1], [], []>} : vector<2x64xf32>, vector<64x64xf32>, vector<2x64xf32> -> vector<2x64xf32>
    %119 = vector.broadcast %22 : vector<1x64xf32> to vector<2x64xf32>
    %120 = arith.addf %118, %119 : vector<2x64xf32>
    %cst_71 = arith.constant dense<0.000000e+00> : vector<2x64xf32>
    %121 = tpu.matmul %113, %31, %cst_71 {dimension_numbers = #tpu.dot_dimension_numbers<[1], [0], [0], [1], [0, 0, 1, 1], [], []>} : vector<2x64xf32>, vector<64x64xf32>, vector<2x64xf32> -> vector<2x64xf32>
    %122 = vector.broadcast %33 : vector<1x64xf32> to vector<2x64xf32>
    %123 = arith.addf %121, %122 : vector<2x64xf32>
    %cst_72 = arith.constant dense<0.000000e+00> : vector<2x64xf32>
    %124 = tpu.matmul %113, %42, %cst_72 {dimension_numbers = #tpu.dot_dimension_numbers<[1], [0], [0], [1], [0, 0, 1, 1], [], []>} : vector<2x64xf32>, vector<64x64xf32>, vector<2x64xf32> -> vector<2x64xf32>
    %125 = vector.broadcast %44 : vector<1x64xf32> to vector<2x64xf32>
    %126 = arith.addf %124, %125 : vector<2x64xf32>
    %127 = vector.extract_strided_slice %18 {offsets = [4, 0], sizes = [2, 64], strides = [1, 1]} : vector<16x64xf32> to vector<2x64xf32>
    %128 = arith.addf %127, %120 : vector<2x64xf32>
    %129 = arith.negf %128 : vector<2x64xf32>
    %130 = math.exp %129 : vector<2x64xf32>
    %cst_73 = arith.constant 1.000000e+00 : f32
    %131 = vector.broadcast %cst_73 : f32 to vector<2x64xf32>
    %132 = arith.addf %131, %130 : vector<2x64xf32>
    %133 = arith.divf %131, %132 : vector<2x64xf32>
    %134 = vector.extract_strided_slice %29 {offsets = [4, 0], sizes = [2, 64], strides = [1, 1]} : vector<16x64xf32> to vector<2x64xf32>
    %135 = arith.addf %134, %123 : vector<2x64xf32>
    %136 = arith.negf %135 : vector<2x64xf32>
    %137 = math.exp %136 : vector<2x64xf32>
    %cst_74 = arith.constant 1.000000e+00 : f32
    %138 = vector.broadcast %cst_74 : f32 to vector<2x64xf32>
    %139 = arith.addf %138, %137 : vector<2x64xf32>
    %140 = arith.divf %138, %139 : vector<2x64xf32>
    %141 = vector.extract_strided_slice %40 {offsets = [4, 0], sizes = [2, 64], strides = [1, 1]} : vector<16x64xf32> to vector<2x64xf32>
    %142 = arith.mulf %133, %126 : vector<2x64xf32>
    %143 = arith.addf %141, %142 : vector<2x64xf32>
    %144 = math.tanh %143 : vector<2x64xf32>
    %cst_75 = arith.constant 1.000000e+00 : f32
    %145 = vector.broadcast %cst_75 : f32 to vector<2x64xf32>
    %146 = arith.subf %145, %140 : vector<2x64xf32>
    %147 = arith.mulf %146, %144 : vector<2x64xf32>
    %148 = arith.mulf %140, %113 : vector<2x64xf32>
    %149 = arith.addf %147, %148 : vector<2x64xf32>
    %150 = vector.extract_strided_slice %149 {offsets = [0, 0], sizes = [2, 32], strides = [1, 1]} : vector<2x64xf32> to vector<2x32xf32>
    %c4 = arith.constant 4 : index
    %c0_76 = arith.constant 0 : index
    %151 = vector.load %arg23[%c4, %c0_76] : memref<16x64xf32, #tpu.memory_space<vmem>>, vector<2x32xf32>
    tpu.vector_store %arg23[%c4, %c0_76], %150 {strides = array<i32>} : memref<16x64xf32, #tpu.memory_space<vmem>>, vector<2x32xf32>,
    %152 = vector.extract_strided_slice %149 {offsets = [0, 32], sizes = [2, 32], strides = [1, 1]} : vector<2x64xf32> to vector<2x32xf32>
    %c10 = arith.constant 10 : index
    %c32_77 = arith.constant 32 : index
    %153 = vector.load %arg23[%c10, %c32_77] : memref<16x64xf32, #tpu.memory_space<vmem>>, vector<2x32xf32>
    tpu.vector_store %arg23[%c10, %c32_77], %152 {strides = array<i32>} : memref<16x64xf32, #tpu.memory_space<vmem>>, vector<2x32xf32>,
    %cst_78 = arith.constant dense<0.000000e+00> : vector<2x64xf32>
    %154 = tpu.matmul %149, %20, %cst_78 {dimension_numbers = #tpu.dot_dimension_numbers<[1], [0], [0], [1], [0, 0, 1, 1], [], []>} : vector<2x64xf32>, vector<64x64xf32>, vector<2x64xf32> -> vector<2x64xf32>
    %155 = vector.broadcast %22 : vector<1x64xf32> to vector<2x64xf32>
    %156 = arith.addf %154, %155 : vector<2x64xf32>
    %cst_79 = arith.constant dense<0.000000e+00> : vector<2x64xf32>
    %157 = tpu.matmul %149, %31, %cst_79 {dimension_numbers = #tpu.dot_dimension_numbers<[1], [0], [0], [1], [0, 0, 1, 1], [], []>} : vector<2x64xf32>, vector<64x64xf32>, vector<2x64xf32> -> vector<2x64xf32>
    %158 = vector.broadcast %33 : vector<1x64xf32> to vector<2x64xf32>
    %159 = arith.addf %157, %158 : vector<2x64xf32>
    %cst_80 = arith.constant dense<0.000000e+00> : vector<2x64xf32>
    %160 = tpu.matmul %149, %42, %cst_80 {dimension_numbers = #tpu.dot_dimension_numbers<[1], [0], [0], [1], [0, 0, 1, 1], [], []>} : vector<2x64xf32>, vector<64x64xf32>, vector<2x64xf32> -> vector<2x64xf32>
    %161 = vector.broadcast %44 : vector<1x64xf32> to vector<2x64xf32>
    %162 = arith.addf %160, %161 : vector<2x64xf32>
    %163 = vector.extract_strided_slice %18 {offsets = [6, 0], sizes = [2, 64], strides = [1, 1]} : vector<16x64xf32> to vector<2x64xf32>
    %164 = arith.addf %163, %156 : vector<2x64xf32>
    %165 = arith.negf %164 : vector<2x64xf32>
    %166 = math.exp %165 : vector<2x64xf32>
    %cst_81 = arith.constant 1.000000e+00 : f32
    %167 = vector.broadcast %cst_81 : f32 to vector<2x64xf32>
    %168 = arith.addf %167, %166 : vector<2x64xf32>
    %169 = arith.divf %167, %168 : vector<2x64xf32>
    %170 = vector.extract_strided_slice %29 {offsets = [6, 0], sizes = [2, 64], strides = [1, 1]} : vector<16x64xf32> to vector<2x64xf32>
    %171 = arith.addf %170, %159 : vector<2x64xf32>
    %172 = arith.negf %171 : vector<2x64xf32>
    %173 = math.exp %172 : vector<2x64xf32>
    %cst_82 = arith.constant 1.000000e+00 : f32
    %174 = vector.broadcast %cst_82 : f32 to vector<2x64xf32>
    %175 = arith.addf %174, %173 : vector<2x64xf32>
    %176 = arith.divf %174, %175 : vector<2x64xf32>
    %177 = vector.extract_strided_slice %40 {offsets = [6, 0], sizes = [2, 64], strides = [1, 1]} : vector<16x64xf32> to vector<2x64xf32>
    %178 = arith.mulf %169, %162 : vector<2x64xf32>
    %179 = arith.addf %177, %178 : vector<2x64xf32>
    %180 = math.tanh %179 : vector<2x64xf32>
    %cst_83 = arith.constant 1.000000e+00 : f32
    %181 = vector.broadcast %cst_83 : f32 to vector<2x64xf32>
    %182 = arith.subf %181, %176 : vector<2x64xf32>
    %183 = arith.mulf %182, %180 : vector<2x64xf32>
    %184 = arith.mulf %176, %149 : vector<2x64xf32>
    %185 = arith.addf %183, %184 : vector<2x64xf32>
    %186 = vector.extract_strided_slice %185 {offsets = [0, 0], sizes = [2, 32], strides = [1, 1]} : vector<2x64xf32> to vector<2x32xf32>
    %c6 = arith.constant 6 : index
    %c0_84 = arith.constant 0 : index
    %187 = vector.load %arg23[%c6, %c0_84] : memref<16x64xf32, #tpu.memory_space<vmem>>, vector<2x32xf32>
    tpu.vector_store %arg23[%c6, %c0_84], %186 {strides = array<i32>} : memref<16x64xf32, #tpu.memory_space<vmem>>, vector<2x32xf32>,
    %188 = vector.extract_strided_slice %185 {offsets = [0, 32], sizes = [2, 32], strides = [1, 1]} : vector<2x64xf32> to vector<2x32xf32>
    %c8 = arith.constant 8 : index
    %c32_85 = arith.constant 32 : index
    %189 = vector.load %arg23[%c8, %c32_85] : memref<16x64xf32, #tpu.memory_space<vmem>>, vector<2x32xf32>
    tpu.vector_store %arg23[%c8, %c32_85], %188 {strides = array<i32>} : memref<16x64xf32, #tpu.memory_space<vmem>>, vector<2x32xf32>,
    %cst_86 = arith.constant dense<0.000000e+00> : vector<2x64xf32>
    %190 = tpu.matmul %185, %20, %cst_86 {dimension_numbers = #tpu.dot_dimension_numbers<[1], [0], [0], [1], [0, 0, 1, 1], [], []>} : vector<2x64xf32>, vector<64x64xf32>, vector<2x64xf32> -> vector<2x64xf32>
    %191 = vector.broadcast %22 : vector<1x64xf32> to vector<2x64xf32>
    %192 = arith.addf %190, %191 : vector<2x64xf32>
    %cst_87 = arith.constant dense<0.000000e+00> : vector<2x64xf32>
    %193 = tpu.matmul %185, %31, %cst_87 {dimension_numbers = #tpu.dot_dimension_numbers<[1], [0], [0], [1], [0, 0, 1, 1], [], []>} : vector<2x64xf32>, vector<64x64xf32>, vector<2x64xf32> -> vector<2x64xf32>
    %194 = vector.broadcast %33 : vector<1x64xf32> to vector<2x64xf32>
    %195 = arith.addf %193, %194 : vector<2x64xf32>
    %cst_88 = arith.constant dense<0.000000e+00> : vector<2x64xf32>
    %196 = tpu.matmul %185, %42, %cst_88 {dimension_numbers = #tpu.dot_dimension_numbers<[1], [0], [0], [1], [0, 0, 1, 1], [], []>} : vector<2x64xf32>, vector<64x64xf32>, vector<2x64xf32> -> vector<2x64xf32>
    %197 = vector.broadcast %44 : vector<1x64xf32> to vector<2x64xf32>
    %198 = arith.addf %196, %197 : vector<2x64xf32>
    %199 = vector.extract_strided_slice %18 {offsets = [8, 0], sizes = [2, 64], strides = [1, 1]} : vector<16x64xf32> to vector<2x64xf32>
    %200 = arith.addf %199, %192 : vector<2x64xf32>
    %201 = arith.negf %200 : vector<2x64xf32>
    %202 = math.exp %201 : vector<2x64xf32>
    %cst_89 = arith.constant 1.000000e+00 : f32
    %203 = vector.broadcast %cst_89 : f32 to vector<2x64xf32>
    %204 = arith.addf %203, %202 : vector<2x64xf32>
    %205 = arith.divf %203, %204 : vector<2x64xf32>
    %206 = vector.extract_strided_slice %29 {offsets = [8, 0], sizes = [2, 64], strides = [1, 1]} : vector<16x64xf32> to vector<2x64xf32>
    %207 = arith.addf %206, %195 : vector<2x64xf32>
    %208 = arith.negf %207 : vector<2x64xf32>
    %209 = math.exp %208 : vector<2x64xf32>
    %cst_90 = arith.constant 1.000000e+00 : f32
    %210 = vector.broadcast %cst_90 : f32 to vector<2x64xf32>
    %211 = arith.addf %210, %209 : vector<2x64xf32>
    %212 = arith.divf %210, %211 : vector<2x64xf32>
    %213 = vector.extract_strided_slice %40 {offsets = [8, 0], sizes = [2, 64], strides = [1, 1]} : vector<16x64xf32> to vector<2x64xf32>
    %214 = arith.mulf %205, %198 : vector<2x64xf32>
    %215 = arith.addf %213, %214 : vector<2x64xf32>
    %216 = math.tanh %215 : vector<2x64xf32>
    %cst_91 = arith.constant 1.000000e+00 : f32
    %217 = vector.broadcast %cst_91 : f32 to vector<2x64xf32>
    %218 = arith.subf %217, %212 : vector<2x64xf32>
    %219 = arith.mulf %218, %216 : vector<2x64xf32>
    %220 = arith.mulf %212, %185 : vector<2x64xf32>
    %221 = arith.addf %219, %220 : vector<2x64xf32>
    %222 = vector.extract_strided_slice %221 {offsets = [0, 0], sizes = [2, 32], strides = [1, 1]} : vector<2x64xf32> to vector<2x32xf32>
    %c8_92 = arith.constant 8 : index
    %c0_93 = arith.constant 0 : index
    %223 = vector.load %arg23[%c8_92, %c0_93] : memref<16x64xf32, #tpu.memory_space<vmem>>, vector<2x32xf32>
    tpu.vector_store %arg23[%c8_92, %c0_93], %222 {strides = array<i32>} : memref<16x64xf32, #tpu.memory_space<vmem>>, vector<2x32xf32>,
    %224 = vector.extract_strided_slice %221 {offsets = [0, 32], sizes = [2, 32], strides = [1, 1]} : vector<2x64xf32> to vector<2x32xf32>
    %c6_94 = arith.constant 6 : index
    %c32_95 = arith.constant 32 : index
    %225 = vector.load %arg23[%c6_94, %c32_95] : memref<16x64xf32, #tpu.memory_space<vmem>>, vector<2x32xf32>
    tpu.vector_store %arg23[%c6_94, %c32_95], %224 {strides = array<i32>} : memref<16x64xf32, #tpu.memory_space<vmem>>, vector<2x32xf32>,
    %cst_96 = arith.constant dense<0.000000e+00> : vector<2x64xf32>
    %226 = tpu.matmul %221, %20, %cst_96 {dimension_numbers = #tpu.dot_dimension_numbers<[1], [0], [0], [1], [0, 0, 1, 1], [], []>} : vector<2x64xf32>, vector<64x64xf32>, vector<2x64xf32> -> vector<2x64xf32>
    %227 = vector.broadcast %22 : vector<1x64xf32> to vector<2x64xf32>
    %228 = arith.addf %226, %227 : vector<2x64xf32>
    %cst_97 = arith.constant dense<0.000000e+00> : vector<2x64xf32>
    %229 = tpu.matmul %221, %31, %cst_97 {dimension_numbers = #tpu.dot_dimension_numbers<[1], [0], [0], [1], [0, 0, 1, 1], [], []>} : vector<2x64xf32>, vector<64x64xf32>, vector<2x64xf32> -> vector<2x64xf32>
    %230 = vector.broadcast %33 : vector<1x64xf32> to vector<2x64xf32>
    %231 = arith.addf %229, %230 : vector<2x64xf32>
    %cst_98 = arith.constant dense<0.000000e+00> : vector<2x64xf32>
    %232 = tpu.matmul %221, %42, %cst_98 {dimension_numbers = #tpu.dot_dimension_numbers<[1], [0], [0], [1], [0, 0, 1, 1], [], []>} : vector<2x64xf32>, vector<64x64xf32>, vector<2x64xf32> -> vector<2x64xf32>
    %233 = vector.broadcast %44 : vector<1x64xf32> to vector<2x64xf32>
    %234 = arith.addf %232, %233 : vector<2x64xf32>
    %235 = vector.extract_strided_slice %18 {offsets = [10, 0], sizes = [2, 64], strides = [1, 1]} : vector<16x64xf32> to vector<2x64xf32>
    %236 = arith.addf %235, %228 : vector<2x64xf32>
    %237 = arith.negf %236 : vector<2x64xf32>
    %238 = math.exp %237 : vector<2x64xf32>
    %cst_99 = arith.constant 1.000000e+00 : f32
    %239 = vector.broadcast %cst_99 : f32 to vector<2x64xf32>
    %240 = arith.addf %239, %238 : vector<2x64xf32>
    %241 = arith.divf %239, %240 : vector<2x64xf32>
    %242 = vector.extract_strided_slice %29 {offsets = [10, 0], sizes = [2, 64], strides = [1, 1]} : vector<16x64xf32> to vector<2x64xf32>
    %243 = arith.addf %242, %231 : vector<2x64xf32>
    %244 = arith.negf %243 : vector<2x64xf32>
    %245 = math.exp %244 : vector<2x64xf32>
    %cst_100 = arith.constant 1.000000e+00 : f32
    %246 = vector.broadcast %cst_100 : f32 to vector<2x64xf32>
    %247 = arith.addf %246, %245 : vector<2x64xf32>
    %248 = arith.divf %246, %247 : vector<2x64xf32>
    %249 = vector.extract_strided_slice %40 {offsets = [10, 0], sizes = [2, 64], strides = [1, 1]} : vector<16x64xf32> to vector<2x64xf32>
    %250 = arith.mulf %241, %234 : vector<2x64xf32>
    %251 = arith.addf %249, %250 : vector<2x64xf32>
    %252 = math.tanh %251 : vector<2x64xf32>
    %cst_101 = arith.constant 1.000000e+00 : f32
    %253 = vector.broadcast %cst_101 : f32 to vector<2x64xf32>
    %254 = arith.subf %253, %248 : vector<2x64xf32>
    %255 = arith.mulf %254, %252 : vector<2x64xf32>
    %256 = arith.mulf %248, %221 : vector<2x64xf32>
    %257 = arith.addf %255, %256 : vector<2x64xf32>
    %258 = vector.extract_strided_slice %257 {offsets = [0, 0], sizes = [2, 32], strides = [1, 1]} : vector<2x64xf32> to vector<2x32xf32>
    %c10_102 = arith.constant 10 : index
    %c0_103 = arith.constant 0 : index
    %259 = vector.load %arg23[%c10_102, %c0_103] : memref<16x64xf32, #tpu.memory_space<vmem>>, vector<2x32xf32>
    tpu.vector_store %arg23[%c10_102, %c0_103], %258 {strides = array<i32>} : memref<16x64xf32, #tpu.memory_space<vmem>>, vector<2x32xf32>,
    %260 = vector.extract_strided_slice %257 {offsets = [0, 32], sizes = [2, 32], strides = [1, 1]} : vector<2x64xf32> to vector<2x32xf32>
    %c4_104 = arith.constant 4 : index
    %c32_105 = arith.constant 32 : index
    %261 = vector.load %arg23[%c4_104, %c32_105] : memref<16x64xf32, #tpu.memory_space<vmem>>, vector<2x32xf32>
    tpu.vector_store %arg23[%c4_104, %c32_105], %260 {strides = array<i32>} : memref<16x64xf32, #tpu.memory_space<vmem>>, vector<2x32xf32>,
    %cst_106 = arith.constant dense<0.000000e+00> : vector<2x64xf32>
    %262 = tpu.matmul %257, %20, %cst_106 {dimension_numbers = #tpu.dot_dimension_numbers<[1], [0], [0], [1], [0, 0, 1, 1], [], []>} : vector<2x64xf32>, vector<64x64xf32>, vector<2x64xf32> -> vector<2x64xf32>
    %263 = vector.broadcast %22 : vector<1x64xf32> to vector<2x64xf32>
    %264 = arith.addf %262, %263 : vector<2x64xf32>
    %cst_107 = arith.constant dense<0.000000e+00> : vector<2x64xf32>
    %265 = tpu.matmul %257, %31, %cst_107 {dimension_numbers = #tpu.dot_dimension_numbers<[1], [0], [0], [1], [0, 0, 1, 1], [], []>} : vector<2x64xf32>, vector<64x64xf32>, vector<2x64xf32> -> vector<2x64xf32>
    %266 = vector.broadcast %33 : vector<1x64xf32> to vector<2x64xf32>
    %267 = arith.addf %265, %266 : vector<2x64xf32>
    %cst_108 = arith.constant dense<0.000000e+00> : vector<2x64xf32>
    %268 = tpu.matmul %257, %42, %cst_108 {dimension_numbers = #tpu.dot_dimension_numbers<[1], [0], [0], [1], [0, 0, 1, 1], [], []>} : vector<2x64xf32>, vector<64x64xf32>, vector<2x64xf32> -> vector<2x64xf32>
    %269 = vector.broadcast %44 : vector<1x64xf32> to vector<2x64xf32>
    %270 = arith.addf %268, %269 : vector<2x64xf32>
    %271 = vector.extract_strided_slice %18 {offsets = [12, 0], sizes = [2, 64], strides = [1, 1]} : vector<16x64xf32> to vector<2x64xf32>
    %272 = arith.addf %271, %264 : vector<2x64xf32>
    %273 = arith.negf %272 : vector<2x64xf32>
    %274 = math.exp %273 : vector<2x64xf32>
    %cst_109 = arith.constant 1.000000e+00 : f32
    %275 = vector.broadcast %cst_109 : f32 to vector<2x64xf32>
    %276 = arith.addf %275, %274 : vector<2x64xf32>
    %277 = arith.divf %275, %276 : vector<2x64xf32>
    %278 = vector.extract_strided_slice %29 {offsets = [12, 0], sizes = [2, 64], strides = [1, 1]} : vector<16x64xf32> to vector<2x64xf32>
    %279 = arith.addf %278, %267 : vector<2x64xf32>
    %280 = arith.negf %279 : vector<2x64xf32>
    %281 = math.exp %280 : vector<2x64xf32>
    %cst_110 = arith.constant 1.000000e+00 : f32
    %282 = vector.broadcast %cst_110 : f32 to vector<2x64xf32>
    %283 = arith.addf %282, %281 : vector<2x64xf32>
    %284 = arith.divf %282, %283 : vector<2x64xf32>
    %285 = vector.extract_strided_slice %40 {offsets = [12, 0], sizes = [2, 64], strides = [1, 1]} : vector<16x64xf32> to vector<2x64xf32>
    %286 = arith.mulf %277, %270 : vector<2x64xf32>
    %287 = arith.addf %285, %286 : vector<2x64xf32>
    %288 = math.tanh %287 : vector<2x64xf32>
    %cst_111 = arith.constant 1.000000e+00 : f32
    %289 = vector.broadcast %cst_111 : f32 to vector<2x64xf32>
    %290 = arith.subf %289, %284 : vector<2x64xf32>
    %291 = arith.mulf %290, %288 : vector<2x64xf32>
    %292 = arith.mulf %284, %257 : vector<2x64xf32>
    %293 = arith.addf %291, %292 : vector<2x64xf32>
    %294 = vector.extract_strided_slice %293 {offsets = [0, 0], sizes = [2, 32], strides = [1, 1]} : vector<2x64xf32> to vector<2x32xf32>
    %c12_112 = arith.constant 12 : index
    %c0_113 = arith.constant 0 : index
    %295 = vector.load %arg23[%c12_112, %c0_113] : memref<16x64xf32, #tpu.memory_space<vmem>>, vector<2x32xf32>
    tpu.vector_store %arg23[%c12_112, %c0_113], %294 {strides = array<i32>} : memref<16x64xf32, #tpu.memory_space<vmem>>, vector<2x32xf32>,
    %296 = vector.extract_strided_slice %293 {offsets = [0, 32], sizes = [2, 32], strides = [1, 1]} : vector<2x64xf32> to vector<2x32xf32>
    %c2_114 = arith.constant 2 : index
    %c32_115 = arith.constant 32 : index
    %297 = vector.load %arg23[%c2_114, %c32_115] : memref<16x64xf32, #tpu.memory_space<vmem>>, vector<2x32xf32>
    tpu.vector_store %arg23[%c2_114, %c32_115], %296 {strides = array<i32>} : memref<16x64xf32, #tpu.memory_space<vmem>>, vector<2x32xf32>,
    %cst_116 = arith.constant dense<0.000000e+00> : vector<2x64xf32>
    %298 = tpu.matmul %293, %20, %cst_116 {dimension_numbers = #tpu.dot_dimension_numbers<[1], [0], [0], [1], [0, 0, 1, 1], [], []>} : vector<2x64xf32>, vector<64x64xf32>, vector<2x64xf32> -> vector<2x64xf32>
    %299 = vector.broadcast %22 : vector<1x64xf32> to vector<2x64xf32>
    %300 = arith.addf %298, %299 : vector<2x64xf32>
    %cst_117 = arith.constant dense<0.000000e+00> : vector<2x64xf32>
    %301 = tpu.matmul %293, %31, %cst_117 {dimension_numbers = #tpu.dot_dimension_numbers<[1], [0], [0], [1], [0, 0, 1, 1], [], []>} : vector<2x64xf32>, vector<64x64xf32>, vector<2x64xf32> -> vector<2x64xf32>
    %302 = vector.broadcast %33 : vector<1x64xf32> to vector<2x64xf32>
    %303 = arith.addf %301, %302 : vector<2x64xf32>
    %cst_118 = arith.constant dense<0.000000e+00> : vector<2x64xf32>
    %304 = tpu.matmul %293, %42, %cst_118 {dimension_numbers = #tpu.dot_dimension_numbers<[1], [0], [0], [1], [0, 0, 1, 1], [], []>} : vector<2x64xf32>, vector<64x64xf32>, vector<2x64xf32> -> vector<2x64xf32>
    %305 = vector.broadcast %44 : vector<1x64xf32> to vector<2x64xf32>
    %306 = arith.addf %304, %305 : vector<2x64xf32>
    %307 = vector.extract_strided_slice %18 {offsets = [14, 0], sizes = [2, 64], strides = [1, 1]} : vector<16x64xf32> to vector<2x64xf32>
    %308 = arith.addf %307, %300 : vector<2x64xf32>
    %309 = arith.negf %308 : vector<2x64xf32>
    %310 = math.exp %309 : vector<2x64xf32>
    %cst_119 = arith.constant 1.000000e+00 : f32
    %311 = vector.broadcast %cst_119 : f32 to vector<2x64xf32>
    %312 = arith.addf %311, %310 : vector<2x64xf32>
    %313 = arith.divf %311, %312 : vector<2x64xf32>
    %314 = vector.extract_strided_slice %29 {offsets = [14, 0], sizes = [2, 64], strides = [1, 1]} : vector<16x64xf32> to vector<2x64xf32>
    %315 = arith.addf %314, %303 : vector<2x64xf32>
    %316 = arith.negf %315 : vector<2x64xf32>
    %317 = math.exp %316 : vector<2x64xf32>
    %cst_120 = arith.constant 1.000000e+00 : f32
    %318 = vector.broadcast %cst_120 : f32 to vector<2x64xf32>
    %319 = arith.addf %318, %317 : vector<2x64xf32>
    %320 = arith.divf %318, %319 : vector<2x64xf32>
    %321 = vector.extract_strided_slice %40 {offsets = [14, 0], sizes = [2, 64], strides = [1, 1]} : vector<16x64xf32> to vector<2x64xf32>
    %322 = arith.mulf %313, %306 : vector<2x64xf32>
    %323 = arith.addf %321, %322 : vector<2x64xf32>
    %324 = math.tanh %323 : vector<2x64xf32>
    %cst_121 = arith.constant 1.000000e+00 : f32
    %325 = vector.broadcast %cst_121 : f32 to vector<2x64xf32>
    %326 = arith.subf %325, %320 : vector<2x64xf32>
    %327 = arith.mulf %326, %324 : vector<2x64xf32>
    %328 = arith.mulf %320, %293 : vector<2x64xf32>
    %329 = arith.addf %327, %328 : vector<2x64xf32>
    %330 = vector.extract_strided_slice %329 {offsets = [0, 0], sizes = [2, 32], strides = [1, 1]} : vector<2x64xf32> to vector<2x32xf32>
    %c14_122 = arith.constant 14 : index
    %c0_123 = arith.constant 0 : index
    %331 = vector.load %arg23[%c14_122, %c0_123] : memref<16x64xf32, #tpu.memory_space<vmem>>, vector<2x32xf32>
    tpu.vector_store %arg23[%c14_122, %c0_123], %330 {strides = array<i32>} : memref<16x64xf32, #tpu.memory_space<vmem>>, vector<2x32xf32>,
    %332 = vector.extract_strided_slice %329 {offsets = [0, 32], sizes = [2, 32], strides = [1, 1]} : vector<2x64xf32> to vector<2x32xf32>
    %c0_124 = arith.constant 0 : index
    %c32_125 = arith.constant 32 : index
    %333 = vector.load %arg23[%c0_124, %c32_125] : memref<16x64xf32, #tpu.memory_space<vmem>>, vector<2x32xf32>
    tpu.vector_store %arg23[%c0_124, %c32_125], %332 {strides = array<i32>} : memref<16x64xf32, #tpu.memory_space<vmem>>, vector<2x32xf32>,
    %334 = vector.extract_strided_slice %329 {offsets = [0, 0], sizes = [2, 32], strides = [1, 1]} : vector<2x64xf32> to vector<2x32xf32>
    %c0_126 = arith.constant 0 : index
    %c0_127 = arith.constant 0 : index
    %c0_128 = arith.constant 0 : index
    %335 = vector.load %arg22[%c0_126, %c0_127, %c0_128] : memref<6x2x32xf32, #tpu.memory_space<vmem>>, vector<1x2x32xf32>
    %336 = vector.shape_cast %335 : vector<1x2x32xf32> to vector<2x32xf32>
    %337 = vector.shape_cast %334 : vector<2x32xf32> to vector<1x2x32xf32>
    tpu.vector_store %arg22[%c0_126, %c0_127, %c0_128], %337 {strides = array<i32>} : memref<6x2x32xf32, #tpu.memory_space<vmem>>, vector<1x2x32xf32>,
    %338 = vector.extract_strided_slice %329 {offsets = [0, 32], sizes = [2, 32], strides = [1, 1]} : vector<2x64xf32> to vector<2x32xf32>
    %c1_129 = arith.constant 1 : index
    %c0_130 = arith.constant 0 : index
    %c0_131 = arith.constant 0 : index
    %339 = vector.load %arg22[%c1_129, %c0_130, %c0_131] : memref<6x2x32xf32, #tpu.memory_space<vmem>>, vector<1x2x32xf32>
    %340 = vector.shape_cast %339 : vector<1x2x32xf32> to vector<2x32xf32>
    %341 = vector.shape_cast %338 : vector<2x32xf32> to vector<1x2x32xf32>
    tpu.vector_store %arg22[%c1_129, %c0_130, %c0_131], %341 {strides = array<i32>} : memref<6x2x32xf32, #tpu.memory_space<vmem>>, vector<1x2x32xf32>,
    %c0_132 = arith.constant 0 : index
    %c0_133 = arith.constant 0 : index
    %342 = vector.load %arg23[%c0_132, %c0_133] : memref<16x64xf32, #tpu.memory_space<vmem>>, vector<16x64xf32>
    %cst_134 = arith.constant dense<0.000000e+00> : vector<16x64xf32>
    %343 = tpu.matmul %7, %342, %cst_134 {dimension_numbers = #tpu.dot_dimension_numbers<[1], [0], [0], [1], [0, 0, 1, 1], [], []>} : vector<16x16xf32>, vector<16x64xf32>, vector<16x64xf32> -> vector<16x64xf32>
    %c0_135 = arith.constant 0 : index
    %c0_136 = arith.constant 0 : index
    %344 = vector.load %arg24[%c0_135, %c0_136] : memref<16x128xf32, #tpu.memory_space<vmem>>, vector<16x64xf32>
    tpu.vector_store %arg24[%c0_135, %c0_136], %342 {strides = array<i32>} : memref<16x128xf32, #tpu.memory_space<vmem>>, vector<16x64xf32>,
    %c0_137 = arith.constant 0 : index
    %c64 = arith.constant 64 : index
    %345 = vector.load %arg24[%c0_137, %c64] : memref<16x128xf32, #tpu.memory_space<vmem>>, vector<16x64xf32>
    tpu.vector_store %arg24[%c0_137, %c64], %343 {strides = array<i32>} : memref<16x128xf32, #tpu.memory_space<vmem>>, vector<16x64xf32>,
    %c0_138 = arith.constant 0 : index
    %c0_139 = arith.constant 0 : index
    %346 = vector.load %arg24[%c0_138, %c0_139] : memref<16x128xf32, #tpu.memory_space<vmem>>, vector<16x128xf32>
    %c0_140 = arith.constant 0 : index
    %c0_141 = arith.constant 0 : index
    %c0_142 = arith.constant 0 : index
    %347 = vector.load %arg7[%c0_140, %c0_141, %c0_142] : memref<6x128x64xf32, #tpu.memory_space<vmem>>, vector<1x128x64xf32>
    %348 = vector.shape_cast %347 : vector<1x128x64xf32> to vector<128x64xf32>
    %cst_143 = arith.constant dense<0.000000e+00> : vector<16x64xf32>
    %349 = tpu.matmul %346, %348, %cst_143 {dimension_numbers = #tpu.dot_dimension_numbers<[1], [0], [0], [1], [0, 0, 1, 1], [], []>} : vector<16x128xf32>, vector<128x64xf32>, vector<16x64xf32> -> vector<16x64xf32>
    %c3 = arith.constant 3 : index
    %c0_144 = arith.constant 0 : index
    %c0_145 = arith.constant 0 : index
    %350 = vector.load %arg9[%c3, %c0_144, %c0_145] : memref<9x1x64xf32, #tpu.memory_space<vmem>>, vector<1x1x64xf32>
    %351 = vector.shape_cast %350 : vector<1x1x64xf32> to vector<1x64xf32>
    %352 = vector.broadcast %351 : vector<1x64xf32> to vector<16x64xf32>
    %353 = arith.addf %349, %352 : vector<16x64xf32>
    %c3_146 = arith.constant 3 : index
    %c0_147 = arith.constant 0 : index
    %c0_148 = arith.constant 0 : index
    %354 = vector.load %arg8[%c3_146, %c0_147, %c0_148] : memref<9x64x64xf32, #tpu.memory_space<vmem>>, vector<1x64x64xf32>
    %355 = vector.shape_cast %354 : vector<1x64x64xf32> to vector<64x64xf32>
    %c3_149 = arith.constant 3 : index
    %c0_150 = arith.constant 0 : index
    %c0_151 = arith.constant 0 : index
    %356 = vector.load %arg10[%c3_149, %c0_150, %c0_151] : memref<9x1x64xf32, #tpu.memory_space<vmem>>, vector<1x1x64xf32>
    %357 = vector.shape_cast %356 : vector<1x1x64xf32> to vector<1x64xf32>
    %c1_152 = arith.constant 1 : index
    %c0_153 = arith.constant 0 : index
    %c0_154 = arith.constant 0 : index
    %358 = vector.load %arg7[%c1_152, %c0_153, %c0_154] : memref<6x128x64xf32, #tpu.memory_space<vmem>>, vector<1x128x64xf32>
    %359 = vector.shape_cast %358 : vector<1x128x64xf32> to vector<128x64xf32>
    %cst_155 = arith.constant dense<0.000000e+00> : vector<16x64xf32>
    %360 = tpu.matmul %346, %359, %cst_155 {dimension_numbers = #tpu.dot_dimension_numbers<[1], [0], [0], [1], [0, 0, 1, 1], [], []>} : vector<16x128xf32>, vector<128x64xf32>, vector<16x64xf32> -> vector<16x64xf32>
    %c4_156 = arith.constant 4 : index
    %c0_157 = arith.constant 0 : index
    %c0_158 = arith.constant 0 : index
    %361 = vector.load %arg9[%c4_156, %c0_157, %c0_158] : memref<9x1x64xf32, #tpu.memory_space<vmem>>, vector<1x1x64xf32>
    %362 = vector.shape_cast %361 : vector<1x1x64xf32> to vector<1x64xf32>
    %363 = vector.broadcast %362 : vector<1x64xf32> to vector<16x64xf32>
    %364 = arith.addf %360, %363 : vector<16x64xf32>
    %c4_159 = arith.constant 4 : index
    %c0_160 = arith.constant 0 : index
    %c0_161 = arith.constant 0 : index
    %365 = vector.load %arg8[%c4_159, %c0_160, %c0_161] : memref<9x64x64xf32, #tpu.memory_space<vmem>>, vector<1x64x64xf32>
    %366 = vector.shape_cast %365 : vector<1x64x64xf32> to vector<64x64xf32>
    %c4_162 = arith.constant 4 : index
    %c0_163 = arith.constant 0 : index
    %c0_164 = arith.constant 0 : index
    %367 = vector.load %arg10[%c4_162, %c0_163, %c0_164] : memref<9x1x64xf32, #tpu.memory_space<vmem>>, vector<1x1x64xf32>
    %368 = vector.shape_cast %367 : vector<1x1x64xf32> to vector<1x64xf32>
    %c2_165 = arith.constant 2 : index
    %c0_166 = arith.constant 0 : index
    %c0_167 = arith.constant 0 : index
    %369 = vector.load %arg7[%c2_165, %c0_166, %c0_167] : memref<6x128x64xf32, #tpu.memory_space<vmem>>, vector<1x128x64xf32>
    %370 = vector.shape_cast %369 : vector<1x128x64xf32> to vector<128x64xf32>
    %cst_168 = arith.constant dense<0.000000e+00> : vector<16x64xf32>
    %371 = tpu.matmul %346, %370, %cst_168 {dimension_numbers = #tpu.dot_dimension_numbers<[1], [0], [0], [1], [0, 0, 1, 1], [], []>} : vector<16x128xf32>, vector<128x64xf32>, vector<16x64xf32> -> vector<16x64xf32>
    %c5 = arith.constant 5 : index
    %c0_169 = arith.constant 0 : index
    %c0_170 = arith.constant 0 : index
    %372 = vector.load %arg9[%c5, %c0_169, %c0_170] : memref<9x1x64xf32, #tpu.memory_space<vmem>>, vector<1x1x64xf32>
    %373 = vector.shape_cast %372 : vector<1x1x64xf32> to vector<1x64xf32>
    %374 = vector.broadcast %373 : vector<1x64xf32> to vector<16x64xf32>
    %375 = arith.addf %371, %374 : vector<16x64xf32>
    %c5_171 = arith.constant 5 : index
    %c0_172 = arith.constant 0 : index
    %c0_173 = arith.constant 0 : index
    %376 = vector.load %arg8[%c5_171, %c0_172, %c0_173] : memref<9x64x64xf32, #tpu.memory_space<vmem>>, vector<1x64x64xf32>
    %377 = vector.shape_cast %376 : vector<1x64x64xf32> to vector<64x64xf32>
    %c5_174 = arith.constant 5 : index
    %c0_175 = arith.constant 0 : index
    %c0_176 = arith.constant 0 : index
    %378 = vector.load %arg10[%c5_174, %c0_175, %c0_176] : memref<9x1x64xf32, #tpu.memory_space<vmem>>, vector<1x1x64xf32>
    %379 = vector.shape_cast %378 : vector<1x1x64xf32> to vector<1x64xf32>
    %cst_177 = arith.constant 0.000000e+00 : f32
    %380 = vector.broadcast %cst_177 : f32 to vector<2x64xf32>
    %cst_178 = arith.constant dense<0.000000e+00> : vector<2x64xf32>
    %381 = tpu.matmul %380, %355, %cst_178 {dimension_numbers = #tpu.dot_dimension_numbers<[1], [0], [0], [1], [0, 0, 1, 1], [], []>} : vector<2x64xf32>, vector<64x64xf32>, vector<2x64xf32> -> vector<2x64xf32>
    %382 = vector.broadcast %357 : vector<1x64xf32> to vector<2x64xf32>
    %383 = arith.addf %381, %382 : vector<2x64xf32>
    %cst_179 = arith.constant dense<0.000000e+00> : vector<2x64xf32>
    %384 = tpu.matmul %380, %366, %cst_179 {dimension_numbers = #tpu.dot_dimension_numbers<[1], [0], [0], [1], [0, 0, 1, 1], [], []>} : vector<2x64xf32>, vector<64x64xf32>, vector<2x64xf32> -> vector<2x64xf32>
    %385 = vector.broadcast %368 : vector<1x64xf32> to vector<2x64xf32>
    %386 = arith.addf %384, %385 : vector<2x64xf32>
    %cst_180 = arith.constant dense<0.000000e+00> : vector<2x64xf32>
    %387 = tpu.matmul %380, %377, %cst_180 {dimension_numbers = #tpu.dot_dimension_numbers<[1], [0], [0], [1], [0, 0, 1, 1], [], []>} : vector<2x64xf32>, vector<64x64xf32>, vector<2x64xf32> -> vector<2x64xf32>
    %388 = vector.broadcast %379 : vector<1x64xf32> to vector<2x64xf32>
    %389 = arith.addf %387, %388 : vector<2x64xf32>
    %390 = vector.extract_strided_slice %353 {offsets = [0, 0], sizes = [2, 64], strides = [1, 1]} : vector<16x64xf32> to vector<2x64xf32>
    %391 = arith.addf %390, %383 : vector<2x64xf32>
    %392 = arith.negf %391 : vector<2x64xf32>
    %393 = math.exp %392 : vector<2x64xf32>
    %cst_181 = arith.constant 1.000000e+00 : f32
    %394 = vector.broadcast %cst_181 : f32 to vector<2x64xf32>
    %395 = arith.addf %394, %393 : vector<2x64xf32>
    %396 = arith.divf %394, %395 : vector<2x64xf32>
    %397 = vector.extract_strided_slice %364 {offsets = [0, 0], sizes = [2, 64], strides = [1, 1]} : vector<16x64xf32> to vector<2x64xf32>
    %398 = arith.addf %397, %386 : vector<2x64xf32>
    %399 = arith.negf %398 : vector<2x64xf32>
    %400 = math.exp %399 : vector<2x64xf32>
    %cst_182 = arith.constant 1.000000e+00 : f32
    %401 = vector.broadcast %cst_182 : f32 to vector<2x64xf32>
    %402 = arith.addf %401, %400 : vector<2x64xf32>
    %403 = arith.divf %401, %402 : vector<2x64xf32>
    %404 = vector.extract_strided_slice %375 {offsets = [0, 0], sizes = [2, 64], strides = [1, 1]} : vector<16x64xf32> to vector<2x64xf32>
    %405 = arith.mulf %396, %389 : vector<2x64xf32>
    %406 = arith.addf %404, %405 : vector<2x64xf32>
    %407 = math.tanh %406 : vector<2x64xf32>
    %cst_183 = arith.constant 1.000000e+00 : f32
    %408 = vector.broadcast %cst_183 : f32 to vector<2x64xf32>
    %409 = arith.subf %408, %403 : vector<2x64xf32>
    %410 = arith.mulf %409, %407 : vector<2x64xf32>
    %411 = arith.mulf %403, %380 : vector<2x64xf32>
    %412 = arith.addf %410, %411 : vector<2x64xf32>
    %413 = vector.extract_strided_slice %412 {offsets = [0, 0], sizes = [2, 32], strides = [1, 1]} : vector<2x64xf32> to vector<2x32xf32>
    %c0_184 = arith.constant 0 : index
    %c0_185 = arith.constant 0 : index
    %414 = vector.load %arg23[%c0_184, %c0_185] : memref<16x64xf32, #tpu.memory_space<vmem>>, vector<2x32xf32>
    tpu.vector_store %arg23[%c0_184, %c0_185], %413 {strides = array<i32>} : memref<16x64xf32, #tpu.memory_space<vmem>>, vector<2x32xf32>,
    %415 = vector.extract_strided_slice %412 {offsets = [0, 32], sizes = [2, 32], strides = [1, 1]} : vector<2x64xf32> to vector<2x32xf32>
    %c14_186 = arith.constant 14 : index
    %c32_187 = arith.constant 32 : index
    %416 = vector.load %arg23[%c14_186, %c32_187] : memref<16x64xf32, #tpu.memory_space<vmem>>, vector<2x32xf32>
    tpu.vector_store %arg23[%c14_186, %c32_187], %415 {strides = array<i32>} : memref<16x64xf32, #tpu.memory_space<vmem>>, vector<2x32xf32>,
    %cst_188 = arith.constant dense<0.000000e+00> : vector<2x64xf32>
    %417 = tpu.matmul %412, %355, %cst_188 {dimension_numbers = #tpu.dot_dimension_numbers<[1], [0], [0], [1], [0, 0, 1, 1], [], []>} : vector<2x64xf32>, vector<64x64xf32>, vector<2x64xf32> -> vector<2x64xf32>
    %418 = vector.broadcast %357 : vector<1x64xf32> to vector<2x64xf32>
    %419 = arith.addf %417, %418 : vector<2x64xf32>
    %cst_189 = arith.constant dense<0.000000e+00> : vector<2x64xf32>
    %420 = tpu.matmul %412, %366, %cst_189 {dimension_numbers = #tpu.dot_dimension_numbers<[1], [0], [0], [1], [0, 0, 1, 1], [], []>} : vector<2x64xf32>, vector<64x64xf32>, vector<2x64xf32> -> vector<2x64xf32>
    %421 = vector.broadcast %368 : vector<1x64xf32> to vector<2x64xf32>
    %422 = arith.addf %420, %421 : vector<2x64xf32>
    %cst_190 = arith.constant dense<0.000000e+00> : vector<2x64xf32>
    %423 = tpu.matmul %412, %377, %cst_190 {dimension_numbers = #tpu.dot_dimension_numbers<[1], [0], [0], [1], [0, 0, 1, 1], [], []>} : vector<2x64xf32>, vector<64x64xf32>, vector<2x64xf32> -> vector<2x64xf32>
    %424 = vector.broadcast %379 : vector<1x64xf32> to vector<2x64xf32>
    %425 = arith.addf %423, %424 : vector<2x64xf32>
    %426 = vector.extract_strided_slice %353 {offsets = [2, 0], sizes = [2, 64], strides = [1, 1]} : vector<16x64xf32> to vector<2x64xf32>
    %427 = arith.addf %426, %419 : vector<2x64xf32>
    %428 = arith.negf %427 : vector<2x64xf32>
    %429 = math.exp %428 : vector<2x64xf32>
    %cst_191 = arith.constant 1.000000e+00 : f32
    %430 = vector.broadcast %cst_191 : f32 to vector<2x64xf32>
    %431 = arith.addf %430, %429 : vector<2x64xf32>
    %432 = arith.divf %430, %431 : vector<2x64xf32>
    %433 = vector.extract_strided_slice %364 {offsets = [2, 0], sizes = [2, 64], strides = [1, 1]} : vector<16x64xf32> to vector<2x64xf32>
    %434 = arith.addf %433, %422 : vector<2x64xf32>
    %435 = arith.negf %434 : vector<2x64xf32>
    %436 = math.exp %435 : vector<2x64xf32>
    %cst_192 = arith.constant 1.000000e+00 : f32
    %437 = vector.broadcast %cst_192 : f32 to vector<2x64xf32>
    %438 = arith.addf %437, %436 : vector<2x64xf32>
    %439 = arith.divf %437, %438 : vector<2x64xf32>
    %440 = vector.extract_strided_slice %375 {offsets = [2, 0], sizes = [2, 64], strides = [1, 1]} : vector<16x64xf32> to vector<2x64xf32>
    %441 = arith.mulf %432, %425 : vector<2x64xf32>
    %442 = arith.addf %440, %441 : vector<2x64xf32>
    %443 = math.tanh %442 : vector<2x64xf32>
    %cst_193 = arith.constant 1.000000e+00 : f32
    %444 = vector.broadcast %cst_193 : f32 to vector<2x64xf32>
    %445 = arith.subf %444, %439 : vector<2x64xf32>
    %446 = arith.mulf %445, %443 : vector<2x64xf32>
    %447 = arith.mulf %439, %412 : vector<2x64xf32>
    %448 = arith.addf %446, %447 : vector<2x64xf32>
    %449 = vector.extract_strided_slice %448 {offsets = [0, 0], sizes = [2, 32], strides = [1, 1]} : vector<2x64xf32> to vector<2x32xf32>
    %c2_194 = arith.constant 2 : index
    %c0_195 = arith.constant 0 : index
    %450 = vector.load %arg23[%c2_194, %c0_195] : memref<16x64xf32, #tpu.memory_space<vmem>>, vector<2x32xf32>
    tpu.vector_store %arg23[%c2_194, %c0_195], %449 {strides = array<i32>} : memref<16x64xf32, #tpu.memory_space<vmem>>, vector<2x32xf32>,
    %451 = vector.extract_strided_slice %448 {offsets = [0, 32], sizes = [2, 32], strides = [1, 1]} : vector<2x64xf32> to vector<2x32xf32>
    %c12_196 = arith.constant 12 : index
    %c32_197 = arith.constant 32 : index
    %452 = vector.load %arg23[%c12_196, %c32_197] : memref<16x64xf32, #tpu.memory_space<vmem>>, vector<2x32xf32>
    tpu.vector_store %arg23[%c12_196, %c32_197], %451 {strides = array<i32>} : memref<16x64xf32, #tpu.memory_space<vmem>>, vector<2x32xf32>,
    %cst_198 = arith.constant dense<0.000000e+00> : vector<2x64xf32>
    %453 = tpu.matmul %448, %355, %cst_198 {dimension_numbers = #tpu.dot_dimension_numbers<[1], [0], [0], [1], [0, 0, 1, 1], [], []>} : vector<2x64xf32>, vector<64x64xf32>, vector<2x64xf32> -> vector<2x64xf32>
    %454 = vector.broadcast %357 : vector<1x64xf32> to vector<2x64xf32>
    %455 = arith.addf %453, %454 : vector<2x64xf32>
    %cst_199 = arith.constant dense<0.000000e+00> : vector<2x64xf32>
    %456 = tpu.matmul %448, %366, %cst_199 {dimension_numbers = #tpu.dot_dimension_numbers<[1], [0], [0], [1], [0, 0, 1, 1], [], []>} : vector<2x64xf32>, vector<64x64xf32>, vector<2x64xf32> -> vector<2x64xf32>
    %457 = vector.broadcast %368 : vector<1x64xf32> to vector<2x64xf32>
    %458 = arith.addf %456, %457 : vector<2x64xf32>
    %cst_200 = arith.constant dense<0.000000e+00> : vector<2x64xf32>
    %459 = tpu.matmul %448, %377, %cst_200 {dimension_numbers = #tpu.dot_dimension_numbers<[1], [0], [0], [1], [0, 0, 1, 1], [], []>} : vector<2x64xf32>, vector<64x64xf32>, vector<2x64xf32> -> vector<2x64xf32>
    %460 = vector.broadcast %379 : vector<1x64xf32> to vector<2x64xf32>
    %461 = arith.addf %459, %460 : vector<2x64xf32>
    %462 = vector.extract_strided_slice %353 {offsets = [4, 0], sizes = [2, 64], strides = [1, 1]} : vector<16x64xf32> to vector<2x64xf32>
    %463 = arith.addf %462, %455 : vector<2x64xf32>
    %464 = arith.negf %463 : vector<2x64xf32>
    %465 = math.exp %464 : vector<2x64xf32>
    %cst_201 = arith.constant 1.000000e+00 : f32
    %466 = vector.broadcast %cst_201 : f32 to vector<2x64xf32>
    %467 = arith.addf %466, %465 : vector<2x64xf32>
    %468 = arith.divf %466, %467 : vector<2x64xf32>
    %469 = vector.extract_strided_slice %364 {offsets = [4, 0], sizes = [2, 64], strides = [1, 1]} : vector<16x64xf32> to vector<2x64xf32>
    %470 = arith.addf %469, %458 : vector<2x64xf32>
    %471 = arith.negf %470 : vector<2x64xf32>
    %472 = math.exp %471 : vector<2x64xf32>
    %cst_202 = arith.constant 1.000000e+00 : f32
    %473 = vector.broadcast %cst_202 : f32 to vector<2x64xf32>
    %474 = arith.addf %473, %472 : vector<2x64xf32>
    %475 = arith.divf %473, %474 : vector<2x64xf32>
    %476 = vector.extract_strided_slice %375 {offsets = [4, 0], sizes = [2, 64], strides = [1, 1]} : vector<16x64xf32> to vector<2x64xf32>
    %477 = arith.mulf %468, %461 : vector<2x64xf32>
    %478 = arith.addf %476, %477 : vector<2x64xf32>
    %479 = math.tanh %478 : vector<2x64xf32>
    %cst_203 = arith.constant 1.000000e+00 : f32
    %480 = vector.broadcast %cst_203 : f32 to vector<2x64xf32>
    %481 = arith.subf %480, %475 : vector<2x64xf32>
    %482 = arith.mulf %481, %479 : vector<2x64xf32>
    %483 = arith.mulf %475, %448 : vector<2x64xf32>
    %484 = arith.addf %482, %483 : vector<2x64xf32>
    %485 = vector.extract_strided_slice %484 {offsets = [0, 0], sizes = [2, 32], strides = [1, 1]} : vector<2x64xf32> to vector<2x32xf32>
    %c4_204 = arith.constant 4 : index
    %c0_205 = arith.constant 0 : index
    %486 = vector.load %arg23[%c4_204, %c0_205] : memref<16x64xf32, #tpu.memory_space<vmem>>, vector<2x32xf32>
    tpu.vector_store %arg23[%c4_204, %c0_205], %485 {strides = array<i32>} : memref<16x64xf32, #tpu.memory_space<vmem>>, vector<2x32xf32>,
    %487 = vector.extract_strided_slice %484 {offsets = [0, 32], sizes = [2, 32], strides = [1, 1]} : vector<2x64xf32> to vector<2x32xf32>
    %c10_206 = arith.constant 10 : index
    %c32_207 = arith.constant 32 : index
    %488 = vector.load %arg23[%c10_206, %c32_207] : memref<16x64xf32, #tpu.memory_space<vmem>>, vector<2x32xf32>
    tpu.vector_store %arg23[%c10_206, %c32_207], %487 {strides = array<i32>} : memref<16x64xf32, #tpu.memory_space<vmem>>, vector<2x32xf32>,
    %cst_208 = arith.constant dense<0.000000e+00> : vector<2x64xf32>
    %489 = tpu.matmul %484, %355, %cst_208 {dimension_numbers = #tpu.dot_dimension_numbers<[1], [0], [0], [1], [0, 0, 1, 1], [], []>} : vector<2x64xf32>, vector<64x64xf32>, vector<2x64xf32> -> vector<2x64xf32>
    %490 = vector.broadcast %357 : vector<1x64xf32> to vector<2x64xf32>
    %491 = arith.addf %489, %490 : vector<2x64xf32>
    %cst_209 = arith.constant dense<0.000000e+00> : vector<2x64xf32>
    %492 = tpu.matmul %484, %366, %cst_209 {dimension_numbers = #tpu.dot_dimension_numbers<[1], [0], [0], [1], [0, 0, 1, 1], [], []>} : vector<2x64xf32>, vector<64x64xf32>, vector<2x64xf32> -> vector<2x64xf32>
    %493 = vector.broadcast %368 : vector<1x64xf32> to vector<2x64xf32>
    %494 = arith.addf %492, %493 : vector<2x64xf32>
    %cst_210 = arith.constant dense<0.000000e+00> : vector<2x64xf32>
    %495 = tpu.matmul %484, %377, %cst_210 {dimension_numbers = #tpu.dot_dimension_numbers<[1], [0], [0], [1], [0, 0, 1, 1], [], []>} : vector<2x64xf32>, vector<64x64xf32>, vector<2x64xf32> -> vector<2x64xf32>
    %496 = vector.broadcast %379 : vector<1x64xf32> to vector<2x64xf32>
    %497 = arith.addf %495, %496 : vector<2x64xf32>
    %498 = vector.extract_strided_slice %353 {offsets = [6, 0], sizes = [2, 64], strides = [1, 1]} : vector<16x64xf32> to vector<2x64xf32>
    %499 = arith.addf %498, %491 : vector<2x64xf32>
    %500 = arith.negf %499 : vector<2x64xf32>
    %501 = math.exp %500 : vector<2x64xf32>
    %cst_211 = arith.constant 1.000000e+00 : f32
    %502 = vector.broadcast %cst_211 : f32 to vector<2x64xf32>
    %503 = arith.addf %502, %501 : vector<2x64xf32>
    %504 = arith.divf %502, %503 : vector<2x64xf32>
    %505 = vector.extract_strided_slice %364 {offsets = [6, 0], sizes = [2, 64], strides = [1, 1]} : vector<16x64xf32> to vector<2x64xf32>
    %506 = arith.addf %505, %494 : vector<2x64xf32>
    %507 = arith.negf %506 : vector<2x64xf32>
    %508 = math.exp %507 : vector<2x64xf32>
    %cst_212 = arith.constant 1.000000e+00 : f32
    %509 = vector.broadcast %cst_212 : f32 to vector<2x64xf32>
    %510 = arith.addf %509, %508 : vector<2x64xf32>
    %511 = arith.divf %509, %510 : vector<2x64xf32>
    %512 = vector.extract_strided_slice %375 {offsets = [6, 0], sizes = [2, 64], strides = [1, 1]} : vector<16x64xf32> to vector<2x64xf32>
    %513 = arith.mulf %504, %497 : vector<2x64xf32>
    %514 = arith.addf %512, %513 : vector<2x64xf32>
    %515 = math.tanh %514 : vector<2x64xf32>
    %cst_213 = arith.constant 1.000000e+00 : f32
    %516 = vector.broadcast %cst_213 : f32 to vector<2x64xf32>
    %517 = arith.subf %516, %511 : vector<2x64xf32>
    %518 = arith.mulf %517, %515 : vector<2x64xf32>
    %519 = arith.mulf %511, %484 : vector<2x64xf32>
    %520 = arith.addf %518, %519 : vector<2x64xf32>
    %521 = vector.extract_strided_slice %520 {offsets = [0, 0], sizes = [2, 32], strides = [1, 1]} : vector<2x64xf32> to vector<2x32xf32>
    %c6_214 = arith.constant 6 : index
    %c0_215 = arith.constant 0 : index
    %522 = vector.load %arg23[%c6_214, %c0_215] : memref<16x64xf32, #tpu.memory_space<vmem>>, vector<2x32xf32>
    tpu.vector_store %arg23[%c6_214, %c0_215], %521 {strides = array<i32>} : memref<16x64xf32, #tpu.memory_space<vmem>>, vector<2x32xf32>,
    %523 = vector.extract_strided_slice %520 {offsets = [0, 32], sizes = [2, 32], strides = [1, 1]} : vector<2x64xf32> to vector<2x32xf32>
    %c8_216 = arith.constant 8 : index
    %c32_217 = arith.constant 32 : index
    %524 = vector.load %arg23[%c8_216, %c32_217] : memref<16x64xf32, #tpu.memory_space<vmem>>, vector<2x32xf32>
    tpu.vector_store %arg23[%c8_216, %c32_217], %523 {strides = array<i32>} : memref<16x64xf32, #tpu.memory_space<vmem>>, vector<2x32xf32>,
    %cst_218 = arith.constant dense<0.000000e+00> : vector<2x64xf32>
    %525 = tpu.matmul %520, %355, %cst_218 {dimension_numbers = #tpu.dot_dimension_numbers<[1], [0], [0], [1], [0, 0, 1, 1], [], []>} : vector<2x64xf32>, vector<64x64xf32>, vector<2x64xf32> -> vector<2x64xf32>
    %526 = vector.broadcast %357 : vector<1x64xf32> to vector<2x64xf32>
    %527 = arith.addf %525, %526 : vector<2x64xf32>
    %cst_219 = arith.constant dense<0.000000e+00> : vector<2x64xf32>
    %528 = tpu.matmul %520, %366, %cst_219 {dimension_numbers = #tpu.dot_dimension_numbers<[1], [0], [0], [1], [0, 0, 1, 1], [], []>} : vector<2x64xf32>, vector<64x64xf32>, vector<2x64xf32> -> vector<2x64xf32>
    %529 = vector.broadcast %368 : vector<1x64xf32> to vector<2x64xf32>
    %530 = arith.addf %528, %529 : vector<2x64xf32>
    %cst_220 = arith.constant dense<0.000000e+00> : vector<2x64xf32>
    %531 = tpu.matmul %520, %377, %cst_220 {dimension_numbers = #tpu.dot_dimension_numbers<[1], [0], [0], [1], [0, 0, 1, 1], [], []>} : vector<2x64xf32>, vector<64x64xf32>, vector<2x64xf32> -> vector<2x64xf32>
    %532 = vector.broadcast %379 : vector<1x64xf32> to vector<2x64xf32>
    %533 = arith.addf %531, %532 : vector<2x64xf32>
    %534 = vector.extract_strided_slice %353 {offsets = [8, 0], sizes = [2, 64], strides = [1, 1]} : vector<16x64xf32> to vector<2x64xf32>
    %535 = arith.addf %534, %527 : vector<2x64xf32>
    %536 = arith.negf %535 : vector<2x64xf32>
    %537 = math.exp %536 : vector<2x64xf32>
    %cst_221 = arith.constant 1.000000e+00 : f32
    %538 = vector.broadcast %cst_221 : f32 to vector<2x64xf32>
    %539 = arith.addf %538, %537 : vector<2x64xf32>
    %540 = arith.divf %538, %539 : vector<2x64xf32>
    %541 = vector.extract_strided_slice %364 {offsets = [8, 0], sizes = [2, 64], strides = [1, 1]} : vector<16x64xf32> to vector<2x64xf32>
    %542 = arith.addf %541, %530 : vector<2x64xf32>
    %543 = arith.negf %542 : vector<2x64xf32>
    %544 = math.exp %543 : vector<2x64xf32>
    %cst_222 = arith.constant 1.000000e+00 : f32
    %545 = vector.broadcast %cst_222 : f32 to vector<2x64xf32>
    %546 = arith.addf %545, %544 : vector<2x64xf32>
    %547 = arith.divf %545, %546 : vector<2x64xf32>
    %548 = vector.extract_strided_slice %375 {offsets = [8, 0], sizes = [2, 64], strides = [1, 1]} : vector<16x64xf32> to vector<2x64xf32>
    %549 = arith.mulf %540, %533 : vector<2x64xf32>
    %550 = arith.addf %548, %549 : vector<2x64xf32>
    %551 = math.tanh %550 : vector<2x64xf32>
    %cst_223 = arith.constant 1.000000e+00 : f32
    %552 = vector.broadcast %cst_223 : f32 to vector<2x64xf32>
    %553 = arith.subf %552, %547 : vector<2x64xf32>
    %554 = arith.mulf %553, %551 : vector<2x64xf32>
    %555 = arith.mulf %547, %520 : vector<2x64xf32>
    %556 = arith.addf %554, %555 : vector<2x64xf32>
    %557 = vector.extract_strided_slice %556 {offsets = [0, 0], sizes = [2, 32], strides = [1, 1]} : vector<2x64xf32> to vector<2x32xf32>
    %c8_224 = arith.constant 8 : index
    %c0_225 = arith.constant 0 : index
    %558 = vector.load %arg23[%c8_224, %c0_225] : memref<16x64xf32, #tpu.memory_space<vmem>>, vector<2x32xf32>
    tpu.vector_store %arg23[%c8_224, %c0_225], %557 {strides = array<i32>} : memref<16x64xf32, #tpu.memory_space<vmem>>, vector<2x32xf32>,
    %559 = vector.extract_strided_slice %556 {offsets = [0, 32], sizes = [2, 32], strides = [1, 1]} : vector<2x64xf32> to vector<2x32xf32>
    %c6_226 = arith.constant 6 : index
    %c32_227 = arith.constant 32 : index
    %560 = vector.load %arg23[%c6_226, %c32_227] : memref<16x64xf32, #tpu.memory_space<vmem>>, vector<2x32xf32>
    tpu.vector_store %arg23[%c6_226, %c32_227], %559 {strides = array<i32>} : memref<16x64xf32, #tpu.memory_space<vmem>>, vector<2x32xf32>,
    %cst_228 = arith.constant dense<0.000000e+00> : vector<2x64xf32>
    %561 = tpu.matmul %556, %355, %cst_228 {dimension_numbers = #tpu.dot_dimension_numbers<[1], [0], [0], [1], [0, 0, 1, 1], [], []>} : vector<2x64xf32>, vector<64x64xf32>, vector<2x64xf32> -> vector<2x64xf32>
    %562 = vector.broadcast %357 : vector<1x64xf32> to vector<2x64xf32>
    %563 = arith.addf %561, %562 : vector<2x64xf32>
    %cst_229 = arith.constant dense<0.000000e+00> : vector<2x64xf32>
    %564 = tpu.matmul %556, %366, %cst_229 {dimension_numbers = #tpu.dot_dimension_numbers<[1], [0], [0], [1], [0, 0, 1, 1], [], []>} : vector<2x64xf32>, vector<64x64xf32>, vector<2x64xf32> -> vector<2x64xf32>
    %565 = vector.broadcast %368 : vector<1x64xf32> to vector<2x64xf32>
    %566 = arith.addf %564, %565 : vector<2x64xf32>
    %cst_230 = arith.constant dense<0.000000e+00> : vector<2x64xf32>
    %567 = tpu.matmul %556, %377, %cst_230 {dimension_numbers = #tpu.dot_dimension_numbers<[1], [0], [0], [1], [0, 0, 1, 1], [], []>} : vector<2x64xf32>, vector<64x64xf32>, vector<2x64xf32> -> vector<2x64xf32>
    %568 = vector.broadcast %379 : vector<1x64xf32> to vector<2x64xf32>
    %569 = arith.addf %567, %568 : vector<2x64xf32>
    %570 = vector.extract_strided_slice %353 {offsets = [10, 0], sizes = [2, 64], strides = [1, 1]} : vector<16x64xf32> to vector<2x64xf32>
    %571 = arith.addf %570, %563 : vector<2x64xf32>
    %572 = arith.negf %571 : vector<2x64xf32>
    %573 = math.exp %572 : vector<2x64xf32>
    %cst_231 = arith.constant 1.000000e+00 : f32
    %574 = vector.broadcast %cst_231 : f32 to vector<2x64xf32>
    %575 = arith.addf %574, %573 : vector<2x64xf32>
    %576 = arith.divf %574, %575 : vector<2x64xf32>
    %577 = vector.extract_strided_slice %364 {offsets = [10, 0], sizes = [2, 64], strides = [1, 1]} : vector<16x64xf32> to vector<2x64xf32>
    %578 = arith.addf %577, %566 : vector<2x64xf32>
    %579 = arith.negf %578 : vector<2x64xf32>
    %580 = math.exp %579 : vector<2x64xf32>
    %cst_232 = arith.constant 1.000000e+00 : f32
    %581 = vector.broadcast %cst_232 : f32 to vector<2x64xf32>
    %582 = arith.addf %581, %580 : vector<2x64xf32>
    %583 = arith.divf %581, %582 : vector<2x64xf32>
    %584 = vector.extract_strided_slice %375 {offsets = [10, 0], sizes = [2, 64], strides = [1, 1]} : vector<16x64xf32> to vector<2x64xf32>
    %585 = arith.mulf %576, %569 : vector<2x64xf32>
    %586 = arith.addf %584, %585 : vector<2x64xf32>
    %587 = math.tanh %586 : vector<2x64xf32>
    %cst_233 = arith.constant 1.000000e+00 : f32
    %588 = vector.broadcast %cst_233 : f32 to vector<2x64xf32>
    %589 = arith.subf %588, %583 : vector<2x64xf32>
    %590 = arith.mulf %589, %587 : vector<2x64xf32>
    %591 = arith.mulf %583, %556 : vector<2x64xf32>
    %592 = arith.addf %590, %591 : vector<2x64xf32>
    %593 = vector.extract_strided_slice %592 {offsets = [0, 0], sizes = [2, 32], strides = [1, 1]} : vector<2x64xf32> to vector<2x32xf32>
    %c10_234 = arith.constant 10 : index
    %c0_235 = arith.constant 0 : index
    %594 = vector.load %arg23[%c10_234, %c0_235] : memref<16x64xf32, #tpu.memory_space<vmem>>, vector<2x32xf32>
    tpu.vector_store %arg23[%c10_234, %c0_235], %593 {strides = array<i32>} : memref<16x64xf32, #tpu.memory_space<vmem>>, vector<2x32xf32>,
    %595 = vector.extract_strided_slice %592 {offsets = [0, 32], sizes = [2, 32], strides = [1, 1]} : vector<2x64xf32> to vector<2x32xf32>
    %c4_236 = arith.constant 4 : index
    %c32_237 = arith.constant 32 : index
    %596 = vector.load %arg23[%c4_236, %c32_237] : memref<16x64xf32, #tpu.memory_space<vmem>>, vector<2x32xf32>
    tpu.vector_store %arg23[%c4_236, %c32_237], %595 {strides = array<i32>} : memref<16x64xf32, #tpu.memory_space<vmem>>, vector<2x32xf32>,
    %cst_238 = arith.constant dense<0.000000e+00> : vector<2x64xf32>
    %597 = tpu.matmul %592, %355, %cst_238 {dimension_numbers = #tpu.dot_dimension_numbers<[1], [0], [0], [1], [0, 0, 1, 1], [], []>} : vector<2x64xf32>, vector<64x64xf32>, vector<2x64xf32> -> vector<2x64xf32>
    %598 = vector.broadcast %357 : vector<1x64xf32> to vector<2x64xf32>
    %599 = arith.addf %597, %598 : vector<2x64xf32>
    %cst_239 = arith.constant dense<0.000000e+00> : vector<2x64xf32>
    %600 = tpu.matmul %592, %366, %cst_239 {dimension_numbers = #tpu.dot_dimension_numbers<[1], [0], [0], [1], [0, 0, 1, 1], [], []>} : vector<2x64xf32>, vector<64x64xf32>, vector<2x64xf32> -> vector<2x64xf32>
    %601 = vector.broadcast %368 : vector<1x64xf32> to vector<2x64xf32>
    %602 = arith.addf %600, %601 : vector<2x64xf32>
    %cst_240 = arith.constant dense<0.000000e+00> : vector<2x64xf32>
    %603 = tpu.matmul %592, %377, %cst_240 {dimension_numbers = #tpu.dot_dimension_numbers<[1], [0], [0], [1], [0, 0, 1, 1], [], []>} : vector<2x64xf32>, vector<64x64xf32>, vector<2x64xf32> -> vector<2x64xf32>
    %604 = vector.broadcast %379 : vector<1x64xf32> to vector<2x64xf32>
    %605 = arith.addf %603, %604 : vector<2x64xf32>
    %606 = vector.extract_strided_slice %353 {offsets = [12, 0], sizes = [2, 64], strides = [1, 1]} : vector<16x64xf32> to vector<2x64xf32>
    %607 = arith.addf %606, %599 : vector<2x64xf32>
    %608 = arith.negf %607 : vector<2x64xf32>
    %609 = math.exp %608 : vector<2x64xf32>
    %cst_241 = arith.constant 1.000000e+00 : f32
    %610 = vector.broadcast %cst_241 : f32 to vector<2x64xf32>
    %611 = arith.addf %610, %609 : vector<2x64xf32>
    %612 = arith.divf %610, %611 : vector<2x64xf32>
    %613 = vector.extract_strided_slice %364 {offsets = [12, 0], sizes = [2, 64], strides = [1, 1]} : vector<16x64xf32> to vector<2x64xf32>
    %614 = arith.addf %613, %602 : vector<2x64xf32>
    %615 = arith.negf %614 : vector<2x64xf32>
    %616 = math.exp %615 : vector<2x64xf32>
    %cst_242 = arith.constant 1.000000e+00 : f32
    %617 = vector.broadcast %cst_242 : f32 to vector<2x64xf32>
    %618 = arith.addf %617, %616 : vector<2x64xf32>
    %619 = arith.divf %617, %618 : vector<2x64xf32>
    %620 = vector.extract_strided_slice %375 {offsets = [12, 0], sizes = [2, 64], strides = [1, 1]} : vector<16x64xf32> to vector<2x64xf32>
    %621 = arith.mulf %612, %605 : vector<2x64xf32>
    %622 = arith.addf %620, %621 : vector<2x64xf32>
    %623 = math.tanh %622 : vector<2x64xf32>
    %cst_243 = arith.constant 1.000000e+00 : f32
    %624 = vector.broadcast %cst_243 : f32 to vector<2x64xf32>
    %625 = arith.subf %624, %619 : vector<2x64xf32>
    %626 = arith.mulf %625, %623 : vector<2x64xf32>
    %627 = arith.mulf %619, %592 : vector<2x64xf32>
    %628 = arith.addf %626, %627 : vector<2x64xf32>
    %629 = vector.extract_strided_slice %628 {offsets = [0, 0], sizes = [2, 32], strides = [1, 1]} : vector<2x64xf32> to vector<2x32xf32>
    %c12_244 = arith.constant 12 : index
    %c0_245 = arith.constant 0 : index
    %630 = vector.load %arg23[%c12_244, %c0_245] : memref<16x64xf32, #tpu.memory_space<vmem>>, vector<2x32xf32>
    tpu.vector_store %arg23[%c12_244, %c0_245], %629 {strides = array<i32>} : memref<16x64xf32, #tpu.memory_space<vmem>>, vector<2x32xf32>,
    %631 = vector.extract_strided_slice %628 {offsets = [0, 32], sizes = [2, 32], strides = [1, 1]} : vector<2x64xf32> to vector<2x32xf32>
    %c2_246 = arith.constant 2 : index
    %c32_247 = arith.constant 32 : index
    %632 = vector.load %arg23[%c2_246, %c32_247] : memref<16x64xf32, #tpu.memory_space<vmem>>, vector<2x32xf32>
    tpu.vector_store %arg23[%c2_246, %c32_247], %631 {strides = array<i32>} : memref<16x64xf32, #tpu.memory_space<vmem>>, vector<2x32xf32>,
    %cst_248 = arith.constant dense<0.000000e+00> : vector<2x64xf32>
    %633 = tpu.matmul %628, %355, %cst_248 {dimension_numbers = #tpu.dot_dimension_numbers<[1], [0], [0], [1], [0, 0, 1, 1], [], []>} : vector<2x64xf32>, vector<64x64xf32>, vector<2x64xf32> -> vector<2x64xf32>
    %634 = vector.broadcast %357 : vector<1x64xf32> to vector<2x64xf32>
    %635 = arith.addf %633, %634 : vector<2x64xf32>
    %cst_249 = arith.constant dense<0.000000e+00> : vector<2x64xf32>
    %636 = tpu.matmul %628, %366, %cst_249 {dimension_numbers = #tpu.dot_dimension_numbers<[1], [0], [0], [1], [0, 0, 1, 1], [], []>} : vector<2x64xf32>, vector<64x64xf32>, vector<2x64xf32> -> vector<2x64xf32>
    %637 = vector.broadcast %368 : vector<1x64xf32> to vector<2x64xf32>
    %638 = arith.addf %636, %637 : vector<2x64xf32>
    %cst_250 = arith.constant dense<0.000000e+00> : vector<2x64xf32>
    %639 = tpu.matmul %628, %377, %cst_250 {dimension_numbers = #tpu.dot_dimension_numbers<[1], [0], [0], [1], [0, 0, 1, 1], [], []>} : vector<2x64xf32>, vector<64x64xf32>, vector<2x64xf32> -> vector<2x64xf32>
    %640 = vector.broadcast %379 : vector<1x64xf32> to vector<2x64xf32>
    %641 = arith.addf %639, %640 : vector<2x64xf32>
    %642 = vector.extract_strided_slice %353 {offsets = [14, 0], sizes = [2, 64], strides = [1, 1]} : vector<16x64xf32> to vector<2x64xf32>
    %643 = arith.addf %642, %635 : vector<2x64xf32>
    %644 = arith.negf %643 : vector<2x64xf32>
    %645 = math.exp %644 : vector<2x64xf32>
    %cst_251 = arith.constant 1.000000e+00 : f32
    %646 = vector.broadcast %cst_251 : f32 to vector<2x64xf32>
    %647 = arith.addf %646, %645 : vector<2x64xf32>
    %648 = arith.divf %646, %647 : vector<2x64xf32>
    %649 = vector.extract_strided_slice %364 {offsets = [14, 0], sizes = [2, 64], strides = [1, 1]} : vector<16x64xf32> to vector<2x64xf32>
    %650 = arith.addf %649, %638 : vector<2x64xf32>
    %651 = arith.negf %650 : vector<2x64xf32>
    %652 = math.exp %651 : vector<2x64xf32>
    %cst_252 = arith.constant 1.000000e+00 : f32
    %653 = vector.broadcast %cst_252 : f32 to vector<2x64xf32>
    %654 = arith.addf %653, %652 : vector<2x64xf32>
    %655 = arith.divf %653, %654 : vector<2x64xf32>
    %656 = vector.extract_strided_slice %375 {offsets = [14, 0], sizes = [2, 64], strides = [1, 1]} : vector<16x64xf32> to vector<2x64xf32>
    %657 = arith.mulf %648, %641 : vector<2x64xf32>
    %658 = arith.addf %656, %657 : vector<2x64xf32>
    %659 = math.tanh %658 : vector<2x64xf32>
    %cst_253 = arith.constant 1.000000e+00 : f32
    %660 = vector.broadcast %cst_253 : f32 to vector<2x64xf32>
    %661 = arith.subf %660, %655 : vector<2x64xf32>
    %662 = arith.mulf %661, %659 : vector<2x64xf32>
    %663 = arith.mulf %655, %628 : vector<2x64xf32>
    %664 = arith.addf %662, %663 : vector<2x64xf32>
    %665 = vector.extract_strided_slice %664 {offsets = [0, 0], sizes = [2, 32], strides = [1, 1]} : vector<2x64xf32> to vector<2x32xf32>
    %c14_254 = arith.constant 14 : index
    %c0_255 = arith.constant 0 : index
    %666 = vector.load %arg23[%c14_254, %c0_255] : memref<16x64xf32, #tpu.memory_space<vmem>>, vector<2x32xf32>
    tpu.vector_store %arg23[%c14_254, %c0_255], %665 {strides = array<i32>} : memref<16x64xf32, #tpu.memory_space<vmem>>, vector<2x32xf32>,
    %667 = vector.extract_strided_slice %664 {offsets = [0, 32], sizes = [2, 32], strides = [1, 1]} : vector<2x64xf32> to vector<2x32xf32>
    %c0_256 = arith.constant 0 : index
    %c32_257 = arith.constant 32 : index
    %668 = vector.load %arg23[%c0_256, %c32_257] : memref<16x64xf32, #tpu.memory_space<vmem>>, vector<2x32xf32>
    tpu.vector_store %arg23[%c0_256, %c32_257], %667 {strides = array<i32>} : memref<16x64xf32, #tpu.memory_space<vmem>>, vector<2x32xf32>,
    %669 = vector.extract_strided_slice %664 {offsets = [0, 0], sizes = [2, 32], strides = [1, 1]} : vector<2x64xf32> to vector<2x32xf32>
    %c2_258 = arith.constant 2 : index
    %c0_259 = arith.constant 0 : index
    %c0_260 = arith.constant 0 : index
    %670 = vector.load %arg22[%c2_258, %c0_259, %c0_260] : memref<6x2x32xf32, #tpu.memory_space<vmem>>, vector<1x2x32xf32>
    %671 = vector.shape_cast %670 : vector<1x2x32xf32> to vector<2x32xf32>
    %672 = vector.shape_cast %669 : vector<2x32xf32> to vector<1x2x32xf32>
    tpu.vector_store %arg22[%c2_258, %c0_259, %c0_260], %672 {strides = array<i32>} : memref<6x2x32xf32, #tpu.memory_space<vmem>>, vector<1x2x32xf32>,
    %673 = vector.extract_strided_slice %664 {offsets = [0, 32], sizes = [2, 32], strides = [1, 1]} : vector<2x64xf32> to vector<2x32xf32>
    %c3_261 = arith.constant 3 : index
    %c0_262 = arith.constant 0 : index
    %c0_263 = arith.constant 0 : index
    %674 = vector.load %arg22[%c3_261, %c0_262, %c0_263] : memref<6x2x32xf32, #tpu.memory_space<vmem>>, vector<1x2x32xf32>
    %675 = vector.shape_cast %674 : vector<1x2x32xf32> to vector<2x32xf32>
    %676 = vector.shape_cast %673 : vector<2x32xf32> to vector<1x2x32xf32>
    tpu.vector_store %arg22[%c3_261, %c0_262, %c0_263], %676 {strides = array<i32>} : memref<6x2x32xf32, #tpu.memory_space<vmem>>, vector<1x2x32xf32>,
    %c0_264 = arith.constant 0 : index
    %c0_265 = arith.constant 0 : index
    %677 = vector.load %arg23[%c0_264, %c0_265] : memref<16x64xf32, #tpu.memory_space<vmem>>, vector<16x64xf32>
    %cst_266 = arith.constant dense<0.000000e+00> : vector<16x64xf32>
    %678 = tpu.matmul %7, %677, %cst_266 {dimension_numbers = #tpu.dot_dimension_numbers<[1], [0], [0], [1], [0, 0, 1, 1], [], []>} : vector<16x16xf32>, vector<16x64xf32>, vector<16x64xf32> -> vector<16x64xf32>
    %c0_267 = arith.constant 0 : index
    %c0_268 = arith.constant 0 : index
    %679 = vector.load %arg24[%c0_267, %c0_268] : memref<16x128xf32, #tpu.memory_space<vmem>>, vector<16x64xf32>
    tpu.vector_store %arg24[%c0_267, %c0_268], %677 {strides = array<i32>} : memref<16x128xf32, #tpu.memory_space<vmem>>, vector<16x64xf32>,
    %c0_269 = arith.constant 0 : index
    %c64_270 = arith.constant 64 : index
    %680 = vector.load %arg24[%c0_269, %c64_270] : memref<16x128xf32, #tpu.memory_space<vmem>>, vector<16x64xf32>
    tpu.vector_store %arg24[%c0_269, %c64_270], %678 {strides = array<i32>} : memref<16x128xf32, #tpu.memory_space<vmem>>, vector<16x64xf32>,
    %c0_271 = arith.constant 0 : index
    %c0_272 = arith.constant 0 : index
    %681 = vector.load %arg24[%c0_271, %c0_272] : memref<16x128xf32, #tpu.memory_space<vmem>>, vector<16x128xf32>
    %c3_273 = arith.constant 3 : index
    %c0_274 = arith.constant 0 : index
    %c0_275 = arith.constant 0 : index
    %682 = vector.load %arg7[%c3_273, %c0_274, %c0_275] : memref<6x128x64xf32, #tpu.memory_space<vmem>>, vector<1x128x64xf32>
    %683 = vector.shape_cast %682 : vector<1x128x64xf32> to vector<128x64xf32>
    %cst_276 = arith.constant dense<0.000000e+00> : vector<16x64xf32>
    %684 = tpu.matmul %681, %683, %cst_276 {dimension_numbers = #tpu.dot_dimension_numbers<[1], [0], [0], [1], [0, 0, 1, 1], [], []>} : vector<16x128xf32>, vector<128x64xf32>, vector<16x64xf32> -> vector<16x64xf32>
    %c6_277 = arith.constant 6 : index
    %c0_278 = arith.constant 0 : index
    %c0_279 = arith.constant 0 : index
    %685 = vector.load %arg9[%c6_277, %c0_278, %c0_279] : memref<9x1x64xf32, #tpu.memory_space<vmem>>, vector<1x1x64xf32>
    %686 = vector.shape_cast %685 : vector<1x1x64xf32> to vector<1x64xf32>
    %687 = vector.broadcast %686 : vector<1x64xf32> to vector<16x64xf32>
    %688 = arith.addf %684, %687 : vector<16x64xf32>
    %c6_280 = arith.constant 6 : index
    %c0_281 = arith.constant 0 : index
    %c0_282 = arith.constant 0 : index
    %689 = vector.load %arg8[%c6_280, %c0_281, %c0_282] : memref<9x64x64xf32, #tpu.memory_space<vmem>>, vector<1x64x64xf32>
    %690 = vector.shape_cast %689 : vector<1x64x64xf32> to vector<64x64xf32>
    %c6_283 = arith.constant 6 : index
    %c0_284 = arith.constant 0 : index
    %c0_285 = arith.constant 0 : index
    %691 = vector.load %arg10[%c6_283, %c0_284, %c0_285] : memref<9x1x64xf32, #tpu.memory_space<vmem>>, vector<1x1x64xf32>
    %692 = vector.shape_cast %691 : vector<1x1x64xf32> to vector<1x64xf32>
    %c4_286 = arith.constant 4 : index
    %c0_287 = arith.constant 0 : index
    %c0_288 = arith.constant 0 : index
    %693 = vector.load %arg7[%c4_286, %c0_287, %c0_288] : memref<6x128x64xf32, #tpu.memory_space<vmem>>, vector<1x128x64xf32>
    %694 = vector.shape_cast %693 : vector<1x128x64xf32> to vector<128x64xf32>
    %cst_289 = arith.constant dense<0.000000e+00> : vector<16x64xf32>
    %695 = tpu.matmul %681, %694, %cst_289 {dimension_numbers = #tpu.dot_dimension_numbers<[1], [0], [0], [1], [0, 0, 1, 1], [], []>} : vector<16x128xf32>, vector<128x64xf32>, vector<16x64xf32> -> vector<16x64xf32>
    %c7 = arith.constant 7 : index
    %c0_290 = arith.constant 0 : index
    %c0_291 = arith.constant 0 : index
    %696 = vector.load %arg9[%c7, %c0_290, %c0_291] : memref<9x1x64xf32, #tpu.memory_space<vmem>>, vector<1x1x64xf32>
    %697 = vector.shape_cast %696 : vector<1x1x64xf32> to vector<1x64xf32>
    %698 = vector.broadcast %697 : vector<1x64xf32> to vector<16x64xf32>
    %699 = arith.addf %695, %698 : vector<16x64xf32>
    %c7_292 = arith.constant 7 : index
    %c0_293 = arith.constant 0 : index
    %c0_294 = arith.constant 0 : index
    %700 = vector.load %arg8[%c7_292, %c0_293, %c0_294] : memref<9x64x64xf32, #tpu.memory_space<vmem>>, vector<1x64x64xf32>
    %701 = vector.shape_cast %700 : vector<1x64x64xf32> to vector<64x64xf32>
    %c7_295 = arith.constant 7 : index
    %c0_296 = arith.constant 0 : index
    %c0_297 = arith.constant 0 : index
    %702 = vector.load %arg10[%c7_295, %c0_296, %c0_297] : memref<9x1x64xf32, #tpu.memory_space<vmem>>, vector<1x1x64xf32>
    %703 = vector.shape_cast %702 : vector<1x1x64xf32> to vector<1x64xf32>
    %c5_298 = arith.constant 5 : index
    %c0_299 = arith.constant 0 : index
    %c0_300 = arith.constant 0 : index
    %704 = vector.load %arg7[%c5_298, %c0_299, %c0_300] : memref<6x128x64xf32, #tpu.memory_space<vmem>>, vector<1x128x64xf32>
    %705 = vector.shape_cast %704 : vector<1x128x64xf32> to vector<128x64xf32>
    %cst_301 = arith.constant dense<0.000000e+00> : vector<16x64xf32>
    %706 = tpu.matmul %681, %705, %cst_301 {dimension_numbers = #tpu.dot_dimension_numbers<[1], [0], [0], [1], [0, 0, 1, 1], [], []>} : vector<16x128xf32>, vector<128x64xf32>, vector<16x64xf32> -> vector<16x64xf32>
    %c8_302 = arith.constant 8 : index
    %c0_303 = arith.constant 0 : index
    %c0_304 = arith.constant 0 : index
    %707 = vector.load %arg9[%c8_302, %c0_303, %c0_304] : memref<9x1x64xf32, #tpu.memory_space<vmem>>, vector<1x1x64xf32>
    %708 = vector.shape_cast %707 : vector<1x1x64xf32> to vector<1x64xf32>
    %709 = vector.broadcast %708 : vector<1x64xf32> to vector<16x64xf32>
    %710 = arith.addf %706, %709 : vector<16x64xf32>
    %c8_305 = arith.constant 8 : index
    %c0_306 = arith.constant 0 : index
    %c0_307 = arith.constant 0 : index
    %711 = vector.load %arg8[%c8_305, %c0_306, %c0_307] : memref<9x64x64xf32, #tpu.memory_space<vmem>>, vector<1x64x64xf32>
    %712 = vector.shape_cast %711 : vector<1x64x64xf32> to vector<64x64xf32>
    %c8_308 = arith.constant 8 : index
    %c0_309 = arith.constant 0 : index
    %c0_310 = arith.constant 0 : index
    %713 = vector.load %arg10[%c8_308, %c0_309, %c0_310] : memref<9x1x64xf32, #tpu.memory_space<vmem>>, vector<1x1x64xf32>
    %714 = vector.shape_cast %713 : vector<1x1x64xf32> to vector<1x64xf32>
    %cst_311 = arith.constant 0.000000e+00 : f32
    %715 = vector.broadcast %cst_311 : f32 to vector<2x64xf32>
    %cst_312 = arith.constant dense<0.000000e+00> : vector<2x64xf32>
    %716 = tpu.matmul %715, %690, %cst_312 {dimension_numbers = #tpu.dot_dimension_numbers<[1], [0], [0], [1], [0, 0, 1, 1], [], []>} : vector<2x64xf32>, vector<64x64xf32>, vector<2x64xf32> -> vector<2x64xf32>
    %717 = vector.broadcast %692 : vector<1x64xf32> to vector<2x64xf32>
    %718 = arith.addf %716, %717 : vector<2x64xf32>
    %cst_313 = arith.constant dense<0.000000e+00> : vector<2x64xf32>
    %719 = tpu.matmul %715, %701, %cst_313 {dimension_numbers = #tpu.dot_dimension_numbers<[1], [0], [0], [1], [0, 0, 1, 1], [], []>} : vector<2x64xf32>, vector<64x64xf32>, vector<2x64xf32> -> vector<2x64xf32>
    %720 = vector.broadcast %703 : vector<1x64xf32> to vector<2x64xf32>
    %721 = arith.addf %719, %720 : vector<2x64xf32>
    %cst_314 = arith.constant dense<0.000000e+00> : vector<2x64xf32>
    %722 = tpu.matmul %715, %712, %cst_314 {dimension_numbers = #tpu.dot_dimension_numbers<[1], [0], [0], [1], [0, 0, 1, 1], [], []>} : vector<2x64xf32>, vector<64x64xf32>, vector<2x64xf32> -> vector<2x64xf32>
    %723 = vector.broadcast %714 : vector<1x64xf32> to vector<2x64xf32>
    %724 = arith.addf %722, %723 : vector<2x64xf32>
    %725 = vector.extract_strided_slice %688 {offsets = [0, 0], sizes = [2, 64], strides = [1, 1]} : vector<16x64xf32> to vector<2x64xf32>
    %726 = arith.addf %725, %718 : vector<2x64xf32>
    %727 = arith.negf %726 : vector<2x64xf32>
    %728 = math.exp %727 : vector<2x64xf32>
    %cst_315 = arith.constant 1.000000e+00 : f32
    %729 = vector.broadcast %cst_315 : f32 to vector<2x64xf32>
    %730 = arith.addf %729, %728 : vector<2x64xf32>
    %731 = arith.divf %729, %730 : vector<2x64xf32>
    %732 = vector.extract_strided_slice %699 {offsets = [0, 0], sizes = [2, 64], strides = [1, 1]} : vector<16x64xf32> to vector<2x64xf32>
    %733 = arith.addf %732, %721 : vector<2x64xf32>
    %734 = arith.negf %733 : vector<2x64xf32>
    %735 = math.exp %734 : vector<2x64xf32>
    %cst_316 = arith.constant 1.000000e+00 : f32
    %736 = vector.broadcast %cst_316 : f32 to vector<2x64xf32>
    %737 = arith.addf %736, %735 : vector<2x64xf32>
    %738 = arith.divf %736, %737 : vector<2x64xf32>
    %739 = vector.extract_strided_slice %710 {offsets = [0, 0], sizes = [2, 64], strides = [1, 1]} : vector<16x64xf32> to vector<2x64xf32>
    %740 = arith.mulf %731, %724 : vector<2x64xf32>
    %741 = arith.addf %739, %740 : vector<2x64xf32>
    %742 = math.tanh %741 : vector<2x64xf32>
    %cst_317 = arith.constant 1.000000e+00 : f32
    %743 = vector.broadcast %cst_317 : f32 to vector<2x64xf32>
    %744 = arith.subf %743, %738 : vector<2x64xf32>
    %745 = arith.mulf %744, %742 : vector<2x64xf32>
    %746 = arith.mulf %738, %715 : vector<2x64xf32>
    %747 = arith.addf %745, %746 : vector<2x64xf32>
    %748 = vector.extract_strided_slice %747 {offsets = [0, 0], sizes = [2, 32], strides = [1, 1]} : vector<2x64xf32> to vector<2x32xf32>
    %c0_318 = arith.constant 0 : index
    %c0_319 = arith.constant 0 : index
    %749 = vector.load %arg23[%c0_318, %c0_319] : memref<16x64xf32, #tpu.memory_space<vmem>>, vector<2x32xf32>
    tpu.vector_store %arg23[%c0_318, %c0_319], %748 {strides = array<i32>} : memref<16x64xf32, #tpu.memory_space<vmem>>, vector<2x32xf32>,
    %750 = vector.extract_strided_slice %747 {offsets = [0, 32], sizes = [2, 32], strides = [1, 1]} : vector<2x64xf32> to vector<2x32xf32>
    %c14_320 = arith.constant 14 : index
    %c32_321 = arith.constant 32 : index
    %751 = vector.load %arg23[%c14_320, %c32_321] : memref<16x64xf32, #tpu.memory_space<vmem>>, vector<2x32xf32>
    tpu.vector_store %arg23[%c14_320, %c32_321], %750 {strides = array<i32>} : memref<16x64xf32, #tpu.memory_space<vmem>>, vector<2x32xf32>,
    %cst_322 = arith.constant dense<0.000000e+00> : vector<2x64xf32>
    %752 = tpu.matmul %747, %690, %cst_322 {dimension_numbers = #tpu.dot_dimension_numbers<[1], [0], [0], [1], [0, 0, 1, 1], [], []>} : vector<2x64xf32>, vector<64x64xf32>, vector<2x64xf32> -> vector<2x64xf32>
    %753 = vector.broadcast %692 : vector<1x64xf32> to vector<2x64xf32>
    %754 = arith.addf %752, %753 : vector<2x64xf32>
    %cst_323 = arith.constant dense<0.000000e+00> : vector<2x64xf32>
    %755 = tpu.matmul %747, %701, %cst_323 {dimension_numbers = #tpu.dot_dimension_numbers<[1], [0], [0], [1], [0, 0, 1, 1], [], []>} : vector<2x64xf32>, vector<64x64xf32>, vector<2x64xf32> -> vector<2x64xf32>
    %756 = vector.broadcast %703 : vector<1x64xf32> to vector<2x64xf32>
    %757 = arith.addf %755, %756 : vector<2x64xf32>
    %cst_324 = arith.constant dense<0.000000e+00> : vector<2x64xf32>
    %758 = tpu.matmul %747, %712, %cst_324 {dimension_numbers = #tpu.dot_dimension_numbers<[1], [0], [0], [1], [0, 0, 1, 1], [], []>} : vector<2x64xf32>, vector<64x64xf32>, vector<2x64xf32> -> vector<2x64xf32>
    %759 = vector.broadcast %714 : vector<1x64xf32> to vector<2x64xf32>
    %760 = arith.addf %758, %759 : vector<2x64xf32>
    %761 = vector.extract_strided_slice %688 {offsets = [2, 0], sizes = [2, 64], strides = [1, 1]} : vector<16x64xf32> to vector<2x64xf32>
    %762 = arith.addf %761, %754 : vector<2x64xf32>
    %763 = arith.negf %762 : vector<2x64xf32>
    %764 = math.exp %763 : vector<2x64xf32>
    %cst_325 = arith.constant 1.000000e+00 : f32
    %765 = vector.broadcast %cst_325 : f32 to vector<2x64xf32>
    %766 = arith.addf %765, %764 : vector<2x64xf32>
    %767 = arith.divf %765, %766 : vector<2x64xf32>
    %768 = vector.extract_strided_slice %699 {offsets = [2, 0], sizes = [2, 64], strides = [1, 1]} : vector<16x64xf32> to vector<2x64xf32>
    %769 = arith.addf %768, %757 : vector<2x64xf32>
    %770 = arith.negf %769 : vector<2x64xf32>
    %771 = math.exp %770 : vector<2x64xf32>
    %cst_326 = arith.constant 1.000000e+00 : f32
    %772 = vector.broadcast %cst_326 : f32 to vector<2x64xf32>
    %773 = arith.addf %772, %771 : vector<2x64xf32>
    %774 = arith.divf %772, %773 : vector<2x64xf32>
    %775 = vector.extract_strided_slice %710 {offsets = [2, 0], sizes = [2, 64], strides = [1, 1]} : vector<16x64xf32> to vector<2x64xf32>
    %776 = arith.mulf %767, %760 : vector<2x64xf32>
    %777 = arith.addf %775, %776 : vector<2x64xf32>
    %778 = math.tanh %777 : vector<2x64xf32>
    %cst_327 = arith.constant 1.000000e+00 : f32
    %779 = vector.broadcast %cst_327 : f32 to vector<2x64xf32>
    %780 = arith.subf %779, %774 : vector<2x64xf32>
    %781 = arith.mulf %780, %778 : vector<2x64xf32>
    %782 = arith.mulf %774, %747 : vector<2x64xf32>
    %783 = arith.addf %781, %782 : vector<2x64xf32>
    %784 = vector.extract_strided_slice %783 {offsets = [0, 0], sizes = [2, 32], strides = [1, 1]} : vector<2x64xf32> to vector<2x32xf32>
    %c2_328 = arith.constant 2 : index
    %c0_329 = arith.constant 0 : index
    %785 = vector.load %arg23[%c2_328, %c0_329] : memref<16x64xf32, #tpu.memory_space<vmem>>, vector<2x32xf32>
    tpu.vector_store %arg23[%c2_328, %c0_329], %784 {strides = array<i32>} : memref<16x64xf32, #tpu.memory_space<vmem>>, vector<2x32xf32>,
    %786 = vector.extract_strided_slice %783 {offsets = [0, 32], sizes = [2, 32], strides = [1, 1]} : vector<2x64xf32> to vector<2x32xf32>
    %c12_330 = arith.constant 12 : index
    %c32_331 = arith.constant 32 : index
    %787 = vector.load %arg23[%c12_330, %c32_331] : memref<16x64xf32, #tpu.memory_space<vmem>>, vector<2x32xf32>
    tpu.vector_store %arg23[%c12_330, %c32_331], %786 {strides = array<i32>} : memref<16x64xf32, #tpu.memory_space<vmem>>, vector<2x32xf32>,
    %cst_332 = arith.constant dense<0.000000e+00> : vector<2x64xf32>
    %788 = tpu.matmul %783, %690, %cst_332 {dimension_numbers = #tpu.dot_dimension_numbers<[1], [0], [0], [1], [0, 0, 1, 1], [], []>} : vector<2x64xf32>, vector<64x64xf32>, vector<2x64xf32> -> vector<2x64xf32>
    %789 = vector.broadcast %692 : vector<1x64xf32> to vector<2x64xf32>
    %790 = arith.addf %788, %789 : vector<2x64xf32>
    %cst_333 = arith.constant dense<0.000000e+00> : vector<2x64xf32>
    %791 = tpu.matmul %783, %701, %cst_333 {dimension_numbers = #tpu.dot_dimension_numbers<[1], [0], [0], [1], [0, 0, 1, 1], [], []>} : vector<2x64xf32>, vector<64x64xf32>, vector<2x64xf32> -> vector<2x64xf32>
    %792 = vector.broadcast %703 : vector<1x64xf32> to vector<2x64xf32>
    %793 = arith.addf %791, %792 : vector<2x64xf32>
    %cst_334 = arith.constant dense<0.000000e+00> : vector<2x64xf32>
    %794 = tpu.matmul %783, %712, %cst_334 {dimension_numbers = #tpu.dot_dimension_numbers<[1], [0], [0], [1], [0, 0, 1, 1], [], []>} : vector<2x64xf32>, vector<64x64xf32>, vector<2x64xf32> -> vector<2x64xf32>
    %795 = vector.broadcast %714 : vector<1x64xf32> to vector<2x64xf32>
    %796 = arith.addf %794, %795 : vector<2x64xf32>
    %797 = vector.extract_strided_slice %688 {offsets = [4, 0], sizes = [2, 64], strides = [1, 1]} : vector<16x64xf32> to vector<2x64xf32>
    %798 = arith.addf %797, %790 : vector<2x64xf32>
    %799 = arith.negf %798 : vector<2x64xf32>
    %800 = math.exp %799 : vector<2x64xf32>
    %cst_335 = arith.constant 1.000000e+00 : f32
    %801 = vector.broadcast %cst_335 : f32 to vector<2x64xf32>
    %802 = arith.addf %801, %800 : vector<2x64xf32>
    %803 = arith.divf %801, %802 : vector<2x64xf32>
    %804 = vector.extract_strided_slice %699 {offsets = [4, 0], sizes = [2, 64], strides = [1, 1]} : vector<16x64xf32> to vector<2x64xf32>
    %805 = arith.addf %804, %793 : vector<2x64xf32>
    %806 = arith.negf %805 : vector<2x64xf32>
    %807 = math.exp %806 : vector<2x64xf32>
    %cst_336 = arith.constant 1.000000e+00 : f32
    %808 = vector.broadcast %cst_336 : f32 to vector<2x64xf32>
    %809 = arith.addf %808, %807 : vector<2x64xf32>
    %810 = arith.divf %808, %809 : vector<2x64xf32>
    %811 = vector.extract_strided_slice %710 {offsets = [4, 0], sizes = [2, 64], strides = [1, 1]} : vector<16x64xf32> to vector<2x64xf32>
    %812 = arith.mulf %803, %796 : vector<2x64xf32>
    %813 = arith.addf %811, %812 : vector<2x64xf32>
    %814 = math.tanh %813 : vector<2x64xf32>
    %cst_337 = arith.constant 1.000000e+00 : f32
    %815 = vector.broadcast %cst_337 : f32 to vector<2x64xf32>
    %816 = arith.subf %815, %810 : vector<2x64xf32>
    %817 = arith.mulf %816, %814 : vector<2x64xf32>
    %818 = arith.mulf %810, %783 : vector<2x64xf32>
    %819 = arith.addf %817, %818 : vector<2x64xf32>
    %820 = vector.extract_strided_slice %819 {offsets = [0, 0], sizes = [2, 32], strides = [1, 1]} : vector<2x64xf32> to vector<2x32xf32>
    %c4_338 = arith.constant 4 : index
    %c0_339 = arith.constant 0 : index
    %821 = vector.load %arg23[%c4_338, %c0_339] : memref<16x64xf32, #tpu.memory_space<vmem>>, vector<2x32xf32>
    tpu.vector_store %arg23[%c4_338, %c0_339], %820 {strides = array<i32>} : memref<16x64xf32, #tpu.memory_space<vmem>>, vector<2x32xf32>,
    %822 = vector.extract_strided_slice %819 {offsets = [0, 32], sizes = [2, 32], strides = [1, 1]} : vector<2x64xf32> to vector<2x32xf32>
    %c10_340 = arith.constant 10 : index
    %c32_341 = arith.constant 32 : index
    %823 = vector.load %arg23[%c10_340, %c32_341] : memref<16x64xf32, #tpu.memory_space<vmem>>, vector<2x32xf32>
    tpu.vector_store %arg23[%c10_340, %c32_341], %822 {strides = array<i32>} : memref<16x64xf32, #tpu.memory_space<vmem>>, vector<2x32xf32>,
    %cst_342 = arith.constant dense<0.000000e+00> : vector<2x64xf32>
    %824 = tpu.matmul %819, %690, %cst_342 {dimension_numbers = #tpu.dot_dimension_numbers<[1], [0], [0], [1], [0, 0, 1, 1], [], []>} : vector<2x64xf32>, vector<64x64xf32>, vector<2x64xf32> -> vector<2x64xf32>
    %825 = vector.broadcast %692 : vector<1x64xf32> to vector<2x64xf32>
    %826 = arith.addf %824, %825 : vector<2x64xf32>
    %cst_343 = arith.constant dense<0.000000e+00> : vector<2x64xf32>
    %827 = tpu.matmul %819, %701, %cst_343 {dimension_numbers = #tpu.dot_dimension_numbers<[1], [0], [0], [1], [0, 0, 1, 1], [], []>} : vector<2x64xf32>, vector<64x64xf32>, vector<2x64xf32> -> vector<2x64xf32>
    %828 = vector.broadcast %703 : vector<1x64xf32> to vector<2x64xf32>
    %829 = arith.addf %827, %828 : vector<2x64xf32>
    %cst_344 = arith.constant dense<0.000000e+00> : vector<2x64xf32>
    %830 = tpu.matmul %819, %712, %cst_344 {dimension_numbers = #tpu.dot_dimension_numbers<[1], [0], [0], [1], [0, 0, 1, 1], [], []>} : vector<2x64xf32>, vector<64x64xf32>, vector<2x64xf32> -> vector<2x64xf32>
    %831 = vector.broadcast %714 : vector<1x64xf32> to vector<2x64xf32>
    %832 = arith.addf %830, %831 : vector<2x64xf32>
    %833 = vector.extract_strided_slice %688 {offsets = [6, 0], sizes = [2, 64], strides = [1, 1]} : vector<16x64xf32> to vector<2x64xf32>
    %834 = arith.addf %833, %826 : vector<2x64xf32>
    %835 = arith.negf %834 : vector<2x64xf32>
    %836 = math.exp %835 : vector<2x64xf32>
    %cst_345 = arith.constant 1.000000e+00 : f32
    %837 = vector.broadcast %cst_345 : f32 to vector<2x64xf32>
    %838 = arith.addf %837, %836 : vector<2x64xf32>
    %839 = arith.divf %837, %838 : vector<2x64xf32>
    %840 = vector.extract_strided_slice %699 {offsets = [6, 0], sizes = [2, 64], strides = [1, 1]} : vector<16x64xf32> to vector<2x64xf32>
    %841 = arith.addf %840, %829 : vector<2x64xf32>
    %842 = arith.negf %841 : vector<2x64xf32>
    %843 = math.exp %842 : vector<2x64xf32>
    %cst_346 = arith.constant 1.000000e+00 : f32
    %844 = vector.broadcast %cst_346 : f32 to vector<2x64xf32>
    %845 = arith.addf %844, %843 : vector<2x64xf32>
    %846 = arith.divf %844, %845 : vector<2x64xf32>
    %847 = vector.extract_strided_slice %710 {offsets = [6, 0], sizes = [2, 64], strides = [1, 1]} : vector<16x64xf32> to vector<2x64xf32>
    %848 = arith.mulf %839, %832 : vector<2x64xf32>
    %849 = arith.addf %847, %848 : vector<2x64xf32>
    %850 = math.tanh %849 : vector<2x64xf32>
    %cst_347 = arith.constant 1.000000e+00 : f32
    %851 = vector.broadcast %cst_347 : f32 to vector<2x64xf32>
    %852 = arith.subf %851, %846 : vector<2x64xf32>
    %853 = arith.mulf %852, %850 : vector<2x64xf32>
    %854 = arith.mulf %846, %819 : vector<2x64xf32>
    %855 = arith.addf %853, %854 : vector<2x64xf32>
    %856 = vector.extract_strided_slice %855 {offsets = [0, 0], sizes = [2, 32], strides = [1, 1]} : vector<2x64xf32> to vector<2x32xf32>
    %c6_348 = arith.constant 6 : index
    %c0_349 = arith.constant 0 : index
    %857 = vector.load %arg23[%c6_348, %c0_349] : memref<16x64xf32, #tpu.memory_space<vmem>>, vector<2x32xf32>
    tpu.vector_store %arg23[%c6_348, %c0_349], %856 {strides = array<i32>} : memref<16x64xf32, #tpu.memory_space<vmem>>, vector<2x32xf32>,
    %858 = vector.extract_strided_slice %855 {offsets = [0, 32], sizes = [2, 32], strides = [1, 1]} : vector<2x64xf32> to vector<2x32xf32>
    %c8_350 = arith.constant 8 : index
    %c32_351 = arith.constant 32 : index
    %859 = vector.load %arg23[%c8_350, %c32_351] : memref<16x64xf32, #tpu.memory_space<vmem>>, vector<2x32xf32>
    tpu.vector_store %arg23[%c8_350, %c32_351], %858 {strides = array<i32>} : memref<16x64xf32, #tpu.memory_space<vmem>>, vector<2x32xf32>,
    %cst_352 = arith.constant dense<0.000000e+00> : vector<2x64xf32>
    %860 = tpu.matmul %855, %690, %cst_352 {dimension_numbers = #tpu.dot_dimension_numbers<[1], [0], [0], [1], [0, 0, 1, 1], [], []>} : vector<2x64xf32>, vector<64x64xf32>, vector<2x64xf32> -> vector<2x64xf32>
    %861 = vector.broadcast %692 : vector<1x64xf32> to vector<2x64xf32>
    %862 = arith.addf %860, %861 : vector<2x64xf32>
    %cst_353 = arith.constant dense<0.000000e+00> : vector<2x64xf32>
    %863 = tpu.matmul %855, %701, %cst_353 {dimension_numbers = #tpu.dot_dimension_numbers<[1], [0], [0], [1], [0, 0, 1, 1], [], []>} : vector<2x64xf32>, vector<64x64xf32>, vector<2x64xf32> -> vector<2x64xf32>
    %864 = vector.broadcast %703 : vector<1x64xf32> to vector<2x64xf32>
    %865 = arith.addf %863, %864 : vector<2x64xf32>
    %cst_354 = arith.constant dense<0.000000e+00> : vector<2x64xf32>
    %866 = tpu.matmul %855, %712, %cst_354 {dimension_numbers = #tpu.dot_dimension_numbers<[1], [0], [0], [1], [0, 0, 1, 1], [], []>} : vector<2x64xf32>, vector<64x64xf32>, vector<2x64xf32> -> vector<2x64xf32>
    %867 = vector.broadcast %714 : vector<1x64xf32> to vector<2x64xf32>
    %868 = arith.addf %866, %867 : vector<2x64xf32>
    %869 = vector.extract_strided_slice %688 {offsets = [8, 0], sizes = [2, 64], strides = [1, 1]} : vector<16x64xf32> to vector<2x64xf32>
    %870 = arith.addf %869, %862 : vector<2x64xf32>
    %871 = arith.negf %870 : vector<2x64xf32>
    %872 = math.exp %871 : vector<2x64xf32>
    %cst_355 = arith.constant 1.000000e+00 : f32
    %873 = vector.broadcast %cst_355 : f32 to vector<2x64xf32>
    %874 = arith.addf %873, %872 : vector<2x64xf32>
    %875 = arith.divf %873, %874 : vector<2x64xf32>
    %876 = vector.extract_strided_slice %699 {offsets = [8, 0], sizes = [2, 64], strides = [1, 1]} : vector<16x64xf32> to vector<2x64xf32>
    %877 = arith.addf %876, %865 : vector<2x64xf32>
    %878 = arith.negf %877 : vector<2x64xf32>
    %879 = math.exp %878 : vector<2x64xf32>
    %cst_356 = arith.constant 1.000000e+00 : f32
    %880 = vector.broadcast %cst_356 : f32 to vector<2x64xf32>
    %881 = arith.addf %880, %879 : vector<2x64xf32>
    %882 = arith.divf %880, %881 : vector<2x64xf32>
    %883 = vector.extract_strided_slice %710 {offsets = [8, 0], sizes = [2, 64], strides = [1, 1]} : vector<16x64xf32> to vector<2x64xf32>
    %884 = arith.mulf %875, %868 : vector<2x64xf32>
    %885 = arith.addf %883, %884 : vector<2x64xf32>
    %886 = math.tanh %885 : vector<2x64xf32>
    %cst_357 = arith.constant 1.000000e+00 : f32
    %887 = vector.broadcast %cst_357 : f32 to vector<2x64xf32>
    %888 = arith.subf %887, %882 : vector<2x64xf32>
    %889 = arith.mulf %888, %886 : vector<2x64xf32>
    %890 = arith.mulf %882, %855 : vector<2x64xf32>
    %891 = arith.addf %889, %890 : vector<2x64xf32>
    %892 = vector.extract_strided_slice %891 {offsets = [0, 0], sizes = [2, 32], strides = [1, 1]} : vector<2x64xf32> to vector<2x32xf32>
    %c8_358 = arith.constant 8 : index
    %c0_359 = arith.constant 0 : index
    %893 = vector.load %arg23[%c8_358, %c0_359] : memref<16x64xf32, #tpu.memory_space<vmem>>, vector<2x32xf32>
    tpu.vector_store %arg23[%c8_358, %c0_359], %892 {strides = array<i32>} : memref<16x64xf32, #tpu.memory_space<vmem>>, vector<2x32xf32>,
    %894 = vector.extract_strided_slice %891 {offsets = [0, 32], sizes = [2, 32], strides = [1, 1]} : vector<2x64xf32> to vector<2x32xf32>
    %c6_360 = arith.constant 6 : index
    %c32_361 = arith.constant 32 : index
    %895 = vector.load %arg23[%c6_360, %c32_361] : memref<16x64xf32, #tpu.memory_space<vmem>>, vector<2x32xf32>
    tpu.vector_store %arg23[%c6_360, %c32_361], %894 {strides = array<i32>} : memref<16x64xf32, #tpu.memory_space<vmem>>, vector<2x32xf32>,
    %cst_362 = arith.constant dense<0.000000e+00> : vector<2x64xf32>
    %896 = tpu.matmul %891, %690, %cst_362 {dimension_numbers = #tpu.dot_dimension_numbers<[1], [0], [0], [1], [0, 0, 1, 1], [], []>} : vector<2x64xf32>, vector<64x64xf32>, vector<2x64xf32> -> vector<2x64xf32>
    %897 = vector.broadcast %692 : vector<1x64xf32> to vector<2x64xf32>
    %898 = arith.addf %896, %897 : vector<2x64xf32>
    %cst_363 = arith.constant dense<0.000000e+00> : vector<2x64xf32>
    %899 = tpu.matmul %891, %701, %cst_363 {dimension_numbers = #tpu.dot_dimension_numbers<[1], [0], [0], [1], [0, 0, 1, 1], [], []>} : vector<2x64xf32>, vector<64x64xf32>, vector<2x64xf32> -> vector<2x64xf32>
    %900 = vector.broadcast %703 : vector<1x64xf32> to vector<2x64xf32>
    %901 = arith.addf %899, %900 : vector<2x64xf32>
    %cst_364 = arith.constant dense<0.000000e+00> : vector<2x64xf32>
    %902 = tpu.matmul %891, %712, %cst_364 {dimension_numbers = #tpu.dot_dimension_numbers<[1], [0], [0], [1], [0, 0, 1, 1], [], []>} : vector<2x64xf32>, vector<64x64xf32>, vector<2x64xf32> -> vector<2x64xf32>
    %903 = vector.broadcast %714 : vector<1x64xf32> to vector<2x64xf32>
    %904 = arith.addf %902, %903 : vector<2x64xf32>
    %905 = vector.extract_strided_slice %688 {offsets = [10, 0], sizes = [2, 64], strides = [1, 1]} : vector<16x64xf32> to vector<2x64xf32>
    %906 = arith.addf %905, %898 : vector<2x64xf32>
    %907 = arith.negf %906 : vector<2x64xf32>
    %908 = math.exp %907 : vector<2x64xf32>
    %cst_365 = arith.constant 1.000000e+00 : f32
    %909 = vector.broadcast %cst_365 : f32 to vector<2x64xf32>
    %910 = arith.addf %909, %908 : vector<2x64xf32>
    %911 = arith.divf %909, %910 : vector<2x64xf32>
    %912 = vector.extract_strided_slice %699 {offsets = [10, 0], sizes = [2, 64], strides = [1, 1]} : vector<16x64xf32> to vector<2x64xf32>
    %913 = arith.addf %912, %901 : vector<2x64xf32>
    %914 = arith.negf %913 : vector<2x64xf32>
    %915 = math.exp %914 : vector<2x64xf32>
    %cst_366 = arith.constant 1.000000e+00 : f32
    %916 = vector.broadcast %cst_366 : f32 to vector<2x64xf32>
    %917 = arith.addf %916, %915 : vector<2x64xf32>
    %918 = arith.divf %916, %917 : vector<2x64xf32>
    %919 = vector.extract_strided_slice %710 {offsets = [10, 0], sizes = [2, 64], strides = [1, 1]} : vector<16x64xf32> to vector<2x64xf32>
    %920 = arith.mulf %911, %904 : vector<2x64xf32>
    %921 = arith.addf %919, %920 : vector<2x64xf32>
    %922 = math.tanh %921 : vector<2x64xf32>
    %cst_367 = arith.constant 1.000000e+00 : f32
    %923 = vector.broadcast %cst_367 : f32 to vector<2x64xf32>
    %924 = arith.subf %923, %918 : vector<2x64xf32>
    %925 = arith.mulf %924, %922 : vector<2x64xf32>
    %926 = arith.mulf %918, %891 : vector<2x64xf32>
    %927 = arith.addf %925, %926 : vector<2x64xf32>
    %928 = vector.extract_strided_slice %927 {offsets = [0, 0], sizes = [2, 32], strides = [1, 1]} : vector<2x64xf32> to vector<2x32xf32>
    %c10_368 = arith.constant 10 : index
    %c0_369 = arith.constant 0 : index
    %929 = vector.load %arg23[%c10_368, %c0_369] : memref<16x64xf32, #tpu.memory_space<vmem>>, vector<2x32xf32>
    tpu.vector_store %arg23[%c10_368, %c0_369], %928 {strides = array<i32>} : memref<16x64xf32, #tpu.memory_space<vmem>>, vector<2x32xf32>,
    %930 = vector.extract_strided_slice %927 {offsets = [0, 32], sizes = [2, 32], strides = [1, 1]} : vector<2x64xf32> to vector<2x32xf32>
    %c4_370 = arith.constant 4 : index
    %c32_371 = arith.constant 32 : index
    %931 = vector.load %arg23[%c4_370, %c32_371] : memref<16x64xf32, #tpu.memory_space<vmem>>, vector<2x32xf32>
    tpu.vector_store %arg23[%c4_370, %c32_371], %930 {strides = array<i32>} : memref<16x64xf32, #tpu.memory_space<vmem>>, vector<2x32xf32>,
    %cst_372 = arith.constant dense<0.000000e+00> : vector<2x64xf32>
    %932 = tpu.matmul %927, %690, %cst_372 {dimension_numbers = #tpu.dot_dimension_numbers<[1], [0], [0], [1], [0, 0, 1, 1], [], []>} : vector<2x64xf32>, vector<64x64xf32>, vector<2x64xf32> -> vector<2x64xf32>
    %933 = vector.broadcast %692 : vector<1x64xf32> to vector<2x64xf32>
    %934 = arith.addf %932, %933 : vector<2x64xf32>
    %cst_373 = arith.constant dense<0.000000e+00> : vector<2x64xf32>
    %935 = tpu.matmul %927, %701, %cst_373 {dimension_numbers = #tpu.dot_dimension_numbers<[1], [0], [0], [1], [0, 0, 1, 1], [], []>} : vector<2x64xf32>, vector<64x64xf32>, vector<2x64xf32> -> vector<2x64xf32>
    %936 = vector.broadcast %703 : vector<1x64xf32> to vector<2x64xf32>
    %937 = arith.addf %935, %936 : vector<2x64xf32>
    %cst_374 = arith.constant dense<0.000000e+00> : vector<2x64xf32>
    %938 = tpu.matmul %927, %712, %cst_374 {dimension_numbers = #tpu.dot_dimension_numbers<[1], [0], [0], [1], [0, 0, 1, 1], [], []>} : vector<2x64xf32>, vector<64x64xf32>, vector<2x64xf32> -> vector<2x64xf32>
    %939 = vector.broadcast %714 : vector<1x64xf32> to vector<2x64xf32>
    %940 = arith.addf %938, %939 : vector<2x64xf32>
    %941 = vector.extract_strided_slice %688 {offsets = [12, 0], sizes = [2, 64], strides = [1, 1]} : vector<16x64xf32> to vector<2x64xf32>
    %942 = arith.addf %941, %934 : vector<2x64xf32>
    %943 = arith.negf %942 : vector<2x64xf32>
    %944 = math.exp %943 : vector<2x64xf32>
    %cst_375 = arith.constant 1.000000e+00 : f32
    %945 = vector.broadcast %cst_375 : f32 to vector<2x64xf32>
    %946 = arith.addf %945, %944 : vector<2x64xf32>
    %947 = arith.divf %945, %946 : vector<2x64xf32>
    %948 = vector.extract_strided_slice %699 {offsets = [12, 0], sizes = [2, 64], strides = [1, 1]} : vector<16x64xf32> to vector<2x64xf32>
    %949 = arith.addf %948, %937 : vector<2x64xf32>
    %950 = arith.negf %949 : vector<2x64xf32>
    %951 = math.exp %950 : vector<2x64xf32>
    %cst_376 = arith.constant 1.000000e+00 : f32
    %952 = vector.broadcast %cst_376 : f32 to vector<2x64xf32>
    %953 = arith.addf %952, %951 : vector<2x64xf32>
    %954 = arith.divf %952, %953 : vector<2x64xf32>
    %955 = vector.extract_strided_slice %710 {offsets = [12, 0], sizes = [2, 64], strides = [1, 1]} : vector<16x64xf32> to vector<2x64xf32>
    %956 = arith.mulf %947, %940 : vector<2x64xf32>
    %957 = arith.addf %955, %956 : vector<2x64xf32>
    %958 = math.tanh %957 : vector<2x64xf32>
    %cst_377 = arith.constant 1.000000e+00 : f32
    %959 = vector.broadcast %cst_377 : f32 to vector<2x64xf32>
    %960 = arith.subf %959, %954 : vector<2x64xf32>
    %961 = arith.mulf %960, %958 : vector<2x64xf32>
    %962 = arith.mulf %954, %927 : vector<2x64xf32>
    %963 = arith.addf %961, %962 : vector<2x64xf32>
    %964 = vector.extract_strided_slice %963 {offsets = [0, 0], sizes = [2, 32], strides = [1, 1]} : vector<2x64xf32> to vector<2x32xf32>
    %c12_378 = arith.constant 12 : index
    %c0_379 = arith.constant 0 : index
    %965 = vector.load %arg23[%c12_378, %c0_379] : memref<16x64xf32, #tpu.memory_space<vmem>>, vector<2x32xf32>
    tpu.vector_store %arg23[%c12_378, %c0_379], %964 {strides = array<i32>} : memref<16x64xf32, #tpu.memory_space<vmem>>, vector<2x32xf32>,
    %966 = vector.extract_strided_slice %963 {offsets = [0, 32], sizes = [2, 32], strides = [1, 1]} : vector<2x64xf32> to vector<2x32xf32>
    %c2_380 = arith.constant 2 : index
    %c32_381 = arith.constant 32 : index
    %967 = vector.load %arg23[%c2_380, %c32_381] : memref<16x64xf32, #tpu.memory_space<vmem>>, vector<2x32xf32>
    tpu.vector_store %arg23[%c2_380, %c32_381], %966 {strides = array<i32>} : memref<16x64xf32, #tpu.memory_space<vmem>>, vector<2x32xf32>,
    %cst_382 = arith.constant dense<0.000000e+00> : vector<2x64xf32>
    %968 = tpu.matmul %963, %690, %cst_382 {dimension_numbers = #tpu.dot_dimension_numbers<[1], [0], [0], [1], [0, 0, 1, 1], [], []>} : vector<2x64xf32>, vector<64x64xf32>, vector<2x64xf32> -> vector<2x64xf32>
    %969 = vector.broadcast %692 : vector<1x64xf32> to vector<2x64xf32>
    %970 = arith.addf %968, %969 : vector<2x64xf32>
    %cst_383 = arith.constant dense<0.000000e+00> : vector<2x64xf32>
    %971 = tpu.matmul %963, %701, %cst_383 {dimension_numbers = #tpu.dot_dimension_numbers<[1], [0], [0], [1], [0, 0, 1, 1], [], []>} : vector<2x64xf32>, vector<64x64xf32>, vector<2x64xf32> -> vector<2x64xf32>
    %972 = vector.broadcast %703 : vector<1x64xf32> to vector<2x64xf32>
    %973 = arith.addf %971, %972 : vector<2x64xf32>
    %cst_384 = arith.constant dense<0.000000e+00> : vector<2x64xf32>
    %974 = tpu.matmul %963, %712, %cst_384 {dimension_numbers = #tpu.dot_dimension_numbers<[1], [0], [0], [1], [0, 0, 1, 1], [], []>} : vector<2x64xf32>, vector<64x64xf32>, vector<2x64xf32> -> vector<2x64xf32>
    %975 = vector.broadcast %714 : vector<1x64xf32> to vector<2x64xf32>
    %976 = arith.addf %974, %975 : vector<2x64xf32>
    %977 = vector.extract_strided_slice %688 {offsets = [14, 0], sizes = [2, 64], strides = [1, 1]} : vector<16x64xf32> to vector<2x64xf32>
    %978 = arith.addf %977, %970 : vector<2x64xf32>
    %979 = arith.negf %978 : vector<2x64xf32>
    %980 = math.exp %979 : vector<2x64xf32>
    %cst_385 = arith.constant 1.000000e+00 : f32
    %981 = vector.broadcast %cst_385 : f32 to vector<2x64xf32>
    %982 = arith.addf %981, %980 : vector<2x64xf32>
    %983 = arith.divf %981, %982 : vector<2x64xf32>
    %984 = vector.extract_strided_slice %699 {offsets = [14, 0], sizes = [2, 64], strides = [1, 1]} : vector<16x64xf32> to vector<2x64xf32>
    %985 = arith.addf %984, %973 : vector<2x64xf32>
    %986 = arith.negf %985 : vector<2x64xf32>
    %987 = math.exp %986 : vector<2x64xf32>
    %cst_386 = arith.constant 1.000000e+00 : f32
    %988 = vector.broadcast %cst_386 : f32 to vector<2x64xf32>
    %989 = arith.addf %988, %987 : vector<2x64xf32>
    %990 = arith.divf %988, %989 : vector<2x64xf32>
    %991 = vector.extract_strided_slice %710 {offsets = [14, 0], sizes = [2, 64], strides = [1, 1]} : vector<16x64xf32> to vector<2x64xf32>
    %992 = arith.mulf %983, %976 : vector<2x64xf32>
    %993 = arith.addf %991, %992 : vector<2x64xf32>
    %994 = math.tanh %993 : vector<2x64xf32>
    %cst_387 = arith.constant 1.000000e+00 : f32
    %995 = vector.broadcast %cst_387 : f32 to vector<2x64xf32>
    %996 = arith.subf %995, %990 : vector<2x64xf32>
    %997 = arith.mulf %996, %994 : vector<2x64xf32>
    %998 = arith.mulf %990, %963 : vector<2x64xf32>
    %999 = arith.addf %997, %998 : vector<2x64xf32>
    %1000 = vector.extract_strided_slice %999 {offsets = [0, 0], sizes = [2, 32], strides = [1, 1]} : vector<2x64xf32> to vector<2x32xf32>
    %c14_388 = arith.constant 14 : index
    %c0_389 = arith.constant 0 : index
    %1001 = vector.load %arg23[%c14_388, %c0_389] : memref<16x64xf32, #tpu.memory_space<vmem>>, vector<2x32xf32>
    tpu.vector_store %arg23[%c14_388, %c0_389], %1000 {strides = array<i32>} : memref<16x64xf32, #tpu.memory_space<vmem>>, vector<2x32xf32>,
    %1002 = vector.extract_strided_slice %999 {offsets = [0, 32], sizes = [2, 32], strides = [1, 1]} : vector<2x64xf32> to vector<2x32xf32>
    %c0_390 = arith.constant 0 : index
    %c32_391 = arith.constant 32 : index
    %1003 = vector.load %arg23[%c0_390, %c32_391] : memref<16x64xf32, #tpu.memory_space<vmem>>, vector<2x32xf32>
    tpu.vector_store %arg23[%c0_390, %c32_391], %1002 {strides = array<i32>} : memref<16x64xf32, #tpu.memory_space<vmem>>, vector<2x32xf32>,
    %1004 = vector.extract_strided_slice %999 {offsets = [0, 0], sizes = [2, 32], strides = [1, 1]} : vector<2x64xf32> to vector<2x32xf32>
    %c4_392 = arith.constant 4 : index
    %c0_393 = arith.constant 0 : index
    %c0_394 = arith.constant 0 : index
    %1005 = vector.load %arg22[%c4_392, %c0_393, %c0_394] : memref<6x2x32xf32, #tpu.memory_space<vmem>>, vector<1x2x32xf32>
    %1006 = vector.shape_cast %1005 : vector<1x2x32xf32> to vector<2x32xf32>
    %1007 = vector.shape_cast %1004 : vector<2x32xf32> to vector<1x2x32xf32>
    tpu.vector_store %arg22[%c4_392, %c0_393, %c0_394], %1007 {strides = array<i32>} : memref<6x2x32xf32, #tpu.memory_space<vmem>>, vector<1x2x32xf32>,
    %1008 = vector.extract_strided_slice %999 {offsets = [0, 32], sizes = [2, 32], strides = [1, 1]} : vector<2x64xf32> to vector<2x32xf32>
    %c5_395 = arith.constant 5 : index
    %c0_396 = arith.constant 0 : index
    %c0_397 = arith.constant 0 : index
    %1009 = vector.load %arg22[%c5_395, %c0_396, %c0_397] : memref<6x2x32xf32, #tpu.memory_space<vmem>>, vector<1x2x32xf32>
    %1010 = vector.shape_cast %1009 : vector<1x2x32xf32> to vector<2x32xf32>
    %1011 = vector.shape_cast %1008 : vector<2x32xf32> to vector<1x2x32xf32>
    tpu.vector_store %arg22[%c5_395, %c0_396, %c0_397], %1011 {strides = array<i32>} : memref<6x2x32xf32, #tpu.memory_space<vmem>>, vector<1x2x32xf32>,
    %c0_398 = arith.constant 0 : index
    %c0_399 = arith.constant 0 : index
    %1012 = vector.load %arg23[%c0_398, %c0_399] : memref<16x64xf32, #tpu.memory_space<vmem>>, vector<16x64xf32>
    %c0_400 = arith.constant 0 : index
    %c0_401 = arith.constant 0 : index
    %1013 = vector.load %arg11[%c0_400, %c0_401] : memref<64x32xf32, #tpu.memory_space<vmem>>, vector<64x32xf32>
    %cst_402 = arith.constant dense<0.000000e+00> : vector<16x32xf32>
    %1014 = tpu.matmul %1012, %1013, %cst_402 {dimension_numbers = #tpu.dot_dimension_numbers<[1], [0], [0], [1], [0, 0, 1, 1], [], []>} : vector<16x64xf32>, vector<64x32xf32>, vector<16x32xf32> -> vector<16x32xf32>
    %c0_403 = arith.constant 0 : index
    %c0_404 = arith.constant 0 : index
    %1015 = vector.load %arg12[%c0_403, %c0_404] : memref<1x32xf32, #tpu.memory_space<vmem>>, vector<1x32xf32>
    %1016 = vector.broadcast %1015 : vector<1x32xf32> to vector<16x32xf32>
    %1017 = arith.addf %1014, %1016 : vector<16x32xf32>
    %1018 = math.tanh %1017 : vector<16x32xf32>
    %c0_405 = arith.constant 0 : index
    %c0_406 = arith.constant 0 : index
    %1019 = vector.load %arg13[%c0_405, %c0_406] : memref<1x32xf32, #tpu.memory_space<vmem>>, vector<1x32xf32>
    %1020 = vector.broadcast %1019 : vector<1x32xf32> to vector<16x32xf32>
    %1021 = arith.mulf %1018, %1020 : vector<16x32xf32>
    %cst_407 = arith.constant dense<0.000000e+00> : vector<16xf32>
    %1022 = vector.multi_reduction <add>, %1021, %cst_407 [1] : vector<16x32xf32> to vector<16xf32>
    %1023 = vector.shape_cast %1022 : vector<16xf32> to vector<16x1xf32>
    %c0_408 = arith.constant 0 : index
    %c0_409 = arith.constant 0 : index
    %1024 = vector.load %arg14[%c0_408, %c0_409] : memref<1x1xf32, #tpu.memory_space<vmem>>, vector<1x1xf32>
    %1025 = vector.broadcast %1024 : vector<1x1xf32> to vector<16x1xf32>
    %1026 = arith.addf %1023, %1025 : vector<16x1xf32>
    %c0_410 = arith.constant 0 : index
    %c0_411 = arith.constant 0 : index
    %1027 = vector.load %arg2[%c0_410, %c0_411] : memref<16x2xf32, #tpu.memory_space<vmem>>, vector<16x2xf32>
    %cst_412 = arith.constant 5.000000e-01 : f32
    %1028 = vector.broadcast %cst_412 : f32 to vector<16x2xf32>
    %1029 = arith.cmpf ogt, %1027, %1028 : vector<16x2xf32>
    %cst_413 = arith.constant 0xFF800000 : f32
    %1030 = vector.shape_cast %1026 : vector<16x1xf32> to vector<16x1xf32>
    %1031 = vector.broadcast %1030 : vector<16x1xf32> to vector<16x2xf32>
    %1032 = vector.broadcast %cst_413 : f32 to vector<16x2xf32>
    %1033 = arith.select %1029, %1031, %1032 : vector<16x2xi1>, vector<16x2xf32>
    %cst_414 = arith.constant dense<0xFF800000> : vector<2xf32>
    %1034 = vector.multi_reduction <maximumf>, %1033, %cst_414 [0] : vector<16x2xf32> to vector<2xf32>
    %1035 = vector.shape_cast %1034 : vector<2xf32> to vector<1x2xf32>
    %1036 = vector.broadcast %1035 : vector<1x2xf32> to vector<16x2xf32>
    %1037 = arith.mulf %1027, %1036 : vector<16x2xf32>
    %cst_415 = arith.constant dense<0.000000e+00> : vector<16xf32>
    %1038 = vector.multi_reduction <add>, %1037, %cst_415 [1] : vector<16x2xf32> to vector<16xf32>
    %1039 = vector.shape_cast %1038 : vector<16xf32> to vector<16x1xf32>
    %1040 = arith.subf %1026, %1039 : vector<16x1xf32>
    %1041 = math.exp %1040 : vector<16x1xf32>
    %1042 = vector.broadcast %1041 : vector<16x1xf32> to vector<16x2xf32>
    %1043 = arith.mulf %1027, %1042 : vector<16x2xf32>
    %cst_416 = arith.constant dense<0.000000e+00> : vector<2xf32>
    %1044 = vector.multi_reduction <add>, %1043, %cst_416 [0] : vector<16x2xf32> to vector<2xf32>
    %1045 = vector.shape_cast %1044 : vector<2xf32> to vector<1x2xf32>
    %1046 = vector.broadcast %1045 : vector<1x2xf32> to vector<16x2xf32>
    %1047 = arith.mulf %1027, %1046 : vector<16x2xf32>
    %cst_417 = arith.constant dense<0.000000e+00> : vector<16xf32>
    %1048 = vector.multi_reduction <add>, %1047, %cst_417 [1] : vector<16x2xf32> to vector<16xf32>
    %1049 = vector.shape_cast %1048 : vector<16xf32> to vector<16x1xf32>
    %1050 = arith.divf %1041, %1049 : vector<16x1xf32>
    %c0_418 = arith.constant 0 : index
    %c0_419 = arith.constant 0 : index
    %1051 = vector.load %arg19[%c0_418, %c0_419] : memref<16x1xf32, #tpu.memory_space<vmem>>, vector<16x1xf32>
    tpu.vector_store %arg19[%c0_418, %c0_419], %1050 {strides = array<i32>} : memref<16x1xf32, #tpu.memory_space<vmem>>, vector<16x1xf32>,
    %c0_420 = arith.constant 0 : index
    %c0_421 = arith.constant 0 : index
    %1052 = vector.load %arg1[%c0_420, %c0_421] : memref<2x16xf32, #tpu.memory_space<vmem>>, vector<2x16xf32>
    %1053 = vector.broadcast %1050 : vector<16x1xf32> to vector<16x64xf32>
    %1054 = arith.mulf %1053, %1012 : vector<16x64xf32>
    %cst_422 = arith.constant dense<0.000000e+00> : vector<2x64xf32>
    %1055 = tpu.matmul %1052, %1054, %cst_422 {dimension_numbers = #tpu.dot_dimension_numbers<[1], [0], [0], [1], [0, 0, 1, 1], [], []>} : vector<2x16xf32>, vector<16x64xf32>, vector<2x64xf32> -> vector<2x64xf32>
    %c0_423 = arith.constant 0 : index
    %c0_424 = arith.constant 0 : index
    %1056 = vector.load %arg20[%c0_423, %c0_424] : memref<2x64xf32, #tpu.memory_space<vmem>>, vector<2x64xf32>
    tpu.vector_store %arg20[%c0_423, %c0_424], %1055 {strides = array<i32>} : memref<2x64xf32, #tpu.memory_space<vmem>>, vector<2x64xf32>,
    %c0_425 = arith.constant 0 : index
    %c0_426 = arith.constant 0 : index
    %1057 = vector.load %arg15[%c0_425, %c0_426] : memref<64x96xf32, #tpu.memory_space<vmem>>, vector<64x96xf32>
    %cst_427 = arith.constant dense<0.000000e+00> : vector<2x96xf32>
    %1058 = tpu.matmul %1055, %1057, %cst_427 {dimension_numbers = #tpu.dot_dimension_numbers<[1], [0], [0], [1], [0, 0, 1, 1], [], []>} : vector<2x64xf32>, vector<64x96xf32>, vector<2x96xf32> -> vector<2x96xf32>
    %c0_428 = arith.constant 0 : index
    %c0_429 = arith.constant 0 : index
    %1059 = vector.load %arg16[%c0_428, %c0_429] : memref<1x96xf32, #tpu.memory_space<vmem>>, vector<1x96xf32>
    %1060 = vector.broadcast %1059 : vector<1x96xf32> to vector<2x96xf32>
    %1061 = arith.addf %1058, %1060 : vector<2x96xf32>
    %cst_430 = arith.constant 0.000000e+00 : f32
    %1062 = vector.broadcast %cst_430 : f32 to vector<2x96xf32>
    %1063 = arith.maximumf %1061, %1062 : vector<2x96xf32>
    %c0_431 = arith.constant 0 : index
    %c0_432 = arith.constant 0 : index
    %1064 = vector.load %arg17[%c0_431, %c0_432] : memref<96x128xf32, #tpu.memory_space<vmem>>, vector<96x128xf32>
    %cst_433 = arith.constant dense<0.000000e+00> : vector<2x128xf32>
    %1065 = tpu.matmul %1063, %1064, %cst_433 {dimension_numbers = #tpu.dot_dimension_numbers<[1], [0], [0], [1], [0, 0, 1, 1], [], []>} : vector<2x96xf32>, vector<96x128xf32>, vector<2x128xf32> -> vector<2x128xf32>
    %c0_434 = arith.constant 0 : index
    %c0_435 = arith.constant 0 : index
    %1066 = vector.load %arg18[%c0_434, %c0_435] : memref<1x128xf32, #tpu.memory_space<vmem>>, vector<1x128xf32>
    %1067 = vector.broadcast %1066 : vector<1x128xf32> to vector<2x128xf32>
    %1068 = arith.addf %1065, %1067 : vector<2x128xf32>
    %1069 = tpu.iota {dimensions = array<i32: 1>} : vector<2x128xi32>
    %c6_i32 = arith.constant 6 : i32
    %1070 = vector.broadcast %c6_i32 : i32 to vector<2x128xi32>
    %1071 = arith.cmpi eq, %1069, %1070 : vector<2x128xi32>
    %1072 = arith.negf %1068 : vector<2x128xf32>
    %1073 = math.exp %1072 : vector<2x128xf32>
    %cst_436 = arith.constant 1.000000e+00 : f32
    %1074 = vector.broadcast %cst_436 : f32 to vector<2x128xf32>
    %1075 = arith.addf %1074, %1073 : vector<2x128xf32>
    %1076 = arith.divf %1074, %1075 : vector<2x128xf32>
    %1077 = arith.select %1071, %1076, %1068 : vector<2x128xi1>, vector<2x128xf32>
    %c0_437 = arith.constant 0 : index
    %c0_438 = arith.constant 0 : index
    %1078 = vector.load %arg21[%c0_437, %c0_438] : memref<2x128xf32, #tpu.memory_space<vmem>>, vector<2x128xf32>
    tpu.vector_store %arg21[%c0_437, %c0_438], %1077 {strides = array<i32>} : memref<2x128xf32, #tpu.memory_space<vmem>>, vector<2x128xf32>,
    return
  }
}

</mosaic_0001>

<bundles_post_ra>
// kernel: stimulation_net_forward.1
= control target key start
LH: loop header
LB: loop body
LE: loop exit
PB: predicated region body
PF: predicated region fallthrough
CT: control target
= control target key end

     0   :  { %s14571_s0 = inlined_call_operand.vmem [shape: f32[8,2,32], index: 0, kind: input, shape index: {}]   ;;  %s14572_s1 = inlined_call_operand.vmem [shape: f32[2,16], index: 1, kind: input, shape index: {}]   ;;  %s14573_s2 = inlined_call_operand.vmem [shape: f32[16,2], index: 2, kind: input, shape index: {}]   ;;  %s14574_s3 = inlined_call_operand.vmem [shape: f32[16,16], index: 3, kind: input, shape index: {}]   ;;  %s14575_s4 = inlined_call_operand.vmem [shape: f32[32,32], index: 4, kind: input, shape index: {}]   ;;  %s14576_s5 = inlined_call_operand.vmem [shape: f32[1,32], index: 5, kind: input, shape index: {}]   ;;  %s14577_s6 = inlined_call_operand.vmem [shape: f32[3,64,64], index: 6, kind: input, shape index: {}]   ;;  %s14578_s7 = inlined_call_operand.vmem [shape: f32[6,128,64], index: 7, kind: input, shape index: {}]   ;;  %s14579_s8 = inlined_call_operand.vmem [shape: f32[9,64,64], index: 8, kind: input, shape index: {}]   ;;  %s14580_s9 = inlined_call_operand.vmem [shape: f32[9,1,64], index: 9, kind: input, shape index: {}]   ;;  %s14581_s10 = inlined_call_operand.vmem [shape: f32[9,1,64], index: 10, kind: input, shape index: {}]   ;;  %s14582_s11 = inlined_call_operand.vmem [shape: f32[64,32], index: 11, kind: input, shape index: {}]   ;;  %s14583_s12 = inlined_call_operand.vmem [shape: f32[1,32], index: 12, kind: input, shape index: {}]   ;;  %s14584_s13 = inlined_call_operand.vmem [shape: f32[1,32], index: 13, kind: input, shape index: {}]   ;;  %s14585_s14 = inlined_call_operand.<no memory space> [shape: f32[1,1], index: 14, kind: input, shape index: {}]   ;;  %s14586_s15 = inlined_call_operand.vmem [shape: f32[64,96], index: 15, kind: input, shape index: {}]   ;;  %s14587_s16 = inlined_call_operand.vmem [shape: f32[1,96], index: 16, kind: input, shape index: {}]   ;;  %s14588_s17 = inlined_call_operand.vmem [shape: f32[96,128], index: 17, kind: input, shape index: {}]   ;;  %s14589_s18 = inlined_call_operand.vmem [shape: f32[1,128], index: 18, kind: input, shape index: {}]   ;;  %s14590_s19 = inlined_call_operand.vmem [shape: f32[16,1], index: 19, kind: output, shape index: {0}]   ;;  %s14591_s20 = inlined_call_operand.hbm [shape: f32[2,64], index: 20, kind: output, shape index: {1}]   ;;  %s14592_s21 = inlined_call_operand.vmem [shape: f32[2,128], index: 21, kind: output, shape index: {2}]   ;;  %s14593_s22 = inlined_call_operand.hbm [shape: f32[6,2,32], index: 22, kind: output, shape index: {3}]  }
   0x1   :  { %14599 = sst [smem:[#allocation11_spill]] %s14571_s0  ;;  %v28_v0 = vstv %s14585_s14 }
   0x2   :  { %14600 = sst [smem:[#allocation12_spill]] %s14572_s1  ;;  %29 = vst [vmem:[#allocation4] sm:$0x1] %v28_v0 }
   0x3   :  { %14601 = sst [smem:[#allocation13_spill]] %s14573_s2 }
   0x4   :  { %14602 = sst [smem:[#allocation14_spill]] %s14574_s3 }
   0x5   :  { %14603 = sst [smem:[#allocation15_spill]] %s14575_s4 }
   0x6   :  { %14604 = sst [smem:[#allocation16_spill]] %s14576_s5 }
   0x7   :  { %14605 = sst [smem:[#allocation17_spill]] %s14577_s6 }
   0x8   :  { %30 = vsyncpa [#allocation6], 0  ;;  %s14606_s4 = sld [smem:[#allocation15_spill]]  ;;  %v102_v4 = vlaneseq  ;;  %s14607_s26 = sld [smem:[#allocation11_spill]]  ;;  %v12351_v9 = vmov 1983009808  }
   0x9   :  { %v100_v10 = vunpack.c.l.s4 %v12351_v9 }
   0xa   :  { %v103_v14 = vshrl.u32 %v102_v4, 7 }
   0xb   :  { %v101_v17 = vunpack.c.0.s8 %v100_v10 }
   0xe   :  { %v78_v1 = vld [vmem:[%s14606_s4] sm:$0xff]  ;;  %v79_v2 = vld [vmem:[%s14606_s4 + $0x8] sm:$0xff]  ;;  %v80_v3 = vld [vmem:[%s14606_s4 + $0x10] sm:$0xff] }
   0xf   :  { %v10857_v5 = vpack.c.bf16 %v79_v2, %v78_v1  ;;  %v81_v6 = vld [vmem:[%s14606_s4 + $0x18] sm:$0xff]  ;;  %v70_v7 = vld [vmem:[%s14607_s26] sm:$0x3]  ;;  %v71_v8 = vld [vmem:[%s14607_s26 + $0x2] sm:$0x3] }
  0x10   :  { %v10861_v11 = vpack.c.bf16 %v81_v6, %v80_v3  ;;  %v72_v12 = vld [vmem:[%s14607_s26 + $0x4] sm:$0x3]  ;;  %v73_v13 = vld [vmem:[%s14607_s26 + $0x6] sm:$0x3]  ;;  %v97_v15 = vcombine.low %v70_v7, %v71_v8  ;;  %v74_v18 = vld [vmem:[%s14607_s26 + $0x8] sm:$0x3] }
  0x11   :  { %10858 = vmatprep.subr.bf16.mxu1 %v10857_v5  ;;  %v98_v16 = vcombine.low %v72_v12, %v73_v13  ;;  %v75_v19 = vld [vmem:[%s14607_s26 + $0xa] sm:$0x3]  ;;  %v76_v20 = vld [vmem:[%s14607_s26 + $0xc] sm:$0x3]  ;;  %v77_v21 = vld [vmem:[%s14607_s26 + $0xe] sm:$0x3] }
  0x12   :  { %10860 = vmatpush3.bf16.msra.mxu1 %v10857_v5  ;;  %v114_v22 = vcombine.low %v74_v18, %v75_v19 }
  0x13   :  { %31 = vsyncpa [#allocation8], 0  ;;  %10862 = vmatprep.subr.bf16.mxu1 %v10861_v11  ;;  %v104_v23 = vsub.s32 %v101_v17, %v103_v14  ;;  %v115_v24 = vcombine.low %v76_v20, %v77_v21  ;;  %vm131_vm0 = vcmask 261120   ;;  %s14608_s26 = sld [smem:[#allocation14_spill]]  ;;  %vm213_vm1 = vcmask 130048   ;;  %s14609_s28 = sld [smem:[#allocation16_spill]] }
  0x14   :  { %s14610_s23 = sld [smem:[#allocation17_spill]]  ;;  %v12352_v2 = vmov 0.0|0.0   ;;  %s12353_s2 = smov 32   ;;  %vm305_vm2 = vcmask 523520   ;;  %vm325_vm3 = vcmask 523264   ;;  %v407_v8 = vld [vmem:[%s14579_s8] sm:$0xff] }
  0x15   :  { %v105_v25 = vrot.slane %v97_v15, %v104_v23  ;;  %v112_v26 = vrot.slane %v98_v16, %v104_v23  ;;  %v122_v27 = vrot.slane %v114_v22, %v104_v23  ;;  %v129_v28 = vrot.slane %v115_v24, %v104_v23  ;;  %v408_v9 = vld [vmem:[%s14579_s8 + $0x8] sm:$0xff]  ;;  %v409_v15 = vld [vmem:[%s14579_s8 + $0x10] sm:$0xff]  ;;  %v410_v16 = vld [vmem:[%s14579_s8 + $0x18] sm:$0xff]  ;;  %s12356_s4 = smov 64   ;;  %s14612_s24 = sld [smem:[#allocation12_spill]] }
  0x16   :  { %10864 = vmatpush3.bf16.msra.mxu1 %v10861_v11  ;;  %v12603_v13 = vpack.c.bf16 %v408_v9, %v407_v8  ;;  %v12620_v20 = vpack.c.bf16 %v410_v16, %v409_v15  ;;  %v411_v22 = vld [vmem:[%s14579_s8 + $0x20] sm:$0xff]  ;;  %v412_v23 = vld [vmem:[%s14579_s8 + $0x28] sm:$0xff]  ;;  %vm12354_vm4 = vmmov 0   ;;  %vm874_vm5 = vcmask 254976   ;;  %s12359_s29 = smov [#allocation5]  }
  0x17   :  { %v113_v29 = vcombine.low %v105_v25, %v112_v26  ;;  %v130_v30 = vcombine.low %v122_v27, %v129_v28  ;;  %v12355_v26 = vmov 0.0   ;;  %v12639_v27 = vpack.c.bf16 %v412_v23, %v411_v22 }
  0x18   :  { %vm876_vm6 = vcmask 517376   ;;  %vm1123_vm7 = vcmask 257026   ;;  %vm1125_vm8 = vcmask 519426   ;;  %vm1373_vm9 = vcmask 259076  }
  0x19   :  { %9126 = vmatprep.mubr.msk.f32.mxu1 %vm131_vm0, %v113_v29  ;;  %v211_v31 = vld [vmem:[%s14608_s26] sm:$0xff]  ;;  %v212_v38 = vld [vmem:[%s14608_s26 + $0x8] sm:$0xff]  ;;  %v413_v29 = vld [vmem:[%s14579_s8 + $0x30] sm:$0xff]  ;;  %vm1375_vm10 = vcmask 521476   ;;  %vm1623_vm11 = vcmask 261126   ;;  %vm1625_vm12 = vcmask 523526  }
  0x1a   :  { %9127 = vmatmul.mubr.msk.f32.vlgmr.msra.gmra.mrb[0].mxu1 %vm131_vm0, %v130_v30  ;;  %v7948_v32 = vld [vmem:[%s14609_s28] ss:$0 sm:$0xff]  ;;  %v311_v40 = vld [vmem:[%s14610_s23 + $0x8] sm:$0xff]  ;;  %v312_v44 = vld [vmem:[%s14610_s23 + $0x10] sm:$0xff]  ;;  %vm2702_vm13 = vcmask 1048064   ;;  %vm7569_vm15 = vcmask 15360  }
  0x1b   :  { %9133 = vmatprep.mubr.msk.f32.mxu1 %vm213_vm1, %v211_v31  ;;  %v310_v39 = vld [vmem:[%s14610_s23] sm:$0xff]  ;;  %v7957_v43 = vld [vmem:[%s14610_s23 + $0x48] sm:$0xff]  ;;  %v313_v45 = vld [vmem:[%s14610_s23 + $0x18] sm:$0xff] }
  0x1c   :  { %v7956_v41 = vld [vmem:[%s14610_s23 + $0x40] sm:$0xff]  ;;  %v10869_v42 = vpack.c.bf16 %v311_v40, %v310_v39  ;;  %v10873_v47 = vpack.c.bf16 %v313_v45, %v312_v44  ;;  %v7958_v48 = vld [vmem:[%s14610_s23 + $0x50] sm:$0xff]  ;;  %v7959_v49 = vld [vmem:[%s14610_s23 + $0x58] sm:$0xff] }
  0x1d   :  { %v10885_v46 = vpack.c.bf16 %v7957_v43, %v7956_v41  ;;  %v10889_v50 = vpack.c.bf16 %v7959_v49, %v7958_v48  ;;  %v314_v51 = vld [vmem:[%s14610_s23 + $0x20] sm:$0xff]  ;;  %v315_v52 = vld [vmem:[%s14610_s23 + $0x28] sm:$0xff]  ;;  %v316_v57 = vld [vmem:[%s14610_s23 + $0x30] sm:$0xff] }
  0x1e   :  { %v7960_v53 = vld [vmem:[%s14610_s23 + $0x60] sm:$0xff]  ;;  %v10877_v54 = vpack.c.bf16 %v315_v52, %v314_v51  ;;  %v7961_v55 = vld [vmem:[%s14610_s23 + $0x68] sm:$0xff]  ;;  %v317_v58 = vld [vmem:[%s14610_s23 + $0x38] sm:$0xff] }
  0x1f   :  { %10886 = vmatprep.subr.bf16.mxu0 %v10885_v46  ;;  %v10893_v56 = vpack.c.bf16 %v7961_v55, %v7960_v53  ;;  %v7962_v59 = vld [vmem:[%s14610_s23 + $0x70] sm:$0xff]  ;;  %v10881_v60 = vpack.c.bf16 %v317_v58, %v316_v57  ;;  %v7963_v61 = vld [vmem:[%s14610_s23 + $0x78] sm:$0xff]  ;;  %v7977_v63 = vld [vmem:[%s14610_s23 + $0x80] sm:$0xff] }
  0x20   :  { %10888 = vmatpush3.bf16.msra.mxu0 %v10885_v46  ;;  %v10897_v62 = vpack.c.bf16 %v7963_v61, %v7962_v59  ;;  %v7978_v0 = vld [vmem:[%s14610_s23 + $0x88] sm:$0xff]  ;;  %v7979_v11 = vld [vmem:[%s14610_s23 + $0x90] sm:$0xff]  ;;  %v7980_v12 = vld [vmem:[%s14610_s23 + $0x98] sm:$0xff] }
  0x21   :  { %10890 = vmatprep.subr.bf16.mxu0 %v10889_v50  ;;  %v10901_v1 = vpack.c.bf16 %v7978_v0, %v7977_v63  ;;  %v10905_v14 = vpack.c.bf16 %v7980_v12, %v7979_v11  ;;  %v7981_v18 = vld [vmem:[%s14610_s23 + $0xa0] sm:$0xff]  ;;  %v7982_v19 = vld [vmem:[%s14610_s23 + $0xa8] sm:$0xff]  ;;  %v7983_v24 = vld [vmem:[%s14610_s23 + $0xb0] sm:$0xff] }
  0x22   :  { %v10909_v21 = vpack.c.bf16 %v7982_v19, %v7981_v18  ;;  %v7984_v25 = vld [vmem:[%s14610_s23 + $0xb8] sm:$0xff]  ;;  %v7991_v40 = vld [vmem:[%s14579_s8 + $0x90] sm:$0xff]  ;;  %v7972_v43 = vld [vmem:[%s14579_s8 + $0x60] sm:$0xff] }
  0x23   :  { %v10913_v28 = vpack.c.bf16 %v7984_v25, %v7983_v24  ;;  %v414_v30 = vld [vmem:[%s14579_s8 + $0x38] sm:$0xff]  ;;  %v7973_v45 = vld [vmem:[%s14579_s8 + $0x68] sm:$0xff]  ;;  %v7993_v46 = vld [vmem:[%s14579_s8 + $0xa0] sm:$0xff] }
  0x24   :  { %10892 = vmatpush3.bf16.msra.mxu0 %v10889_v50  ;;  %v12649_v31 = vpack.c.bf16 %v414_v30, %v413_v29  ;;  %v7971_v39 = vld [vmem:[%s14579_s8 + $0x58] sm:$0xff]  ;;  %v12710_v48 = vpack.c.bf16 %v7973_v45, %v7972_v43  ;;  %v7974_v49 = vld [vmem:[%s14579_s8 + $0x70] sm:$0xff]  ;;  %v7965_v57 = vld [vmem:[%s14580_s9 + $0x1] ss:$0 sm:$0xff] }
  0x25   :  { %10894 = vmatprep.subr.bf16.mxu0 %v10893_v56  ;;  %v7992_v41 = vld [vmem:[%s14579_s8 + $0x98] sm:$0xff]  ;;  %v7995_v52 = vld [vmem:[%s14579_s8 + $0xb0] sm:$0xff]  ;;  %v7986_v0 = vld [vmem:[%s14580_s9 + $0x2] ss:$0 sm:$0xff] }
  0x26   :  { %v12692_v44 = vpack.c.bf16 %v7992_v41, %v7991_v40  ;;  %v7975_v51 = vld [vmem:[%s14579_s8 + $0x78] sm:$0xff] }
  0x27   :  { %v7996_v53 = vld [vmem:[%s14579_s8 + $0xb8] sm:$0xff] }
  0x28   :  { %10896 = vmatpush3.bf16.msra.mxu0 %v10893_v56  ;;  %v12733_v55 = vpack.c.bf16 %v7996_v53, %v7995_v52  ;;  %v7953_v56 = vld [vmem:[%s14580_s9] ss:$0 sm:$0xff] }
  0x29   :  { %10898 = vmatprep.subr.bf16.mxu0 %v10897_v62 }
  0x2c   :  { %10900 = vmatpush3.bf16.msra.mxu0 %v10897_v62 }
  0x2d   :  { %10917 = vmatprep.subr.bf16.mxu0 %v12352_v2 }
  0xed   :  { %v9128_v33 = vpop.f32.mrb[0].mxu1 }
  0xee   :  { %v208_v34 = vadd.f32 %v9128_v33, %v7948_v32  ;;  %v202_v35 = vpop.f32.mrb[1].mxu1  ;;  %v7969_v33 = vld [vmem:[%s14579_s8 + $0x48] sm:$0xff] }
  0xef   :  { %v203_v36 = vadd.f32 %v7948_v32, %v202_v35  ;;  %v7968_v32 = vld [vmem:[%s14579_s8 + $0x40] sm:$0xff]  ;;  %v7990_v35 = vld [vmem:[%s14579_s8 + $0x88] sm:$0xff] }
  0xf0   :  { %296 = vst.msk [vmem:[#allocation3 + $0x8] sm:$0xff] %vm131_vm0, %v208_v34 }
  0xf1   :  { %v10865_v37 = vpack.c.bf16 %v208_v34, %v203_v36  ;;  %295 = vst.msk [vmem:[#allocation3] sm:$0xff] %vm131_vm0, %v203_v36  ;;  %v7989_v34 = vld [vmem:[%s14579_s8 + $0x80] sm:$0xff]  ;;  %v12665_v36 = vpack.c.bf16 %v7969_v33, %v7968_v32 }
  0xf3   :  { %10866 = vmatprep.subr.bf16.mxu1 %v10865_v37 }
  0xf4   :  { %10868 = vmatpush3.bf16.msra.mxu1 %v10865_v37  ;;  %v7970_v37 = vld [vmem:[%s14579_s8 + $0x50] sm:$0xff] }
  0xf5   :  { %10870 = vmatprep.subr.bf16.mxu1 %v10869_v42 }
  0xf7   :  { %9134 = vmatmul.mubr.msk.f32.vlgmr.msra.gmra.mrb[2].mxu1 %vm213_vm1, %v212_v38  ;;  %v12670_v38 = vpack.c.bf16 %v7990_v35, %v7989_v34 }
  0xf8   :  { %10872 = vmatpush3.bf16.msra.mxu1 %v10869_v42  ;;  %v12686_v42 = vpack.c.bf16 %v7971_v39, %v7970_v37 }
  0xf9   :  { %10874 = vmatprep.subr.bf16.mxu1 %v10873_v47 }
  0xfc   :  { %10876 = vmatpush3.bf16.msra.mxu1 %v10873_v47  ;;  %v7994_v47 = vld [vmem:[%s14579_s8 + $0xa8] sm:$0xff] }
  0xfd   :  { %10878 = vmatprep.subr.bf16.mxu1 %v10877_v54  ;;  %v12716_v50 = vpack.c.bf16 %v7994_v47, %v7993_v46 }
 0x100   :  { %10880 = vmatpush3.bf16.msra.mxu1 %v10877_v54  ;;  %v12730_v54 = vpack.c.bf16 %v7975_v51, %v7974_v49 }
 0x101   :  { %10882 = vmatprep.subr.bf16.mxu1 %v10881_v60 }
 0x104   :  { %10884 = vmatpush3.bf16.msra.mxu1 %v10881_v60 }
 0x105   :  { %10902 = vmatprep.subr.bf16.mxu1 %v10901_v1 }
 0x1ca   :  { %v9135_v3 = vpop.f32.mrb[2].mxu1 }
 0x1cb   :  { %v286_v5 = vpop.f32.mrb[3].mxu1 }
 0x1cc   :  { %299 = vrot.lane.b32.xlu0 %v286_v5, %s12353_s2 }
 0x1d0   :  { %301 = vrot.lane.b32.xlu0 %v9135_v3, %s12353_s2 }
 0x23e   :  { %v300_v6 = vpop.permute.xlu0 %299 }
 0x23f   :  { %306 = vst.msk [vmem:[#allocation3] sm:$0xff] %vm305_vm2, %v300_v6 }
 0x242   :  { %v302_v7 = vpop.permute.xlu0 %301 }
 0x243   :  { %307 = vst.msk [vmem:[#allocation3 + $0x8] sm:$0xff] %vm305_vm2, %v302_v7  ;;  %vm7626_vm2 = vcmask 7168  }
 0x246   :  { %v308_v10 = vld [vmem:[#allocation3] sm:$0xff] }
 0x247   :  { %9152 = vmatprep.mubr.msk.f32.mxu1 %vm325_vm3, %v308_v10  ;;  %9171 = vmatprep.mubr.msk.f32.mxu0 %vm325_vm3, %v308_v10 }
 0x24a   :  { %v309_v17 = vld [vmem:[#allocation3 + $0x8] sm:$0xff] }
 0x24b   :  { %9153 = vmatmul.mubr.msk.f32.vlgmr.msra.gmra.mrb[4].mxu1 %vm325_vm3, %v309_v17  ;;  %9172 = vmatmul.mubr.msk.f32.vlgmr.msra.gmra.mrb[0].mxu0 %vm325_vm3, %v309_v17 }
 0x24c   :  { %10904 = vmatpush3.bf16.msra.mxu1 %v10901_v1  ;;  %10919 = vmatpush3.bf16.msra.mxu0 %v12603_v13  ;;  %v12779_v1 = vld [vmem:[%s14581_s10] ss:$0 sm:$0xff] }
 0x24d   :  { %9190 = vmatprep.mubr.msk.f32.mxu1 %vm325_vm3, %v308_v10  ;;  %10906 = vmatprep.subr.bf16.mxu1 %v10905_v14 }
 0x24e   :  { %10920 = vmatprep.subr.bf16.mxu0 %v12352_v2  ;;  %9209 = vmatprep.mubr.msk.f32.mxu0 %vm12354_vm4, %v12355_v26 }
 0x250   :  { %10908 = vmatpush3.bf16.msra.mxu1 %v10905_v14  ;;  %10922 = vmatpush3.bf16.msra.mxu0 %v12620_v20  ;;  %v12790_v14 = vld [vmem:[%s14581_s10 + $0x1] ss:$0 sm:$0xff] }
 0x251   :  { %10910 = vmatprep.subr.bf16.mxu1 %v10909_v21  ;;  %10923 = vmatprep.subr.bf16.mxu0 %v12352_v2 }
 0x254   :  { %10912 = vmatpush3.bf16.msra.mxu1 %v10909_v21  ;;  %10925 = vmatpush3.bf16.msra.mxu0 %v12639_v27 }
 0x255   :  { %10914 = vmatprep.subr.bf16.mxu1 %v10913_v28  ;;  %10926 = vmatprep.subr.bf16.mxu0 %v12352_v2 }
 0x258   :  { %10916 = vmatpush3.bf16.msra.mxu1 %v10913_v28  ;;  %10928 = vmatpush3.bf16.msra.mxu0 %v12649_v31  ;;  %v12799_v28 = vld [vmem:[%s14581_s10 + $0x2] ss:$0 sm:$0xff] }
 0x259   :  { %10929 = vmatprep.subr.bf16.mxu1 %v12352_v2  ;;  %10941 = vmatprep.subr.bf16.mxu0 %v12352_v2 }
 0x25b   :  { %9191 = vmatmul.mubr.msk.f32.vlgmr.msra.gmra.mrb[6].mxu1 %vm325_vm3, %v309_v17  ;;  %9210 = vmatmul.mubr.f32.vlgmr.msra.gmra.mrb[2].mxu0 %v12355_v26 }
 0x25c   :  { %10931 = vmatpush3.bf16.msra.mxu1 %v12665_v36  ;;  %10943 = vmatpush3.bf16.msra.mxu0 %v12670_v38 }
 0x25d   :  { %10932 = vmatprep.subr.bf16.mxu1 %v12352_v2  ;;  %9228 = vmatprep.mubr.msk.f32.mxu1 %vm12354_vm4, %v12355_v26 }
 0x25e   :  { %10944 = vmatprep.subr.bf16.mxu0 %v12352_v2  ;;  %9247 = vmatprep.mubr.msk.f32.mxu0 %vm12354_vm4, %v12355_v26 }
 0x260   :  { %10934 = vmatpush3.bf16.msra.mxu1 %v12686_v42  ;;  %10946 = vmatpush3.bf16.msra.mxu0 %v12692_v44 }
 0x261   :  { %10935 = vmatprep.subr.bf16.mxu1 %v12352_v2  ;;  %10947 = vmatprep.subr.bf16.mxu0 %v12352_v2 }
 0x264   :  { %10937 = vmatpush3.bf16.msra.mxu1 %v12710_v48  ;;  %10949 = vmatpush3.bf16.msra.mxu0 %v12716_v50 }
 0x265   :  { %10938 = vmatprep.subr.bf16.mxu1 %v12352_v2  ;;  %10950 = vmatprep.subr.bf16.mxu0 %v12352_v2 }
 0x268   :  { %10940 = vmatpush3.bf16.msra.mxu1 %v12730_v54  ;;  %10952 = vmatpush3.bf16.msra.mxu0 %v12733_v55 }
 0x269   :  { %10953 = vmatprep.subr.bf16.mxu1 %v12352_v2  ;;  %10965 = vmatprep.subr.bf16.mxu0 %v12352_v2 }
 0x26b   :  { %9229 = vmatmul.mubr.f32.vlgmr.msra.gmra.mrb[8].mxu1 %v12355_v26  ;;  %9248 = vmatmul.mubr.f32.vlgmr.msra.gmra.mrb[4].mxu0 %v12355_v26 }
 0x26c   :  { %10955 = vmatpush3.bf16.msra.mxu1 %v12603_v13  ;;  %10967 = vmatpush3.bf16.msra.mxu0 %v12665_v36 }
 0x26d   :  { %10956 = vmatprep.subr.bf16.mxu1 %v12352_v2  ;;  %10968 = vmatprep.subr.bf16.mxu0 %v12352_v2 }
 0x26e   :  { %9266 = vmatprep.mubr.msk.f32.mxu1 %vm12354_vm4, %v12355_v26  ;;  %9285 = vmatprep.mubr.msk.f32.mxu0 %vm12354_vm4, %v12355_v26 }
 0x270   :  { %10958 = vmatpush3.bf16.msra.mxu1 %v12620_v20  ;;  %10970 = vmatpush3.bf16.msra.mxu0 %v12686_v42 }
 0x271   :  { %10959 = vmatprep.subr.bf16.mxu1 %v12352_v2  ;;  %10971 = vmatprep.subr.bf16.mxu0 %v12352_v2 }
 0x274   :  { %10961 = vmatpush3.bf16.msra.mxu1 %v12639_v27  ;;  %10973 = vmatpush3.bf16.msra.mxu0 %v12710_v48 }
 0x275   :  { %10962 = vmatprep.subr.bf16.mxu1 %v12352_v2  ;;  %10974 = vmatprep.subr.bf16.mxu0 %v12352_v2 }
 0x278   :  { %10964 = vmatpush3.bf16.msra.mxu1 %v12649_v31  ;;  %10976 = vmatpush3.bf16.msra.mxu0 %v12730_v54 }
 0x279   :  { %10977 = vmatprep.subr.bf16.mxu1 %v12352_v2  ;;  %10989 = vmatprep.subr.bf16.mxu0 %v12352_v2 }
 0x31e   :  { %v9154_v58 = vpop.f32.mrb[4].mxu1  ;;  %v9173_v59 = vpop.f32.mrb[0].mxu0 }
 0x31f   :  { %v12769_v60 = vadd.f32 %v9154_v58, %v7953_v56  ;;  %v12771_v61 = vadd.f32 %v9173_v59, %v7965_v57  ;;  %v398_v62 = vpop.f32.mrb[5].mxu1  ;;  %v499_v63 = vpop.f32.mrb[1].mxu0 }
 0x320   :  { %v12781_v6 = vadd.f32 %v7953_v56, %v398_v62  ;;  %v12792_v18 = vadd.f32 %v7965_v57, %v499_v63 }
 0x32e   :  { %v9192_v3 = vpop.f32.mrb[6].mxu1  ;;  %v697_v5 = vpop.f32.mrb[2].mxu0 }
 0x32f   :  { %v12783_v7 = vadd.f32 %v9192_v3, %v7986_v0  ;;  %v698_v8 = vadd.f32 %v12779_v1, %v697_v5  ;;  %v602_v9 = vpop.f32.mrb[7].mxu1  ;;  %v9211_v10 = vpop.f32.mrb[3].mxu0 }
 0x330   :  { %v12802_v33 = vadd.f32 %v7986_v0, %v602_v9 }
 0x331   :  { %v853_v11 = vadd.f32 %v698_v8, %v12781_v6 }
 0x333   :  { %v8001_v12 = vmul.f32 -1.442695, %v853_v11 }
 0x335   :  { %12043 = vpow2.f32 %v8001_v12 }
 0x33e   :  { %v773_v15 = vpop.f32.mrb[8].mxu1  ;;  %v849_v16 = vpop.f32.mrb[4].mxu0 }
 0x33f   :  { %v12044_v17 = vpop.eup %12043  ;;  %v774_v19 = vadd.f32 %v12790_v14, %v773_v15  ;;  %v9230_v21 = vpop.f32.mrb[9].mxu1  ;;  %v850_v29 = vadd.f32 %v12799_v28, %v849_v16 }
 0x340   :  { %v9249_v22 = vpop.f32.mrb[5].mxu0  ;;  %v857_v23 = vadd.f32 1.0, %v12044_v17 }
 0x341   :  { %v860_v24 = vadd.f32 %v774_v19, %v12792_v18 }
 0x342   :  { %12045 = vrcp.f32 %v857_v23 }
 0x343   :  { %v8002_v25 = vmul.f32 -1.442695, %v860_v24 }
 0x345   :  { %12047 = vpow2.f32 %v8002_v25 }
 0x34c   :  { %v12046_v30 = vpop.eup %12045 }
 0x34d   :  { %v867_v32 = vmul.f32 %v12046_v30, %v850_v29 }
 0x34f   :  { %v12048_v34 = vpop.eup %12047  ;;  %v868_v37 = vadd.f32 %v867_v32, %v12802_v33 }
 0x350   :  { %v864_v35 = vadd.f32 1.0, %v12048_v34 }
 0x352   :  { %12049 = vrcp.f32 %v864_v35 }
 0x353   :  { %12051 = vtanh.f32 %v868_v37 }
 0x35c   :  { %v12050_v39 = vpop.eup %12049 }
 0x35d   :  { %v870_v40 = vsub.f32 1.0, %v12050_v39  ;;  %v12052_v41 = vpop.eup %12051  ;;  %v872_v43 = vmul.f32 0.0, %v12050_v39 }
 0x35f   :  { %v871_v45 = vmul.f32 %v12052_v41, %v870_v40 }
 0x361   :  { %v873_v46 = vadd.f32 %v872_v43, %v871_v45 }
 0x363   :  { %9267 = vmatmul.mubr.msk.f32.vlgmr.msra.gmra.mrb[10].mxu1 %vm325_vm3, %v873_v46  ;;  %9286 = vmatmul.mubr.msk.f32.vlgmr.msra.gmra.mrb[6].mxu0 %vm325_vm3, %v873_v46  ;;  %875 = vst.msk [vmem:[#allocation2] sm:$0x3] %vm874_vm5, %v873_v46  ;;  %v1119_v17 = vrot.slane %v873_v46, 6 }
 0x364   :  { %877 = vst.msk [vmem:[#allocation2 + $0xe] sm:$0x3] %vm876_vm6, %v873_v46  ;;  %10979 = vmatpush3.bf16.msra.mxu1 %v12670_v38  ;;  %9304 = vmatprep.mubr.msk.f32.mxu1 %vm12354_vm4, %v12355_v26 }
 0x365   :  { %10980 = vmatprep.subr.bf16.mxu1 %v12352_v2  ;;  %10991 = vmatpush3.bf16.msra.mxu0 %v12603_v13 }
 0x366   :  { %10992 = vmatprep.subr.bf16.mxu0 %v12352_v2  ;;  %9323 = vmatprep.mubr.msk.f32.mxu0 %vm12354_vm4, %v12355_v26 }
 0x368   :  { %10982 = vmatpush3.bf16.msra.mxu1 %v12692_v44 }
 0x369   :  { %10983 = vmatprep.subr.bf16.mxu1 %v12352_v2  ;;  %10994 = vmatpush3.bf16.msra.mxu0 %v12620_v20 }
 0x36a   :  { %10995 = vmatprep.subr.bf16.mxu0 %v12352_v2 }
 0x36c   :  { %10985 = vmatpush3.bf16.msra.mxu1 %v12716_v50 }
 0x36d   :  { %10986 = vmatprep.subr.bf16.mxu1 %v12352_v2  ;;  %10997 = vmatpush3.bf16.msra.mxu0 %v12639_v27 }
 0x36e   :  { %10998 = vmatprep.subr.bf16.mxu0 %v12352_v2 }
 0x370   :  { %10988 = vmatpush3.bf16.msra.mxu1 %v12733_v55 }
 0x371   :  { %11001 = vmatprep.subr.bf16.mxu1 %v12352_v2  ;;  %11000 = vmatpush3.bf16.msra.mxu0 %v12649_v31 }
 0x372   :  { %11013 = vmatprep.subr.bf16.mxu0 %v12352_v2 }
 0x373   :  { %9305 = vmatmul.mubr.msk.f32.vlgmr.msra.gmra.mrb[12].mxu1 %vm325_vm3, %v873_v46 }
 0x374   :  { %11003 = vmatpush3.bf16.msra.mxu1 %v12665_v36  ;;  %9342 = vmatprep.mubr.msk.f32.mxu1 %vm12354_vm4, %v12355_v26 }
 0x375   :  { %11004 = vmatprep.subr.bf16.mxu1 %v12352_v2 }
 0x378   :  { %11006 = vmatpush3.bf16.msra.mxu1 %v12686_v42 }
 0x379   :  { %11007 = vmatprep.subr.bf16.mxu1 %v12352_v2 }
 0x37c   :  { %11009 = vmatpush3.bf16.msra.mxu1 %v12710_v48 }
 0x37d   :  { %11010 = vmatprep.subr.bf16.mxu1 %v12352_v2 }
 0x380   :  { %11012 = vmatpush3.bf16.msra.mxu1 %v12730_v54 }
 0x381   :  { %11025 = vmatprep.subr.bf16.mxu1 %v12352_v2 }
 0x436   :  { %v947_v47 = vpop.f32.mrb[10].mxu1  ;;  %v1017_v49 = vpop.f32.mrb[6].mxu0 }
 0x437   :  { %v948_v51 = vadd.f32 %v12779_v1, %v947_v47  ;;  %v1018_v52 = vadd.f32 %v12790_v14, %v1017_v49  ;;  %v9268_v53 = vpop.f32.mrb[11].mxu1  ;;  %v9287_v56 = vpop.f32.mrb[7].mxu0 }
 0x439   :  { %v1092_v57 = vrot.slane %v948_v51, 6  ;;  %v1102_v58 = vrot.slane %v1018_v52, 6 }
 0x43b   :  { %v1094_v59 = vadd.f32 %v1092_v57, %v12781_v6  ;;  %v1104_v62 = vadd.f32 %v1102_v58, %v12792_v18 }
 0x43d   :  { %v8006_v63 = vmul.f32 -1.442695, %v1094_v59  ;;  %v8007_v0 = vmul.f32 -1.442695, %v1104_v62 }
 0x43f   :  { %12053 = vpow2.f32 %v8006_v63 }
 0x440   :  { %12055 = vpow2.f32 %v8007_v0 }
 0x446   :  { %v1087_v3 = vpop.f32.mrb[12].mxu1 }
 0x447   :  { %v9306_v5 = vpop.f32.mrb[13].mxu1  ;;  %v1088_v12 = vadd.f32 %v12799_v28, %v1087_v3 }
 0x449   :  { %v12054_v8 = vpop.eup %12053  ;;  %v1112_v15 = vrot.slane %v1088_v12, 6 }
 0x44a   :  { %v12056_v9 = vpop.eup %12055  ;;  %v1098_v10 = vadd.f32 1.0, %v12054_v8 }
 0x44b   :  { %v1108_v11 = vadd.f32 1.0, %v12056_v9 }
 0x44c   :  { %12057 = vrcp.f32 %v1098_v10 }
 0x44d   :  { %12059 = vrcp.f32 %v1108_v11 }
 0x456   :  { %v12058_v16 = vpop.eup %12057 }
 0x457   :  { %v12060_v19 = vpop.eup %12059  ;;  %v1114_v21 = vmul.f32 %v12058_v16, %v1112_v15 }
 0x458   :  { %v1121_v22 = vmul.f32 %v12060_v19, %v1119_v17  ;;  %v1117_v24 = vsub.f32 1.0, %v12060_v19 }
 0x459   :  { %v1115_v23 = vadd.f32 %v1114_v21, %v12802_v33 }
 0x45b   :  { %12061 = vtanh.f32 %v1115_v23 }
 0x465   :  { %v12062_v25 = vpop.eup %12061 }
 0x466   :  { %v1118_v29 = vmul.f32 %v12062_v25, %v1117_v24 }
 0x468   :  { %v12846_v30 = vadd.f32 %v1121_v22, %v1118_v29 }
 0x46a   :  { %1124 = vst.msk [vmem:[#allocation2] sm:$0xc] %vm1123_vm7, %v12846_v30  ;;  %v1128_v32 = vrot.slane %v12846_v30, 2  ;;  %v1369_v3 = vrot.slane %v12846_v30, 6 }
 0x46b   :  { %1126 = vst.msk [vmem:[#allocation2 + $0xa] sm:$0xc] %vm1125_vm8, %v12846_v30 }
 0x46c   :  { %9324 = vmatmul.mubr.msk.f32.vlgmr.msra.gmra.mrb[8].mxu0 %vm325_vm3, %v1128_v32  ;;  %9343 = vmatmul.mubr.msk.f32.vlgmr.msra.gmra.mrb[14].mxu1 %vm325_vm3, %v1128_v32 }
 0x46d   :  { %11015 = vmatpush3.bf16.msra.mxu0 %v12670_v38  ;;  %9361 = vmatprep.mubr.msk.f32.mxu0 %vm12354_vm4, %v12355_v26 }
 0x46e   :  { %11016 = vmatprep.subr.bf16.mxu0 %v12352_v2  ;;  %11027 = vmatpush3.bf16.msra.mxu1 %v12603_v13 }
 0x46f   :  { %11028 = vmatprep.subr.bf16.mxu1 %v12352_v2  ;;  %9380 = vmatprep.mubr.msk.f32.mxu1 %vm12354_vm4, %v12355_v26 }
 0x471   :  { %11018 = vmatpush3.bf16.msra.mxu0 %v12692_v44 }
 0x472   :  { %11019 = vmatprep.subr.bf16.mxu0 %v12352_v2  ;;  %11030 = vmatpush3.bf16.msra.mxu1 %v12620_v20 }
 0x473   :  { %11031 = vmatprep.subr.bf16.mxu1 %v12352_v2 }
 0x475   :  { %11021 = vmatpush3.bf16.msra.mxu0 %v12716_v50 }
 0x476   :  { %11022 = vmatprep.subr.bf16.mxu0 %v12352_v2  ;;  %11033 = vmatpush3.bf16.msra.mxu1 %v12639_v27 }
 0x477   :  { %11034 = vmatprep.subr.bf16.mxu1 %v12352_v2 }
 0x479   :  { %11024 = vmatpush3.bf16.msra.mxu0 %v12733_v55 }
 0x47a   :  { %11037 = vmatprep.subr.bf16.mxu0 %v12352_v2  ;;  %11036 = vmatpush3.bf16.msra.mxu1 %v12649_v31 }
 0x47b   :  { %11049 = vmatprep.subr.bf16.mxu1 %v12352_v2 }
 0x47c   :  { %9362 = vmatmul.mubr.msk.f32.vlgmr.msra.gmra.mrb[10].mxu0 %vm325_vm3, %v1128_v32 }
 0x47d   :  { %11039 = vmatpush3.bf16.msra.mxu0 %v12665_v36  ;;  %9399 = vmatprep.mubr.msk.f32.mxu0 %vm12354_vm4, %v12355_v26 }
 0x47e   :  { %11040 = vmatprep.subr.bf16.mxu0 %v12352_v2 }
 0x481   :  { %11042 = vmatpush3.bf16.msra.mxu0 %v12686_v42 }
 0x482   :  { %11043 = vmatprep.subr.bf16.mxu0 %v12352_v2 }
 0x485   :  { %11045 = vmatpush3.bf16.msra.mxu0 %v12710_v48 }
 0x486   :  { %11046 = vmatprep.subr.bf16.mxu0 %v12352_v2 }
 0x489   :  { %11048 = vmatpush3.bf16.msra.mxu0 %v12730_v54 }
 0x48a   :  { %11061 = vmatprep.subr.bf16.mxu0 %v12352_v2 }
 0x53f   :  { %v1197_v34 = vpop.f32.mrb[8].mxu0  ;;  %v1267_v35 = vpop.f32.mrb[14].mxu1 }
 0x540   :  { %v1198_v37 = vadd.f32 %v12779_v1, %v1197_v34  ;;  %v1268_v39 = vadd.f32 %v12790_v14, %v1267_v35  ;;  %v9325_v40 = vpop.f32.mrb[9].mxu0  ;;  %v9344_v41 = vpop.f32.mrb[15].mxu1 }
 0x542   :  { %v1342_v43 = vrot.slane %v1198_v37, 4  ;;  %v1352_v45 = vrot.slane %v1268_v39, 4 }
 0x544   :  { %v1344_v46 = vadd.f32 %v1342_v43, %v12781_v6  ;;  %v1354_v47 = vadd.f32 %v1352_v45, %v12792_v18 }
 0x546   :  { %v8011_v49 = vmul.f32 -1.442695, %v1344_v46  ;;  %v8012_v51 = vmul.f32 -1.442695, %v1354_v47 }
 0x548   :  { %12063 = vpow2.f32 %v8011_v49 }
 0x549   :  { %12065 = vpow2.f32 %v8012_v51 }
 0x54f   :  { %v1337_v52 = vpop.f32.mrb[10].mxu0 }
 0x550   :  { %v9363_v53 = vpop.f32.mrb[11].mxu0  ;;  %v1338_v62 = vadd.f32 %v12799_v28, %v1337_v52 }
 0x552   :  { %v12064_v56 = vpop.eup %12063  ;;  %v1362_v63 = vrot.slane %v1338_v62, 4 }
 0x553   :  { %v12066_v57 = vpop.eup %12065  ;;  %v1348_v58 = vadd.f32 1.0, %v12064_v56 }
 0x554   :  { %v1358_v59 = vadd.f32 1.0, %v12066_v57 }
 0x555   :  { %12067 = vrcp.f32 %v1348_v58 }
 0x556   :  { %12069 = vrcp.f32 %v1358_v59 }
 0x55f   :  { %v12068_v0 = vpop.eup %12067 }
 0x560   :  { %v12070_v5 = vpop.eup %12069  ;;  %v1364_v8 = vmul.f32 %v12068_v0, %v1362_v63 }
 0x561   :  { %v1371_v9 = vmul.f32 %v12070_v5, %v1369_v3  ;;  %v1367_v11 = vsub.f32 1.0, %v12070_v5 }
 0x562   :  { %v1365_v10 = vadd.f32 %v1364_v8, %v12802_v33 }
 0x564   :  { %12071 = vtanh.f32 %v1365_v10 }
 0x56e   :  { %v12072_v12 = vpop.eup %12071 }
 0x56f   :  { %v1368_v15 = vmul.f32 %v12072_v12, %v1367_v11 }
 0x571   :  { %v12893_v16 = vadd.f32 %v1371_v9, %v1368_v15 }
 0x573   :  { %1374 = vst.msk [vmem:[#allocation2] sm:$0x30] %vm1373_vm9, %v12893_v16  ;;  %v1378_v17 = vrot.slane %v12893_v16, 4 }
 0x574   :  { %1376 = vst.msk [vmem:[#allocation2 + $0x6] sm:$0x30] %vm1375_vm10, %v12893_v16 }
 0x575   :  { %9381 = vmatmul.mubr.msk.f32.vlgmr.msra.gmra.mrb[16].mxu1 %vm325_vm3, %v1378_v17  ;;  %9400 = vmatmul.mubr.msk.f32.vlgmr.msra.gmra.mrb[12].mxu0 %vm325_vm3, %v1378_v17 }
 0x576   :  { %11051 = vmatpush3.bf16.msra.mxu1 %v12670_v38  ;;  %9418 = vmatprep.mubr.msk.f32.mxu1 %vm12354_vm4, %v12355_v26 }
 0x577   :  { %11052 = vmatprep.subr.bf16.mxu1 %v12352_v2  ;;  %11063 = vmatpush3.bf16.msra.mxu0 %v12603_v13 }
 0x578   :  { %11064 = vmatprep.subr.bf16.mxu0 %v12352_v2  ;;  %9437 = vmatprep.mubr.msk.f32.mxu0 %vm12354_vm4, %v12355_v26 }
 0x57a   :  { %11054 = vmatpush3.bf16.msra.mxu1 %v12692_v44 }
 0x57b   :  { %11055 = vmatprep.subr.bf16.mxu1 %v12352_v2  ;;  %11066 = vmatpush3.bf16.msra.mxu0 %v12620_v20 }
 0x57c   :  { %11067 = vmatprep.subr.bf16.mxu0 %v12352_v2 }
 0x57e   :  { %11057 = vmatpush3.bf16.msra.mxu1 %v12716_v50 }
 0x57f   :  { %11058 = vmatprep.subr.bf16.mxu1 %v12352_v2  ;;  %11069 = vmatpush3.bf16.msra.mxu0 %v12639_v27 }
 0x580   :  { %11070 = vmatprep.subr.bf16.mxu0 %v12352_v2 }
 0x582   :  { %11060 = vmatpush3.bf16.msra.mxu1 %v12733_v55 }
 0x583   :  { %11073 = vmatprep.subr.bf16.mxu1 %v12352_v2  ;;  %11072 = vmatpush3.bf16.msra.mxu0 %v12649_v31 }
 0x584   :  { %11085 = vmatprep.subr.bf16.mxu0 %v12352_v2 }
 0x585   :  { %9419 = vmatmul.mubr.msk.f32.vlgmr.msra.gmra.mrb[18].mxu1 %vm325_vm3, %v1378_v17 }
 0x586   :  { %11075 = vmatpush3.bf16.msra.mxu1 %v12665_v36  ;;  %9456 = vmatprep.mubr.msk.f32.mxu1 %vm12354_vm4, %v12355_v26 }
 0x587   :  { %11076 = vmatprep.subr.bf16.mxu1 %v12352_v2 }
 0x58a   :  { %11078 = vmatpush3.bf16.msra.mxu1 %v12686_v42 }
 0x58b   :  { %11079 = vmatprep.subr.bf16.mxu1 %v12352_v2 }
 0x58e   :  { %11081 = vmatpush3.bf16.msra.mxu1 %v12710_v48 }
 0x58f   :  { %11082 = vmatprep.subr.bf16.mxu1 %v12352_v2 }
 0x592   :  { %11084 = vmatpush3.bf16.msra.mxu1 %v12730_v54 }
 0x593   :  { %11097 = vmatprep.subr.bf16.mxu1 %v12352_v2 }
 0x648   :  { %v1447_v19 = vpop.f32.mrb[16].mxu1  ;;  %v1517_v21 = vpop.f32.mrb[12].mxu0 }
 0x649   :  { %v1448_v22 = vadd.f32 %v12779_v1, %v1447_v19  ;;  %v1518_v23 = vadd.f32 %v12790_v14, %v1517_v21  ;;  %v9382_v24 = vpop.f32.mrb[17].mxu1  ;;  %v9401_v25 = vpop.f32.mrb[13].mxu0 }
 0x64b   :  { %v1592_v29 = vrot.slane %v1448_v22, 2  ;;  %v1602_v30 = vrot.slane %v1518_v23, 2 }
 0x64d   :  { %v1594_v32 = vadd.f32 %v1592_v29, %v12781_v6  ;;  %v1604_v34 = vadd.f32 %v1602_v30, %v12792_v18  ;;  %v1619_v6 = vrot.slane %v12893_v16, 6 }
 0x64f   :  { %v8016_v35 = vmul.f32 -1.442695, %v1594_v32  ;;  %v8017_v37 = vmul.f32 -1.442695, %v1604_v34 }
 0x651   :  { %12073 = vpow2.f32 %v8016_v35 }
 0x652   :  { %12075 = vpow2.f32 %v8017_v37 }
 0x658   :  { %v1587_v39 = vpop.f32.mrb[18].mxu1 }
 0x659   :  { %v9420_v40 = vpop.f32.mrb[19].mxu1  ;;  %v1588_v47 = vadd.f32 %v12799_v28, %v1587_v39 }
 0x65b   :  { %v12074_v41 = vpop.eup %12073  ;;  %v1612_v49 = vrot.slane %v1588_v47, 2 }
 0x65c   :  { %v12076_v43 = vpop.eup %12075  ;;  %v1598_v45 = vadd.f32 1.0, %v12074_v41 }
 0x65d   :  { %v1608_v46 = vadd.f32 1.0, %v12076_v43 }
 0x65e   :  { %12077 = vrcp.f32 %v1598_v45 }
 0x65f   :  { %12079 = vrcp.f32 %v1608_v46 }
 0x668   :  { %v12078_v51 = vpop.eup %12077 }
 0x669   :  { %v12080_v52 = vpop.eup %12079  ;;  %v1614_v18 = vmul.f32 %v12078_v51, %v1612_v49 }
 0x66a   :  { %v1621_v53 = vmul.f32 %v12080_v52, %v1619_v6  ;;  %v1617_v57 = vsub.f32 1.0, %v12080_v52 }
 0x66b   :  { %v1615_v56 = vadd.f32 %v1614_v18, %v12802_v33 }
 0x66d   :  { %12081 = vtanh.f32 %v1615_v56 }
 0x677   :  { %v12082_v58 = vpop.eup %12081 }
 0x678   :  { %v1618_v59 = vmul.f32 %v12082_v58, %v1617_v57 }
 0x67a   :  { %v1622_v62 = vadd.f32 %v1621_v53, %v1618_v59 }
 0x67c   :  { %1624 = vst.msk [vmem:[#allocation2] sm:$0xc0] %vm1623_vm11, %v1622_v62  ;;  %v1628_v63 = vrot.slane %v1622_v62, 6 }
 0x67d   :  { %1626 = vst.msk [vmem:[#allocation2 + $0x2] sm:$0xc0] %vm1625_vm12, %v1622_v62 }
 0x67e   :  { %9438 = vmatmul.mubr.msk.f32.vlgmr.msra.gmra.mrb[14].mxu0 %vm325_vm3, %v1628_v63  ;;  %9457 = vmatmul.mubr.msk.f32.vlgmr.msra.gmra.mrb[20].mxu1 %vm325_vm3, %v1628_v63 }
 0x67f   :  { %11087 = vmatpush3.bf16.msra.mxu0 %v12670_v38  ;;  %9475 = vmatprep.mubr.msk.f32.mxu0 %vm12354_vm4, %v12355_v26 }
 0x680   :  { %11088 = vmatprep.subr.bf16.mxu0 %v12352_v2  ;;  %11099 = vmatpush3.bf16.msra.mxu1 %v12603_v13 }
 0x681   :  { %11100 = vmatprep.subr.bf16.mxu1 %v12352_v2  ;;  %9494 = vmatprep.mubr.msk.f32.mxu1 %vm12354_vm4, %v12355_v26 }
 0x683   :  { %11090 = vmatpush3.bf16.msra.mxu0 %v12692_v44 }
 0x684   :  { %11091 = vmatprep.subr.bf16.mxu0 %v12352_v2  ;;  %11102 = vmatpush3.bf16.msra.mxu1 %v12620_v20 }
 0x685   :  { %11103 = vmatprep.subr.bf16.mxu1 %v12352_v2 }
 0x687   :  { %11093 = vmatpush3.bf16.msra.mxu0 %v12716_v50 }
 0x688   :  { %11094 = vmatprep.subr.bf16.mxu0 %v12352_v2  ;;  %11105 = vmatpush3.bf16.msra.mxu1 %v12639_v27 }
 0x689   :  { %11106 = vmatprep.subr.bf16.mxu1 %v12352_v2 }
 0x68b   :  { %11096 = vmatpush3.bf16.msra.mxu0 %v12733_v55 }
 0x68c   :  { %11109 = vmatprep.subr.bf16.mxu0 %v12352_v2  ;;  %11108 = vmatpush3.bf16.msra.mxu1 %v12649_v31 }
 0x68d   :  { %11121 = vmatprep.subr.bf16.mxu1 %v12352_v2 }
 0x68e   :  { %9476 = vmatmul.mubr.msk.f32.vlgmr.msra.gmra.mrb[16].mxu0 %vm325_vm3, %v1628_v63 }
 0x68f   :  { %11111 = vmatpush3.bf16.msra.mxu0 %v12665_v36  ;;  %9513 = vmatprep.mubr.msk.f32.mxu0 %vm12354_vm4, %v12355_v26 }
 0x690   :  { %11112 = vmatprep.subr.bf16.mxu0 %v12352_v2 }
 0x693   :  { %11114 = vmatpush3.bf16.msra.mxu0 %v12686_v42 }
 0x694   :  { %11115 = vmatprep.subr.bf16.mxu0 %v12352_v2 }
 0x697   :  { %11117 = vmatpush3.bf16.msra.mxu0 %v12710_v48 }
 0x698   :  { %11118 = vmatprep.subr.bf16.mxu0 %v12352_v2 }
 0x69b   :  { %11120 = vmatpush3.bf16.msra.mxu0 %v12730_v54 }
 0x69c   :  { %11133 = vmatprep.subr.bf16.mxu0 %v12352_v2 }
 0x751   :  { %v1697_v33 = vpop.f32.mrb[14].mxu0  ;;  %v1767_v0 = vpop.f32.mrb[20].mxu1 }
 0x752   :  { %v1698_v3 = vadd.f32 %v12779_v1, %v1697_v33  ;;  %v9439_v5 = vpop.f32.mrb[15].mxu0  ;;  %v9458_v8 = vpop.f32.mrb[21].mxu1  ;;  %v1768_v9 = vadd.f32 %v12790_v14, %v1767_v0 }
 0x754   :  { %v1841_v10 = vadd.f32 %v1698_v3, %v12769_v60  ;;  %v1848_v12 = vadd.f32 %v1768_v9, %v12771_v61 }
 0x756   :  { %v8021_v11 = vmul.f32 -1.442695, %v1841_v10  ;;  %v8022_v15 = vmul.f32 -1.442695, %v1848_v12 }
 0x758   :  { %12083 = vpow2.f32 %v8021_v11 }
 0x759   :  { %12085 = vpow2.f32 %v8022_v15 }
 0x761   :  { %v1837_v16 = vpop.f32.mrb[16].mxu0 }
 0x762   :  { %v12084_v17 = vpop.eup %12083  ;;  %v9477_v19 = vpop.f32.mrb[17].mxu0  ;;  %v1838_v24 = vadd.f32 %v12799_v28, %v1837_v16 }
 0x763   :  { %v1845_v21 = vadd.f32 1.0, %v12084_v17  ;;  %v12086_v22 = vpop.eup %12085 }
 0x764   :  { %v1852_v23 = vadd.f32 1.0, %v12086_v22 }
 0x765   :  { %12087 = vrcp.f32 %v1845_v21 }
 0x766   :  { %12089 = vrcp.f32 %v1852_v23 }
 0x76f   :  { %v12088_v25 = vpop.eup %12087 }
 0x770   :  { %v1855_v29 = vmul.f32 %v12088_v25, %v1838_v24  ;;  %v12090_v32 = vpop.eup %12089 }
 0x771   :  { %v1858_v34 = vsub.f32 1.0, %v12090_v32  ;;  %v1861_v37 = vmul.f32 %v12090_v32, %v1628_v63 }
 0x772   :  { %v1856_v30 = vadd.f32 %v1855_v29, %v12783_v7 }
 0x774   :  { %12091 = vtanh.f32 %v1856_v30 }
 0x77e   :  { %v12092_v35 = vpop.eup %12091 }
 0x77f   :  { %v1859_v39 = vmul.f32 %v12092_v35, %v1858_v34 }
 0x781   :  { %v1862_v40 = vadd.f32 %v1861_v37, %v1859_v39 }
 0x783   :  { %1863 = vst.msk [vmem:[#allocation2 + $0x8] sm:$0x3] %vm874_vm5, %v1862_v40  ;;  %9495 = vmatmul.mubr.msk.f32.vlgmr.msra.gmra.mrb[22].mxu1 %vm325_vm3, %v1862_v40  ;;  %9514 = vmatmul.mubr.msk.f32.vlgmr.msra.gmra.mrb[18].mxu0 %vm325_vm3, %v1862_v40  ;;  %v2106_v8 = vrot.slane %v1862_v40, 6 }
 0x784   :  { %1864 = vst.msk [vmem:[#allocation2 + $0x6] sm:$0x3] %vm876_vm6, %v1862_v40  ;;  %11123 = vmatpush3.bf16.msra.mxu1 %v12670_v38  ;;  %9532 = vmatprep.mubr.msk.f32.mxu1 %vm12354_vm4, %v12355_v26 }
 0x785   :  { %11124 = vmatprep.subr.bf16.mxu1 %v12352_v2  ;;  %11135 = vmatpush3.bf16.msra.mxu0 %v12603_v13 }
 0x786   :  { %11136 = vmatprep.subr.bf16.mxu0 %v12352_v2  ;;  %9551 = vmatprep.mubr.msk.f32.mxu0 %vm12354_vm4, %v12355_v26 }
 0x788   :  { %11126 = vmatpush3.bf16.msra.mxu1 %v12692_v44 }
 0x789   :  { %11127 = vmatprep.subr.bf16.mxu1 %v12352_v2  ;;  %11138 = vmatpush3.bf16.msra.mxu0 %v12620_v20 }
 0x78a   :  { %11139 = vmatprep.subr.bf16.mxu0 %v12352_v2 }
 0x78c   :  { %11129 = vmatpush3.bf16.msra.mxu1 %v12716_v50 }
 0x78d   :  { %11130 = vmatprep.subr.bf16.mxu1 %v12352_v2  ;;  %11141 = vmatpush3.bf16.msra.mxu0 %v12639_v27 }
 0x78e   :  { %11142 = vmatprep.subr.bf16.mxu0 %v12352_v2 }
 0x790   :  { %11132 = vmatpush3.bf16.msra.mxu1 %v12733_v55 }
 0x791   :  { %11145 = vmatprep.subr.bf16.mxu1 %v12352_v2  ;;  %11144 = vmatpush3.bf16.msra.mxu0 %v12649_v31 }
 0x792   :  { %11157 = vmatprep.subr.bf16.mxu0 %v12352_v2 }
 0x793   :  { %9533 = vmatmul.mubr.msk.f32.vlgmr.msra.gmra.mrb[24].mxu1 %vm325_vm3, %v1862_v40 }
 0x794   :  { %11147 = vmatpush3.bf16.msra.mxu1 %v12665_v36  ;;  %9570 = vmatprep.mubr.msk.f32.mxu1 %vm12354_vm4, %v12355_v26 }
 0x795   :  { %11148 = vmatprep.subr.bf16.mxu1 %v12352_v2 }
 0x798   :  { %11150 = vmatpush3.bf16.msra.mxu1 %v12686_v42 }
 0x799   :  { %11151 = vmatprep.subr.bf16.mxu1 %v12352_v2 }
 0x79c   :  { %11153 = vmatpush3.bf16.msra.mxu1 %v12710_v48 }
 0x79d   :  { %11154 = vmatprep.subr.bf16.mxu1 %v12352_v2 }
 0x7a0   :  { %11156 = vmatpush3.bf16.msra.mxu1 %v12730_v54 }
 0x7a1   :  { %11169 = vmatprep.subr.bf16.mxu1 %v12352_v2 }
 0x856   :  { %v1934_v41 = vpop.f32.mrb[22].mxu1  ;;  %v2004_v43 = vpop.f32.mrb[18].mxu0 }
 0x857   :  { %v1935_v45 = vadd.f32 %v12779_v1, %v1934_v41  ;;  %v2005_v46 = vadd.f32 %v12790_v14, %v2004_v43  ;;  %v9496_v47 = vpop.f32.mrb[23].mxu1  ;;  %v9515_v49 = vpop.f32.mrb[19].mxu0 }
 0x859   :  { %v2079_v51 = vrot.slane %v1935_v45, 6  ;;  %v2089_v6 = vrot.slane %v2005_v46, 6 }
 0x85b   :  { %v2081_v52 = vadd.f32 %v2079_v51, %v12769_v60  ;;  %v2091_v18 = vadd.f32 %v2089_v6, %v12771_v61 }
 0x85d   :  { %v8026_v53 = vmul.f32 -1.442695, %v2081_v52  ;;  %v8027_v56 = vmul.f32 -1.442695, %v2091_v18 }
 0x85f   :  { %12093 = vpow2.f32 %v8026_v53 }
 0x860   :  { %12095 = vpow2.f32 %v8027_v56  ;;  %v12299_v56 = vld [vmem:[%s14608_s26] sm:$0xff] }
 0x866   :  { %v2074_v57 = vpop.f32.mrb[24].mxu1 }
 0x867   :  { %v9534_v58 = vpop.f32.mrb[25].mxu1  ;;  %v2075_v0 = vadd.f32 %v12799_v28, %v2074_v57 }
 0x869   :  { %v12094_v59 = vpop.eup %12093  ;;  %v2099_v3 = vrot.slane %v2075_v0, 6 }
 0x86a   :  { %v12096_v62 = vpop.eup %12095  ;;  %v2085_v63 = vadd.f32 1.0, %v12094_v59 }
 0x86b   :  { %v2095_v33 = vadd.f32 1.0, %v12096_v62 }
 0x86c   :  { %12097 = vrcp.f32 %v2085_v63 }
 0x86d   :  { %12099 = vrcp.f32 %v2095_v33 }
 0x876   :  { %v12098_v5 = vpop.eup %12097 }
 0x877   :  { %v12100_v9 = vpop.eup %12099  ;;  %v2101_v10 = vmul.f32 %v12098_v5, %v2099_v3 }
 0x878   :  { %v2108_v11 = vmul.f32 %v12100_v9, %v2106_v8  ;;  %v2104_v15 = vsub.f32 1.0, %v12100_v9 }
 0x879   :  { %v2102_v12 = vadd.f32 %v2101_v10, %v12783_v7 }
 0x87b   :  { %12101 = vtanh.f32 %v2102_v12 }
 0x885   :  { %v12102_v16 = vpop.eup %12101 }
 0x886   :  { %v2105_v17 = vmul.f32 %v12102_v16, %v2104_v15 }
 0x888   :  { %v2109_v19 = vadd.f32 %v2108_v11, %v2105_v17 }
 0x88a   :  { %2110 = vst.msk [vmem:[#allocation2 + $0x8] sm:$0xc] %vm1123_vm7, %v2109_v19  ;;  %v2113_v21 = vrot.slane %v2109_v19, 2  ;;  %v2354_v43 = vrot.slane %v2109_v19, 6 }
 0x88b   :  { %2111 = vst.msk [vmem:[#allocation2 + $0x2] sm:$0xc] %vm1125_vm8, %v2109_v19 }
 0x88c   :  { %9552 = vmatmul.mubr.msk.f32.vlgmr.msra.gmra.mrb[20].mxu0 %vm325_vm3, %v2113_v21  ;;  %9571 = vmatmul.mubr.msk.f32.vlgmr.msra.gmra.mrb[26].mxu1 %vm325_vm3, %v2113_v21 }
 0x88d   :  { %11159 = vmatpush3.bf16.msra.mxu0 %v12670_v38  ;;  %9589 = vmatprep.mubr.msk.f32.mxu0 %vm12354_vm4, %v12355_v26 }
 0x88e   :  { %11160 = vmatprep.subr.bf16.mxu0 %v12352_v2  ;;  %11171 = vmatpush3.bf16.msra.mxu1 %v12603_v13 }
 0x88f   :  { %11172 = vmatprep.subr.bf16.mxu1 %v12352_v2  ;;  %9608 = vmatprep.mubr.msk.f32.mxu1 %vm12354_vm4, %v12355_v26 }
 0x891   :  { %11162 = vmatpush3.bf16.msra.mxu0 %v12692_v44 }
 0x892   :  { %11163 = vmatprep.subr.bf16.mxu0 %v12352_v2  ;;  %11174 = vmatpush3.bf16.msra.mxu1 %v12620_v20 }
 0x893   :  { %11175 = vmatprep.subr.bf16.mxu1 %v12352_v2 }
 0x895   :  { %11165 = vmatpush3.bf16.msra.mxu0 %v12716_v50 }
 0x896   :  { %11166 = vmatprep.subr.bf16.mxu0 %v12352_v2  ;;  %11177 = vmatpush3.bf16.msra.mxu1 %v12639_v27 }
 0x897   :  { %11178 = vmatprep.subr.bf16.mxu1 %v12352_v2 }
 0x899   :  { %11168 = vmatpush3.bf16.msra.mxu0 %v12733_v55 }
 0x89a   :  { %11181 = vmatprep.subr.bf16.mxu0 %v12352_v2  ;;  %11180 = vmatpush3.bf16.msra.mxu1 %v12649_v31 }
 0x89b   :  { %11193 = vmatprep.subr.bf16.mxu1 %v12352_v2 }
 0x89c   :  { %9590 = vmatmul.mubr.msk.f32.vlgmr.msra.gmra.mrb[22].mxu0 %vm325_vm3, %v2113_v21 }
 0x89d   :  { %11183 = vmatpush3.bf16.msra.mxu0 %v12665_v36  ;;  %9627 = vmatprep.mubr.msk.f32.mxu0 %vm12354_vm4, %v12355_v26 }
 0x89e   :  { %11184 = vmatprep.subr.bf16.mxu0 %v12352_v2 }
 0x8a1   :  { %11186 = vmatpush3.bf16.msra.mxu0 %v12686_v42 }
 0x8a2   :  { %11187 = vmatprep.subr.bf16.mxu0 %v12352_v2 }
 0x8a5   :  { %11189 = vmatpush3.bf16.msra.mxu0 %v12710_v48 }
 0x8a6   :  { %11190 = vmatprep.subr.bf16.mxu0 %v12352_v2 }
 0x8a9   :  { %11192 = vmatpush3.bf16.msra.mxu0 %v12730_v54 }
 0x95f   :  { %v2182_v13 = vpop.f32.mrb[20].mxu0  ;;  %v2252_v20 = vpop.f32.mrb[26].mxu1 }
 0x960   :  { %v2183_v27 = vadd.f32 %v12779_v1, %v2182_v13  ;;  %v2253_v31 = vadd.f32 %v12790_v14, %v2252_v20  ;;  %v9553_v36 = vpop.f32.mrb[21].mxu0  ;;  %v9572_v22 = vpop.f32.mrb[27].mxu1 }
 0x961   :  { %v12300_v36 = vld [vmem:[%s14608_s26 + $0x8] sm:$0xff]  ;;  %v2707_v22 = vld [vmem:[%s14578_s7] sm:$0xff] }
 0x962   :  { %v2327_v23 = vrot.slane %v2183_v27, 4  ;;  %v2337_v24 = vrot.slane %v2253_v31, 4 }
 0x964   :  { %v2329_v42 = vadd.f32 %v2327_v23, %v12769_v60  ;;  %v2339_v25 = vadd.f32 %v2337_v24, %v12771_v61  ;;  %v2708_v23 = vld [vmem:[%s14578_s7 + $0x8] sm:$0xff]  ;;  %v8051_v24 = vld [vmem:[%s14578_s7 + $0x80] sm:$0xff] }
 0x966   :  { %v8031_v29 = vmul.f32 -1.442695, %v2329_v42  ;;  %v8032_v48 = vmul.f32 -1.442695, %v2339_v25  ;;  %v11209_v42 = vpack.c.bf16 %v2708_v23, %v2707_v22  ;;  %v8052_v25 = vld [vmem:[%s14578_s7 + $0x88] sm:$0xff] }
 0x968   :  { %12103 = vpow2.f32 %v8031_v29  ;;  %v2709_v29 = vld [vmem:[%s14578_s7 + $0x10] sm:$0xff] }
 0x969   :  { %12105 = vpow2.f32 %v8032_v48  ;;  %v2710_v48 = vld [vmem:[%s14578_s7 + $0x18] sm:$0xff] }
 0x96f   :  { %v2322_v30 = vpop.f32.mrb[22].mxu0 }
 0x970   :  { %v9591_v54 = vpop.f32.mrb[23].mxu0  ;;  %v2323_v39 = vadd.f32 %v12799_v28, %v2322_v30  ;;  %v11241_v30 = vpack.c.bf16 %v8052_v25, %v8051_v24  ;;  %v8044_v24 = vld [vmem:[%s14579_s8 + $0xd0] sm:$0xff] }
 0x971   :  { %v11213_v54 = vpack.c.bf16 %v2710_v48, %v2709_v29  ;;  %v8082_v29 = vld [vmem:[%s14578_s7 + $0x120] sm:$0xff]  ;;  %v8083_v48 = vld [vmem:[%s14578_s7 + $0x128] sm:$0xff] }
 0x972   :  { %v12104_v32 = vpop.eup %12103  ;;  %v2347_v40 = vrot.slane %v2323_v39, 4  ;;  %v2712_v39 = vld [vmem:[%s14578_s7 + $0x28] sm:$0xff] }
 0x973   :  { %v12106_v34 = vpop.eup %12105  ;;  %v2333_v35 = vadd.f32 1.0, %v12104_v32  ;;  %v8053_v32 = vld [vmem:[%s14578_s7 + $0x90] sm:$0xff] }
 0x974   :  { %v2343_v37 = vadd.f32 1.0, %v12106_v34  ;;  %v8054_v34 = vld [vmem:[%s14578_s7 + $0x98] sm:$0xff] }
 0x975   :  { %12107 = vrcp.f32 %v2333_v35  ;;  %v2711_v35 = vld [vmem:[%s14578_s7 + $0x20] sm:$0xff] }
 0x976   :  { %12109 = vrcp.f32 %v2343_v37  ;;  %v11245_v37 = vpack.c.bf16 %v8054_v34, %v8053_v32  ;;  %v8046_v32 = vld [vmem:[%s14579_s8 + $0xe0] sm:$0xff]  ;;  %v8047_v34 = vld [vmem:[%s14579_s8 + $0xe8] sm:$0xff] }
 0x97f   :  { %v12108_v41 = vpop.eup %12107 }
 0x980   :  { %v12110_v45 = vpop.eup %12109  ;;  %v2349_v46 = vmul.f32 %v12108_v41, %v2347_v40  ;;  %v8055_v40 = vld [vmem:[%s14578_s7 + $0xa0] sm:$0xff]  ;;  %v8056_v41 = vld [vmem:[%s14578_s7 + $0xa8] sm:$0xff] }
 0x981   :  { %v2356_v47 = vmul.f32 %v12110_v45, %v2354_v43  ;;  %v2352_v51 = vsub.f32 1.0, %v12110_v45  ;;  %v11217_v43 = vpack.c.bf16 %v2712_v39, %v2711_v35  ;;  %v11249_v45 = vpack.c.bf16 %v8056_v41, %v8055_v40  ;;  %v8084_v35 = vld [vmem:[%s14578_s7 + $0x130] sm:$0xff] }
 0x982   :  { %v2350_v49 = vadd.f32 %v2349_v46, %v12783_v7  ;;  %v2713_v46 = vld [vmem:[%s14578_s7 + $0x30] sm:$0xff]  ;;  %v13256_v39 = vpack.c.bf16 %v8047_v34, %v8046_v32 }
 0x983   :  { %v8048_v41 = vld [vmem:[%s14579_s8 + $0xf0] sm:$0xff] }
 0x984   :  { %12111 = vtanh.f32 %v2350_v49  ;;  %v8057_v49 = vld [vmem:[%s14578_s7 + $0xb0] sm:$0xff] }
 0x98e   :  { %v12112_v6 = vpop.eup %12111 }
 0x98f   :  { %v2353_v52 = vmul.f32 %v12112_v6, %v2352_v51  ;;  %v8058_v51 = vld [vmem:[%s14578_s7 + $0xb8] sm:$0xff] }
 0x991   :  { %v2357_v18 = vadd.f32 %v2356_v47, %v2353_v52  ;;  %v2714_v47 = vld [vmem:[%s14578_s7 + $0x38] sm:$0xff]  ;;  %v11253_v52 = vpack.c.bf16 %v8058_v51, %v8057_v49  ;;  %v8069_v51 = vld [vmem:[%s14579_s8 + $0x100] sm:$0xff] }
 0x992   :  { %v11221_v6 = vpack.c.bf16 %v2714_v47, %v2713_v46  ;;  %v8087_v46 = vld [vmem:[%s14578_s7 + $0x148] sm:$0xff] }
 0x993   :  { %2358 = vst.msk [vmem:[#allocation2 + $0x8] sm:$0x30] %vm1373_vm9, %v2357_v18  ;;  %v2361_v53 = vrot.slane %v2357_v18, 4  ;;  %v2602_v16 = vrot.slane %v2357_v18, 6 }
 0x994   :  { %2359 = vst.msk [vmem:[#allocation2 - $0x2] sm:$0x30] %vm1375_vm10, %v2357_v18  ;;  %v2715_v18 = vld [vmem:[%s14578_s7 + $0x40] sm:$0xff] }
 0x995   :  { %9609 = vmatmul.mubr.msk.f32.vlgmr.msra.gmra.mrb[28].mxu1 %vm325_vm3, %v2361_v53  ;;  %9628 = vmatmul.mubr.msk.f32.vlgmr.msra.gmra.mrb[24].mxu0 %vm325_vm3, %v2361_v53 }
 0x996   :  { %11195 = vmatpush3.bf16.msra.mxu1 %v12670_v38  ;;  %9646 = vmatprep.mubr.msk.f32.mxu1 %vm12354_vm4, %v12355_v26 }
 0x997   :  { %11196 = vmatprep.subr.bf16.mxu1 %v12352_v2  ;;  %9653 = vmatprep.mubr.msk.f32.mxu0 %vm213_vm1, %v12299_v56  ;;  %v8059_v56 = vld [vmem:[%s14578_s7 + $0xc0] sm:$0xff] }
 0x99a   :  { %11198 = vmatpush3.bf16.msra.mxu1 %v12692_v44 }
 0x99b   :  { %11199 = vmatprep.subr.bf16.mxu1 %v12352_v2 }
 0x99e   :  { %11201 = vmatpush3.bf16.msra.mxu1 %v12716_v50 }
 0x99f   :  { %11202 = vmatprep.subr.bf16.mxu1 %v12352_v2 }
 0x9a2   :  { %11204 = vmatpush3.bf16.msra.mxu1 %v12733_v55 }
 0x9a3   :  { %11242 = vmatprep.subr.bf16.mxu1 %v11241_v30 }
 0x9a5   :  { %9647 = vmatmul.mubr.msk.f32.vlgmr.msra.gmra.mrb[30].mxu1 %vm325_vm3, %v2361_v53  ;;  %v2716_v53 = vld [vmem:[%s14578_s7 + $0x48] sm:$0xff] }
 0x9a6   :  { %11244 = vmatpush3.bf16.msra.mxu1 %v11241_v30 }
 0x9a7   :  { %11246 = vmatprep.subr.bf16.mxu1 %v11245_v37 }
 0x9aa   :  { %11248 = vmatpush3.bf16.msra.mxu1 %v11245_v37  ;;  %v8085_v37 = vld [vmem:[%s14578_s7 + $0x138] sm:$0xff] }
 0x9ab   :  { %11250 = vmatprep.subr.bf16.mxu1 %v11249_v45  ;;  %v11285_v40 = vpack.c.bf16 %v8085_v37, %v8084_v35  ;;  %v8095_v35 = vld [vmem:[%s14580_s9 + $0x5] ss:$0 sm:$0xff]  ;;  %v13429_v37 = vld [vmem:[%s14581_s10 + $0x4] ss:$0 sm:$0xff] }
 0x9ae   :  { %11252 = vmatpush3.bf16.msra.mxu1 %v11249_v45  ;;  %v8086_v45 = vld [vmem:[%s14578_s7 + $0x140] sm:$0xff] }
 0x9af   :  { %11254 = vmatprep.subr.bf16.mxu1 %v11253_v52  ;;  %v11289_v49 = vpack.c.bf16 %v8087_v46, %v8086_v45 }
 0x9b2   :  { %11256 = vmatpush3.bf16.msra.mxu1 %v11253_v52  ;;  %v8088_v52 = vld [vmem:[%s14578_s7 + $0x150] sm:$0xff] }
 0xa68   :  { %v2430_v38 = vpop.f32.mrb[28].mxu1  ;;  %v2500_v57 = vpop.f32.mrb[24].mxu0 }
 0xa69   :  { %v2431_v58 = vadd.f32 %v12779_v1, %v2430_v38  ;;  %v2501_v59 = vadd.f32 %v12790_v14, %v2500_v57  ;;  %v9610_v62 = vpop.f32.mrb[29].mxu1  ;;  %v9629_v63 = vpop.f32.mrb[25].mxu0  ;;  %v8060_v38 = vld [vmem:[%s14578_s7 + $0xc8] sm:$0xff]  ;;  %v11225_v57 = vpack.c.bf16 %v2716_v53, %v2715_v18  ;;  %v8089_v18 = vld [vmem:[%s14578_s7 + $0x158] sm:$0xff] }
 0xa6a   :  { %v2718_v62 = vld [vmem:[%s14578_s7 + $0x58] sm:$0xff]  ;;  %v8061_v63 = vld [vmem:[%s14578_s7 + $0xd0] sm:$0xff] }
 0xa6b   :  { %v2575_v33 = vrot.slane %v2431_v58, 2  ;;  %v2585_v44 = vrot.slane %v2501_v59, 2  ;;  %v11257_v58 = vpack.c.bf16 %v8060_v38, %v8059_v56  ;;  %v2717_v59 = vld [vmem:[%s14578_s7 + $0x50] sm:$0xff]  ;;  %v11293_v56 = vpack.c.bf16 %v8089_v18, %v8088_v52 }
 0xa6c   :  { %v8071_v38 = vld [vmem:[%s14579_s8 + $0x110] sm:$0xff] }
 0xa6d   :  { %v2577_v0 = vadd.f32 %v2575_v33, %v12769_v60  ;;  %v2587_v50 = vadd.f32 %v2585_v44, %v12771_v61  ;;  %v8062_v33 = vld [vmem:[%s14578_s7 + $0xd8] sm:$0xff]  ;;  %v11229_v44 = vpack.c.bf16 %v2718_v62, %v2717_v59  ;;  %11258 = vmatprep.subr.bf16.mxu1 %v11257_v58  ;;  %v8091_v59 = vld [vmem:[%s14578_s7 + $0x168] sm:$0xff] }
 0xa6e   :  { %11260 = vmatpush3.bf16.msra.mxu1 %v11257_v58  ;;  %v8090_v58 = vld [vmem:[%s14578_s7 + $0x160] sm:$0xff] }
 0xa6f   :  { %v8036_v3 = vmul.f32 -1.442695, %v2577_v0  ;;  %v8037_v5 = vmul.f32 -1.442695, %v2587_v50  ;;  %v11261_v0 = vpack.c.bf16 %v8062_v33, %v8061_v63  ;;  %v2719_v50 = vld [vmem:[%s14578_s7 + $0x60] sm:$0xff]  ;;  %v11297_v63 = vpack.c.bf16 %v8091_v59, %v8090_v58 }
 0xa70   :  { %v8073_v33 = vld [vmem:[%s14579_s8 + $0x120] sm:$0xff] }
 0xa71   :  { %12113 = vpow2.f32 %v8036_v3  ;;  %11262 = vmatprep.subr.bf16.mxu1 %v11261_v0  ;;  %v2720_v3 = vld [vmem:[%s14578_s7 + $0x68] sm:$0xff] }
 0xa72   :  { %12115 = vpow2.f32 %v8037_v5  ;;  %11264 = vmatpush3.bf16.msra.mxu1 %v11261_v0  ;;  %v8063_v5 = vld [vmem:[%s14578_s7 + $0xe0] sm:$0xff]  ;;  %v8092_v0 = vld [vmem:[%s14578_s7 + $0x170] sm:$0xff] }
 0xa78   :  { %v2570_v55 = vpop.f32.mrb[30].mxu1 }
 0xa79   :  { %v9648_v8 = vpop.f32.mrb[31].mxu1  ;;  %v2571_v14 = vadd.f32 %v12799_v28, %v2570_v55  ;;  %v11233_v55 = vpack.c.bf16 %v2720_v3, %v2719_v50  ;;  %v8093_v50 = vld [vmem:[%s14578_s7 + $0x178] sm:$0xff] }
 0xa7a   :  { %v8064_v8 = vld [vmem:[%s14578_s7 + $0xe8] sm:$0xff] }
 0xa7b   :  { %v12114_v9 = vpop.eup %12113  ;;  %v2595_v12 = vrot.slane %v2571_v14, 2 }
 0xa7c   :  { %v12116_v10 = vpop.eup %12115  ;;  %v2581_v11 = vadd.f32 1.0, %v12114_v9  ;;  %v11265_v9 = vpack.c.bf16 %v8064_v8, %v8063_v5  ;;  %v11301_v5 = vpack.c.bf16 %v8093_v50, %v8092_v0  ;;  %v8076_v8 = vld [vmem:[%s14579_s8 + $0x138] sm:$0xff] }
 0xa7d   :  { %v2591_v1 = vadd.f32 1.0, %v12116_v10  ;;  %v2721_v10 = vld [vmem:[%s14578_s7 + $0x70] sm:$0xff] }
 0xa7e   :  { %12117 = vrcp.f32 %v2581_v11  ;;  %11266 = vmatprep.subr.bf16.mxu1 %v11265_v9  ;;  %v2722_v11 = vld [vmem:[%s14578_s7 + $0x78] sm:$0xff] }
 0xa7f   :  { %12119 = vrcp.f32 %v2591_v1  ;;  %v8065_v1 = vld [vmem:[%s14578_s7 + $0xf0] sm:$0xff]  ;;  %11268 = vmatpush3.bf16.msra.mxu1 %v11265_v9  ;;  %v11237_v14 = vpack.c.bf16 %v2722_v11, %v2721_v10  ;;  %v8096_v10 = vld [vmem:[%s14579_s8 + $0x140] sm:$0xff]  ;;  %v8097_v11 = vld [vmem:[%s14579_s8 + $0x148] sm:$0xff] }
 0xa88   :  { %v12118_v15 = vpop.eup %12117 }
 0xa89   :  { %v12120_v60 = vpop.eup %12119  ;;  %v2597_v17 = vmul.f32 %v12118_v15, %v2595_v12  ;;  %v8066_v12 = vld [vmem:[%s14578_s7 + $0xf8] sm:$0xff] }
 0xa8a   :  { %v2604_v61 = vmul.f32 %v12120_v60, %v2602_v16  ;;  %v2600_v21 = vsub.f32 1.0, %v12120_v60  ;;  %v11269_v15 = vpack.c.bf16 %v8066_v12, %v8065_v1  ;;  %v8078_v16 = vld [vmem:[%s14578_s7 + $0x100] sm:$0xff]  ;;  %v8079_v60 = vld [vmem:[%s14578_s7 + $0x108] sm:$0xff]  ;;  %v13343_v1 = vpack.c.bf16 %v8097_v11, %v8096_v10  ;;  %v8099_v12 = vld [vmem:[%s14579_s8 + $0x158] sm:$0xff] }
 0xa8b   :  { %v2598_v19 = vadd.f32 %v2597_v17, %v12783_v7  ;;  %v11273_v17 = vpack.c.bf16 %v8079_v60, %v8078_v16  ;;  %v8100_v16 = vld [vmem:[%s14579_s8 + $0x160] sm:$0xff]  ;;  %v8101_v60 = vld [vmem:[%s14579_s8 + $0x168] sm:$0xff] }
 0xa8c   :  { %11270 = vmatprep.subr.bf16.mxu1 %v11269_v15 }
 0xa8d   :  { %12121 = vtanh.f32 %v2598_v19  ;;  %11272 = vmatpush3.bf16.msra.mxu1 %v11269_v15 }
 0xa8e   :  { %11305 = vmatprep.subr.bf16.mxu1 %v12352_v2 }
 0xa97   :  { %v12122_v13 = vpop.eup %12121 }
 0xa98   :  { %v2601_v20 = vmul.f32 %v12122_v13, %v2600_v21 }
 0xa9a   :  { %v13086_v27 = vadd.f32 %v2604_v61, %v2601_v20  ;;  %v8042_v20 = vld [vmem:[%s14579_s8 + $0xc0] sm:$0xff] }
 0xa9c   :  { %2606 = vst.msk [vmem:[#allocation2 + $0x8] sm:$0xc0] %vm1623_vm11, %v13086_v27  ;;  %2608 = vst.msk [vmem:[#allocation7 - $0x6] sm:$0xc0] %vm1623_vm11, %v13086_v27 }
 0xa9d   :  { %2607 = vst.msk [vmem:[#allocation2 - $0x6] sm:$0xc0] %vm1625_vm12, %v13086_v27 }
 0xaa3   :  { %v2616_v31 = vld [vmem:[#allocation2 + $0x8] sm:$0xff] }
 0xaa4   :  { %v2615_v28 = vld [vmem:[#allocation2] sm:$0xff]  ;;  %2693 = vst.msk [vmem:[#allocation3 + $0x8] sm:$0xff] %vm325_vm3, %v2616_v31 }
 0xaa5   :  { %2692 = vst.msk [vmem:[#allocation3] sm:$0xff] %vm325_vm3, %v2615_v28  ;;  %v11205_v7 = vpack.c.bf16 %v2616_v31, %v2615_v28  ;;  %v8043_v28 = vld [vmem:[%s14579_s8 + $0xc8] sm:$0xff] }
 0xaa6   :  { %v13219_v22 = vpack.c.bf16 %v8043_v28, %v8042_v20  ;;  %v8068_v20 = vld [vmem:[%s14580_s9 + $0x4] ss:$0 sm:$0xff] }
 0xaa7   :  { %11206 = vmatprep.subr.bf16.mxu0 %v11205_v7 }
 0xaa8   :  { %11208 = vmatpush3.bf16.msra.mxu0 %v11205_v7  ;;  %v8080_v7 = vld [vmem:[%s14578_s7 + $0x110] sm:$0xff] }
 0xaa9   :  { %11210 = vmatprep.subr.bf16.mxu0 %v11209_v42 }
 0xaab   :  { %9654 = vmatmul.mubr.msk.f32.vlgmr.msra.gmra.mrb[26].mxu0 %vm213_vm1, %v12300_v36  ;;  %v8081_v36 = vld [vmem:[%s14578_s7 + $0x118] sm:$0xff] }
 0xaac   :  { %11212 = vmatpush3.bf16.msra.mxu0 %v11209_v42  ;;  %v11277_v23 = vpack.c.bf16 %v8081_v36, %v8080_v7  ;;  %v8045_v42 = vld [vmem:[%s14579_s8 + $0xd8] sm:$0xff] }
 0xaad   :  { %11214 = vmatprep.subr.bf16.mxu0 %v11213_v54  ;;  %v13238_v30 = vpack.c.bf16 %v8045_v42, %v8044_v24  ;;  %v13417_v42 = vld [vmem:[%s14581_s10 + $0x3] ss:$0 sm:$0xff] }
 0xab0   :  { %11216 = vmatpush3.bf16.msra.mxu0 %v11213_v54  ;;  %v11281_v54 = vpack.c.bf16 %v8083_v48, %v8082_v29 }
 0xab1   :  { %11218 = vmatprep.subr.bf16.mxu0 %v11217_v43 }
 0xab4   :  { %11220 = vmatpush3.bf16.msra.mxu0 %v11217_v43  ;;  %v8049_v43 = vld [vmem:[%s14579_s8 + $0xf8] sm:$0xff] }
 0xab5   :  { %11222 = vmatprep.subr.bf16.mxu0 %v11221_v6  ;;  %v13272_v47 = vpack.c.bf16 %v8049_v43, %v8048_v41 }
 0xab8   :  { %11224 = vmatpush3.bf16.msra.mxu0 %v11221_v6  ;;  %v8070_v6 = vld [vmem:[%s14579_s8 + $0x108] sm:$0xff] }
 0xab9   :  { %11226 = vmatprep.subr.bf16.mxu0 %v11225_v57  ;;  %v13288_v53 = vpack.c.bf16 %v8070_v6, %v8069_v51 }
 0xabc   :  { %11228 = vmatpush3.bf16.msra.mxu0 %v11225_v57  ;;  %v8072_v57 = vld [vmem:[%s14579_s8 + $0x118] sm:$0xff] }
 0xabd   :  { %11230 = vmatprep.subr.bf16.mxu0 %v11229_v44  ;;  %v13305_v62 = vpack.c.bf16 %v8072_v57, %v8071_v38  ;;  %v13440_v38 = vld [vmem:[%s14581_s10 + $0x5] ss:$0 sm:$0xff] }
 0xac0   :  { %11232 = vmatpush3.bf16.msra.mxu0 %v11229_v44  ;;  %v8074_v44 = vld [vmem:[%s14579_s8 + $0x128] sm:$0xff] }
 0xac1   :  { %11234 = vmatprep.subr.bf16.mxu0 %v11233_v55  ;;  %v13323_v3 = vpack.c.bf16 %v8074_v44, %v8073_v33 }
 0xac4   :  { %11236 = vmatpush3.bf16.msra.mxu0 %v11233_v55  ;;  %v8075_v55 = vld [vmem:[%s14579_s8 + $0x130] sm:$0xff] }
 0xac5   :  { %11238 = vmatprep.subr.bf16.mxu0 %v11237_v14  ;;  %v13333_v9 = vpack.c.bf16 %v8076_v8, %v8075_v55 }
 0xac8   :  { %11240 = vmatpush3.bf16.msra.mxu0 %v11237_v14  ;;  %v8098_v14 = vld [vmem:[%s14579_s8 + $0x150] sm:$0xff] }
 0xac9   :  { %11274 = vmatprep.subr.bf16.mxu0 %v11273_v17  ;;  %v13356_v15 = vpack.c.bf16 %v8099_v12, %v8098_v14 }
 0xb7e   :  { %v9655_v61 = vpop.f32.mrb[26].mxu0 }
 0xb7f   :  { %v2683_v19 = vpop.f32.mrb[27].mxu0 }
 0xb80   :  { %2696 = vrot.lane.b32.xlu1 %v2683_v19, %s12356_s4  ;;  %v8103_v19 = vld [vmem:[%s14579_s8 + $0x178] sm:$0xff] }
 0xb84   :  { %2698 = vrot.lane.b32.xlu1 %v9655_v61, %s12356_s4  ;;  %v8102_v61 = vld [vmem:[%s14579_s8 + $0x170] sm:$0xff] }
 0xbf2   :  { %v2697_v21 = vpop.permute.xlu1 %2696 }
 0xbf3   :  { %2703 = vst.msk [vmem:[#allocation3] sm:$0xff] %vm2702_vm13, %v2697_v21  ;;  %v13384_v21 = vpack.c.bf16 %v8103_v19, %v8102_v61 }
 0xbf6   :  { %v2699_v13 = vpop.permute.xlu1 %2698 }
 0xbf7   :  { %2704 = vst.msk [vmem:[#allocation3 + $0x8] sm:$0xff] %vm2702_vm13, %v2699_v13  ;;  %v8041_v13 = vld [vmem:[%s14580_s9 + $0x3] ss:$0 sm:$0xff] }
 0xbfa   :  { %v2705_v31 = vld [vmem:[#allocation3] sm:$0xff] }
 0xbfb   :  { %9688 = vmatprep.mubr.f32.mxu0 %v2705_v31  ;;  %9723 = vmatprep.mubr.f32.mxu1 %v2705_v31 }
 0xbfe   :  { %v13227_v25 = vld [vmem:[#allocation3 + $0x8] sm:$0xff] }
 0xbff   :  { %9689 = vmatmul.mubr.f32.vlgmr.msra.gmra.mrb[28].mxu0 %v13227_v25  ;;  %9724 = vmatmul.mubr.f32.vlgmr.msra.gmra.mrb[32].mxu1 %v13227_v25 }
 0xc00   :  { %11276 = vmatpush3.bf16.msra.mxu0 %v11273_v17  ;;  %11307 = vmatpush3.bf16.msra.mxu1 %v13219_v22  ;;  %v13372_v17 = vpack.c.bf16 %v8101_v60, %v8100_v16 }
 0xc01   :  { %9758 = vmatprep.mubr.f32.mxu0 %v2705_v31  ;;  %11278 = vmatprep.subr.bf16.mxu0 %v11277_v23 }
 0xc02   :  { %11308 = vmatprep.subr.bf16.mxu1 %v12352_v2  ;;  %9777 = vmatprep.mubr.msk.f32.mxu1 %vm12354_vm4, %v12355_v26 }
 0xc04   :  { %11280 = vmatpush3.bf16.msra.mxu0 %v11277_v23  ;;  %11310 = vmatpush3.bf16.msra.mxu1 %v13238_v30 }
 0xc05   :  { %11282 = vmatprep.subr.bf16.mxu0 %v11281_v54  ;;  %11311 = vmatprep.subr.bf16.mxu1 %v12352_v2 }
 0xc08   :  { %11284 = vmatpush3.bf16.msra.mxu0 %v11281_v54  ;;  %11313 = vmatpush3.bf16.msra.mxu1 %v13256_v39 }
 0xc09   :  { %11286 = vmatprep.subr.bf16.mxu0 %v11285_v40  ;;  %11314 = vmatprep.subr.bf16.mxu1 %v12352_v2 }
 0xc0c   :  { %11288 = vmatpush3.bf16.msra.mxu0 %v11285_v40  ;;  %11316 = vmatpush3.bf16.msra.mxu1 %v13272_v47 }
 0xc0d   :  { %11290 = vmatprep.subr.bf16.mxu0 %v11289_v49  ;;  %11317 = vmatprep.subr.bf16.mxu1 %v12352_v2 }
 0xc0f   :  { %9778 = vmatmul.mubr.f32.vlgmr.msra.gmra.mrb[34].mxu1 %v12355_v26 }
 0xc10   :  { %11292 = vmatpush3.bf16.msra.mxu0 %v11289_v49  ;;  %11319 = vmatpush3.bf16.msra.mxu1 %v13288_v53 }
 0xc11   :  { %11294 = vmatprep.subr.bf16.mxu0 %v11293_v56  ;;  %11320 = vmatprep.subr.bf16.mxu1 %v12352_v2 }
 0xc12   :  { %9796 = vmatprep.mubr.msk.f32.mxu1 %vm12354_vm4, %v12355_v26 }
 0xc14   :  { %11296 = vmatpush3.bf16.msra.mxu0 %v11293_v56  ;;  %11322 = vmatpush3.bf16.msra.mxu1 %v13305_v62 }
 0xc15   :  { %11298 = vmatprep.subr.bf16.mxu0 %v11297_v63  ;;  %11323 = vmatprep.subr.bf16.mxu1 %v12352_v2 }
 0xc18   :  { %11300 = vmatpush3.bf16.msra.mxu0 %v11297_v63  ;;  %11325 = vmatpush3.bf16.msra.mxu1 %v13323_v3 }
 0xc19   :  { %11302 = vmatprep.subr.bf16.mxu0 %v11301_v5  ;;  %11326 = vmatprep.subr.bf16.mxu1 %v12352_v2 }
 0xc1c   :  { %11304 = vmatpush3.bf16.msra.mxu0 %v11301_v5  ;;  %11328 = vmatpush3.bf16.msra.mxu1 %v13333_v9 }
 0xc1d   :  { %11329 = vmatprep.subr.bf16.mxu0 %v12352_v2  ;;  %11341 = vmatprep.subr.bf16.mxu1 %v12352_v2 }
 0xc1f   :  { %9759 = vmatmul.mubr.f32.vlgmr.msra.gmra.mrb[30].mxu0 %v13227_v25  ;;  %9797 = vmatmul.mubr.f32.vlgmr.msra.gmra.mrb[36].mxu1 %v12355_v26 }
 0xc20   :  { %11331 = vmatpush3.bf16.msra.mxu0 %v13343_v1  ;;  %9815 = vmatprep.mubr.msk.f32.mxu0 %vm12354_vm4, %v12355_v26 }
 0xc21   :  { %11332 = vmatprep.subr.bf16.mxu0 %v12352_v2  ;;  %11343 = vmatpush3.bf16.msra.mxu1 %v13219_v22 }
 0xc22   :  { %11344 = vmatprep.subr.bf16.mxu1 %v12352_v2  ;;  %9834 = vmatprep.mubr.msk.f32.mxu1 %vm12354_vm4, %v12355_v26 }
 0xc24   :  { %11334 = vmatpush3.bf16.msra.mxu0 %v13356_v15 }
 0xc25   :  { %11335 = vmatprep.subr.bf16.mxu0 %v12352_v2  ;;  %11346 = vmatpush3.bf16.msra.mxu1 %v13238_v30 }
 0xc26   :  { %11347 = vmatprep.subr.bf16.mxu1 %v12352_v2 }
 0xc28   :  { %11337 = vmatpush3.bf16.msra.mxu0 %v13372_v17 }
 0xc29   :  { %11338 = vmatprep.subr.bf16.mxu0 %v12352_v2  ;;  %11349 = vmatpush3.bf16.msra.mxu1 %v13256_v39 }
 0xc2a   :  { %11350 = vmatprep.subr.bf16.mxu1 %v12352_v2 }
 0xc2c   :  { %11340 = vmatpush3.bf16.msra.mxu0 %v13384_v21 }
 0xc2d   :  { %11353 = vmatprep.subr.bf16.mxu0 %v12352_v2  ;;  %11352 = vmatpush3.bf16.msra.mxu1 %v13272_v47 }
 0xc2e   :  { %11365 = vmatprep.subr.bf16.mxu1 %v12352_v2 }
 0xc2f   :  { %9816 = vmatmul.mubr.f32.vlgmr.msra.gmra.mrb[32].mxu0 %v12355_v26 }
 0xc30   :  { %11355 = vmatpush3.bf16.msra.mxu0 %v13288_v53  ;;  %9853 = vmatprep.mubr.msk.f32.mxu0 %vm12354_vm4, %v12355_v26 }
 0xc31   :  { %11356 = vmatprep.subr.bf16.mxu0 %v12352_v2 }
 0xc34   :  { %11358 = vmatpush3.bf16.msra.mxu0 %v13305_v62 }
 0xc35   :  { %11359 = vmatprep.subr.bf16.mxu0 %v12352_v2 }
 0xc38   :  { %11361 = vmatpush3.bf16.msra.mxu0 %v13323_v3 }
 0xc39   :  { %11362 = vmatprep.subr.bf16.mxu0 %v12352_v2 }
 0xc3c   :  { %11364 = vmatpush3.bf16.msra.mxu0 %v13333_v9 }
 0xc3d   :  { %11377 = vmatprep.subr.bf16.mxu0 %v12352_v2 }
 0xcd2   :  { %v9690_v28 = vpop.f32.mrb[28].mxu0  ;;  %v9725_v31 = vpop.f32.mrb[32].mxu1 }
 0xcd3   :  { %v13410_v7 = vadd.f32 %v9690_v28, %v8041_v13  ;;  %v13412_v36 = vadd.f32 %v9725_v31, %v8068_v20  ;;  %v2797_v23 = vpop.f32.mrb[29].mxu0  ;;  %v2908_v24 = vpop.f32.mrb[33].mxu1 }
 0xcd4   :  { %v13419_v29 = vadd.f32 %v8041_v13, %v2797_v23  ;;  %v13431_v45 = vadd.f32 %v8068_v20, %v2908_v24 }
 0xce2   :  { %v3111_v25 = vpop.f32.mrb[34].mxu1 }
 0xce3   :  { %v3112_v48 = vadd.f32 %v13417_v42, %v3111_v25  ;;  %v9779_v54 = vpop.f32.mrb[35].mxu1 }
 0xce5   :  { %v3267_v32 = vadd.f32 %v3112_v48, %v13419_v29 }
 0xce7   :  { %v8108_v34 = vmul.f32 -1.442695, %v3267_v32 }
 0xce9   :  { %12123 = vpow2.f32 %v8108_v34 }
 0xcf2   :  { %v9760_v40 = vpop.f32.mrb[30].mxu0  ;;  %v3187_v41 = vpop.f32.mrb[36].mxu1 }
 0xcf3   :  { %v12124_v43 = vpop.eup %12123  ;;  %v13433_v46 = vadd.f32 %v9760_v40, %v8095_v35  ;;  %v3188_v49 = vadd.f32 %v13429_v37, %v3187_v41  ;;  %v3019_v51 = vpop.f32.mrb[31].mxu0 }
 0xcf4   :  { %v9798_v6 = vpop.f32.mrb[37].mxu1  ;;  %v3271_v18 = vadd.f32 1.0, %v12124_v43  ;;  %v13443_v0 = vadd.f32 %v8095_v35, %v3019_v51 }
 0xcf5   :  { %v3274_v52 = vadd.f32 %v3188_v49, %v13431_v45 }
 0xcf7   :  { %v8109_v56 = vmul.f32 -1.442695, %v3274_v52 }
 0xcf9   :  { %12125 = vpow2.f32 %v8109_v56 }
 0xcfa   :  { %12127 = vrcp.f32 %v3271_v18 }
 0xd02   :  { %v3263_v57 = vpop.f32.mrb[32].mxu0 }
 0xd03   :  { %v12126_v58 = vpop.eup %12125  ;;  %v3264_v59 = vadd.f32 %v13440_v38, %v3263_v57  ;;  %v9817_v63 = vpop.f32.mrb[33].mxu0 }
 0xd04   :  { %v12128_v33 = vpop.eup %12127  ;;  %v3278_v44 = vadd.f32 1.0, %v12126_v58 }
 0xd05   :  { %v3281_v50 = vmul.f32 %v12128_v33, %v3264_v59 }
 0xd06   :  { %12129 = vrcp.f32 %v3278_v44 }
 0xd07   :  { %v3282_v5 = vadd.f32 %v3281_v50, %v13443_v0 }
 0xd09   :  { %12131 = vtanh.f32 %v3282_v5 }
 0xd10   :  { %v12130_v55 = vpop.eup %12129 }
 0xd11   :  { %v3284_v8 = vsub.f32 1.0, %v12130_v55  ;;  %v3286_v11 = vmul.f32 0.0, %v12130_v55 }
 0xd13   :  { %v12132_v10 = vpop.eup %12131 }
 0xd14   :  { %v3285_v14 = vmul.f32 %v12132_v10, %v3284_v8 }
 0xd16   :  { %v3287_v12 = vadd.f32 %v3286_v11, %v3285_v14 }
 0xd18   :  { %9835 = vmatmul.mubr.msk.f32.vlgmr.msra.gmra.mrb[38].mxu1 %vm325_vm3, %v3287_v12  ;;  %3288 = vst.msk [vmem:[#allocation2] sm:$0x3] %vm874_vm5, %v3287_v12  ;;  %9854 = vmatmul.mubr.msk.f32.vlgmr.msra.gmra.mrb[34].mxu0 %vm325_vm3, %v3287_v12  ;;  %v3531_v6 = vrot.slane %v3287_v12, 6 }
 0xd19   :  { %3289 = vst.msk [vmem:[#allocation2 + $0xe] sm:$0x3] %vm876_vm6, %v3287_v12  ;;  %11367 = vmatpush3.bf16.msra.mxu1 %v13343_v1  ;;  %9872 = vmatprep.mubr.msk.f32.mxu1 %vm12354_vm4, %v12355_v26 }
 0xd1a   :  { %11368 = vmatprep.subr.bf16.mxu1 %v12352_v2  ;;  %11379 = vmatpush3.bf16.msra.mxu0 %v13219_v22 }
 0xd1b   :  { %11380 = vmatprep.subr.bf16.mxu0 %v12352_v2  ;;  %9891 = vmatprep.mubr.msk.f32.mxu0 %vm12354_vm4, %v12355_v26 }
 0xd1d   :  { %11370 = vmatpush3.bf16.msra.mxu1 %v13356_v15 }
 0xd1e   :  { %11371 = vmatprep.subr.bf16.mxu1 %v12352_v2  ;;  %11382 = vmatpush3.bf16.msra.mxu0 %v13238_v30 }
 0xd1f   :  { %11383 = vmatprep.subr.bf16.mxu0 %v12352_v2 }
 0xd21   :  { %11373 = vmatpush3.bf16.msra.mxu1 %v13372_v17 }
 0xd22   :  { %11374 = vmatprep.subr.bf16.mxu1 %v12352_v2  ;;  %11385 = vmatpush3.bf16.msra.mxu0 %v13256_v39 }
 0xd23   :  { %11386 = vmatprep.subr.bf16.mxu0 %v12352_v2 }
 0xd25   :  { %11376 = vmatpush3.bf16.msra.mxu1 %v13384_v21 }
 0xd26   :  { %11389 = vmatprep.subr.bf16.mxu1 %v12352_v2  ;;  %11388 = vmatpush3.bf16.msra.mxu0 %v13272_v47 }
 0xd27   :  { %11401 = vmatprep.subr.bf16.mxu0 %v12352_v2 }
 0xd28   :  { %9873 = vmatmul.mubr.msk.f32.vlgmr.msra.gmra.mrb[40].mxu1 %vm325_vm3, %v3287_v12 }
 0xd29   :  { %11391 = vmatpush3.bf16.msra.mxu1 %v13288_v53  ;;  %9910 = vmatprep.mubr.msk.f32.mxu1 %vm12354_vm4, %v12355_v26 }
 0xd2a   :  { %11392 = vmatprep.subr.bf16.mxu1 %v12352_v2 }
 0xd2d   :  { %11394 = vmatpush3.bf16.msra.mxu1 %v13305_v62 }
 0xd2e   :  { %11395 = vmatprep.subr.bf16.mxu1 %v12352_v2 }
 0xd31   :  { %11397 = vmatpush3.bf16.msra.mxu1 %v13323_v3 }
 0xd32   :  { %11398 = vmatprep.subr.bf16.mxu1 %v12352_v2 }
 0xd35   :  { %11400 = vmatpush3.bf16.msra.mxu1 %v13333_v9 }
 0xd36   :  { %11413 = vmatprep.subr.bf16.mxu1 %v12352_v2 }
 0xdeb   :  { %v3359_v16 = vpop.f32.mrb[38].mxu1  ;;  %v3429_v60 = vpop.f32.mrb[34].mxu0 }
 0xdec   :  { %v3360_v61 = vadd.f32 %v13417_v42, %v3359_v16  ;;  %v3430_v19 = vadd.f32 %v13429_v37, %v3429_v60  ;;  %v9836_v13 = vpop.f32.mrb[39].mxu1  ;;  %v9855_v20 = vpop.f32.mrb[35].mxu0 }
 0xdee   :  { %v3504_v28 = vrot.slane %v3360_v61, 6  ;;  %v3514_v31 = vrot.slane %v3430_v19, 6 }
 0xdf0   :  { %v3506_v23 = vadd.f32 %v3504_v28, %v13419_v29  ;;  %v3516_v24 = vadd.f32 %v3514_v31, %v13431_v45 }
 0xdf2   :  { %v8113_v25 = vmul.f32 -1.442695, %v3506_v23  ;;  %v8114_v48 = vmul.f32 -1.442695, %v3516_v24 }
 0xdf4   :  { %12133 = vpow2.f32 %v8113_v25 }
 0xdf5   :  { %12135 = vpow2.f32 %v8114_v48 }
 0xdfb   :  { %v3499_v54 = vpop.f32.mrb[40].mxu1 }
 0xdfc   :  { %v9874_v32 = vpop.f32.mrb[41].mxu1  ;;  %v3500_v43 = vadd.f32 %v13440_v38, %v3499_v54 }
 0xdfe   :  { %v12134_v34 = vpop.eup %12133  ;;  %v3524_v49 = vrot.slane %v3500_v43, 6 }
 0xdff   :  { %v12136_v35 = vpop.eup %12135  ;;  %v3510_v40 = vadd.f32 1.0, %v12134_v34 }
 0xe00   :  { %v3520_v41 = vadd.f32 1.0, %v12136_v35 }
 0xe01   :  { %12137 = vrcp.f32 %v3510_v40 }
 0xe02   :  { %12139 = vrcp.f32 %v3520_v41 }
 0xe0b   :  { %v12138_v51 = vpop.eup %12137 }
 0xe0c   :  { %v12140_v52 = vpop.eup %12139  ;;  %v3526_v18 = vmul.f32 %v12138_v51, %v3524_v49 }
 0xe0d   :  { %v3533_v56 = vmul.f32 %v12140_v52, %v3531_v6  ;;  %v3529_v58 = vsub.f32 1.0, %v12140_v52 }
 0xe0e   :  { %v3527_v57 = vadd.f32 %v3526_v18, %v13443_v0 }
 0xe10   :  { %12141 = vtanh.f32 %v3527_v57 }
 0xe1a   :  { %v12142_v59 = vpop.eup %12141 }
 0xe1b   :  { %v3530_v63 = vmul.f32 %v12142_v59, %v3529_v58 }
 0xe1d   :  { %v13487_v33 = vadd.f32 %v3533_v56, %v3530_v63 }
 0xe1f   :  { %3535 = vst.msk [vmem:[#allocation2] sm:$0xc] %vm1123_vm7, %v13487_v33  ;;  %v3538_v44 = vrot.slane %v13487_v33, 2  ;;  %v3779_v32 = vrot.slane %v13487_v33, 6 }
 0xe20   :  { %3536 = vst.msk [vmem:[#allocation2 + $0xa] sm:$0xc] %vm1125_vm8, %v13487_v33 }
 0xe21   :  { %9892 = vmatmul.mubr.msk.f32.vlgmr.msra.gmra.mrb[36].mxu0 %vm325_vm3, %v3538_v44  ;;  %9911 = vmatmul.mubr.msk.f32.vlgmr.msra.gmra.mrb[42].mxu1 %vm325_vm3, %v3538_v44 }
 0xe22   :  { %11403 = vmatpush3.bf16.msra.mxu0 %v13343_v1  ;;  %9929 = vmatprep.mubr.msk.f32.mxu0 %vm12354_vm4, %v12355_v26 }
 0xe23   :  { %11404 = vmatprep.subr.bf16.mxu0 %v12352_v2  ;;  %11415 = vmatpush3.bf16.msra.mxu1 %v13219_v22 }
 0xe24   :  { %11416 = vmatprep.subr.bf16.mxu1 %v12352_v2  ;;  %9948 = vmatprep.mubr.msk.f32.mxu1 %vm12354_vm4, %v12355_v26 }
 0xe26   :  { %11406 = vmatpush3.bf16.msra.mxu0 %v13356_v15 }
 0xe27   :  { %11407 = vmatprep.subr.bf16.mxu0 %v12352_v2  ;;  %11418 = vmatpush3.bf16.msra.mxu1 %v13238_v30 }
 0xe28   :  { %11419 = vmatprep.subr.bf16.mxu1 %v12352_v2 }
 0xe2a   :  { %11409 = vmatpush3.bf16.msra.mxu0 %v13372_v17 }
 0xe2b   :  { %11410 = vmatprep.subr.bf16.mxu0 %v12352_v2  ;;  %11421 = vmatpush3.bf16.msra.mxu1 %v13256_v39 }
 0xe2c   :  { %11422 = vmatprep.subr.bf16.mxu1 %v12352_v2 }
 0xe2e   :  { %11412 = vmatpush3.bf16.msra.mxu0 %v13384_v21 }
 0xe2f   :  { %11425 = vmatprep.subr.bf16.mxu0 %v12352_v2  ;;  %11424 = vmatpush3.bf16.msra.mxu1 %v13272_v47 }
 0xe30   :  { %11437 = vmatprep.subr.bf16.mxu1 %v12352_v2 }
 0xe31   :  { %9930 = vmatmul.mubr.msk.f32.vlgmr.msra.gmra.mrb[38].mxu0 %vm325_vm3, %v3538_v44 }
 0xe32   :  { %11427 = vmatpush3.bf16.msra.mxu0 %v13288_v53  ;;  %9967 = vmatprep.mubr.msk.f32.mxu0 %vm12354_vm4, %v12355_v26 }
 0xe33   :  { %11428 = vmatprep.subr.bf16.mxu0 %v12352_v2 }
 0xe36   :  { %11430 = vmatpush3.bf16.msra.mxu0 %v13305_v62 }
 0xe37   :  { %11431 = vmatprep.subr.bf16.mxu0 %v12352_v2 }
 0xe3a   :  { %11433 = vmatpush3.bf16.msra.mxu0 %v13323_v3 }
 0xe3b   :  { %11434 = vmatprep.subr.bf16.mxu0 %v12352_v2 }
 0xe3e   :  { %11436 = vmatpush3.bf16.msra.mxu0 %v13333_v9 }
 0xe3f   :  { %11449 = vmatprep.subr.bf16.mxu0 %v12352_v2 }
 0xef4   :  { %v3607_v50 = vpop.f32.mrb[36].mxu0  ;;  %v3677_v5 = vpop.f32.mrb[42].mxu1 }
 0xef5   :  { %v3608_v55 = vadd.f32 %v13417_v42, %v3607_v50  ;;  %v3678_v8 = vadd.f32 %v13429_v37, %v3677_v5  ;;  %v9893_v10 = vpop.f32.mrb[37].mxu0  ;;  %v9912_v11 = vpop.f32.mrb[43].mxu1 }
 0xef7   :  { %v3752_v14 = vrot.slane %v3608_v55, 4  ;;  %v3762_v12 = vrot.slane %v3678_v8, 4 }
 0xef9   :  { %v3754_v16 = vadd.f32 %v3752_v14, %v13419_v29  ;;  %v3764_v60 = vadd.f32 %v3762_v12, %v13431_v45 }
 0xefb   :  { %v8118_v61 = vmul.f32 -1.442695, %v3754_v16  ;;  %v8119_v19 = vmul.f32 -1.442695, %v3764_v60 }
 0xefd   :  { %12143 = vpow2.f32 %v8118_v61 }
 0xefe   :  { %12145 = vpow2.f32 %v8119_v19 }
 0xf04   :  { %v3747_v13 = vpop.f32.mrb[38].mxu0 }
 0xf05   :  { %v9931_v20 = vpop.f32.mrb[39].mxu0  ;;  %v3748_v25 = vadd.f32 %v13440_v38, %v3747_v13 }
 0xf07   :  { %v12144_v28 = vpop.eup %12143  ;;  %v3772_v48 = vrot.slane %v3748_v25, 4 }
 0xf08   :  { %v12146_v31 = vpop.eup %12145  ;;  %v3758_v23 = vadd.f32 1.0, %v12144_v28 }
 0xf09   :  { %v3768_v24 = vadd.f32 1.0, %v12146_v31 }
 0xf0a   :  { %12147 = vrcp.f32 %v3758_v23 }
 0xf0b   :  { %12149 = vrcp.f32 %v3768_v24 }
 0xf14   :  { %v12148_v54 = vpop.eup %12147 }
 0xf15   :  { %v12150_v34 = vpop.eup %12149  ;;  %v3774_v35 = vmul.f32 %v12148_v54, %v3772_v48 }
 0xf16   :  { %v3781_v40 = vmul.f32 %v12150_v34, %v3779_v32  ;;  %v3777_v43 = vsub.f32 1.0, %v12150_v34 }
 0xf17   :  { %v3775_v41 = vadd.f32 %v3774_v35, %v13443_v0 }
 0xf19   :  { %12151 = vtanh.f32 %v3775_v41 }
 0xf23   :  { %v12152_v49 = vpop.eup %12151 }
 0xf24   :  { %v3778_v51 = vmul.f32 %v12152_v49, %v3777_v43 }
 0xf26   :  { %v13534_v6 = vadd.f32 %v3781_v40, %v3778_v51 }
 0xf28   :  { %3783 = vst.msk [vmem:[#allocation2] sm:$0x30] %vm1373_vm9, %v13534_v6  ;;  %v3786_v52 = vrot.slane %v13534_v6, 4 }
 0xf29   :  { %3784 = vst.msk [vmem:[#allocation2 + $0x6] sm:$0x30] %vm1375_vm10, %v13534_v6 }
 0xf2a   :  { %9949 = vmatmul.mubr.msk.f32.vlgmr.msra.gmra.mrb[44].mxu1 %vm325_vm3, %v3786_v52  ;;  %9968 = vmatmul.mubr.msk.f32.vlgmr.msra.gmra.mrb[40].mxu0 %vm325_vm3, %v3786_v52 }
 0xf2b   :  { %11439 = vmatpush3.bf16.msra.mxu1 %v13343_v1  ;;  %9986 = vmatprep.mubr.msk.f32.mxu1 %vm12354_vm4, %v12355_v26 }
 0xf2c   :  { %11440 = vmatprep.subr.bf16.mxu1 %v12352_v2  ;;  %11451 = vmatpush3.bf16.msra.mxu0 %v13219_v22 }
 0xf2d   :  { %11452 = vmatprep.subr.bf16.mxu0 %v12352_v2  ;;  %10005 = vmatprep.mubr.msk.f32.mxu0 %vm12354_vm4, %v12355_v26 }
 0xf2f   :  { %11442 = vmatpush3.bf16.msra.mxu1 %v13356_v15 }
 0xf30   :  { %11443 = vmatprep.subr.bf16.mxu1 %v12352_v2  ;;  %11454 = vmatpush3.bf16.msra.mxu0 %v13238_v30 }
 0xf31   :  { %11455 = vmatprep.subr.bf16.mxu0 %v12352_v2 }
 0xf33   :  { %11445 = vmatpush3.bf16.msra.mxu1 %v13372_v17 }
 0xf34   :  { %11446 = vmatprep.subr.bf16.mxu1 %v12352_v2  ;;  %11457 = vmatpush3.bf16.msra.mxu0 %v13256_v39 }
 0xf35   :  { %11458 = vmatprep.subr.bf16.mxu0 %v12352_v2 }
 0xf37   :  { %11448 = vmatpush3.bf16.msra.mxu1 %v13384_v21 }
 0xf38   :  { %11461 = vmatprep.subr.bf16.mxu1 %v12352_v2  ;;  %11460 = vmatpush3.bf16.msra.mxu0 %v13272_v47 }
 0xf39   :  { %11473 = vmatprep.subr.bf16.mxu0 %v12352_v2 }
 0xf3a   :  { %9987 = vmatmul.mubr.msk.f32.vlgmr.msra.gmra.mrb[46].mxu1 %vm325_vm3, %v3786_v52 }
 0xf3b   :  { %11463 = vmatpush3.bf16.msra.mxu1 %v13288_v53  ;;  %10024 = vmatprep.mubr.msk.f32.mxu1 %vm12354_vm4, %v12355_v26 }
 0xf3c   :  { %11464 = vmatprep.subr.bf16.mxu1 %v12352_v2 }
 0xf3f   :  { %11466 = vmatpush3.bf16.msra.mxu1 %v13305_v62 }
 0xf40   :  { %11467 = vmatprep.subr.bf16.mxu1 %v12352_v2 }
 0xf43   :  { %11469 = vmatpush3.bf16.msra.mxu1 %v13323_v3 }
 0xf44   :  { %11470 = vmatprep.subr.bf16.mxu1 %v12352_v2 }
 0xf47   :  { %11472 = vmatpush3.bf16.msra.mxu1 %v13333_v9 }
 0xf48   :  { %11485 = vmatprep.subr.bf16.mxu1 %v12352_v2 }
 0xffd   :  { %v3855_v18 = vpop.f32.mrb[44].mxu1  ;;  %v3925_v56 = vpop.f32.mrb[40].mxu0 }
 0xffe   :  { %v3856_v57 = vadd.f32 %v13417_v42, %v3855_v18  ;;  %v3926_v58 = vadd.f32 %v13429_v37, %v3925_v56  ;;  %v9950_v59 = vpop.f32.mrb[45].mxu1  ;;  %v9969_v63 = vpop.f32.mrb[41].mxu0 }
0x1000   :  { %v4000_v33 = vrot.slane %v3856_v57, 2  ;;  %v4010_v44 = vrot.slane %v3926_v58, 2 }
0x1002   :  { %v4002_v50 = vadd.f32 %v4000_v33, %v13419_v29  ;;  %v4012_v5 = vadd.f32 %v4010_v44, %v13431_v45  ;;  %v4027_v29 = vrot.slane %v13534_v6, 6 }
0x1004   :  { %v8123_v55 = vmul.f32 -1.442695, %v4002_v50  ;;  %v8124_v8 = vmul.f32 -1.442695, %v4012_v5 }
0x1006   :  { %12153 = vpow2.f32 %v8123_v55 }
0x1007   :  { %12155 = vpow2.f32 %v8124_v8 }
0x100d   :  { %v3995_v10 = vpop.f32.mrb[46].mxu1 }
0x100e   :  { %v9988_v11 = vpop.f32.mrb[47].mxu1  ;;  %v3996_v61 = vadd.f32 %v13440_v38, %v3995_v10 }
0x1010   :  { %v12154_v14 = vpop.eup %12153  ;;  %v4020_v19 = vrot.slane %v3996_v61, 2 }
0x1011   :  { %v12156_v12 = vpop.eup %12155  ;;  %v4006_v16 = vadd.f32 1.0, %v12154_v14 }
0x1012   :  { %v4016_v60 = vadd.f32 1.0, %v12156_v12 }
0x1013   :  { %12157 = vrcp.f32 %v4006_v16 }
0x1014   :  { %12159 = vrcp.f32 %v4016_v60 }
0x101d   :  { %v12158_v13 = vpop.eup %12157 }
0x101e   :  { %v12160_v20 = vpop.eup %12159  ;;  %v4022_v45 = vmul.f32 %v12158_v13, %v4020_v19 }
0x101f   :  { %v4029_v28 = vmul.f32 %v12160_v20, %v4027_v29  ;;  %v4025_v23 = vsub.f32 1.0, %v12160_v20 }
0x1020   :  { %v4023_v31 = vadd.f32 %v4022_v45, %v13443_v0 }
0x1022   :  { %12161 = vtanh.f32 %v4023_v31 }
0x102c   :  { %v12162_v24 = vpop.eup %12161 }
0x102d   :  { %v4026_v25 = vmul.f32 %v12162_v24, %v4025_v23 }
0x102f   :  { %v4030_v48 = vadd.f32 %v4029_v28, %v4026_v25 }
0x1031   :  { %4031 = vst.msk [vmem:[#allocation2] sm:$0xc0] %vm1623_vm11, %v4030_v48  ;;  %v4034_v54 = vrot.slane %v4030_v48, 6 }
0x1032   :  { %4032 = vst.msk [vmem:[#allocation2 + $0x2] sm:$0xc0] %vm1625_vm12, %v4030_v48 }
0x1033   :  { %10006 = vmatmul.mubr.msk.f32.vlgmr.msra.gmra.mrb[42].mxu0 %vm325_vm3, %v4034_v54  ;;  %10025 = vmatmul.mubr.msk.f32.vlgmr.msra.gmra.mrb[48].mxu1 %vm325_vm3, %v4034_v54 }
0x1034   :  { %11475 = vmatpush3.bf16.msra.mxu0 %v13343_v1  ;;  %10043 = vmatprep.mubr.msk.f32.mxu0 %vm12354_vm4, %v12355_v26 }
0x1035   :  { %11476 = vmatprep.subr.bf16.mxu0 %v12352_v2  ;;  %11487 = vmatpush3.bf16.msra.mxu1 %v13219_v22 }
0x1036   :  { %11488 = vmatprep.subr.bf16.mxu1 %v12352_v2  ;;  %10062 = vmatprep.mubr.msk.f32.mxu1 %vm12354_vm4, %v12355_v26 }
0x1038   :  { %11478 = vmatpush3.bf16.msra.mxu0 %v13356_v15 }
0x1039   :  { %11479 = vmatprep.subr.bf16.mxu0 %v12352_v2  ;;  %11490 = vmatpush3.bf16.msra.mxu1 %v13238_v30 }
0x103a   :  { %11491 = vmatprep.subr.bf16.mxu1 %v12352_v2 }
0x103c   :  { %11481 = vmatpush3.bf16.msra.mxu0 %v13372_v17 }
0x103d   :  { %11482 = vmatprep.subr.bf16.mxu0 %v12352_v2  ;;  %11493 = vmatpush3.bf16.msra.mxu1 %v13256_v39 }
0x103e   :  { %11494 = vmatprep.subr.bf16.mxu1 %v12352_v2 }
0x1040   :  { %11484 = vmatpush3.bf16.msra.mxu0 %v13384_v21 }
0x1041   :  { %11497 = vmatprep.subr.bf16.mxu0 %v12352_v2  ;;  %11496 = vmatpush3.bf16.msra.mxu1 %v13272_v47 }
0x1042   :  { %11509 = vmatprep.subr.bf16.mxu1 %v12352_v2 }
0x1043   :  { %10044 = vmatmul.mubr.msk.f32.vlgmr.msra.gmra.mrb[44].mxu0 %vm325_vm3, %v4034_v54 }
0x1044   :  { %11499 = vmatpush3.bf16.msra.mxu0 %v13288_v53  ;;  %10081 = vmatprep.mubr.msk.f32.mxu0 %vm12354_vm4, %v12355_v26 }
0x1045   :  { %11500 = vmatprep.subr.bf16.mxu0 %v12352_v2 }
0x1048   :  { %11502 = vmatpush3.bf16.msra.mxu0 %v13305_v62 }
0x1049   :  { %11503 = vmatprep.subr.bf16.mxu0 %v12352_v2 }
0x104c   :  { %11505 = vmatpush3.bf16.msra.mxu0 %v13323_v3 }
0x104d   :  { %11506 = vmatprep.subr.bf16.mxu0 %v12352_v2 }
0x1050   :  { %11508 = vmatpush3.bf16.msra.mxu0 %v13333_v9 }
0x1051   :  { %11521 = vmatprep.subr.bf16.mxu0 %v12352_v2 }
0x1106   :  { %v4103_v0 = vpop.f32.mrb[42].mxu0  ;;  %v4173_v32 = vpop.f32.mrb[48].mxu1 }
0x1107   :  { %v4104_v34 = vadd.f32 %v13417_v42, %v4103_v0  ;;  %v10007_v35 = vpop.f32.mrb[43].mxu0  ;;  %v10026_v40 = vpop.f32.mrb[49].mxu1  ;;  %v4174_v41 = vadd.f32 %v13429_v37, %v4173_v32 }
0x1109   :  { %v4247_v43 = vadd.f32 %v4104_v34, %v13410_v7  ;;  %v4254_v51 = vadd.f32 %v4174_v41, %v13412_v36 }
0x110b   :  { %v8128_v49 = vmul.f32 -1.442695, %v4247_v43  ;;  %v8129_v6 = vmul.f32 -1.442695, %v4254_v51 }
0x110d   :  { %12163 = vpow2.f32 %v8128_v49 }
0x110e   :  { %12165 = vpow2.f32 %v8129_v6 }
0x1116   :  { %v4243_v52 = vpop.f32.mrb[44].mxu0 }
0x1117   :  { %v12164_v18 = vpop.eup %12163  ;;  %v10045_v56 = vpop.f32.mrb[45].mxu0  ;;  %v4244_v63 = vadd.f32 %v13440_v38, %v4243_v52 }
0x1118   :  { %v4251_v57 = vadd.f32 1.0, %v12164_v18  ;;  %v12166_v58 = vpop.eup %12165 }
0x1119   :  { %v4258_v59 = vadd.f32 1.0, %v12166_v58 }
0x111a   :  { %12167 = vrcp.f32 %v4251_v57 }
0x111b   :  { %12169 = vrcp.f32 %v4258_v59 }
0x1124   :  { %v12168_v33 = vpop.eup %12167 }
0x1125   :  { %v4261_v44 = vmul.f32 %v12168_v33, %v4244_v63  ;;  %v12170_v5 = vpop.eup %12169 }
0x1126   :  { %v4264_v55 = vsub.f32 1.0, %v12170_v5  ;;  %v4267_v10 = vmul.f32 %v12170_v5, %v4034_v54 }
0x1127   :  { %v4262_v50 = vadd.f32 %v4261_v44, %v13433_v46 }
0x1129   :  { %12171 = vtanh.f32 %v4262_v50 }
0x1133   :  { %v12172_v8 = vpop.eup %12171 }
0x1134   :  { %v4265_v11 = vmul.f32 %v12172_v8, %v4264_v55 }
0x1136   :  { %v4268_v14 = vadd.f32 %v4267_v10, %v4265_v11 }
0x1138   :  { %4269 = vst.msk [vmem:[#allocation2 + $0x8] sm:$0x3] %vm874_vm5, %v4268_v14  ;;  %10063 = vmatmul.mubr.msk.f32.vlgmr.msra.gmra.mrb[50].mxu1 %vm325_vm3, %v4268_v14  ;;  %10082 = vmatmul.mubr.msk.f32.vlgmr.msra.gmra.mrb[46].mxu0 %vm325_vm3, %v4268_v14  ;;  %v4512_v41 = vrot.slane %v4268_v14, 6 }
0x1139   :  { %4270 = vst.msk [vmem:[#allocation2 + $0x6] sm:$0x3] %vm876_vm6, %v4268_v14  ;;  %11511 = vmatpush3.bf16.msra.mxu1 %v13343_v1  ;;  %10100 = vmatprep.mubr.msk.f32.mxu1 %vm12354_vm4, %v12355_v26 }
0x113a   :  { %11512 = vmatprep.subr.bf16.mxu1 %v12352_v2  ;;  %11523 = vmatpush3.bf16.msra.mxu0 %v13219_v22 }
0x113b   :  { %11524 = vmatprep.subr.bf16.mxu0 %v12352_v2  ;;  %10119 = vmatprep.mubr.msk.f32.mxu0 %vm12354_vm4, %v12355_v26 }
0x113d   :  { %11514 = vmatpush3.bf16.msra.mxu1 %v13356_v15 }
0x113e   :  { %11515 = vmatprep.subr.bf16.mxu1 %v12352_v2  ;;  %11526 = vmatpush3.bf16.msra.mxu0 %v13238_v30 }
0x113f   :  { %11527 = vmatprep.subr.bf16.mxu0 %v12352_v2 }
0x1141   :  { %11517 = vmatpush3.bf16.msra.mxu1 %v13372_v17 }
0x1142   :  { %11518 = vmatprep.subr.bf16.mxu1 %v12352_v2  ;;  %11529 = vmatpush3.bf16.msra.mxu0 %v13256_v39 }
0x1143   :  { %11530 = vmatprep.subr.bf16.mxu0 %v12352_v2 }
0x1145   :  { %11520 = vmatpush3.bf16.msra.mxu1 %v13384_v21 }
0x1146   :  { %11533 = vmatprep.subr.bf16.mxu1 %v12352_v2  ;;  %11532 = vmatpush3.bf16.msra.mxu0 %v13272_v47 }
0x1147   :  { %11545 = vmatprep.subr.bf16.mxu0 %v12352_v2 }
0x1148   :  { %10101 = vmatmul.mubr.msk.f32.vlgmr.msra.gmra.mrb[52].mxu1 %vm325_vm3, %v4268_v14 }
0x1149   :  { %11535 = vmatpush3.bf16.msra.mxu1 %v13288_v53  ;;  %10138 = vmatprep.mubr.msk.f32.mxu1 %vm12354_vm4, %v12355_v26 }
0x114a   :  { %11536 = vmatprep.subr.bf16.mxu1 %v12352_v2 }
0x114d   :  { %11538 = vmatpush3.bf16.msra.mxu1 %v13305_v62 }
0x114e   :  { %11539 = vmatprep.subr.bf16.mxu1 %v12352_v2 }
0x1151   :  { %11541 = vmatpush3.bf16.msra.mxu1 %v13323_v3 }
0x1152   :  { %11542 = vmatprep.subr.bf16.mxu1 %v12352_v2 }
0x1155   :  { %11544 = vmatpush3.bf16.msra.mxu1 %v13333_v9 }
0x1156   :  { %11557 = vmatprep.subr.bf16.mxu1 %v12352_v2 }
0x120b   :  { %v4340_v12 = vpop.f32.mrb[50].mxu1  ;;  %v4410_v16 = vpop.f32.mrb[46].mxu0 }
0x120c   :  { %v4341_v60 = vadd.f32 %v13417_v42, %v4340_v12  ;;  %v4411_v61 = vadd.f32 %v13429_v37, %v4410_v16  ;;  %v10064_v19 = vpop.f32.mrb[51].mxu1  ;;  %v10083_v13 = vpop.f32.mrb[47].mxu0 }
0x120e   :  { %v4485_v29 = vrot.slane %v4341_v60, 6  ;;  %v4495_v20 = vrot.slane %v4411_v61, 6 }
0x1210   :  { %v4487_v45 = vadd.f32 %v4485_v29, %v13410_v7  ;;  %v4497_v28 = vadd.f32 %v4495_v20, %v13412_v36 }
0x1212   :  { %v8133_v31 = vmul.f32 -1.442695, %v4487_v45  ;;  %v8134_v23 = vmul.f32 -1.442695, %v4497_v28 }
0x1214   :  { %12173 = vpow2.f32 %v8133_v31 }
0x1215   :  { %12175 = vpow2.f32 %v8134_v23 }
0x121b   :  { %v4480_v24 = vpop.f32.mrb[52].mxu1 }
0x121c   :  { %v10102_v25 = vpop.f32.mrb[53].mxu1  ;;  %v4481_v34 = vadd.f32 %v13440_v38, %v4480_v24  ;;  %v12301_v24 = vld [vmem:[%s14608_s26] sm:$0xff] }
0x121e   :  { %v12174_v48 = vpop.eup %12173  ;;  %v4505_v35 = vrot.slane %v4481_v34, 6 }
0x121f   :  { %v12176_v54 = vpop.eup %12175  ;;  %v4491_v0 = vadd.f32 1.0, %v12174_v48 }
0x1220   :  { %v4501_v32 = vadd.f32 1.0, %v12176_v54 }
0x1221   :  { %12177 = vrcp.f32 %v4491_v0 }
0x1222   :  { %12179 = vrcp.f32 %v4501_v32 }
0x122b   :  { %v12178_v40 = vpop.eup %12177 }
0x122c   :  { %v12180_v43 = vpop.eup %12179  ;;  %v4507_v49 = vmul.f32 %v12178_v40, %v4505_v35 }
0x122d   :  { %v4514_v51 = vmul.f32 %v12180_v43, %v4512_v41  ;;  %v4510_v52 = vsub.f32 1.0, %v12180_v43 }
0x122e   :  { %v4508_v6 = vadd.f32 %v4507_v49, %v13433_v46 }
0x1230   :  { %12181 = vtanh.f32 %v4508_v6 }
0x123a   :  { %v12182_v18 = vpop.eup %12181 }
0x123b   :  { %v4511_v56 = vmul.f32 %v12182_v18, %v4510_v52 }
0x123d   :  { %v4515_v57 = vadd.f32 %v4514_v51, %v4511_v56 }
0x123f   :  { %4516 = vst.msk [vmem:[#allocation2 + $0x8] sm:$0xc] %vm1123_vm7, %v4515_v57  ;;  %v4519_v58 = vrot.slane %v4515_v57, 2  ;;  %v4760_v60 = vrot.slane %v4515_v57, 6 }
0x1240   :  { %4517 = vst.msk [vmem:[#allocation2 + $0x2] sm:$0xc] %vm1125_vm8, %v4515_v57 }
0x1241   :  { %10120 = vmatmul.mubr.msk.f32.vlgmr.msra.gmra.mrb[48].mxu0 %vm325_vm3, %v4519_v58  ;;  %10139 = vmatmul.mubr.msk.f32.vlgmr.msra.gmra.mrb[54].mxu1 %vm325_vm3, %v4519_v58 }
0x1242   :  { %11547 = vmatpush3.bf16.msra.mxu0 %v13343_v1  ;;  %10157 = vmatprep.mubr.msk.f32.mxu0 %vm12354_vm4, %v12355_v26 }
0x1243   :  { %11548 = vmatprep.subr.bf16.mxu0 %v12352_v2  ;;  %11559 = vmatpush3.bf16.msra.mxu1 %v13219_v22 }
0x1244   :  { %11560 = vmatprep.subr.bf16.mxu1 %v12352_v2  ;;  %10176 = vmatprep.mubr.msk.f32.mxu1 %vm12354_vm4, %v12355_v26 }
0x1246   :  { %11550 = vmatpush3.bf16.msra.mxu0 %v13356_v15 }
0x1247   :  { %11551 = vmatprep.subr.bf16.mxu0 %v12352_v2  ;;  %11562 = vmatpush3.bf16.msra.mxu1 %v13238_v30 }
0x1248   :  { %11563 = vmatprep.subr.bf16.mxu1 %v12352_v2 }
0x124a   :  { %11553 = vmatpush3.bf16.msra.mxu0 %v13372_v17 }
0x124b   :  { %11554 = vmatprep.subr.bf16.mxu0 %v12352_v2  ;;  %11565 = vmatpush3.bf16.msra.mxu1 %v13256_v39 }
0x124c   :  { %11566 = vmatprep.subr.bf16.mxu1 %v12352_v2 }
0x124e   :  { %11556 = vmatpush3.bf16.msra.mxu0 %v13384_v21 }
0x124f   :  { %11569 = vmatprep.subr.bf16.mxu0 %v12352_v2  ;;  %11568 = vmatpush3.bf16.msra.mxu1 %v13272_v47 }
0x1250   :  { %11581 = vmatprep.subr.bf16.mxu1 %v12352_v2 }
0x1251   :  { %10158 = vmatmul.mubr.msk.f32.vlgmr.msra.gmra.mrb[50].mxu0 %vm325_vm3, %v4519_v58 }
0x1252   :  { %11571 = vmatpush3.bf16.msra.mxu0 %v13288_v53  ;;  %10195 = vmatprep.mubr.msk.f32.mxu0 %vm12354_vm4, %v12355_v26 }
0x1253   :  { %11572 = vmatprep.subr.bf16.mxu0 %v12352_v2 }
0x1256   :  { %11574 = vmatpush3.bf16.msra.mxu0 %v13305_v62 }
0x1257   :  { %11575 = vmatprep.subr.bf16.mxu0 %v12352_v2 }
0x125a   :  { %11577 = vmatpush3.bf16.msra.mxu0 %v13323_v3 }
0x125b   :  { %11578 = vmatprep.subr.bf16.mxu0 %v12352_v2 }
0x125e   :  { %11580 = vmatpush3.bf16.msra.mxu0 %v13333_v9 }
0x1314   :  { %v4588_v22 = vpop.f32.mrb[48].mxu0  ;;  %v4658_v30 = vpop.f32.mrb[54].mxu1 }
0x1315   :  { %v4589_v39 = vadd.f32 %v13417_v42, %v4588_v22  ;;  %v4659_v47 = vadd.f32 %v13429_v37, %v4658_v30  ;;  %v10121_v53 = vpop.f32.mrb[49].mxu0  ;;  %v10140_v59 = vpop.f32.mrb[55].mxu1 }
0x1317   :  { %v4733_v63 = vrot.slane %v4589_v39, 4  ;;  %v4743_v33 = vrot.slane %v4659_v47, 4 }
0x1319   :  { %v4735_v62 = vadd.f32 %v4733_v63, %v13410_v7  ;;  %v4745_v44 = vadd.f32 %v4743_v33, %v13412_v36  ;;  %v8147_v63 = vld [vmem:[%s14578_s7 + $0x180] sm:$0xff]  ;;  %v8148_v33 = vld [vmem:[%s14578_s7 + $0x188] sm:$0xff] }
0x131b   :  { %v8138_v50 = vmul.f32 -1.442695, %v4735_v62  ;;  %v8139_v3 = vmul.f32 -1.442695, %v4745_v44  ;;  %v8174_v62 = vld [vmem:[%s14578_s7 + $0x200] sm:$0xff]  ;;  %v11597_v44 = vpack.c.bf16 %v8148_v33, %v8147_v63 }
0x131d   :  { %12183 = vpow2.f32 %v8138_v50  ;;  %v8175_v50 = vld [vmem:[%s14578_s7 + $0x208] sm:$0xff] }
0x131e   :  { %12185 = vpow2.f32 %v8139_v3  ;;  %v8149_v3 = vld [vmem:[%s14578_s7 + $0x190] sm:$0xff] }
0x1324   :  { %v4728_v5 = vpop.f32.mrb[50].mxu0 }
0x1325   :  { %v10159_v9 = vpop.f32.mrb[51].mxu0  ;;  %v4729_v14 = vadd.f32 %v13440_v38, %v4728_v5  ;;  %v8150_v5 = vld [vmem:[%s14578_s7 + $0x198] sm:$0xff] }
0x1326   :  { %v11629_v9 = vpack.c.bf16 %v8175_v50, %v8174_v62  ;;  %v8168_v50 = vld [vmem:[%s14579_s8 + $0x198] sm:$0xff] }
0x1327   :  { %v12184_v55 = vpop.eup %12183  ;;  %v4753_v12 = vrot.slane %v4729_v14, 4 }
0x1328   :  { %v12186_v8 = vpop.eup %12185  ;;  %v4739_v10 = vadd.f32 1.0, %v12184_v55  ;;  %v11601_v55 = vpack.c.bf16 %v8150_v5, %v8149_v3  ;;  %v8205_v5 = vld [vmem:[%s14578_s7 + $0x2a0] sm:$0xff] }
0x1329   :  { %v4749_v11 = vadd.f32 1.0, %v12186_v8  ;;  %v8176_v8 = vld [vmem:[%s14578_s7 + $0x210] sm:$0xff] }
0x132a   :  { %12187 = vrcp.f32 %v4739_v10  ;;  %v8177_v10 = vld [vmem:[%s14578_s7 + $0x218] sm:$0xff] }
0x132b   :  { %12189 = vrcp.f32 %v4749_v11  ;;  %v8151_v11 = vld [vmem:[%s14578_s7 + $0x1a0] sm:$0xff]  ;;  %v11633_v14 = vpack.c.bf16 %v8177_v10, %v8176_v8 }
0x132c   :  { %v8169_v10 = vld [vmem:[%s14579_s8 + $0x1a0] sm:$0xff] }
0x1334   :  { %v12188_v16 = vpop.eup %12187 }
0x1335   :  { %v12190_v61 = vpop.eup %12189  ;;  %v4755_v19 = vmul.f32 %v12188_v16, %v4753_v12  ;;  %v8152_v12 = vld [vmem:[%s14578_s7 + $0x1a8] sm:$0xff]  ;;  %v8178_v16 = vld [vmem:[%s14578_s7 + $0x220] sm:$0xff] }
0x1336   :  { %v4762_v13 = vmul.f32 %v12190_v61, %v4760_v60  ;;  %v4758_v20 = vsub.f32 1.0, %v12190_v61  ;;  %v8179_v60 = vld [vmem:[%s14578_s7 + $0x228] sm:$0xff]  ;;  %v11605_v61 = vpack.c.bf16 %v8152_v12, %v8151_v11  ;;  %v8208_v12 = vld [vmem:[%s14578_s7 + $0x2b8] sm:$0xff] }
0x1337   :  { %v4756_v29 = vadd.f32 %v4755_v19, %v13433_v46  ;;  %v11637_v19 = vpack.c.bf16 %v8179_v60, %v8178_v16  ;;  %v8170_v11 = vld [vmem:[%s14579_s8 + $0x1a8] sm:$0xff] }
0x1338   :  { %v13897_v16 = vpack.c.bf16 %v8170_v11, %v8169_v10 }
0x1339   :  { %12191 = vtanh.f32 %v4756_v29  ;;  %v8154_v29 = vld [vmem:[%s14578_s7 + $0x1b8] sm:$0xff] }
0x1343   :  { %v12192_v45 = vpop.eup %12191 }
0x1344   :  { %v4759_v28 = vmul.f32 %v12192_v45, %v4758_v20  ;;  %v8180_v20 = vld [vmem:[%s14578_s7 + $0x230] sm:$0xff]  ;;  %v8181_v45 = vld [vmem:[%s14578_s7 + $0x238] sm:$0xff] }
0x1346   :  { %v4763_v31 = vadd.f32 %v4762_v13, %v4759_v28  ;;  %v8153_v13 = vld [vmem:[%s14578_s7 + $0x1b0] sm:$0xff] }
0x1347   :  { %v11609_v28 = vpack.c.bf16 %v8154_v29, %v8153_v13  ;;  %v8209_v13 = vld [vmem:[%s14578_s7 + $0x2c0] sm:$0xff]  ;;  %v8210_v29 = vld [vmem:[%s14578_s7 + $0x2c8] sm:$0xff] }
0x1348   :  { %4764 = vst.msk [vmem:[#allocation2 + $0x8] sm:$0x30] %vm1373_vm9, %v4763_v31  ;;  %v4767_v23 = vrot.slane %v4763_v31, 4  ;;  %v5008_v56 = vrot.slane %v4763_v31, 6 }
0x1349   :  { %4765 = vst.msk [vmem:[#allocation2 - $0x2] sm:$0x30] %vm1375_vm10, %v4763_v31  ;;  %v11641_v31 = vpack.c.bf16 %v8181_v45, %v8180_v20  ;;  %v11677_v45 = vpack.c.bf16 %v8210_v29, %v8209_v13 }
0x134a   :  { %10177 = vmatmul.mubr.msk.f32.vlgmr.msra.gmra.mrb[56].mxu1 %vm325_vm3, %v4767_v23  ;;  %10196 = vmatmul.mubr.msk.f32.vlgmr.msra.gmra.mrb[52].mxu0 %vm325_vm3, %v4767_v23 }
0x134b   :  { %11583 = vmatpush3.bf16.msra.mxu1 %v13343_v1  ;;  %10214 = vmatprep.mubr.msk.f32.mxu1 %vm12354_vm4, %v12355_v26 }
0x134c   :  { %11584 = vmatprep.subr.bf16.mxu1 %v12352_v2  ;;  %10221 = vmatprep.mubr.msk.f32.mxu0 %vm213_vm1, %v12301_v24  ;;  %v8156_v24 = vld [vmem:[%s14578_s7 + $0x1c8] sm:$0xff] }
0x134f   :  { %11586 = vmatpush3.bf16.msra.mxu1 %v13356_v15 }
0x1350   :  { %11587 = vmatprep.subr.bf16.mxu1 %v12352_v2 }
0x1353   :  { %11589 = vmatpush3.bf16.msra.mxu1 %v13372_v17 }
0x1354   :  { %11590 = vmatprep.subr.bf16.mxu1 %v12352_v2 }
0x1357   :  { %11592 = vmatpush3.bf16.msra.mxu1 %v13384_v21 }
0x1358   :  { %11630 = vmatprep.subr.bf16.mxu1 %v11629_v9 }
0x135a   :  { %10215 = vmatmul.mubr.msk.f32.vlgmr.msra.gmra.mrb[58].mxu1 %vm325_vm3, %v4767_v23  ;;  %v8155_v23 = vld [vmem:[%s14578_s7 + $0x1c0] sm:$0xff] }
0x135b   :  { %11632 = vmatpush3.bf16.msra.mxu1 %v11629_v9  ;;  %v8206_v9 = vld [vmem:[%s14578_s7 + $0x2a8] sm:$0xff] }
0x135c   :  { %11634 = vmatprep.subr.bf16.mxu1 %v11633_v14  ;;  %v11669_v8 = vpack.c.bf16 %v8206_v9, %v8205_v5 }
0x135f   :  { %11636 = vmatpush3.bf16.msra.mxu1 %v11633_v14  ;;  %v8207_v14 = vld [vmem:[%s14578_s7 + $0x2b0] sm:$0xff] }
0x1360   :  { %11638 = vmatprep.subr.bf16.mxu1 %v11637_v19  ;;  %v11673_v60 = vpack.c.bf16 %v8208_v12, %v8207_v14  ;;  %v8218_v12 = vld [vmem:[%s14580_s9 + $0x8] ss:$0 sm:$0xff] }
0x1363   :  { %11640 = vmatpush3.bf16.msra.mxu1 %v11637_v19  ;;  %v8172_v19 = vld [vmem:[%s14579_s8 + $0x1b8] sm:$0xff] }
0x1364   :  { %11642 = vmatprep.subr.bf16.mxu1 %v11641_v31 }
0x1367   :  { %11644 = vmatpush3.bf16.msra.mxu1 %v11641_v31  ;;  %v8193_v31 = vld [vmem:[%s14579_s8 + $0x1c8] sm:$0xff] }
0x141d   :  { %v4836_v1 = vpop.f32.mrb[56].mxu1  ;;  %v4906_v25 = vpop.f32.mrb[52].mxu0 }
0x141e   :  { %v4837_v48 = vadd.f32 %v13417_v42, %v4836_v1  ;;  %v4907_v54 = vadd.f32 %v13429_v37, %v4906_v25  ;;  %v10178_v0 = vpop.f32.mrb[57].mxu1  ;;  %v10197_v32 = vpop.f32.mrb[53].mxu0  ;;  %v8182_v1 = vld [vmem:[%s14578_s7 + $0x240] sm:$0xff]  ;;  %v8183_v25 = vld [vmem:[%s14578_s7 + $0x248] sm:$0xff] }
0x141f   :  { %v8157_v0 = vld [vmem:[%s14578_s7 + $0x1d0] sm:$0xff]  ;;  %v8158_v32 = vld [vmem:[%s14578_s7 + $0x1d8] sm:$0xff] }
0x1420   :  { %v4981_v34 = vrot.slane %v4837_v48, 2  ;;  %v4991_v15 = vrot.slane %v4907_v54, 2  ;;  %v11613_v48 = vpack.c.bf16 %v8156_v24, %v8155_v23  ;;  %v11645_v54 = vpack.c.bf16 %v8183_v25, %v8182_v1  ;;  %v8211_v23 = vld [vmem:[%s14578_s7 + $0x2d0] sm:$0xff]  ;;  %v8212_v24 = vld [vmem:[%s14578_s7 + $0x2d8] sm:$0xff] }
0x1421   :  { %v11681_v25 = vpack.c.bf16 %v8212_v24, %v8211_v23 }
0x1422   :  { %v4983_v35 = vadd.f32 %v4981_v34, %v13410_v7  ;;  %v4993_v17 = vadd.f32 %v4991_v15, %v13412_v36  ;;  %v8184_v34 = vld [vmem:[%s14578_s7 + $0x250] sm:$0xff]  ;;  %v8185_v15 = vld [vmem:[%s14578_s7 + $0x258] sm:$0xff]  ;;  %11646 = vmatprep.subr.bf16.mxu1 %v11645_v54 }
0x1423   :  { %11648 = vmatpush3.bf16.msra.mxu1 %v11645_v54  ;;  %v8195_v54 = vld [vmem:[%s14579_s8 + $0x1d8] sm:$0xff] }
0x1424   :  { %v8143_v40 = vmul.f32 -1.442695, %v4983_v35  ;;  %v8144_v41 = vmul.f32 -1.442695, %v4993_v17  ;;  %v11617_v35 = vpack.c.bf16 %v8158_v32, %v8157_v0  ;;  %v11649_v17 = vpack.c.bf16 %v8185_v15, %v8184_v34  ;;  %v8213_v0 = vld [vmem:[%s14578_s7 + $0x2e0] sm:$0xff]  ;;  %v8214_v32 = vld [vmem:[%s14578_s7 + $0x2e8] sm:$0xff] }
0x1425   :  { %v11685_v15 = vpack.c.bf16 %v8214_v32, %v8213_v0 }
0x1426   :  { %12193 = vpow2.f32 %v8143_v40  ;;  %11650 = vmatprep.subr.bf16.mxu1 %v11649_v17  ;;  %v8159_v40 = vld [vmem:[%s14578_s7 + $0x1e0] sm:$0xff] }
0x1427   :  { %12195 = vpow2.f32 %v8144_v41  ;;  %11652 = vmatpush3.bf16.msra.mxu1 %v11649_v17  ;;  %v8160_v41 = vld [vmem:[%s14578_s7 + $0x1e8] sm:$0xff] }
0x1428   :  { %v8197_v17 = vld [vmem:[%s14579_s8 + $0x1e8] sm:$0xff] }
0x142d   :  { %v4976_v21 = vpop.f32.mrb[58].mxu1 }
0x142e   :  { %v10216_v43 = vpop.f32.mrb[59].mxu1  ;;  %v4977_v37 = vadd.f32 %v13440_v38, %v4976_v21  ;;  %v8186_v21 = vld [vmem:[%s14578_s7 + $0x260] sm:$0xff] }
0x142f   :  { %v11621_v43 = vpack.c.bf16 %v8160_v41, %v8159_v40  ;;  %v8215_v40 = vld [vmem:[%s14578_s7 + $0x2f0] sm:$0xff]  ;;  %v8216_v41 = vld [vmem:[%s14578_s7 + $0x2f8] sm:$0xff] }
0x1430   :  { %v12194_v49 = vpop.eup %12193  ;;  %v5001_v52 = vrot.slane %v4977_v37, 2  ;;  %v8188_v37 = vld [vmem:[%s14578_s7 + $0x270] sm:$0xff] }
0x1431   :  { %v12196_v51 = vpop.eup %12195  ;;  %v4987_v6 = vadd.f32 1.0, %v12194_v49  ;;  %v8187_v49 = vld [vmem:[%s14578_s7 + $0x268] sm:$0xff] }
0x1432   :  { %v4997_v42 = vadd.f32 1.0, %v12196_v51  ;;  %v11653_v51 = vpack.c.bf16 %v8187_v49, %v8186_v21  ;;  %v8198_v49 = vld [vmem:[%s14579_s8 + $0x1f0] sm:$0xff] }
0x1433   :  { %12197 = vrcp.f32 %v4987_v6  ;;  %v8161_v6 = vld [vmem:[%s14578_s7 + $0x1f0] sm:$0xff] }
0x1434   :  { %12199 = vrcp.f32 %v4997_v42  ;;  %v8162_v42 = vld [vmem:[%s14578_s7 + $0x1f8] sm:$0xff]  ;;  %11654 = vmatprep.subr.bf16.mxu1 %v11653_v51 }
0x1435   :  { %11656 = vmatpush3.bf16.msra.mxu1 %v11653_v51  ;;  %v8199_v51 = vld [vmem:[%s14579_s8 + $0x1f8] sm:$0xff] }
0x143d   :  { %v12198_v18 = vpop.eup %12197 }
0x143e   :  { %v12200_v7 = vpop.eup %12199  ;;  %v5003_v57 = vmul.f32 %v12198_v18, %v5001_v52  ;;  %v11625_v52 = vpack.c.bf16 %v8162_v42, %v8161_v6  ;;  %v8189_v18 = vld [vmem:[%s14578_s7 + $0x278] sm:$0xff]  ;;  %v13974_v6 = vpack.c.bf16 %v8199_v51, %v8198_v49  ;;  %v8219_v42 = vld [vmem:[%s14579_s8 + $0x200] sm:$0xff] }
0x143f   :  { %v5010_v36 = vmul.f32 %v12200_v7, %v5008_v56  ;;  %v5006_v22 = vsub.f32 1.0, %v12200_v7  ;;  %v11657_v56 = vpack.c.bf16 %v8189_v18, %v8188_v37  ;;  %v8201_v7 = vld [vmem:[%s14578_s7 + $0x280] sm:$0xff]  ;;  %v8220_v37 = vld [vmem:[%s14579_s8 + $0x208] sm:$0xff]  ;;  %v8221_v18 = vld [vmem:[%s14579_s8 + $0x210] sm:$0xff] }
0x1440   :  { %v5004_v58 = vadd.f32 %v5003_v57, %v13433_v46  ;;  %v12302_v46 = vld [vmem:[%s14608_s26 + $0x8] sm:$0xff] }
0x1441   :  { %11658 = vmatprep.subr.bf16.mxu1 %v11657_v56  ;;  %v8202_v57 = vld [vmem:[%s14578_s7 + $0x288] sm:$0xff] }
0x1442   :  { %12201 = vtanh.f32 %v5004_v58  ;;  %11660 = vmatpush3.bf16.msra.mxu1 %v11657_v56  ;;  %v8222_v56 = vld [vmem:[%s14579_s8 + $0x218] sm:$0xff] }
0x1443   :  { %11693 = vmatprep.subr.bf16.mxu1 %v12352_v2 }
0x144c   :  { %v12202_v30 = vpop.eup %12201 }
0x144d   :  { %v5007_v39 = vmul.f32 %v12202_v30, %v5006_v22 }
0x144f   :  { %v13727_v47 = vadd.f32 %v5010_v36, %v5007_v39  ;;  %v11661_v36 = vpack.c.bf16 %v8202_v57, %v8201_v7  ;;  %v13997_v7 = vpack.c.bf16 %v8222_v56, %v8221_v18  ;;  %v8223_v57 = vld [vmem:[%s14579_s8 + $0x220] sm:$0xff] }
0x1451   :  { %5012 = vst.msk [vmem:[#allocation2 + $0x8] sm:$0xc0] %vm1623_vm11, %v13727_v47  ;;  %5015 = vst.msk [vmem:[#allocation7 - $0x2] sm:$0xc0] %vm1623_vm11, %v13727_v47 }
0x1452   :  { %5013 = vst.msk [vmem:[#allocation2 - $0x6] sm:$0xc0] %vm1625_vm12, %v13727_v47 }
0x1458   :  { %v5023_v53 = vld [vmem:[#allocation2 + $0x8] sm:$0xff] }
0x1459   :  { %v5022_v38 = vld [vmem:[#allocation2] sm:$0xff]  ;;  %5100 = vst.msk [vmem:[#allocation3 + $0x8] sm:$0xff] %vm325_vm3, %v5023_v53 }
0x145a   :  { %v11593_v59 = vpack.c.bf16 %v5023_v53, %v5022_v38  ;;  %5099 = vst.msk [vmem:[#allocation3] sm:$0xff] %vm325_vm3, %v5022_v38  ;;  %v8165_v38 = vld [vmem:[%s14579_s8 + $0x180] sm:$0xff]  ;;  %v8166_v53 = vld [vmem:[%s14579_s8 + $0x188] sm:$0xff] }
0x145b   :  { %v13860_v63 = vpack.c.bf16 %v8166_v53, %v8165_v38  ;;  %v8164_v38 = vld [vmem:[%s14580_s9 + $0x6] ss:$0 sm:$0xff]  ;;  %v8191_v53 = vld [vmem:[%s14580_s9 + $0x7] ss:$0 sm:$0xff] }
0x145c   :  { %11594 = vmatprep.subr.bf16.mxu0 %v11593_v59 }
0x145d   :  { %11596 = vmatpush3.bf16.msra.mxu0 %v11593_v59  ;;  %v8203_v59 = vld [vmem:[%s14578_s7 + $0x290] sm:$0xff] }
0x145e   :  { %11598 = vmatprep.subr.bf16.mxu0 %v11597_v44 }
0x1460   :  { %10222 = vmatmul.mubr.msk.f32.vlgmr.msra.gmra.mrb[54].mxu0 %vm213_vm1, %v12302_v46  ;;  %v8204_v46 = vld [vmem:[%s14578_s7 + $0x298] sm:$0xff]  ;;  %s12360_s7 = smov [#allocation7]  }
0x1461   :  { %11600 = vmatpush3.bf16.msra.mxu0 %v11597_v44  ;;  %v11665_v62 = vpack.c.bf16 %v8204_v46, %v8203_v59  ;;  %v8167_v44 = vld [vmem:[%s14579_s8 + $0x190] sm:$0xff]  ;;  %s7929_s30 = sshll.u32 %s12360_s7, 4  ;;  %s14531_s30 = int_to_ptr.vmem [resolvable:$true] %s7929_s30 }
0x1462   :  { %11602 = vmatprep.subr.bf16.mxu0 %v11601_v55 }
0x1465   :  { %11604 = vmatpush3.bf16.msra.mxu0 %v11601_v55  ;;  %v13879_v55 = vpack.c.bf16 %v8168_v50, %v8167_v44 }
0x1466   :  { %11606 = vmatprep.subr.bf16.mxu0 %v11605_v61 }
0x1469   :  { %11608 = vmatpush3.bf16.msra.mxu0 %v11605_v61  ;;  %v8171_v61 = vld [vmem:[%s14579_s8 + $0x1b0] sm:$0xff] }
0x146a   :  { %11610 = vmatprep.subr.bf16.mxu0 %v11609_v28  ;;  %v13913_v20 = vpack.c.bf16 %v8172_v19, %v8171_v61 }
0x146d   :  { %11612 = vmatpush3.bf16.msra.mxu0 %v11609_v28  ;;  %v8192_v28 = vld [vmem:[%s14579_s8 + $0x1c0] sm:$0xff] }
0x146e   :  { %11614 = vmatprep.subr.bf16.mxu0 %v11613_v48  ;;  %v13929_v1 = vpack.c.bf16 %v8193_v31, %v8192_v28 }
0x1471   :  { %11616 = vmatpush3.bf16.msra.mxu0 %v11613_v48  ;;  %v8194_v48 = vld [vmem:[%s14579_s8 + $0x1d0] sm:$0xff] }
0x1472   :  { %11618 = vmatprep.subr.bf16.mxu0 %v11617_v35  ;;  %v13946_v34 = vpack.c.bf16 %v8195_v54, %v8194_v48  ;;  %v14081_v54 = vld [vmem:[%s14581_s10 + $0x8] ss:$0 sm:$0xff] }
0x1475   :  { %11620 = vmatpush3.bf16.msra.mxu0 %v11617_v35  ;;  %v8196_v35 = vld [vmem:[%s14579_s8 + $0x1e0] sm:$0xff] }
0x1476   :  { %11622 = vmatprep.subr.bf16.mxu0 %v11621_v43  ;;  %v13964_v21 = vpack.c.bf16 %v8197_v17, %v8196_v35 }
0x1479   :  { %11624 = vmatpush3.bf16.msra.mxu0 %v11621_v43  ;;  %v11689_v43 = vpack.c.bf16 %v8216_v41, %v8215_v40 }
0x147a   :  { %11626 = vmatprep.subr.bf16.mxu0 %v11625_v52 }
0x147d   :  { %11628 = vmatpush3.bf16.msra.mxu0 %v11625_v52  ;;  %v13984_v52 = vpack.c.bf16 %v8220_v37, %v8219_v42 }
0x147e   :  { %11662 = vmatprep.subr.bf16.mxu0 %v11661_v36 }
0x1533   :  { %v10223_v58 = vpop.f32.mrb[54].mxu0 }
0x1534   :  { %5105 = vrot.lane.b32.xlu1 %v10223_v58, %s12356_s4  ;;  %v5090_v22 = vpop.f32.mrb[55].mxu0 }
0x1535   :  { %5103 = vrot.lane.b32.xlu0 %v5090_v22, %s12356_s4  ;;  %v8225_v22 = vld [vmem:[%s14579_s8 + $0x230] sm:$0xff] }
0x15a6   :  { %v5106_v30 = vpop.permute.xlu1 %5105 }
0x15a7   :  { %5110 = vst.msk [vmem:[#allocation3 + $0x8] sm:$0xff] %vm2702_vm13, %v5106_v30  ;;  %v5104_v39 = vpop.permute.xlu0 %5103  ;;  %v8226_v30 = vld [vmem:[%s14579_s8 + $0x238] sm:$0xff] }
0x15a8   :  { %5109 = vst.msk [vmem:[#allocation3] sm:$0xff] %vm2702_vm13, %v5104_v39  ;;  %v14025_v39 = vpack.c.bf16 %v8226_v30, %v8225_v22 }
0x15ae   :  { %v13868_v3 = vld [vmem:[#allocation3 + $0x8] sm:$0xff] }
0x15af   :  { %v5111_v33 = vld [vmem:[#allocation3] sm:$0xff] }
0x15b0   :  { %10256 = vmatprep.mubr.f32.mxu0 %v5111_v33  ;;  %10291 = vmatprep.mubr.f32.mxu1 %v5111_v33 }
0x15b1   :  { %10257 = vmatmul.mubr.f32.vlgmr.msra.gmra.mrb[56].mxu0 %v13868_v3  ;;  %10292 = vmatmul.mubr.f32.vlgmr.msra.gmra.mrb[60].mxu1 %v13868_v3 }
0x15b2   :  { %11664 = vmatpush3.bf16.msra.mxu0 %v11661_v36  ;;  %11695 = vmatpush3.bf16.msra.mxu1 %v13860_v63  ;;  %v8224_v36 = vld [vmem:[%s14579_s8 + $0x228] sm:$0xff]  ;;  %s12358_s8 = smov 96  }
0x15b3   :  { %10326 = vmatprep.mubr.f32.mxu0 %v5111_v33  ;;  %11666 = vmatprep.subr.bf16.mxu0 %v11665_v62  ;;  %v14013_v58 = vpack.c.bf16 %v8224_v36, %v8223_v57 }
0x15b4   :  { %11696 = vmatprep.subr.bf16.mxu1 %v12352_v2  ;;  %10345 = vmatprep.mubr.msk.f32.mxu1 %vm12354_vm4, %v12355_v26 }
0x15b6   :  { %11668 = vmatpush3.bf16.msra.mxu0 %v11665_v62  ;;  %11698 = vmatpush3.bf16.msra.mxu1 %v13879_v55 }
0x15b7   :  { %11670 = vmatprep.subr.bf16.mxu0 %v11669_v8  ;;  %11699 = vmatprep.subr.bf16.mxu1 %v12352_v2 }
0x15ba   :  { %11672 = vmatpush3.bf16.msra.mxu0 %v11669_v8  ;;  %11701 = vmatpush3.bf16.msra.mxu1 %v13897_v16 }
0x15bb   :  { %11674 = vmatprep.subr.bf16.mxu0 %v11673_v60  ;;  %11702 = vmatprep.subr.bf16.mxu1 %v12352_v2 }
0x15be   :  { %11676 = vmatpush3.bf16.msra.mxu0 %v11673_v60  ;;  %11704 = vmatpush3.bf16.msra.mxu1 %v13913_v20  ;;  %v14070_v60 = vld [vmem:[%s14581_s10 + $0x7] ss:$0 sm:$0xff] }
0x15bf   :  { %11678 = vmatprep.subr.bf16.mxu0 %v11677_v45  ;;  %11705 = vmatprep.subr.bf16.mxu1 %v12352_v2 }
0x15c1   :  { %10346 = vmatmul.mubr.f32.vlgmr.msra.gmra.mrb[62].mxu1 %v12355_v26 }
0x15c2   :  { %11680 = vmatpush3.bf16.msra.mxu0 %v11677_v45  ;;  %11707 = vmatpush3.bf16.msra.mxu1 %v13929_v1 }
0x15c3   :  { %11682 = vmatprep.subr.bf16.mxu0 %v11681_v25  ;;  %11708 = vmatprep.subr.bf16.mxu1 %v12352_v2 }
0x15c4   :  { %10364 = vmatprep.mubr.msk.f32.mxu1 %vm12354_vm4, %v12355_v26 }
0x15c6   :  { %11684 = vmatpush3.bf16.msra.mxu0 %v11681_v25  ;;  %11710 = vmatpush3.bf16.msra.mxu1 %v13946_v34 }
0x15c7   :  { %11686 = vmatprep.subr.bf16.mxu0 %v11685_v15  ;;  %11711 = vmatprep.subr.bf16.mxu1 %v12352_v2 }
0x15ca   :  { %11688 = vmatpush3.bf16.msra.mxu0 %v11685_v15  ;;  %11713 = vmatpush3.bf16.msra.mxu1 %v13964_v21 }
0x15cb   :  { %11690 = vmatprep.subr.bf16.mxu0 %v11689_v43  ;;  %11714 = vmatprep.subr.bf16.mxu1 %v12352_v2 }
0x15ce   :  { %11692 = vmatpush3.bf16.msra.mxu0 %v11689_v43  ;;  %11716 = vmatpush3.bf16.msra.mxu1 %v13974_v6 }
0x15cf   :  { %11717 = vmatprep.subr.bf16.mxu0 %v12352_v2  ;;  %11729 = vmatprep.subr.bf16.mxu1 %v12352_v2 }
0x15d1   :  { %10327 = vmatmul.mubr.f32.vlgmr.msra.gmra.mrb[58].mxu0 %v13868_v3  ;;  %10365 = vmatmul.mubr.f32.vlgmr.msra.gmra.mrb[64].mxu1 %v12355_v26  ;;  %v14058_v3 = vld [vmem:[%s14581_s10 + $0x6] ss:$0 sm:$0xff]  ;;  %s14611_s10 = sld [smem:[#allocation13_spill]] }
0x15d2   :  { %11719 = vmatpush3.bf16.msra.mxu0 %v13984_v52  ;;  %10383 = vmatprep.mubr.msk.f32.mxu0 %vm12354_vm4, %v12355_v26 }
0x15d3   :  { %11720 = vmatprep.subr.bf16.mxu0 %v12352_v2  ;;  %11731 = vmatpush3.bf16.msra.mxu1 %v13860_v63 }
0x15d4   :  { %11732 = vmatprep.subr.bf16.mxu1 %v12352_v2  ;;  %10402 = vmatprep.mubr.msk.f32.mxu1 %vm12354_vm4, %v12355_v26 }
0x15d6   :  { %11722 = vmatpush3.bf16.msra.mxu0 %v13997_v7 }
0x15d7   :  { %11723 = vmatprep.subr.bf16.mxu0 %v12352_v2  ;;  %11734 = vmatpush3.bf16.msra.mxu1 %v13879_v55 }
0x15d8   :  { %11735 = vmatprep.subr.bf16.mxu1 %v12352_v2 }
0x15da   :  { %11725 = vmatpush3.bf16.msra.mxu0 %v14013_v58 }
0x15db   :  { %11726 = vmatprep.subr.bf16.mxu0 %v12352_v2  ;;  %11737 = vmatpush3.bf16.msra.mxu1 %v13897_v16 }
0x15dc   :  { %11738 = vmatprep.subr.bf16.mxu1 %v12352_v2 }
0x15de   :  { %11728 = vmatpush3.bf16.msra.mxu0 %v14025_v39 }
0x15df   :  { %11741 = vmatprep.subr.bf16.mxu0 %v12352_v2  ;;  %11740 = vmatpush3.bf16.msra.mxu1 %v13913_v20 }
0x15e0   :  { %11753 = vmatprep.subr.bf16.mxu1 %v12352_v2 }
0x15e1   :  { %10384 = vmatmul.mubr.f32.vlgmr.msra.gmra.mrb[60].mxu0 %v12355_v26 }
0x15e2   :  { %11743 = vmatpush3.bf16.msra.mxu0 %v13929_v1  ;;  %10421 = vmatprep.mubr.msk.f32.mxu0 %vm12354_vm4, %v12355_v26 }
0x15e3   :  { %11744 = vmatprep.subr.bf16.mxu0 %v12352_v2 }
0x15e6   :  { %11746 = vmatpush3.bf16.msra.mxu0 %v13946_v34 }
0x15e7   :  { %11747 = vmatprep.subr.bf16.mxu0 %v12352_v2 }
0x15ea   :  { %11749 = vmatpush3.bf16.msra.mxu0 %v13964_v21 }
0x15eb   :  { %11750 = vmatprep.subr.bf16.mxu0 %v12352_v2 }
0x15ee   :  { %11752 = vmatpush3.bf16.msra.mxu0 %v13974_v6 }
0x15ef   :  { %11765 = vmatprep.subr.bf16.mxu0 %v12352_v2 }
0x1684   :  { %v10258_v59 = vpop.f32.mrb[56].mxu0  ;;  %v10293_v46 = vpop.f32.mrb[60].mxu1 }
0x1685   :  { %v14051_v33 = vadd.f32 %v10258_v59, %v8164_v38  ;;  %v14053_v62 = vadd.f32 %v10293_v46, %v8191_v53  ;;  %v5204_v44 = vpop.f32.mrb[57].mxu0  ;;  %v5315_v50 = vpop.f32.mrb[61].mxu1 }
0x1686   :  { %v14060_v9 = vadd.f32 %v8164_v38, %v5204_v44  ;;  %v14072_v29 = vadd.f32 %v8191_v53, %v5315_v50 }
0x1694   :  { %v5518_v5 = vpop.f32.mrb[62].mxu1 }
0x1695   :  { %v5519_v8 = vadd.f32 %v14058_v3, %v5518_v5  ;;  %v10347_v10 = vpop.f32.mrb[63].mxu1 }
0x1697   :  { %v5674_v11 = vadd.f32 %v5519_v8, %v14060_v9 }
0x1699   :  { %v8231_v14 = vmul.f32 -1.442695, %v5674_v11 }
0x169b   :  { %12203 = vpow2.f32 %v8231_v14 }
0x16a4   :  { %v10328_v61 = vpop.f32.mrb[58].mxu0  ;;  %v5594_v19 = vpop.f32.mrb[64].mxu1 }
0x16a5   :  { %v12204_v13 = vpop.eup %12203  ;;  %v14074_v45 = vadd.f32 %v10328_v61, %v8218_v12  ;;  %v5595_v28 = vadd.f32 %v14070_v60, %v5594_v19  ;;  %v5426_v31 = vpop.f32.mrb[59].mxu0 }
0x16a6   :  { %v10366_v23 = vpop.f32.mrb[65].mxu1  ;;  %v5678_v25 = vadd.f32 1.0, %v12204_v13  ;;  %v14084_v41 = vadd.f32 %v8218_v12, %v5426_v31 }
0x16a7   :  { %v5681_v24 = vadd.f32 %v5595_v28, %v14072_v29 }
0x16a9   :  { %v8232_v48 = vmul.f32 -1.442695, %v5681_v24 }
0x16ab   :  { %12205 = vpow2.f32 %v8232_v48 }
0x16ac   :  { %12207 = vrcp.f32 %v5678_v25 }
0x16b4   :  { %v5670_v0 = vpop.f32.mrb[60].mxu0 }
0x16b5   :  { %v12206_v32 = vpop.eup %12205  ;;  %v5671_v15 = vadd.f32 %v14081_v54, %v5670_v0  ;;  %v10385_v35 = vpop.f32.mrb[61].mxu0 }
0x16b6   :  { %v12208_v17 = vpop.eup %12207  ;;  %v5685_v40 = vadd.f32 1.0, %v12206_v32 }
0x16b7   :  { %v5688_v43 = vmul.f32 %v12208_v17, %v5671_v15 }
0x16b8   :  { %12209 = vrcp.f32 %v5685_v40 }
0x16b9   :  { %v5689_v49 = vadd.f32 %v5688_v43, %v14084_v41 }
0x16bb   :  { %12211 = vtanh.f32 %v5689_v49 }
0x16c2   :  { %v12210_v51 = vpop.eup %12209 }
0x16c3   :  { %v5691_v42 = vsub.f32 1.0, %v12210_v51  ;;  %v5693_v18 = vmul.f32 0.0, %v12210_v51 }
0x16c5   :  { %v12212_v37 = vpop.eup %12211 }
0x16c6   :  { %v5692_v56 = vmul.f32 %v12212_v37, %v5691_v42 }
0x16c8   :  { %v5694_v57 = vadd.f32 %v5693_v18, %v5692_v56 }
0x16ca   :  { %5695 = vst.msk [vmem:[#allocation2] sm:$0x3] %vm874_vm5, %v5694_v57  ;;  %10403 = vmatmul.mubr.msk.f32.vlgmr.msra.gmra.mrb[66].mxu1 %vm325_vm3, %v5694_v57  ;;  %10422 = vmatmul.mubr.msk.f32.vlgmr.msra.gmra.mrb[62].mxu0 %vm325_vm3, %v5694_v57  ;;  %v5938_v24 = vrot.slane %v5694_v57, 6 }
0x16cb   :  { %5696 = vst.msk [vmem:[#allocation2 + $0xe] sm:$0x3] %vm876_vm6, %v5694_v57  ;;  %11755 = vmatpush3.bf16.msra.mxu1 %v13984_v52  ;;  %10440 = vmatprep.mubr.msk.f32.mxu1 %vm12354_vm4, %v12355_v26 }
0x16cc   :  { %11756 = vmatprep.subr.bf16.mxu1 %v12352_v2  ;;  %11767 = vmatpush3.bf16.msra.mxu0 %v13860_v63 }
0x16cd   :  { %11768 = vmatprep.subr.bf16.mxu0 %v12352_v2  ;;  %10459 = vmatprep.mubr.msk.f32.mxu0 %vm12354_vm4, %v12355_v26 }
0x16cf   :  { %11758 = vmatpush3.bf16.msra.mxu1 %v13997_v7 }
0x16d0   :  { %11759 = vmatprep.subr.bf16.mxu1 %v12352_v2  ;;  %11770 = vmatpush3.bf16.msra.mxu0 %v13879_v55 }
0x16d1   :  { %11771 = vmatprep.subr.bf16.mxu0 %v12352_v2 }
0x16d3   :  { %11761 = vmatpush3.bf16.msra.mxu1 %v14013_v58 }
0x16d4   :  { %11762 = vmatprep.subr.bf16.mxu1 %v12352_v2  ;;  %11773 = vmatpush3.bf16.msra.mxu0 %v13897_v16 }
0x16d5   :  { %11774 = vmatprep.subr.bf16.mxu0 %v12352_v2 }
0x16d7   :  { %11764 = vmatpush3.bf16.msra.mxu1 %v14025_v39 }
0x16d8   :  { %11777 = vmatprep.subr.bf16.mxu1 %v12352_v2  ;;  %11776 = vmatpush3.bf16.msra.mxu0 %v13913_v20 }
0x16d9   :  { %11789 = vmatprep.subr.bf16.mxu0 %v12352_v2 }
0x16da   :  { %10441 = vmatmul.mubr.msk.f32.vlgmr.msra.gmra.mrb[68].mxu1 %vm325_vm3, %v5694_v57 }
0x16db   :  { %11779 = vmatpush3.bf16.msra.mxu1 %v13929_v1  ;;  %10478 = vmatprep.mubr.msk.f32.mxu1 %vm12354_vm4, %v12355_v26 }
0x16dc   :  { %11780 = vmatprep.subr.bf16.mxu1 %v12352_v2 }
0x16df   :  { %11782 = vmatpush3.bf16.msra.mxu1 %v13946_v34 }
0x16e0   :  { %11783 = vmatprep.subr.bf16.mxu1 %v12352_v2 }
0x16e3   :  { %11785 = vmatpush3.bf16.msra.mxu1 %v13964_v21 }
0x16e4   :  { %11786 = vmatprep.subr.bf16.mxu1 %v12352_v2 }
0x16e7   :  { %11788 = vmatpush3.bf16.msra.mxu1 %v13974_v6 }
0x16e8   :  { %11801 = vmatprep.subr.bf16.mxu1 %v12352_v2 }
0x179d   :  { %v5766_v36 = vpop.f32.mrb[66].mxu1  ;;  %v5836_v22 = vpop.f32.mrb[62].mxu0 }
0x179e   :  { %v5767_v30 = vadd.f32 %v14058_v3, %v5766_v36  ;;  %v5837_v38 = vadd.f32 %v14070_v60, %v5836_v22  ;;  %v10404_v53 = vpop.f32.mrb[67].mxu1  ;;  %v10423_v59 = vpop.f32.mrb[63].mxu0 }
0x17a0   :  { %v5911_v46 = vrot.slane %v5767_v30, 6  ;;  %v5921_v44 = vrot.slane %v5837_v38, 6 }
0x17a2   :  { %v5913_v50 = vadd.f32 %v5911_v46, %v14060_v9  ;;  %v5923_v5 = vadd.f32 %v5921_v44, %v14072_v29 }
0x17a4   :  { %v8236_v8 = vmul.f32 -1.442695, %v5913_v50  ;;  %v8237_v10 = vmul.f32 -1.442695, %v5923_v5 }
0x17a6   :  { %12213 = vpow2.f32 %v8236_v8 }
0x17a7   :  { %12215 = vpow2.f32 %v8237_v10 }
0x17ad   :  { %v5906_v11 = vpop.f32.mrb[68].mxu1 }
0x17ae   :  { %v10442_v14 = vpop.f32.mrb[69].mxu1  ;;  %v5907_v28 = vadd.f32 %v14081_v54, %v5906_v11 }
0x17b0   :  { %v12214_v12 = vpop.eup %12213  ;;  %v5931_v31 = vrot.slane %v5907_v28, 6 }
0x17b1   :  { %v12216_v61 = vpop.eup %12215  ;;  %v5917_v19 = vadd.f32 1.0, %v12214_v12 }
0x17b2   :  { %v5927_v13 = vadd.f32 1.0, %v12216_v61 }
0x17b3   :  { %12217 = vrcp.f32 %v5917_v19 }
0x17b4   :  { %12219 = vrcp.f32 %v5927_v13 }
0x17bd   :  { %v12218_v23 = vpop.eup %12217 }
0x17be   :  { %v12220_v25 = vpop.eup %12219  ;;  %v5933_v48 = vmul.f32 %v12218_v23, %v5931_v31 }
0x17bf   :  { %v5940_v0 = vmul.f32 %v12220_v25, %v5938_v24  ;;  %v5936_v15 = vsub.f32 1.0, %v12220_v25 }
0x17c0   :  { %v5934_v32 = vadd.f32 %v5933_v48, %v14084_v41 }
0x17c2   :  { %12221 = vtanh.f32 %v5934_v32 }
0x17cc   :  { %v12222_v35 = vpop.eup %12221 }
0x17cd   :  { %v5937_v17 = vmul.f32 %v12222_v35, %v5936_v15 }
0x17cf   :  { %v14128_v40 = vadd.f32 %v5940_v0, %v5937_v17 }
0x17d1   :  { %5942 = vst.msk [vmem:[#allocation2] sm:$0xc] %vm1123_vm7, %v14128_v40  ;;  %v5945_v43 = vrot.slane %v14128_v40, 2  ;;  %v6186_v12 = vrot.slane %v14128_v40, 6 }
0x17d2   :  { %5943 = vst.msk [vmem:[#allocation2 + $0xa] sm:$0xc] %vm1125_vm8, %v14128_v40 }
0x17d3   :  { %10460 = vmatmul.mubr.msk.f32.vlgmr.msra.gmra.mrb[64].mxu0 %vm325_vm3, %v5945_v43  ;;  %10479 = vmatmul.mubr.msk.f32.vlgmr.msra.gmra.mrb[70].mxu1 %vm325_vm3, %v5945_v43 }
0x17d4   :  { %11791 = vmatpush3.bf16.msra.mxu0 %v13984_v52  ;;  %10497 = vmatprep.mubr.msk.f32.mxu0 %vm12354_vm4, %v12355_v26 }
0x17d5   :  { %11792 = vmatprep.subr.bf16.mxu0 %v12352_v2  ;;  %11803 = vmatpush3.bf16.msra.mxu1 %v13860_v63 }
0x17d6   :  { %11804 = vmatprep.subr.bf16.mxu1 %v12352_v2  ;;  %10516 = vmatprep.mubr.msk.f32.mxu1 %vm12354_vm4, %v12355_v26 }
0x17d8   :  { %11794 = vmatpush3.bf16.msra.mxu0 %v13997_v7 }
0x17d9   :  { %11795 = vmatprep.subr.bf16.mxu0 %v12352_v2  ;;  %11806 = vmatpush3.bf16.msra.mxu1 %v13879_v55 }
0x17da   :  { %11807 = vmatprep.subr.bf16.mxu1 %v12352_v2 }
0x17dc   :  { %11797 = vmatpush3.bf16.msra.mxu0 %v14013_v58 }
0x17dd   :  { %11798 = vmatprep.subr.bf16.mxu0 %v12352_v2  ;;  %11809 = vmatpush3.bf16.msra.mxu1 %v13897_v16 }
0x17de   :  { %11810 = vmatprep.subr.bf16.mxu1 %v12352_v2 }
0x17e0   :  { %11800 = vmatpush3.bf16.msra.mxu0 %v14025_v39 }
0x17e1   :  { %11813 = vmatprep.subr.bf16.mxu0 %v12352_v2  ;;  %11812 = vmatpush3.bf16.msra.mxu1 %v13913_v20 }
0x17e2   :  { %11825 = vmatprep.subr.bf16.mxu1 %v12352_v2 }
0x17e3   :  { %10498 = vmatmul.mubr.msk.f32.vlgmr.msra.gmra.mrb[66].mxu0 %vm325_vm3, %v5945_v43 }
0x17e4   :  { %11815 = vmatpush3.bf16.msra.mxu0 %v13929_v1  ;;  %10535 = vmatprep.mubr.msk.f32.mxu0 %vm12354_vm4, %v12355_v26 }
0x17e5   :  { %11816 = vmatprep.subr.bf16.mxu0 %v12352_v2 }
0x17e8   :  { %11818 = vmatpush3.bf16.msra.mxu0 %v13946_v34 }
0x17e9   :  { %11819 = vmatprep.subr.bf16.mxu0 %v12352_v2 }
0x17ec   :  { %11821 = vmatpush3.bf16.msra.mxu0 %v13964_v21 }
0x17ed   :  { %11822 = vmatprep.subr.bf16.mxu0 %v12352_v2 }
0x17f0   :  { %11824 = vmatpush3.bf16.msra.mxu0 %v13974_v6 }
0x17f1   :  { %11837 = vmatprep.subr.bf16.mxu0 %v12352_v2 }
0x18a6   :  { %v6014_v49 = vpop.f32.mrb[64].mxu0  ;;  %v6084_v51 = vpop.f32.mrb[70].mxu1 }
0x18a7   :  { %v6015_v42 = vadd.f32 %v14058_v3, %v6014_v49  ;;  %v6085_v37 = vadd.f32 %v14070_v60, %v6084_v51  ;;  %v10461_v18 = vpop.f32.mrb[65].mxu0  ;;  %v10480_v56 = vpop.f32.mrb[71].mxu1 }
0x18a9   :  { %v6159_v57 = vrot.slane %v6015_v42, 4  ;;  %v6169_v36 = vrot.slane %v6085_v37, 4 }
0x18ab   :  { %v6161_v22 = vadd.f32 %v6159_v57, %v14060_v9  ;;  %v6171_v30 = vadd.f32 %v6169_v36, %v14072_v29 }
0x18ad   :  { %v8241_v38 = vmul.f32 -1.442695, %v6161_v22  ;;  %v8242_v53 = vmul.f32 -1.442695, %v6171_v30 }
0x18af   :  { %12223 = vpow2.f32 %v8241_v38 }
0x18b0   :  { %12225 = vpow2.f32 %v8242_v53 }
0x18b6   :  { %v6154_v59 = vpop.f32.mrb[66].mxu0 }
0x18b7   :  { %v10499_v46 = vpop.f32.mrb[67].mxu0  ;;  %v6155_v10 = vadd.f32 %v14081_v54, %v6154_v59 }
0x18b9   :  { %v12224_v44 = vpop.eup %12223  ;;  %v6179_v11 = vrot.slane %v6155_v10, 4 }
0x18ba   :  { %v12226_v50 = vpop.eup %12225  ;;  %v6165_v5 = vadd.f32 1.0, %v12224_v44 }
0x18bb   :  { %v6175_v8 = vadd.f32 1.0, %v12226_v50 }
0x18bc   :  { %12227 = vrcp.f32 %v6165_v5 }
0x18bd   :  { %12229 = vrcp.f32 %v6175_v8 }
0x18c6   :  { %v12228_v14 = vpop.eup %12227 }
0x18c7   :  { %v12230_v61 = vpop.eup %12229  ;;  %v6181_v19 = vmul.f32 %v12228_v14, %v6179_v11 }
0x18c8   :  { %v6188_v13 = vmul.f32 %v12230_v61, %v6186_v12  ;;  %v6184_v31 = vsub.f32 1.0, %v12230_v61 }
0x18c9   :  { %v6182_v28 = vadd.f32 %v6181_v19, %v14084_v41 }
0x18cb   :  { %12231 = vtanh.f32 %v6182_v28 }
0x18d5   :  { %v12232_v23 = vpop.eup %12231 }
0x18d6   :  { %v6185_v24 = vmul.f32 %v12232_v23, %v6184_v31 }
0x18d8   :  { %v14175_v25 = vadd.f32 %v6188_v13, %v6185_v24 }
0x18da   :  { %6190 = vst.msk [vmem:[#allocation2] sm:$0x30] %vm1373_vm9, %v14175_v25  ;;  %v6193_v48 = vrot.slane %v14175_v25, 4 }
0x18db   :  { %6191 = vst.msk [vmem:[#allocation2 + $0x6] sm:$0x30] %vm1375_vm10, %v14175_v25 }
0x18dc   :  { %10517 = vmatmul.mubr.msk.f32.vlgmr.msra.gmra.mrb[72].mxu1 %vm325_vm3, %v6193_v48  ;;  %10536 = vmatmul.mubr.msk.f32.vlgmr.msra.gmra.mrb[68].mxu0 %vm325_vm3, %v6193_v48 }
0x18dd   :  { %11827 = vmatpush3.bf16.msra.mxu1 %v13984_v52  ;;  %10554 = vmatprep.mubr.msk.f32.mxu1 %vm12354_vm4, %v12355_v26 }
0x18de   :  { %11828 = vmatprep.subr.bf16.mxu1 %v12352_v2  ;;  %11839 = vmatpush3.bf16.msra.mxu0 %v13860_v63 }
0x18df   :  { %11840 = vmatprep.subr.bf16.mxu0 %v12352_v2  ;;  %10573 = vmatprep.mubr.msk.f32.mxu0 %vm12354_vm4, %v12355_v26 }
0x18e1   :  { %11830 = vmatpush3.bf16.msra.mxu1 %v13997_v7 }
0x18e2   :  { %11831 = vmatprep.subr.bf16.mxu1 %v12352_v2  ;;  %11842 = vmatpush3.bf16.msra.mxu0 %v13879_v55 }
0x18e3   :  { %11843 = vmatprep.subr.bf16.mxu0 %v12352_v2 }
0x18e5   :  { %11833 = vmatpush3.bf16.msra.mxu1 %v14013_v58 }
0x18e6   :  { %11834 = vmatprep.subr.bf16.mxu1 %v12352_v2  ;;  %11845 = vmatpush3.bf16.msra.mxu0 %v13897_v16 }
0x18e7   :  { %11846 = vmatprep.subr.bf16.mxu0 %v12352_v2 }
0x18e9   :  { %11836 = vmatpush3.bf16.msra.mxu1 %v14025_v39 }
0x18ea   :  { %11849 = vmatprep.subr.bf16.mxu1 %v12352_v2  ;;  %11848 = vmatpush3.bf16.msra.mxu0 %v13913_v20 }
0x18eb   :  { %11861 = vmatprep.subr.bf16.mxu0 %v12352_v2 }
0x18ec   :  { %10555 = vmatmul.mubr.msk.f32.vlgmr.msra.gmra.mrb[74].mxu1 %vm325_vm3, %v6193_v48 }
0x18ed   :  { %11851 = vmatpush3.bf16.msra.mxu1 %v13929_v1  ;;  %10592 = vmatprep.mubr.msk.f32.mxu1 %vm12354_vm4, %v12355_v26 }
0x18ee   :  { %11852 = vmatprep.subr.bf16.mxu1 %v12352_v2 }
0x18f1   :  { %11854 = vmatpush3.bf16.msra.mxu1 %v13946_v34 }
0x18f2   :  { %11855 = vmatprep.subr.bf16.mxu1 %v12352_v2 }
0x18f5   :  { %11857 = vmatpush3.bf16.msra.mxu1 %v13964_v21 }
0x18f6   :  { %11858 = vmatprep.subr.bf16.mxu1 %v12352_v2 }
0x18f9   :  { %11860 = vmatpush3.bf16.msra.mxu1 %v13974_v6 }
0x18fa   :  { %11873 = vmatprep.subr.bf16.mxu1 %v12352_v2 }
0x19af   :  { %v6262_v0 = vpop.f32.mrb[72].mxu1  ;;  %v6332_v32 = vpop.f32.mrb[68].mxu0 }
0x19b0   :  { %v6263_v15 = vadd.f32 %v14058_v3, %v6262_v0  ;;  %v6333_v35 = vadd.f32 %v14070_v60, %v6332_v32  ;;  %v10518_v17 = vpop.f32.mrb[73].mxu1  ;;  %v10537_v40 = vpop.f32.mrb[69].mxu0 }
0x19b2   :  { %v6407_v43 = vrot.slane %v6263_v15, 2  ;;  %v6417_v49 = vrot.slane %v6333_v35, 2 }
0x19b4   :  { %v6409_v51 = vadd.f32 %v6407_v43, %v14060_v9  ;;  %v6419_v42 = vadd.f32 %v6417_v49, %v14072_v29  ;;  %v6434_v9 = vrot.slane %v14175_v25, 6 }
0x19b6   :  { %v8246_v37 = vmul.f32 -1.442695, %v6409_v51  ;;  %v8247_v18 = vmul.f32 -1.442695, %v6419_v42 }
0x19b8   :  { %12233 = vpow2.f32 %v8246_v37 }
0x19b9   :  { %12235 = vpow2.f32 %v8247_v18 }
0x19bf   :  { %v6402_v56 = vpop.f32.mrb[74].mxu1 }
0x19c0   :  { %v10556_v57 = vpop.f32.mrb[75].mxu1  ;;  %v6403_v53 = vadd.f32 %v14081_v54, %v6402_v56 }
0x19c2   :  { %v12234_v36 = vpop.eup %12233  ;;  %v6427_v59 = vrot.slane %v6403_v53, 2 }
0x19c3   :  { %v12236_v22 = vpop.eup %12235  ;;  %v6413_v30 = vadd.f32 1.0, %v12234_v36 }
0x19c4   :  { %v6423_v38 = vadd.f32 1.0, %v12236_v22 }
0x19c5   :  { %12237 = vrcp.f32 %v6413_v30 }
0x19c6   :  { %12239 = vrcp.f32 %v6423_v38 }
0x19cf   :  { %v12238_v46 = vpop.eup %12237 }
0x19d0   :  { %v12240_v44 = vpop.eup %12239  ;;  %v6429_v29 = vmul.f32 %v12238_v46, %v6427_v59 }
0x19d1   :  { %v6436_v50 = vmul.f32 %v12240_v44, %v6434_v9  ;;  %v6432_v8 = vsub.f32 1.0, %v12240_v44 }
0x19d2   :  { %v6430_v5 = vadd.f32 %v6429_v29, %v14084_v41 }
0x19d4   :  { %12241 = vtanh.f32 %v6430_v5 }
0x19de   :  { %v12242_v10 = vpop.eup %12241 }
0x19df   :  { %v6433_v11 = vmul.f32 %v12242_v10, %v6432_v8 }
0x19e1   :  { %v6437_v14 = vadd.f32 %v6436_v50, %v6433_v11 }
0x19e3   :  { %6438 = vst.msk [vmem:[#allocation2] sm:$0xc0] %vm1623_vm11, %v6437_v14  ;;  %v6441_v12 = vrot.slane %v6437_v14, 6 }
0x19e4   :  { %6439 = vst.msk [vmem:[#allocation2 + $0x2] sm:$0xc0] %vm1625_vm12, %v6437_v14 }
0x19e5   :  { %10574 = vmatmul.mubr.msk.f32.vlgmr.msra.gmra.mrb[70].mxu0 %vm325_vm3, %v6441_v12  ;;  %10593 = vmatmul.mubr.msk.f32.vlgmr.msra.gmra.mrb[76].mxu1 %vm325_vm3, %v6441_v12 }
0x19e6   :  { %11863 = vmatpush3.bf16.msra.mxu0 %v13984_v52  ;;  %10611 = vmatprep.mubr.msk.f32.mxu0 %vm12354_vm4, %v12355_v26 }
0x19e7   :  { %11864 = vmatprep.subr.bf16.mxu0 %v12352_v2  ;;  %11875 = vmatpush3.bf16.msra.mxu1 %v13860_v63 }
0x19e8   :  { %11876 = vmatprep.subr.bf16.mxu1 %v12352_v2  ;;  %10630 = vmatprep.mubr.msk.f32.mxu1 %vm12354_vm4, %v12355_v26 }
0x19ea   :  { %11866 = vmatpush3.bf16.msra.mxu0 %v13997_v7 }
0x19eb   :  { %11867 = vmatprep.subr.bf16.mxu0 %v12352_v2  ;;  %11878 = vmatpush3.bf16.msra.mxu1 %v13879_v55 }
0x19ec   :  { %11879 = vmatprep.subr.bf16.mxu1 %v12352_v2 }
0x19ee   :  { %11869 = vmatpush3.bf16.msra.mxu0 %v14013_v58 }
0x19ef   :  { %11870 = vmatprep.subr.bf16.mxu0 %v12352_v2  ;;  %11881 = vmatpush3.bf16.msra.mxu1 %v13897_v16 }
0x19f0   :  { %11882 = vmatprep.subr.bf16.mxu1 %v12352_v2 }
0x19f2   :  { %11872 = vmatpush3.bf16.msra.mxu0 %v14025_v39 }
0x19f3   :  { %11885 = vmatprep.subr.bf16.mxu0 %v12352_v2  ;;  %11884 = vmatpush3.bf16.msra.mxu1 %v13913_v20 }
0x19f4   :  { %11897 = vmatprep.subr.bf16.mxu1 %v12352_v2 }
0x19f5   :  { %10612 = vmatmul.mubr.msk.f32.vlgmr.msra.gmra.mrb[72].mxu0 %vm325_vm3, %v6441_v12 }
0x19f6   :  { %11887 = vmatpush3.bf16.msra.mxu0 %v13929_v1  ;;  %10649 = vmatprep.mubr.msk.f32.mxu0 %vm12354_vm4, %v12355_v26 }
0x19f7   :  { %11888 = vmatprep.subr.bf16.mxu0 %v12352_v2 }
0x19fa   :  { %11890 = vmatpush3.bf16.msra.mxu0 %v13946_v34 }
0x19fb   :  { %11891 = vmatprep.subr.bf16.mxu0 %v12352_v2 }
0x19fe   :  { %11893 = vmatpush3.bf16.msra.mxu0 %v13964_v21 }
0x19ff   :  { %11894 = vmatprep.subr.bf16.mxu0 %v12352_v2 }
0x1a02   :  { %11896 = vmatpush3.bf16.msra.mxu0 %v13974_v6 }
0x1a03   :  { %11909 = vmatprep.subr.bf16.mxu0 %v12352_v2 }
0x1ab8   :  { %v6510_v41 = vpop.f32.mrb[70].mxu0  ;;  %v6580_v61 = vpop.f32.mrb[76].mxu1 }
0x1ab9   :  { %v6511_v19 = vadd.f32 %v14058_v3, %v6510_v41  ;;  %v10575_v13 = vpop.f32.mrb[71].mxu0  ;;  %v10594_v28 = vpop.f32.mrb[77].mxu1  ;;  %v6581_v31 = vadd.f32 %v14070_v60, %v6580_v61 }
0x1abb   :  { %v6654_v23 = vadd.f32 %v6511_v19, %v14051_v33  ;;  %v6661_v25 = vadd.f32 %v6581_v31, %v14053_v62 }
0x1abd   :  { %v8251_v24 = vmul.f32 -1.442695, %v6654_v23  ;;  %v8252_v48 = vmul.f32 -1.442695, %v6661_v25 }
0x1abf   :  { %12243 = vpow2.f32 %v8251_v24 }
0x1ac0   :  { %12245 = vpow2.f32 %v8252_v48 }
0x1ac8   :  { %v6650_v0 = vpop.f32.mrb[72].mxu0 }
0x1ac9   :  { %v12244_v32 = vpop.eup %12243  ;;  %v10613_v15 = vpop.f32.mrb[73].mxu0  ;;  %v6651_v43 = vadd.f32 %v14081_v54, %v6650_v0 }
0x1aca   :  { %v6658_v35 = vadd.f32 1.0, %v12244_v32  ;;  %v12246_v17 = vpop.eup %12245 }
0x1acb   :  { %v6665_v40 = vadd.f32 1.0, %v12246_v17 }
0x1acc   :  { %12247 = vrcp.f32 %v6658_v35 }
0x1acd   :  { %12249 = vrcp.f32 %v6665_v40 }
0x1ad6   :  { %v12248_v49 = vpop.eup %12247 }
0x1ad7   :  { %v6668_v51 = vmul.f32 %v12248_v49, %v6651_v43  ;;  %v12250_v37 = vpop.eup %12249 }
0x1ad8   :  { %v6671_v18 = vsub.f32 1.0, %v12250_v37  ;;  %v6674_v57 = vmul.f32 %v12250_v37, %v6441_v12 }
0x1ad9   :  { %v6669_v42 = vadd.f32 %v6668_v51, %v14074_v45 }
0x1adb   :  { %12251 = vtanh.f32 %v6669_v42 }
0x1ae5   :  { %v12252_v56 = vpop.eup %12251 }
0x1ae6   :  { %v6672_v36 = vmul.f32 %v12252_v56, %v6671_v18 }
0x1ae8   :  { %v6675_v22 = vadd.f32 %v6674_v57, %v6672_v36 }
0x1aea   :  { %6676 = vst.msk [vmem:[#allocation2 + $0x8] sm:$0x3] %vm874_vm5, %v6675_v22  ;;  %10631 = vmatmul.mubr.msk.f32.vlgmr.msra.gmra.mrb[78].mxu1 %vm325_vm3, %v6675_v22  ;;  %10650 = vmatmul.mubr.msk.f32.vlgmr.msra.gmra.mrb[74].mxu0 %vm325_vm3, %v6675_v22  ;;  %v6919_v23 = vrot.slane %v6675_v22, 6 }
0x1aeb   :  { %6677 = vst.msk [vmem:[#allocation2 + $0x6] sm:$0x3] %vm876_vm6, %v6675_v22  ;;  %11899 = vmatpush3.bf16.msra.mxu1 %v13984_v52  ;;  %10668 = vmatprep.mubr.msk.f32.mxu1 %vm12354_vm4, %v12355_v26 }
0x1aec   :  { %11900 = vmatprep.subr.bf16.mxu1 %v12352_v2  ;;  %11911 = vmatpush3.bf16.msra.mxu0 %v13860_v63 }
0x1aed   :  { %11912 = vmatprep.subr.bf16.mxu0 %v12352_v2  ;;  %10687 = vmatprep.mubr.msk.f32.mxu0 %vm12354_vm4, %v12355_v26 }
0x1aef   :  { %11902 = vmatpush3.bf16.msra.mxu1 %v13997_v7 }
0x1af0   :  { %11903 = vmatprep.subr.bf16.mxu1 %v12352_v2  ;;  %11914 = vmatpush3.bf16.msra.mxu0 %v13879_v55 }
0x1af1   :  { %11915 = vmatprep.subr.bf16.mxu0 %v12352_v2 }
0x1af3   :  { %11905 = vmatpush3.bf16.msra.mxu1 %v14013_v58 }
0x1af4   :  { %11906 = vmatprep.subr.bf16.mxu1 %v12352_v2  ;;  %11917 = vmatpush3.bf16.msra.mxu0 %v13897_v16 }
0x1af5   :  { %11918 = vmatprep.subr.bf16.mxu0 %v12352_v2 }
0x1af7   :  { %11908 = vmatpush3.bf16.msra.mxu1 %v14025_v39 }
0x1af8   :  { %11921 = vmatprep.subr.bf16.mxu1 %v12352_v2  ;;  %11920 = vmatpush3.bf16.msra.mxu0 %v13913_v20 }
0x1af9   :  { %11933 = vmatprep.subr.bf16.mxu0 %v12352_v2 }
0x1afa   :  { %10669 = vmatmul.mubr.msk.f32.vlgmr.msra.gmra.mrb[80].mxu1 %vm325_vm3, %v6675_v22 }
0x1afb   :  { %11923 = vmatpush3.bf16.msra.mxu1 %v13929_v1  ;;  %10706 = vmatprep.mubr.msk.f32.mxu1 %vm12354_vm4, %v12355_v26 }
0x1afc   :  { %11924 = vmatprep.subr.bf16.mxu1 %v12352_v2 }
0x1aff   :  { %11926 = vmatpush3.bf16.msra.mxu1 %v13946_v34 }
0x1b00   :  { %11927 = vmatprep.subr.bf16.mxu1 %v12352_v2 }
0x1b03   :  { %11929 = vmatpush3.bf16.msra.mxu1 %v13964_v21 }
0x1b04   :  { %11930 = vmatprep.subr.bf16.mxu1 %v12352_v2 }
0x1b07   :  { %11932 = vmatpush3.bf16.msra.mxu1 %v13974_v6 }
0x1b08   :  { %11945 = vmatprep.subr.bf16.mxu1 %v12352_v2 }
0x1bbd   :  { %v6747_v30 = vpop.f32.mrb[78].mxu1  ;;  %v6817_v38 = vpop.f32.mrb[74].mxu0 }
0x1bbe   :  { %v6748_v53 = vadd.f32 %v14058_v3, %v6747_v30  ;;  %v6818_v59 = vadd.f32 %v14070_v60, %v6817_v38  ;;  %v10632_v46 = vpop.f32.mrb[79].mxu1  ;;  %v10651_v9 = vpop.f32.mrb[75].mxu0 }
0x1bc0   :  { %v6892_v44 = vrot.slane %v6748_v53, 6  ;;  %v6902_v29 = vrot.slane %v6818_v59, 6 }
0x1bc2   :  { %v6894_v50 = vadd.f32 %v6892_v44, %v14051_v33  ;;  %v6904_v5 = vadd.f32 %v6902_v29, %v14053_v62 }
0x1bc4   :  { %v8256_v8 = vmul.f32 -1.442695, %v6894_v50  ;;  %v8257_v10 = vmul.f32 -1.442695, %v6904_v5 }
0x1bc6   :  { %12253 = vpow2.f32 %v8256_v8 }
0x1bc7   :  { %12255 = vpow2.f32 %v8257_v10 }
0x1bcd   :  { %v6887_v11 = vpop.f32.mrb[80].mxu1 }
0x1bce   :  { %v10670_v14 = vpop.f32.mrb[81].mxu1  ;;  %v6888_v13 = vadd.f32 %v14081_v54, %v6887_v11 }
0x1bcf   :  { %v7434_v14 = vld [vmem:[%s14582_s11 + $0x18] sm:$0xff] }
0x1bd0   :  { %v12254_v12 = vpop.eup %12253  ;;  %v6912_v28 = vrot.slane %v6888_v13, 6  ;;  %v7437_v13 = vld [vmem:[%s14582_s11 + $0x30] sm:$0xff] }
0x1bd1   :  { %v12256_v41 = vpop.eup %12255  ;;  %v6898_v61 = vadd.f32 1.0, %v12254_v12 }
0x1bd2   :  { %v6908_v19 = vadd.f32 1.0, %v12256_v41  ;;  %v7435_v41 = vld [vmem:[%s14582_s11 + $0x20] sm:$0xff] }
0x1bd3   :  { %12257 = vrcp.f32 %v6898_v61  ;;  %v7436_v61 = vld [vmem:[%s14582_s11 + $0x28] sm:$0xff] }
0x1bd4   :  { %12259 = vrcp.f32 %v6908_v19  ;;  %v11989_v19 = vpack.c.bf16 %v7436_v61, %v7435_v41 }
0x1bdd   :  { %v12258_v31 = vpop.eup %12257 }
0x1bde   :  { %v12260_v24 = vpop.eup %12259  ;;  %v6914_v25 = vmul.f32 %v12258_v31, %v6912_v28  ;;  %v7438_v28 = vld [vmem:[%s14582_s11 + $0x38] sm:$0xff] }
0x1bdf   :  { %v6921_v48 = vmul.f32 %v12260_v24, %v6919_v23  ;;  %v6917_v32 = vsub.f32 1.0, %v12260_v24  ;;  %v11993_v31 = vpack.c.bf16 %v7438_v28, %v7437_v13 }
0x1be0   :  { %v6915_v0 = vadd.f32 %v6914_v25, %v14074_v45 }
0x1be2   :  { %12261 = vtanh.f32 %v6915_v0 }
0x1bec   :  { %v12262_v15 = vpop.eup %12261 }
0x1bed   :  { %v6918_v35 = vmul.f32 %v12262_v15, %v6917_v32 }
0x1bef   :  { %v6922_v17 = vadd.f32 %v6921_v48, %v6918_v35 }
0x1bf1   :  { %6923 = vst.msk [vmem:[#allocation2 + $0x8] sm:$0xc] %vm1123_vm7, %v6922_v17  ;;  %v6926_v40 = vrot.slane %v6922_v17, 2  ;;  %v7167_v59 = vrot.slane %v6922_v17, 6 }
0x1bf2   :  { %6924 = vst.msk [vmem:[#allocation2 + $0x2] sm:$0xc] %vm1125_vm8, %v6922_v17 }
0x1bf3   :  { %10688 = vmatmul.mubr.msk.f32.vlgmr.msra.gmra.mrb[76].mxu0 %vm325_vm3, %v6926_v40  ;;  %10707 = vmatmul.mubr.msk.f32.vlgmr.msra.gmra.mrb[82].mxu1 %vm325_vm3, %v6926_v40 }
0x1bf4   :  { %11935 = vmatpush3.bf16.msra.mxu0 %v13984_v52  ;;  %10725 = vmatprep.mubr.msk.f32.mxu0 %vm12354_vm4, %v12355_v26 }
0x1bf5   :  { %11936 = vmatprep.subr.bf16.mxu0 %v12352_v2  ;;  %11947 = vmatpush3.bf16.msra.mxu1 %v13860_v63 }
0x1bf6   :  { %11948 = vmatprep.subr.bf16.mxu1 %v12352_v2  ;;  %10744 = vmatprep.mubr.msk.f32.mxu1 %vm12354_vm4, %v12355_v26 }
0x1bf8   :  { %11938 = vmatpush3.bf16.msra.mxu0 %v13997_v7 }
0x1bf9   :  { %11939 = vmatprep.subr.bf16.mxu0 %v12352_v2  ;;  %11950 = vmatpush3.bf16.msra.mxu1 %v13879_v55 }
0x1bfa   :  { %11951 = vmatprep.subr.bf16.mxu1 %v12352_v2 }
0x1bfc   :  { %11941 = vmatpush3.bf16.msra.mxu0 %v14013_v58 }
0x1bfd   :  { %11942 = vmatprep.subr.bf16.mxu0 %v12352_v2  ;;  %11953 = vmatpush3.bf16.msra.mxu1 %v13897_v16 }
0x1bfe   :  { %11954 = vmatprep.subr.bf16.mxu1 %v12352_v2 }
0x1c00   :  { %11944 = vmatpush3.bf16.msra.mxu0 %v14025_v39 }
0x1c01   :  { %11957 = vmatprep.subr.bf16.mxu0 %v12352_v2  ;;  %11956 = vmatpush3.bf16.msra.mxu1 %v13913_v20 }
0x1c02   :  { %11969 = vmatprep.subr.bf16.mxu1 %v12352_v2 }
0x1c03   :  { %10726 = vmatmul.mubr.msk.f32.vlgmr.msra.gmra.mrb[78].mxu0 %vm325_vm3, %v6926_v40 }
0x1c04   :  { %11959 = vmatpush3.bf16.msra.mxu0 %v13929_v1  ;;  %10763 = vmatprep.mubr.msk.f32.mxu0 %vm12354_vm4, %v12355_v26 }
0x1c05   :  { %11960 = vmatprep.subr.bf16.mxu0 %v12352_v2 }
0x1c08   :  { %11962 = vmatpush3.bf16.msra.mxu0 %v13946_v34 }
0x1c09   :  { %11963 = vmatprep.subr.bf16.mxu0 %v12352_v2 }
0x1c0c   :  { %11965 = vmatpush3.bf16.msra.mxu0 %v13964_v21 }
0x1c0d   :  { %11966 = vmatprep.subr.bf16.mxu0 %v12352_v2 }
0x1c10   :  { %11968 = vmatpush3.bf16.msra.mxu0 %v13974_v6 }
0x1cc6   :  { %v6995_v63 = vpop.f32.mrb[76].mxu0  ;;  %v7065_v55 = vpop.f32.mrb[82].mxu1 }
0x1cc7   :  { %v6996_v16 = vadd.f32 %v14058_v3, %v6995_v63  ;;  %v7066_v20 = vadd.f32 %v14070_v60, %v7065_v55  ;;  %v10689_v1 = vpop.f32.mrb[77].mxu0  ;;  %v10708_v43 = vpop.f32.mrb[83].mxu1 }
0x1cc9   :  { %v7140_v49 = vrot.slane %v6996_v16, 4  ;;  %v7150_v51 = vrot.slane %v7066_v20, 4 }
0x1ccb   :  { %v7142_v34 = vadd.f32 %v7140_v49, %v14051_v33  ;;  %v7152_v42 = vadd.f32 %v7150_v51, %v14053_v62 }
0x1ccd   :  { %v8261_v37 = vmul.f32 -1.442695, %v7142_v34  ;;  %v8262_v21 = vmul.f32 -1.442695, %v7152_v42 }
0x1ccf   :  { %12263 = vpow2.f32 %v8261_v37 }
0x1cd0   :  { %12265 = vpow2.f32 %v8262_v21 }
0x1cd6   :  { %v7135_v18 = vpop.f32.mrb[78].mxu0 }
0x1cd7   :  { %v10727_v6 = vpop.f32.mrb[79].mxu0  ;;  %v7136_v30 = vadd.f32 %v14081_v54, %v7135_v18 }
0x1cd9   :  { %v12264_v56 = vpop.eup %12263  ;;  %v7160_v38 = vrot.slane %v7136_v30, 4 }
0x1cda   :  { %v12266_v57 = vpop.eup %12265  ;;  %v7146_v36 = vadd.f32 1.0, %v12264_v56 }
0x1cdb   :  { %v7156_v22 = vadd.f32 1.0, %v12266_v57 }
0x1cdc   :  { %12267 = vrcp.f32 %v7146_v36 }
0x1cdd   :  { %12269 = vrcp.f32 %v7156_v22 }
0x1ce6   :  { %v12268_v53 = vpop.eup %12267 }
0x1ce7   :  { %v12270_v46 = vpop.eup %12269  ;;  %v7162_v9 = vmul.f32 %v12268_v53, %v7160_v38 }
0x1ce8   :  { %v7169_v44 = vmul.f32 %v12270_v46, %v7167_v59  ;;  %v7165_v50 = vsub.f32 1.0, %v12270_v46  ;;  %v8271_v59 = vld [vmem:[%s14584_s13] ss:$0 sm:$0xff] }
0x1ce9   :  { %v7163_v29 = vadd.f32 %v7162_v9, %v14074_v45 }
0x1ceb   :  { %12271 = vtanh.f32 %v7163_v29 }
0x1cf5   :  { %v12272_v5 = vpop.eup %12271 }
0x1cf6   :  { %v7166_v8 = vmul.f32 %v12272_v5, %v7165_v50 }
0x1cf8   :  { %v14344_v10 = vadd.f32 %v7169_v44, %v7166_v8  ;;  %v12357_v8 = vmov 0  }
0x1cf9   :  { %12042 = vset.pattern.permute.xlu1 %v12357_v8  ;;  %12041 = vset.pattern.permute.xlu0 %v12357_v8 }
0x1cfa   :  { %7171 = vst.msk [vmem:[#allocation2 + $0x8] sm:$0x30] %vm1373_vm9, %v14344_v10  ;;  %v7174_v11 = vrot.slane %v14344_v10, 4 }
0x1cfb   :  { %7172 = vst.msk [vmem:[#allocation2 - $0x2] sm:$0x30] %vm1375_vm10, %v14344_v10 }
0x1cfc   :  { %10745 = vmatmul.mubr.msk.f32.vlgmr.msra.gmra.mrb[84].mxu1 %vm325_vm3, %v7174_v11  ;;  %10764 = vmatmul.mubr.msk.f32.vlgmr.msra.gmra.mrb[80].mxu0 %vm325_vm3, %v7174_v11 }
0x1cfd   :  { %11971 = vmatpush3.bf16.msra.mxu1 %v13984_v52  ;;  %10782 = vmatprep.mubr.msk.f32.mxu1 %vm12354_vm4, %v12355_v26  ;;  %v7431_v52 = vld [vmem:[%s14582_s11] sm:$0xff] }
0x1cfe   :  { %11972 = vmatprep.subr.bf16.mxu1 %v12352_v2 }
0x1d01   :  { %11974 = vmatpush3.bf16.msra.mxu1 %v13997_v7  ;;  %v7432_v7 = vld [vmem:[%s14582_s11 + $0x8] sm:$0xff] }
0x1d02   :  { %11975 = vmatprep.subr.bf16.mxu1 %v12352_v2 }
0x1d05   :  { %11977 = vmatpush3.bf16.msra.mxu1 %v14013_v58  ;;  %v11981_v58 = vpack.c.bf16 %v7432_v7, %v7431_v52 }
0x1d06   :  { %11978 = vmatprep.subr.bf16.mxu1 %v12352_v2 }
0x1d07   :  { %11982 = vmatprep.subr.bf16.mxu0 %v11981_v58 }
0x1d08   :  { %11984 = vmatpush3.bf16.msra.mxu0 %v11981_v58 }
0x1d09   :  { %11980 = vmatpush3.bf16.msra.mxu1 %v14025_v39  ;;  %v7433_v39 = vld [vmem:[%s14582_s11 + $0x10] sm:$0xff] }
0x1d0a   :  { %11997 = vmatprep.subr.bf16.mxu1 %v12352_v2  ;;  %v11985_v12 = vpack.c.bf16 %v7434_v14, %v7433_v39  ;;  %v7554_v39 = vld [vmem:[%s14611_s10 + $0x8] sm:$0xff]  ;;  %v7553_v14 = vld [vmem:[%s14611_s10] sm:$0xff] }
0x1d0b   :  { %vm7556_vm14 = vcmp.gt.f32.partialorder %v7554_v39, 0.5 }
0x1d0c   :  { %10783 = vmatmul.mubr.msk.f32.vlgmr.msra.gmra.mrb[86].mxu1 %vm325_vm3, %v7174_v11  ;;  %11986 = vmatprep.subr.bf16.mxu0 %v11985_v12 }
0x1d0d   :  { %10808 = vmatprep.mubr.msk.f32.mxu1 %vm12354_vm4, %v12355_v26  ;;  %11988 = vmatpush3.bf16.msra.mxu0 %v11985_v12 }
0x1d0e   :  { %11990 = vmatprep.subr.bf16.mxu0 %v11989_v19 }
0x1d11   :  { %11992 = vmatpush3.bf16.msra.mxu0 %v11989_v19 }
0x1d12   :  { %11994 = vmatprep.subr.bf16.mxu0 %v11993_v31 }
0x1d15   :  { %11996 = vmatpush3.bf16.msra.mxu0 %v11993_v31 }
0x1d16   :  { %12012 = vmatprep.subr.bf16.mxu0 %v12352_v2 }
0x1dcf   :  { %v7243_v23 = vpop.f32.mrb[84].mxu1  ;;  %v7313_v24 = vpop.f32.mrb[80].mxu0 }
0x1dd0   :  { %v7244_v25 = vadd.f32 %v14058_v3, %v7243_v23  ;;  %v7314_v48 = vadd.f32 %v14070_v60, %v7313_v24  ;;  %v10746_v0 = vpop.f32.mrb[85].mxu1  ;;  %v10765_v32 = vpop.f32.mrb[81].mxu0 }
0x1dd2   :  { %v7388_v15 = vrot.slane %v7244_v25, 2  ;;  %v7398_v35 = vrot.slane %v7314_v48, 2 }
0x1dd4   :  { %v7390_v17 = vadd.f32 %v7388_v15, %v14051_v33  ;;  %v7400_v40 = vadd.f32 %v7398_v35, %v14053_v62  ;;  %v7415_v33 = vrot.slane %v14344_v10, 6  ;;  %v8272_v10 = vld [vmem:[#allocation4] ss:$0 sm:$0xff] }
0x1dd6   :  { %v8266_v63 = vmul.f32 -1.442695, %v7390_v17  ;;  %v8267_v55 = vmul.f32 -1.442695, %v7400_v40 }
0x1dd8   :  { %12273 = vpow2.f32 %v8266_v63 }
0x1dd9   :  { %12275 = vpow2.f32 %v8267_v55 }
0x1ddf   :  { %v7383_v16 = vpop.f32.mrb[86].mxu1 }
0x1de0   :  { %v10784_v20 = vpop.f32.mrb[87].mxu1  ;;  %v7384_v60 = vadd.f32 %v14081_v54, %v7383_v16 }
0x1de2   :  { %v12274_v1 = vpop.eup %12273  ;;  %v7408_v51 = vrot.slane %v7384_v60, 2 }
0x1de3   :  { %v12276_v43 = vpop.eup %12275  ;;  %v7394_v49 = vadd.f32 1.0, %v12274_v1 }
0x1de4   :  { %v7404_v3 = vadd.f32 1.0, %v12276_v43 }
0x1de5   :  { %12277 = vrcp.f32 %v7394_v49 }
0x1de6   :  { %12279 = vrcp.f32 %v7404_v3 }
0x1def   :  { %v12278_v34 = vpop.eup %12277 }
0x1df0   :  { %v12280_v42 = vpop.eup %12279  ;;  %v7410_v62 = vmul.f32 %v12278_v34, %v7408_v51 }
0x1df1   :  { %v7417_v37 = vmul.f32 %v12280_v42, %v7415_v33  ;;  %v7413_v18 = vsub.f32 1.0, %v12280_v42 }
0x1df2   :  { %v7411_v21 = vadd.f32 %v7410_v62, %v14074_v45  ;;  %v8268_v45 = vld [vmem:[%s14583_s12] ss:$0 sm:$0xff] }
0x1df4   :  { %12281 = vtanh.f32 %v7411_v21 }
0x1dfe   :  { %v12282_v6 = vpop.eup %12281 }
0x1dff   :  { %v7414_v56 = vmul.f32 %v12282_v6, %v7413_v18 }
0x1e01   :  { %v14398_v57 = vadd.f32 %v7417_v37, %v7414_v56 }
0x1e03   :  { %7419 = vst.msk [vmem:[#allocation2 + $0x8] sm:$0xc0] %vm1623_vm11, %v14398_v57  ;;  %7422 = vst.msk [vmem:[#allocation7 + $0x2] sm:$0xc0] %vm1623_vm11, %v14398_v57 }
0x1e04   :  { %7420 = vst.msk [vmem:[#allocation2 - $0x6] sm:$0xc0] %vm1625_vm12, %v14398_v57 }
0x1e0a   :  { %v14408_v36 = vld [vmem:[#allocation2 + $0x8] sm:$0xff] }
0x1e0b   :  { %v14406_v54 = vld [vmem:[#allocation2] sm:$0xff] }
0x1e0c   :  { %10801 = vmatprep.mubr.msk.f32.mxu0 %vm325_vm3, %v14406_v54 }
0x1e0d   :  { %10802 = vmatmul.mubr.msk.f32.vlgmr.msra.gmra.mrb[82].mxu0 %vm325_vm3, %v14408_v36 }
0x1e0e   :  { %10854 = vmatprep.mubr.msk.f32.mxu0 %vm12354_vm4, %v12355_v26 }
0x1ee0   :  { %v10803_v22 = vpop.f32.mrb[82].mxu0 }
0x1ee1   :  { %v7524_v30 = vadd.f32 %v10803_v22, %v8268_v45  ;;  %v7518_v38 = vpop.f32.mrb[83].mxu0 }
0x1ee2   :  { %v7519_v53 = vadd.f32 %v8268_v45, %v7518_v38 }
0x1ee3   :  { %12283 = vtanh.f32 %v7524_v30 }
0x1ee4   :  { %12285 = vtanh.f32 %v7519_v53 }
0x1eed   :  { %v12284_v46 = vpop.eup %12283 }
0x1eee   :  { %v12286_v9 = vpop.eup %12285  ;;  %v7537_v44 = vmul.f32 %v12284_v46, %v8271_v59 }
0x1eef   :  { %v7536_v29 = vmul.f32 %v12286_v9, %v8271_v59 }
0x1ef0   :  { %v7541_v50 = vsel %vm131_vm0, %v7537_v44, 0.0 }
0x1ef1   :  { %7542 = vadd.xlane.f32.xlu1 %v7541_v50  ;;  %v7538_v5 = vsel %vm131_vm0, %v7536_v29, 0.0  ;;  %vm7555_vm0 = vcmp.gt.f32.partialorder %v7553_v14, 0.5 }
0x1ef2   :  { %7539 = vadd.xlane.f32.xlu0 %v7538_v5 }
0x1f7e   :  { %v7543_v11 = vpop.xlane.xlu1 %7542 }
0x1f7f   :  { %v7552_v52 = vadd.f32 %v8272_v10, %v7543_v11  ;;  %v7540_v7 = vpop.xlane.xlu0 %7539 }
0x1f80   :  { %v7551_v58 = vadd.f32 %v8272_v10, %v7540_v7  ;;  %v7717_v7 = vld [vmem:[%s14586_s15] sm:$0xff] }
0x1f81   :  { %7564 = vperm.xlu1 %12042, %v7552_v52  }
0x1f82   :  { %7559 = vperm.xlu0 %12041, %v7551_v58  }
0x2000   :  { %v7565_v12 = vpop.permute.xlu1 %7564 }
0x2001   :  { %v7568_v41 = vsel %vm7556_vm14, %v7565_v12, -inf  ;;  %v7560_v61 = vpop.permute.xlu0 %7559 }
0x2002   :  { %v7571_v19 = vsel %vm7569_vm15, %v7568_v41, -inf  ;;  %v7567_v13 = vsel %vm7555_vm0, %v7560_v61, -inf  ;;  %v7721_v41 = vld [vmem:[%s14586_s15 + $0x20] sm:$0xff]  ;;  %v7722_v61 = vld [vmem:[%s14586_s15 + $0x28] sm:$0xff] }
0x2003   :  { %v7570_v28 = vsel %vm7569_vm15, %v7567_v13, -inf  ;;  %v12007_v13 = vpack.c.bf16 %v7722_v61, %v7721_v41 }
0x2004   :  { %v7572_v31 = vmax.f32 %v7570_v28, %v7571_v19  ;;  %v7724_v28 = vld [vmem:[%s14586_s15 + $0x38] sm:$0xff] }
0x2006   :  { %v7573_v23 = vrot.slane %v7572_v31, 4 }
0x2008   :  { %v7574_v24 = vmax.f32 %v7572_v31, %v7573_v23  ;;  %v7806_v23 = vld [vmem:[%s14588_s17] sm:$0xff] }
0x200a   :  { %v7575_v25 = vrot.slane %v7574_v24, 2 }
0x200c   :  { %v7576_v48 = vmax.f32 %v7574_v24, %v7575_v25  ;;  %v7807_v24 = vld [vmem:[%s14588_s17 + $0x8] sm:$0xff]  ;;  %v7808_v25 = vld [vmem:[%s14588_s17 + $0x10] sm:$0xff] }
0x200e   :  { %v7577_v0 = vrot.slane %v7576_v48, 1 }
0x2010   :  { %v7578_v32 = vmax.f32 %v7576_v48, %v7577_v0  ;;  %v12013_v48 = vpack.c.bf16 %v7807_v24, %v7806_v23  ;;  %v7809_v0 = vld [vmem:[%s14588_s17 + $0x18] sm:$0xff] }
0x2012   :  { %v7580_v15 = vmul.f32 %v7578_v32, %v7554_v39  ;;  %v7579_v35 = vmul.f32 %v7578_v32, %v7553_v14  ;;  %12014 = vmatpush3.bf16.msra.mxu0 %v12013_v48  ;;  %v12016_v32 = vpack.c.bf16 %v7809_v0, %v7808_v25 }
0x2013   :  { %12015 = vmatprep.subr.bf16.mxu0 %v12352_v2 }
0x2014   :  { %v7584_v17 = vsel %vm7569_vm15, %v7580_v15, 0.0  ;;  %v7581_v40 = vsel %vm7569_vm15, %v7579_v35, 0.0  ;;  %v7810_v15 = vld [vmem:[%s14588_s17 + $0x20] sm:$0xff]  ;;  %v7811_v35 = vld [vmem:[%s14588_s17 + $0x28] sm:$0xff] }
0x2015   :  { %7585 = vadd.xlane.f32.xlu0 %v7584_v17  ;;  %7582 = vadd.xlane.f32.xlu1 %v7581_v40  ;;  %v12019_v17 = vpack.c.bf16 %v7811_v35, %v7810_v15  ;;  %v7812_v40 = vld [vmem:[%s14588_s17 + $0x30] sm:$0xff] }
0x2016   :  { %12017 = vmatpush3.bf16.msra.mxu0 %v12016_v32 }
0x2017   :  { %12018 = vmatprep.subr.bf16.mxu0 %v12352_v2 }
0x201a   :  { %12020 = vmatpush3.bf16.msra.mxu0 %v12019_v17 }
0x201b   :  { %12021 = vmatprep.subr.bf16.mxu0 %v12352_v2 }
0x20a2   :  { %v7586_v63 = vpop.xlane.xlu0 %7585  ;;  %v7583_v55 = vpop.xlane.xlu1 %7582 }
0x20a3   :  { %v7588_v16 = vsub.f32 %v7552_v52, %v7586_v63  ;;  %v7587_v20 = vsub.f32 %v7551_v58, %v7583_v55  ;;  %v7718_v58 = vld [vmem:[%s14586_s15 + $0x8] sm:$0xff]  ;;  %v7813_v63 = vld [vmem:[%s14588_s17 + $0x38] sm:$0xff] }
0x20a4   :  { %v12022_v55 = vpack.c.bf16 %v7813_v63, %v7812_v40 }
0x20a5   :  { %v7591_v1 = vmul.f32 1.442695, %v7588_v16  ;;  %v7589_v43 = vmul.f32 1.442695, %v7587_v20  ;;  %v7814_v16 = vld [vmem:[%s14588_s17 + $0x40] sm:$0xff]  ;;  %v7815_v20 = vld [vmem:[%s14588_s17 + $0x48] sm:$0xff] }
0x20a6   :  { %12023 = vmatpush3.bf16.msra.mxu0 %v12022_v55 }
0x20a7   :  { %12287 = vpow2.f32 %v7591_v1  ;;  %v12025_v1 = vpack.c.bf16 %v7815_v20, %v7814_v16  ;;  %12024 = vmatprep.subr.bf16.mxu0 %v12352_v2 }
0x20a8   :  { %12289 = vpow2.f32 %v7589_v43 }
0x20aa   :  { %12026 = vmatpush3.bf16.msra.mxu0 %v12025_v1 }
0x20ab   :  { %12027 = vmatprep.subr.bf16.mxu0 %v12352_v2 }
0x20b1   :  { %v12288_v49 = vpop.eup %12287 }
0x20b2   :  { %v12290_v3 = vpop.eup %12289  ;;  %7600 = vperm.xlu0 %12041, %v12288_v49  }
0x20b3   :  { %7595 = vperm.xlu1 %12042, %v12290_v3  }
0x2131   :  { %v7601_v60 = vpop.permute.xlu0 %7600 }
0x2132   :  { %v7604_v51 = vmul.f32 %v7601_v60, %v7554_v39  ;;  %v7596_v34 = vpop.permute.xlu1 %7595  ;;  %v7817_v60 = vld [vmem:[%s14588_s17 + $0x58] sm:$0xff] }
0x2133   :  { %v7603_v33 = vmul.f32 %v7596_v34, %v7553_v14 }
0x2134   :  { %v7606_v42 = vsel %vm7569_vm15, %v7604_v51, 0.0 }
0x2135   :  { %v7605_v62 = vsel %vm7569_vm15, %v7603_v33, 0.0 }
0x2136   :  { %v7607_v37 = vadd.f32 %v7606_v42, %v7605_v62 }
0x2138   :  { %v7608_v21 = vrot.slane %v7607_v37, 4 }
0x213a   :  { %v7609_v18 = vadd.f32 %v7608_v21, %v7607_v37 }
0x213c   :  { %v7610_v6 = vrot.slane %v7609_v18, 2 }
0x213e   :  { %v7611_v56 = vadd.f32 %v7610_v6, %v7609_v18 }
0x2140   :  { %v7612_v45 = vrot.slane %v7611_v56, 1 }
0x2142   :  { %v7613_v22 = vadd.f32 %v7612_v45, %v7611_v56 }
0x2144   :  { %v7615_v30 = vmul.f32 %v7613_v22, %v7554_v39  ;;  %v7614_v38 = vmul.f32 %v7613_v22, %v7553_v14 }
0x2146   :  { %v7619_v53 = vsel %vm7569_vm15, %v7615_v30, 0.0  ;;  %v7616_v59 = vsel %vm7569_vm15, %v7614_v38, 0.0 }
0x2147   :  { %7620 = vadd.xlane.f32.xlu0 %v7619_v53  ;;  %7617 = vadd.xlane.f32.xlu1 %v7616_v59 }
0x21d4   :  { %v7621_v46 = vpop.xlane.xlu0 %7620  ;;  %v7618_v9 = vpop.xlane.xlu1 %7617 }
0x21d5   :  { %12291 = vrcp.f32 %v7621_v46 }
0x21d6   :  { %12293 = vrcp.f32 %v7618_v9 }
0x21df   :  { %v12292_v44 = vpop.eup %12291 }
0x21e0   :  { %v12294_v29 = vpop.eup %12293  ;;  %v7625_v50 = vmul.f32 %v12292_v44, %v12288_v49 }
0x21e1   :  { %v7623_v5 = vmul.f32 %v12294_v29, %v12290_v3  ;;  %v7816_v3 = vld [vmem:[%s14588_s17 + $0x50] sm:$0xff] }
0x21e2   :  { %7637 = vperm.xlu0 %12041, %v7625_v50   ;;  %7628 = vst.msk [vmem:[%s14590_s19 + $0x8] sm:$0xff] %vm7626_vm2, %v7625_v50  ;;  %v12028_v51 = vpack.c.bf16 %v7817_v60, %v7816_v3 }
0x21e3   :  { %7632 = vperm.xlu1 %12042, %v7623_v5   ;;  %7627 = vst.msk [vmem:[%s14590_s19] sm:$0xff] %vm7626_vm2, %v7623_v5 }
0x21e4   :  { %12029 = vmatpush3.bf16.msra.mxu0 %v12028_v51 }
0x21e7   :  { %2610 = vrot.lane.b32.xlu1 %v13086_v27, %s12358_s8 }
0x21eb   :  { %5017 = vrot.lane.b32.xlu1 %v13727_v47, %s12358_s8  ;;  %v7629_v47 = vld [vmem:[%s14612_s24] sm:$0x3] }
0x21ef   :  { %7424 = vrot.lane.b32.xlu1 %v14398_v57, %s12358_s8  ;;  %v12001_v57 = vpack.c.bf16 %v7718_v58, %v7717_v7  ;;  %s7918_s8 = sshll.u32 %s12359_s29, 4  ;;  %s7919_s8 = int_to_ptr.vmem [resolvable:$true] %s7918_s8 }
0x21f0   :  { %s12303_s17 = scalar_lea.vmem %s7919_s8, 32  ;;  %p12308_p1 = scmp.lt.s32.totalorder %s7919_s8, %s7919_s8 }
0x21f1   :  { %p12304_p0 = scmp.ne.s32.totalorder %s7919_s8, %s12303_s17  ;;  %p12309_p2 = scmp.lt.s32.totalorder %s12303_s17, %s12303_s17 }
0x21f3   :  { %p12310_p3 = por %p12309_p2, %p12308_p1 }
0x21f5   :  { %p12311_p4 = pnand %p12310_p3, %p12304_p0 }
0x2261   :  { %v7638_v8 = vpop.permute.xlu0 %7637 }
0x2262   :  { %v7641_v10 = vmul.f32 %v7638_v8, %v14408_v36  ;;  %v7633_v11 = vpop.permute.xlu1 %7632  ;;  %v7720_v36 = vld [vmem:[%s14586_s15 + $0x18] sm:$0xff] }
0x2263   :  { %v7640_v52 = vmul.f32 %v7633_v11, %v14406_v54  ;;  %v7719_v54 = vld [vmem:[%s14586_s15 + $0x10] sm:$0xff] }
0x2264   :  { %v12004_v12 = vpack.c.bf16 %v7720_v36, %v7719_v54 }
0x2265   :  { %v11998_v39 = vpack.c.bf16 %v7641_v10, %v7640_v52 }
0x2266   :  { %v2611_v27 = vpop.permute.xlu1 %2610 }
0x2267   :  { %2614 = vst.msk [vmem:[#allocation7 - $0x4] sm:$0xc0] %vm1623_vm11, %v2611_v27  ;;  %11999 = vmatpush3.bf16.msra.mxu1 %v11998_v39 }
0x2268   :  { %12000 = vmatprep.subr.bf16.mxu1 %v12352_v2 }
0x226a   :  { %10809 = vmatmul.mubr.msk.f32.vlgmr.msra.gmra.mrb[88].mxu1 %vm213_vm1, %v7629_v47  ;;  %v5018_v14 = vpop.permute.xlu1 %5017  ;;  %vm7715_vm1 = vcmask 517120  }
0x226b   :  { %5021 = vst.msk [vmem:[#allocation7] sm:$0xc0] %vm1623_vm11, %v5018_v14  ;;  %12002 = vmatpush3.bf16.msra.mxu1 %v12001_v57  ;;  %10827 = vmatprep.mubr.msk.f32.mxu1 %vm12354_vm4, %v12355_v26  ;;  %v7723_v26 = vld [vmem:[%s14586_s15 + $0x30] sm:$0xff]  ;;  %vm7825_vm4 = vcmask 785408  }
0x226c   :  { %12003 = vmatprep.subr.bf16.mxu1 %v12352_v2  ;;  %v12010_v31 = vpack.c.bf16 %v7724_v28, %v7723_v26 }
0x226e   :  { %v7425_v19 = vpop.permute.xlu1 %7424 }
0x226f   :  { %7428 = vst.msk [vmem:[#allocation7 + $0x4] sm:$0xc0] %vm1623_vm11, %v7425_v19  ;;  %12005 = vmatpush3.bf16.msra.mxu1 %v12004_v12 }
0x2270   :  { %12006 = vmatprep.subr.bf16.mxu1 %v12352_v2 }
0x2273   :  { %12008 = vmatpush3.bf16.msra.mxu1 %v12007_v13 }
0x2274   :  { %12009 = vmatprep.subr.bf16.mxu1 %v12352_v2  ;;  %v8274_v2 = vld [vmem:[%s14587_s16] ss:$0 sm:$0xff] }
0x2277   :  { %12011 = vmatpush3.bf16.msra.mxu1 %v12010_v31 }
0x233d   :  { %v7711_v43 = vpop.f32.mrb[88].mxu1 }
0x233e   :  { %v10810_v49 = vpop.f32.mrb[89].mxu1  ;;  %10828 = vmatmul.mubr.msk.f32.vlgmr.msra.gmra.mrb[90].mxu1 %vm325_vm3, %v7711_v43  ;;  %7716 = vst.msk [vmem:[#allocation5] sm:$0x3] %vm7715_vm1, %v7711_v43 }
0x2411   :  { %v7801_v34 = vpop.f32.mrb[90].mxu1 }
0x2412   :  { %v7802_v33 = vadd.f32 %v8274_v2, %v7801_v34  ;;  %v10829_v42 = vpop.f32.mrb[91].mxu1 }
0x2414   :  { %v7805_v62 = vmax.f32 %v7802_v33, 0.0 }
0x2416   :  { %10855 = vmatmul.mubr.msk.f32.vlgmr.msra.gmra.mrb[84].mxu0 %vm7825_vm4, %v7805_v62 }
0x2417   :  { %12314 = shalt.err (!%p12311_p4)
}
0x2418   :  { %s12315_s15 = scalar_lea.hbm %s14591_s20, 32 }
0x2419   :  { %p12316_p5 = scmp.ne.s32.totalorder %s14591_s20, %s12315_s15  ;;  %p12319_p6 = scmp.lt.u32.totalorder %s12315_s15, %s14591_s20 }
0x241b   :  { %p12321_p7 = pnand %p12319_p6, %p12316_p5 }
0x241d   :  { %12324 = shalt.err (!%p12321_p7)
}
0x241e   :  { %7921 = dma.vmem_to_hbm [thread:$0]  %s7919_s8, 32, %s14591_s20, [#allocation6]  }
0x241f   :  { %s12325_s11 = scalar_lea.vmem %s14531_s30, 192  ;;  %p12330_p9 = scmp.lt.s32.totalorder %s14531_s30, %s14531_s30 }
0x2420   :  { %p12326_p8 = scmp.ne.s32.totalorder %s14531_s30, %s12325_s11  ;;  %p12331_p10 = scmp.lt.s32.totalorder %s12325_s11, %s12325_s11 }
0x2422   :  { %p12332_p11 = por %p12331_p10, %p12330_p9 }
0x2424   :  { %p12333_p12 = pnand %p12332_p11, %p12326_p8 }
0x2426   :  { %12336 = shalt.err (!%p12333_p12)
}
0x2427   :  { %s12337_s25 = scalar_lea.hbm %s14593_s22, 192 }
0x2428   :  { %p12338_p13 = scmp.ne.s32.totalorder %s14593_s22, %s12337_s25  ;;  %p12341_p0 = scmp.lt.u32.totalorder %s12337_s25, %s14593_s22 }
0x242a   :  { %p12343_p1 = pnand %p12341_p0, %p12338_p13 }
0x242c   :  { %12346 = shalt.err (!%p12343_p1)
}
0x242d   :  { %s12361_s20 = smov 2   ;;  %v8276_v37 = vld [vmem:[%s14589_s18] ss:$0 sm:$0xff]  ;;  %v7900_v30 = vand.u32 127, %v102_v4 }
0x242e   :  { %7935 = dma.vmem_to_hbm [thread:$0]  %s14531_s30, 192, %s14593_s22, [#allocation8], %s12353_s2, %s12353_s2, %s12361_s20  }
0x242f   :  { %vm7901_vm3 = vcmp.eq.s32.totalorder %v7900_v30, 6 }
0x24e9   :  { %v7895_v21 = vpop.f32.mrb[84].mxu0 }
0x24ea   :  { %v7896_v18 = vadd.f32 %v8276_v37, %v7895_v21  ;;  %v10856_v6 = vpop.f32.mrb[85].mxu0 }
0x24ec   :  { %v8278_v56 = vmul.f32 -1.442695, %v7896_v18 }
0x24ee   :  { %12295 = vpow2.f32 %v8278_v56 }
0x24f8   :  { %v12296_v45 = vpop.eup %12295 }
0x24f9   :  { %v7905_v22 = vadd.f32 1.0, %v12296_v45 }
0x24fb   :  { %12297 = vrcp.f32 %v7905_v22 }
0x2505   :  { %v12298_v38 = vpop.eup %12297 }
0x2506   :  { %v7908_v53 = vsel %vm7901_vm3, %v12298_v38, %v7896_v18 }
0x2507   :  { %7909 = vst [vmem:[%s14592_s21] sm:$0x3] %v7908_v53 }
0x2508   :  { %12347 = dma.done.wait [#allocation6], 32  }
0x2509   :  { %12348 = vsyncadd [#allocation6], 4294967264 }
0x250a   :  { %12349 = dma.done.wait [#allocation8], 192  }
0x250b   :  { %12350 = vsyncadd [#allocation8], 4294967104 }
0x250c   :  { %7946 = vsyncpa [#allocation6], 1 }
0x250d   :  { %7947 = vsyncpa [#allocation8], 1 }

</bundles_post_ra>
